<compile_context>
chip_gen: v5e
topology: v5e:2x2
jax: 0.10.0
libtpu: 0.0.40
codegen_flags: <defaults>
</compile_context>

<pallas_src>
import functools

import jax
import jax.numpy as jnp
from jax.experimental import pallas as pl
from jax.experimental.pallas import tpu as pltpu


# Hidden sizes fixed by the module spec.
H1, H2, H3, HH, OUT_LANES = 1024, 512, 256, 512, 128


def _round_up(x, m):
    return ((x + m - 1) // m) * m


def _bf16_vpu():
    """True on chips with a bf16 VALU (v6e / v7x); f32 epilogue otherwise (v5e)."""
    try:
        kind = jax.devices()[0].device_kind.lower()
    except Exception:
        return False
    return any(tag in kind for tag in ("v6", "v7", "7x"))


def _choose_batch_tile(B):
    """Batch tile: multiple of 16 (bf16 sublane packing), capped at 512 rows,
    with >= 2 grid steps whenever B > 16 so both v7x TensorCores get work."""
    if B <= 16:
        return 16
    return min(512, _round_up(pl.cdiv(B, 2), 16))


def actor_critic_kernel(obs_ref, w1_ref, w2_ref, w3_ref, wh_ref, wo_ref, b_ref,
                        out_ref, *, bf16_epilogue):
    # Packed biases (f32): one (8, 1024) tile, static slices.
    b1 = b_ref[0:1, :H1]
    b2 = b_ref[1:2, :H2]
    b3 = b_ref[2:3, :H3]
    bh = b_ref[3:4, :HH]
    bo = b_ref[4:5, :OUT_LANES]

    def layer(a_bf16, w_ref, b):
        # bf16 MXU inputs, f32 accumulate. Epilogue (bias + ReLU) in bf16 on
        # v6e/v7x, f32 on v5e; activation handed onward in bf16 either way.
        acc = jnp.dot(a_bf16, w_ref[...], preferred_element_type=jnp.float32)
        if bf16_epilogue:
            return jnp.maximum(acc.astype(jnp.bfloat16) + b.astype(jnp.bfloat16),
                               jnp.bfloat16(0.0))
        return jnp.maximum(acc + b, 0.0).astype(jnp.bfloat16)

    x = obs_ref[...].astype(jnp.bfloat16)

    # Shared trunk: Linear + ReLU x3.
    z = layer(x, w1_ref, b1)
    z = layer(z, w2_ref, b2)
    z = layer(z, w3_ref, b3)

    # Fused head first layers: h[:, :256] = policy hidden, h[:, 256:] = value hidden.
    h = layer(z, wh_ref, bh)

    # Fused block-diagonal final layer -> packed lane-dense output:
    #   out[:, :A] = policy logits, out[:, A] = value, rest zero-padding.
    out = jnp.dot(h, wo_ref[...], preferred_element_type=jnp.float32) + bo
    out_ref[...] = out.astype(out_ref.dtype)


@functools.partial(
    jax.jit, static_argnames=("action_dim", "batch_tile", "weight_buffers"))
def actor_critic_forward(obs, packed_params, action_dim, batch_tile=None,
                         weight_buffers=1):
    w1, w2, w3, wh, wo, biases = packed_params
    assert action_dim + 1 <= OUT_LANES, (
        "fused output packing requires action_dim + 1 <= 128")

    B, obs_dim = obs.shape

    # Batch tile (tunable; auto-chosen by default).
    TB = _choose_batch_tile(B) if batch_tile is None else _round_up(batch_tile, 16)

    # Pad batch only up to the next multiple of 16; Pallas handles the ragged
    # last block when TB does not evenly divide B_pad.
    B_pad = _round_up(B, 16)
    if B_pad != B:
        obs = jnp.pad(obs, ((0, B_pad - B), (0, 0)))
    num_tiles = pl.cdiv(B_pad, TB)

    weight_like = (w1, w2, w3, wh, wo, biases)

    in_specs = [pl.BlockSpec((TB, obs_dim), lambda i: (i, 0))]
    if weight_buffers == 1:
        # Constant block index -> VMEM-resident across the grid; single-buffer
        # them to reclaim ~1.8 MB of VMEM (no re-fetch ever happens anyway).
        in_specs += [pl.BlockSpec(a.shape, lambda i: (0, 0),
                                  pipeline_mode=pl.Buffered(1))
                     for a in weight_like]
    else:
        in_specs += [pl.BlockSpec(a.shape, lambda i: (0, 0)) for a in weight_like]

    # VMEM budget tracks the tile choice: params (single-buffered) +
    # double-buffered obs/out tiles + f32 upper bound on live activations, x2 slack.
    params_bytes = sum(int(a.size) * a.dtype.itemsize for a in weight_like)
    io_bytes = 2 * TB * (obs_dim + OUT_LANES) * 4
    act_bytes = TB * (H1 + H2 + H3 + HH + OUT_LANES) * 4
    vmem_limit = int(min(32 << 20,
                         max(24 << 20, 2 * (params_bytes + io_bytes + act_bytes))))

    kernel = functools.partial(actor_critic_kernel, bf16_epilogue=_bf16_vpu())

    out = pl.pallas_call(
        kernel,
        out_shape=jax.ShapeDtypeStruct((B_pad, OUT_LANES), jnp.float32),
        grid=(num_tiles,),
        in_specs=in_specs,
        out_specs=pl.BlockSpec((TB, OUT_LANES), lambda i: (i, 0)),
        compiler_params=pltpu.CompilerParams(
            dimension_semantics=("parallel",),   # v7x: shard batch across both TCs
            vmem_limit_bytes=vmem_limit,
        ),
    )(obs, *weight_like)

    logits = out[:B, :action_dim]
    value = out[:B, action_dim:action_dim + 1]
    return logits, value


def init_params(key, obs_dim, action_dim):
    """PyTorch-style init: U(-1/sqrt(fan_in), 1/sqrt(fan_in)); weights (in, out)."""
    sizes = [
        (obs_dim, H1),      # shared 1
        (H1, H2),           # shared 2
        (H2, H3),           # shared 3
        (H3, 256),          # policy 1
        (256, action_dim),  # policy 2
        (H3, 256),          # value 1
        (256, 1),           # value 2
    ]
    params = []
    keys = jax.random.split(key, 2 * len(sizes))
    for i, (fan_in, fan_out) in enumerate(sizes):
        bound = 1.0 / jnp.sqrt(jnp.float32(fan_in))
        w = jax.random.uniform(keys[2 * i], (fan_in, fan_out), jnp.float32, -bound, bound)
        b = jax.random.uniform(keys[2 * i + 1], (1, fan_out), jnp.float32, -bound, bound)
        params += [w, b]
    return tuple(params)


def pack_params(params, action_dim):
    """Fuse heads, pack biases, cast weights to bf16 (f32 accumulate in-kernel).

    Note: bf16 weight storage means results differ from the f32 PyTorch module
    by up to ~1e-2 relative; acceptable for A2C logits/values.
    """
    assert action_dim + 1 <= OUT_LANES, (
        "fused output packing requires action_dim + 1 <= 128")
    (w1, b1, w2, b2, w3, b3, wp1, bp1, wp2, bp2, wv1, bv1, wv2, bv2) = params

    # Fused head first layers: (256, 512) weight, (1, 512) bias.
    wh = jnp.concatenate([wp1, wv1], axis=1)
    bh = jnp.concatenate([bp1, bv1], axis=1)

    # Block-diagonal fused final layer: (512, 128).
    wo = jnp.zeros((HH, OUT_LANES), jnp.float32)
    wo = wo.at[:256, :action_dim].set(wp2)
    wo = wo.at[256:, action_dim].set(wv2[:, 0])
    bo = jnp.zeros((1, OUT_LANES), jnp.float32)
    bo = bo.at[0, :action_dim].set(bp2[0])
    bo = bo.at[0, action_dim].set(bv2[0, 0])

    # All biases in one (8, 1024) f32 tile -> single input DMA.
    biases = jnp.zeros((8, H1), jnp.float32)
    biases = biases.at[0, :H1].set(b1[0])
    biases = biases.at[1, :H2].set(b2[0])
    biases = biases.at[2, :H3].set(b3[0])
    biases = biases.at[3, :HH].set(bh[0])
    biases = biases.at[4, :OUT_LANES].set(bo[0])

    bf16 = lambda a: a.astype(jnp.bfloat16)
    return (bf16(w1), bf16(w2), bf16(w3), bf16(wh), bf16(wo), biases)


def reference_forward(obs, params):
    """Pure-JAX reference with matched matmul numerics (bf16 inputs, f32 acc)."""
    (w1, b1, w2, b2, w3, b3, wp1, bp1, wp2, bp2, wv1, bv1, wv2, bv2) = params

    def mm(a, w):
        return jnp.dot(a.astype(jnp.bfloat16), w.astype(jnp.bfloat16),
                       preferred_element_type=jnp.float32)

    z = jax.nn.relu(mm(obs, w1) + b1)
    z = jax.nn.relu(mm(z, w2) + b2)
    z = jax.nn.relu(mm(z, w3) + b3)
    logits = mm(jax.nn.relu(mm(z, wp1) + bp1), wp2) + bp2
    value = mm(jax.nn.relu(mm(z, wv1) + bv1), wv2) + bv2
    return logits, value


if __name__ == "__main__":
    OBS_DIM = 32
    ACTION_DIM = 8
    BATCH = 8

    key = jax.random.PRNGKey(0)
    k_obs, k_params = jax.random.split(key)
    obs = jax.random.normal(k_obs, (BATCH, OBS_DIM), jnp.float32)
    params = init_params(k_params, OBS_DIM, ACTION_DIM)
    packed = pack_params(params, ACTION_DIM)

    try:
        logits, value = jax.block_until_ready(
            actor_critic_forward(obs, packed, ACTION_DIM))
    except Exception:
        # Fallback for JAX versions without BlockSpec(pipeline_mode=...):
        # default double-buffered weights (~1.8 MB extra VMEM, same numerics).
        logits, value = jax.block_until_ready(
            actor_critic_forward(obs, packed, ACTION_DIM, weight_buffers=2))

    ref_logits, ref_value = reference_forward(obs, params)
    assert logits.shape == (BATCH, ACTION_DIM)
    assert value.shape == (BATCH, 1)
    assert jnp.allclose(logits, ref_logits, atol=3e-2, rtol=3e-2)
    assert jnp.allclose(value, ref_value, atol=3e-2, rtol=3e-2)

    print("KERNEL_OK")
</pallas_src>

<mosaic_0001>
module attributes {stable_mosaic.version = 11 : i64} {
  func.func @actor_critic_kernel(%arg0: i32, %arg1: memref<16x32xf32, #tpu.memory_space<vmem>>, %arg2: memref<32x1024xbf16, #tpu.memory_space<vmem>>, %arg3: memref<1024x512xbf16, #tpu.memory_space<vmem>>, %arg4: memref<512x256xbf16, #tpu.memory_space<vmem>>, %arg5: memref<256x512xbf16, #tpu.memory_space<vmem>>, %arg6: memref<512x128xbf16, #tpu.memory_space<vmem>>, %arg7: memref<8x1024xf32, #tpu.memory_space<vmem>>, %arg8: memref<16x128xf32, #tpu.memory_space<vmem>>) attributes {dimension_semantics = [#tpu.dimension_semantics<parallel>], iteration_bounds = array<i64: 1>, scalar_prefetch = 0 : i64, scratch_operands = 0 : i64, tpu.core_type = #tpu.core_type<tc>, window_params = [{transform_indices = @transform_0, window_bounds = array<i64: 16, 32>}, {pipeline_mode = #tpu.pipeline_mode<synchronous>, transform_indices = @transform_1, window_bounds = array<i64: 32, 1024>}, {pipeline_mode = #tpu.pipeline_mode<synchronous>, transform_indices = @transform_2, window_bounds = array<i64: 1024, 512>}, {pipeline_mode = #tpu.pipeline_mode<synchronous>, transform_indices = @transform_3, window_bounds = array<i64: 512, 256>}, {pipeline_mode = #tpu.pipeline_mode<synchronous>, transform_indices = @transform_4, window_bounds = array<i64: 256, 512>}, {pipeline_mode = #tpu.pipeline_mode<synchronous>, transform_indices = @transform_5, window_bounds = array<i64: 512, 128>}, {pipeline_mode = #tpu.pipeline_mode<synchronous>, transform_indices = @transform_6, window_bounds = array<i64: 8, 1024>}, {transform_indices = @transform_7, window_bounds = array<i64: 16, 128>}]} {
    %c0 = arith.constant 0 : index
    %c0_0 = arith.constant 0 : index
    %0 = vector.load %arg7[%c0, %c0_0] : memref<8x1024xf32, #tpu.memory_space<vmem>>, vector<1x1024xf32>
    %c1 = arith.constant 1 : index
    %c0_1 = arith.constant 0 : index
    %1 = vector.load %arg7[%c1, %c0_1] : memref<8x1024xf32, #tpu.memory_space<vmem>>, vector<1x512xf32>
    %c2 = arith.constant 2 : index
    %c0_2 = arith.constant 0 : index
    %2 = vector.load %arg7[%c2, %c0_2] : memref<8x1024xf32, #tpu.memory_space<vmem>>, vector<1x256xf32>
    %c3 = arith.constant 3 : index
    %c0_3 = arith.constant 0 : index
    %3 = vector.load %arg7[%c3, %c0_3] : memref<8x1024xf32, #tpu.memory_space<vmem>>, vector<1x512xf32>
    %c4 = arith.constant 4 : index
    %c0_4 = arith.constant 0 : index
    %4 = vector.load %arg7[%c4, %c0_4] : memref<8x1024xf32, #tpu.memory_space<vmem>>, vector<1x128xf32>
    %c0_5 = arith.constant 0 : index
    %c0_6 = arith.constant 0 : index
    %5 = vector.load %arg1[%c0_5, %c0_6] : memref<16x32xf32, #tpu.memory_space<vmem>>, vector<16x32xf32>
    %6 = arith.truncf %5 : vector<16x32xf32> to vector<16x32xbf16>
    %c0_7 = arith.constant 0 : index
    %c0_8 = arith.constant 0 : index
    %7 = vector.load %arg2[%c0_7, %c0_8] : memref<32x1024xbf16, #tpu.memory_space<vmem>>, vector<32x1024xbf16>
    %cst = arith.constant dense<0.000000e+00> : vector<16x1024xf32>
    %8 = tpu.matmul %6, %7, %cst {dimension_numbers = #tpu.dot_dimension_numbers<[1], [0], [0], [1], [0, 0, 1, 1], [], []>} : vector<16x32xbf16>, vector<32x1024xbf16>, vector<16x1024xf32> -> vector<16x1024xf32>
    %9 = vector.broadcast %0 : vector<1x1024xf32> to vector<16x1024xf32>
    %10 = arith.addf %8, %9 : vector<16x1024xf32>
    %cst_9 = arith.constant 0.000000e+00 : f32
    %11 = vector.broadcast %cst_9 : f32 to vector<16x1024xf32>
    %12 = arith.maximumf %10, %11 : vector<16x1024xf32>
    %13 = arith.truncf %12 : vector<16x1024xf32> to vector<16x1024xbf16>
    %c0_10 = arith.constant 0 : index
    %c0_11 = arith.constant 0 : index
    %14 = vector.load %arg3[%c0_10, %c0_11] : memref<1024x512xbf16, #tpu.memory_space<vmem>>, vector<1024x512xbf16>
    %cst_12 = arith.constant dense<0.000000e+00> : vector<16x512xf32>
    %15 = tpu.matmul %13, %14, %cst_12 {dimension_numbers = #tpu.dot_dimension_numbers<[1], [0], [0], [1], [0, 0, 1, 1], [], []>} : vector<16x1024xbf16>, vector<1024x512xbf16>, vector<16x512xf32> -> vector<16x512xf32>
    %16 = vector.broadcast %1 : vector<1x512xf32> to vector<16x512xf32>
    %17 = arith.addf %15, %16 : vector<16x512xf32>
    %cst_13 = arith.constant 0.000000e+00 : f32
    %18 = vector.broadcast %cst_13 : f32 to vector<16x512xf32>
    %19 = arith.maximumf %17, %18 : vector<16x512xf32>
    %20 = arith.truncf %19 : vector<16x512xf32> to vector<16x512xbf16>
    %c0_14 = arith.constant 0 : index
    %c0_15 = arith.constant 0 : index
    %21 = vector.load %arg4[%c0_14, %c0_15] : memref<512x256xbf16, #tpu.memory_space<vmem>>, vector<512x256xbf16>
    %cst_16 = arith.constant dense<0.000000e+00> : vector<16x256xf32>
    %22 = tpu.matmul %20, %21, %cst_16 {dimension_numbers = #tpu.dot_dimension_numbers<[1], [0], [0], [1], [0, 0, 1, 1], [], []>} : vector<16x512xbf16>, vector<512x256xbf16>, vector<16x256xf32> -> vector<16x256xf32>
    %23 = vector.broadcast %2 : vector<1x256xf32> to vector<16x256xf32>
    %24 = arith.addf %22, %23 : vector<16x256xf32>
    %cst_17 = arith.constant 0.000000e+00 : f32
    %25 = vector.broadcast %cst_17 : f32 to vector<16x256xf32>
    %26 = arith.maximumf %24, %25 : vector<16x256xf32>
    %27 = arith.truncf %26 : vector<16x256xf32> to vector<16x256xbf16>
    %c0_18 = arith.constant 0 : index
    %c0_19 = arith.constant 0 : index
    %28 = vector.load %arg5[%c0_18, %c0_19] : memref<256x512xbf16, #tpu.memory_space<vmem>>, vector<256x512xbf16>
    %cst_20 = arith.constant dense<0.000000e+00> : vector<16x512xf32>
    %29 = tpu.matmul %27, %28, %cst_20 {dimension_numbers = #tpu.dot_dimension_numbers<[1], [0], [0], [1], [0, 0, 1, 1], [], []>} : vector<16x256xbf16>, vector<256x512xbf16>, vector<16x512xf32> -> vector<16x512xf32>
    %30 = vector.broadcast %3 : vector<1x512xf32> to vector<16x512xf32>
    %31 = arith.addf %29, %30 : vector<16x512xf32>
    %cst_21 = arith.constant 0.000000e+00 : f32
    %32 = vector.broadcast %cst_21 : f32 to vector<16x512xf32>
    %33 = arith.maximumf %31, %32 : vector<16x512xf32>
    %34 = arith.truncf %33 : vector<16x512xf32> to vector<16x512xbf16>
    %c0_22 = arith.constant 0 : index
    %c0_23 = arith.constant 0 : index
    %35 = vector.load %arg6[%c0_22, %c0_23] : memref<512x128xbf16, #tpu.memory_space<vmem>>, vector<512x128xbf16>
    %cst_24 = arith.constant dense<0.000000e+00> : vector<16x128xf32>
    %36 = tpu.matmul %34, %35, %cst_24 {dimension_numbers = #tpu.dot_dimension_numbers<[1], [0], [0], [1], [0, 0, 1, 1], [], []>} : vector<16x512xbf16>, vector<512x128xbf16>, vector<16x128xf32> -> vector<16x128xf32>
    %37 = vector.broadcast %4 : vector<1x128xf32> to vector<16x128xf32>
    %38 = arith.addf %36, %37 : vector<16x128xf32>
    %c0_25 = arith.constant 0 : index
    %c0_26 = arith.constant 0 : index
    %39 = vector.load %arg8[%c0_25, %c0_26] : memref<16x128xf32, #tpu.memory_space<vmem>>, vector<16x128xf32>
    tpu.vector_store %arg8[%c0_25, %c0_26], %38 {strides = array<i32>} : memref<16x128xf32, #tpu.memory_space<vmem>>, vector<16x128xf32>,
    return
  }
  func.func @transform_0(%arg0: i32) -> (i32, i32) {
    %c0_i32 = arith.constant 0 : i32
    %c0_i32_0 = arith.constant 0 : i32
    return %arg0, %c0_i32 : i32, i32
  }
  func.func @transform_1(%arg0: i32) -> (i32, i32) {
    %c0_i32 = arith.constant 0 : i32
    %c0_i32_0 = arith.constant 0 : i32
    %c0_i32_1 = arith.constant 0 : i32
    return %c0_i32, %c0_i32_0 : i32, i32
  }
  func.func @transform_2(%arg0: i32) -> (i32, i32) {
    %c0_i32 = arith.constant 0 : i32
    %c0_i32_0 = arith.constant 0 : i32
    %c0_i32_1 = arith.constant 0 : i32
    return %c0_i32, %c0_i32_0 : i32, i32
  }
  func.func @transform_3(%arg0: i32) -> (i32, i32) {
    %c0_i32 = arith.constant 0 : i32
    %c0_i32_0 = arith.constant 0 : i32
    %c0_i32_1 = arith.constant 0 : i32
    return %c0_i32, %c0_i32_0 : i32, i32
  }
  func.func @transform_4(%arg0: i32) -> (i32, i32) {
    %c0_i32 = arith.constant 0 : i32
    %c0_i32_0 = arith.constant 0 : i32
    %c0_i32_1 = arith.constant 0 : i32
    return %c0_i32, %c0_i32_0 : i32, i32
  }
  func.func @transform_5(%arg0: i32) -> (i32, i32) {
    %c0_i32 = arith.constant 0 : i32
    %c0_i32_0 = arith.constant 0 : i32
    %c0_i32_1 = arith.constant 0 : i32
    return %c0_i32, %c0_i32_0 : i32, i32
  }
  func.func @transform_6(%arg0: i32) -> (i32, i32) {
    %c0_i32 = arith.constant 0 : i32
    %c0_i32_0 = arith.constant 0 : i32
    %c0_i32_1 = arith.constant 0 : i32
    return %c0_i32, %c0_i32_0 : i32, i32
  }
  func.func @transform_7(%arg0: i32) -> (i32, i32) {
    %c0_i32 = arith.constant 0 : i32
    %c0_i32_0 = arith.constant 0 : i32
    return %arg0, %c0_i32 : i32, i32
  }
}

module attributes {stable_mosaic.version = 11 : i64} {
  func.func @actor_critic_kernel(%arg0: i32, %arg1: memref<16x32xf32, #tpu.memory_space<vmem>>, %arg2: memref<32x1024xbf16, #tpu.memory_space<vmem>>, %arg3: memref<1024x512xbf16, #tpu.memory_space<vmem>>, %arg4: memref<512x256xbf16, #tpu.memory_space<vmem>>, %arg5: memref<256x512xbf16, #tpu.memory_space<vmem>>, %arg6: memref<512x128xbf16, #tpu.memory_space<vmem>>, %arg7: memref<8x1024xf32, #tpu.memory_space<vmem>>, %arg8: memref<16x128xf32, #tpu.memory_space<vmem>>) attributes {dimension_semantics = [#tpu.dimension_semantics<parallel>], iteration_bounds = array<i64: 1>, scalar_prefetch = 0 : i64, scratch_operands = 0 : i64, tpu.core_type = #tpu.core_type<tc>, window_params = [{transform_indices = @transform_0, window_bounds = array<i64: 16, 32>}, {pipeline_mode = #tpu.pipeline_mode<synchronous>, transform_indices = @transform_1, window_bounds = array<i64: 32, 1024>}, {pipeline_mode = #tpu.pipeline_mode<synchronous>, transform_indices = @transform_2, window_bounds = array<i64: 1024, 512>}, {pipeline_mode = #tpu.pipeline_mode<synchronous>, transform_indices = @transform_3, window_bounds = array<i64: 512, 256>}, {pipeline_mode = #tpu.pipeline_mode<synchronous>, transform_indices = @transform_4, window_bounds = array<i64: 256, 512>}, {pipeline_mode = #tpu.pipeline_mode<synchronous>, transform_indices = @transform_5, window_bounds = array<i64: 512, 128>}, {pipeline_mode = #tpu.pipeline_mode<synchronous>, transform_indices = @transform_6, window_bounds = array<i64: 8, 1024>}, {transform_indices = @transform_7, window_bounds = array<i64: 16, 128>}]} {
    %c0 = arith.constant 0 : index
    %c0_0 = arith.constant 0 : index
    %0 = vector.load %arg7[%c0, %c0_0] : memref<8x1024xf32, #tpu.memory_space<vmem>>, vector<1x1024xf32>
    %c1 = arith.constant 1 : index
    %c0_1 = arith.constant 0 : index
    %1 = vector.load %arg7[%c1, %c0_1] : memref<8x1024xf32, #tpu.memory_space<vmem>>, vector<1x512xf32>
    %c2 = arith.constant 2 : index
    %c0_2 = arith.constant 0 : index
    %2 = vector.load %arg7[%c2, %c0_2] : memref<8x1024xf32, #tpu.memory_space<vmem>>, vector<1x256xf32>
    %c3 = arith.constant 3 : index
    %c0_3 = arith.constant 0 : index
    %3 = vector.load %arg7[%c3, %c0_3] : memref<8x1024xf32, #tpu.memory_space<vmem>>, vector<1x512xf32>
    %c4 = arith.constant 4 : index
    %c0_4 = arith.constant 0 : index
    %4 = vector.load %arg7[%c4, %c0_4] : memref<8x1024xf32, #tpu.memory_space<vmem>>, vector<1x128xf32>
    %c0_5 = arith.constant 0 : index
    %c0_6 = arith.constant 0 : index
    %5 = vector.load %arg1[%c0_5, %c0_6] : memref<16x32xf32, #tpu.memory_space<vmem>>, vector<16x32xf32>
    %6 = arith.truncf %5 : vector<16x32xf32> to vector<16x32xbf16>
    %c0_7 = arith.constant 0 : index
    %c0_8 = arith.constant 0 : index
    %7 = vector.load %arg2[%c0_7, %c0_8] : memref<32x1024xbf16, #tpu.memory_space<vmem>>, vector<32x1024xbf16>
    %cst = arith.constant dense<0.000000e+00> : vector<16x1024xf32>
    %8 = tpu.matmul %6, %7, %cst {dimension_numbers = #tpu.dot_dimension_numbers<[1], [0], [0], [1], [0, 0, 1, 1], [], []>} : vector<16x32xbf16>, vector<32x1024xbf16>, vector<16x1024xf32> -> vector<16x1024xf32>
    %9 = vector.broadcast %0 : vector<1x1024xf32> to vector<16x1024xf32>
    %10 = arith.addf %8, %9 : vector<16x1024xf32>
    %cst_9 = arith.constant 0.000000e+00 : f32
    %11 = vector.broadcast %cst_9 : f32 to vector<16x1024xf32>
    %12 = arith.maximumf %10, %11 : vector<16x1024xf32>
    %13 = arith.truncf %12 : vector<16x1024xf32> to vector<16x1024xbf16>
    %c0_10 = arith.constant 0 : index
    %c0_11 = arith.constant 0 : index
    %14 = vector.load %arg3[%c0_10, %c0_11] : memref<1024x512xbf16, #tpu.memory_space<vmem>>, vector<1024x512xbf16>
    %cst_12 = arith.constant dense<0.000000e+00> : vector<16x512xf32>
    %15 = tpu.matmul %13, %14, %cst_12 {dimension_numbers = #tpu.dot_dimension_numbers<[1], [0], [0], [1], [0, 0, 1, 1], [], []>} : vector<16x1024xbf16>, vector<1024x512xbf16>, vector<16x512xf32> -> vector<16x512xf32>
    %16 = vector.broadcast %1 : vector<1x512xf32> to vector<16x512xf32>
    %17 = arith.addf %15, %16 : vector<16x512xf32>
    %cst_13 = arith.constant 0.000000e+00 : f32
    %18 = vector.broadcast %cst_13 : f32 to vector<16x512xf32>
    %19 = arith.maximumf %17, %18 : vector<16x512xf32>
    %20 = arith.truncf %19 : vector<16x512xf32> to vector<16x512xbf16>
    %c0_14 = arith.constant 0 : index
    %c0_15 = arith.constant 0 : index
    %21 = vector.load %arg4[%c0_14, %c0_15] : memref<512x256xbf16, #tpu.memory_space<vmem>>, vector<512x256xbf16>
    %cst_16 = arith.constant dense<0.000000e+00> : vector<16x256xf32>
    %22 = tpu.matmul %20, %21, %cst_16 {dimension_numbers = #tpu.dot_dimension_numbers<[1], [0], [0], [1], [0, 0, 1, 1], [], []>} : vector<16x512xbf16>, vector<512x256xbf16>, vector<16x256xf32> -> vector<16x256xf32>
    %23 = vector.broadcast %2 : vector<1x256xf32> to vector<16x256xf32>
    %24 = arith.addf %22, %23 : vector<16x256xf32>
    %cst_17 = arith.constant 0.000000e+00 : f32
    %25 = vector.broadcast %cst_17 : f32 to vector<16x256xf32>
    %26 = arith.maximumf %24, %25 : vector<16x256xf32>
    %27 = arith.truncf %26 : vector<16x256xf32> to vector<16x256xbf16>
    %c0_18 = arith.constant 0 : index
    %c0_19 = arith.constant 0 : index
    %28 = vector.load %arg5[%c0_18, %c0_19] : memref<256x512xbf16, #tpu.memory_space<vmem>>, vector<256x512xbf16>
    %cst_20 = arith.constant dense<0.000000e+00> : vector<16x512xf32>
    %29 = tpu.matmul %27, %28, %cst_20 {dimension_numbers = #tpu.dot_dimension_numbers<[1], [0], [0], [1], [0, 0, 1, 1], [], []>} : vector<16x256xbf16>, vector<256x512xbf16>, vector<16x512xf32> -> vector<16x512xf32>
    %30 = vector.broadcast %3 : vector<1x512xf32> to vector<16x512xf32>
    %31 = arith.addf %29, %30 : vector<16x512xf32>
    %cst_21 = arith.constant 0.000000e+00 : f32
    %32 = vector.broadcast %cst_21 : f32 to vector<16x512xf32>
    %33 = arith.maximumf %31, %32 : vector<16x512xf32>
    %34 = arith.truncf %33 : vector<16x512xf32> to vector<16x512xbf16>
    %c0_22 = arith.constant 0 : index
    %c0_23 = arith.constant 0 : index
    %35 = vector.load %arg6[%c0_22, %c0_23] : memref<512x128xbf16, #tpu.memory_space<vmem>>, vector<512x128xbf16>
    %cst_24 = arith.constant dense<0.000000e+00> : vector<16x128xf32>
    %36 = tpu.matmul %34, %35, %cst_24 {dimension_numbers = #tpu.dot_dimension_numbers<[1], [0], [0], [1], [0, 0, 1, 1], [], []>} : vector<16x512xbf16>, vector<512x128xbf16>, vector<16x128xf32> -> vector<16x128xf32>
    %37 = vector.broadcast %4 : vector<1x128xf32> to vector<16x128xf32>
    %38 = arith.addf %36, %37 : vector<16x128xf32>
    %c0_25 = arith.constant 0 : index
    %c0_26 = arith.constant 0 : index
    %39 = vector.load %arg8[%c0_25, %c0_26] : memref<16x128xf32, #tpu.memory_space<vmem>>, vector<16x128xf32>
    tpu.vector_store %arg8[%c0_25, %c0_26], %38 {strides = array<i32>} : memref<16x128xf32, #tpu.memory_space<vmem>>, vector<16x128xf32>,
    return
  }
  func.func @transform_0(%arg0: i32) -> (i32, i32) {
    %c0_i32 = arith.constant 0 : i32
    %c0_i32_0 = arith.constant 0 : i32
    return %arg0, %c0_i32 : i32, i32
  }
  func.func @transform_1(%arg0: i32) -> (i32, i32) {
    %c0_i32 = arith.constant 0 : i32
    %c0_i32_0 = arith.constant 0 : i32
    %c0_i32_1 = arith.constant 0 : i32
    return %c0_i32, %c0_i32_0 : i32, i32
  }
  func.func @transform_2(%arg0: i32) -> (i32, i32) {
    %c0_i32 = arith.constant 0 : i32
    %c0_i32_0 = arith.constant 0 : i32
    %c0_i32_1 = arith.constant 0 : i32
    return %c0_i32, %c0_i32_0 : i32, i32
  }
  func.func @transform_3(%arg0: i32) -> (i32, i32) {
    %c0_i32 = arith.constant 0 : i32
    %c0_i32_0 = arith.constant 0 : i32
    %c0_i32_1 = arith.constant 0 : i32
    return %c0_i32, %c0_i32_0 : i32, i32
  }
  func.func @transform_4(%arg0: i32) -> (i32, i32) {
    %c0_i32 = arith.constant 0 : i32
    %c0_i32_0 = arith.constant 0 : i32
    %c0_i32_1 = arith.constant 0 : i32
    return %c0_i32, %c0_i32_0 : i32, i32
  }
  func.func @transform_5(%arg0: i32) -> (i32, i32) {
    %c0_i32 = arith.constant 0 : i32
    %c0_i32_0 = arith.constant 0 : i32
    %c0_i32_1 = arith.constant 0 : i32
    return %c0_i32, %c0_i32_0 : i32, i32
  }
  func.func @transform_6(%arg0: i32) -> (i32, i32) {
    %c0_i32 = arith.constant 0 : i32
    %c0_i32_0 = arith.constant 0 : i32
    %c0_i32_1 = arith.constant 0 : i32
    return %c0_i32, %c0_i32_0 : i32, i32
  }
  func.func @transform_7(%arg0: i32) -> (i32, i32) {
    %c0_i32 = arith.constant 0 : i32
    %c0_i32_0 = arith.constant 0 : i32
    return %arg0, %c0_i32 : i32, i32
  }
}

</mosaic_0001>

<bundles_post_ra>
// kernel: actor_critic_forward.1
= control target key start
LH: loop header
LB: loop body
LE: loop exit
PB: predicated region body
PF: predicated region fallthrough
CT: control target
= control target key end

     0   :  { %12 = vsyncpa [#allocation3], 0  ;;  %s6305_s0 = inlined_call_operand.vmem [shape: f32[16,32], index: 0, kind: input, shape index: {}]   ;;  %s6306_s1 = inlined_call_operand.hbm [shape: bf16[32,1024], index: 1, kind: input, shape index: {}]   ;;  %s6307_s2 = inlined_call_operand.hbm [shape: bf16[1024,512], index: 2, kind: input, shape index: {}]   ;;  %s6308_s3 = inlined_call_operand.hbm [shape: bf16[512,256], index: 3, kind: input, shape index: {}]   ;;  %s6309_s4 = inlined_call_operand.hbm [shape: bf16[256,512], index: 4, kind: input, shape index: {}]   ;;  %s6310_s5 = inlined_call_operand.hbm [shape: bf16[512,128], index: 5, kind: input, shape index: {}]   ;;  %s6311_s6 = inlined_call_operand.hbm [shape: f32[8,1024], index: 6, kind: input, shape index: {}]   ;;  %s6312_s7 = inlined_call_operand.vmem [shape: f32[16,128], index: 7, kind: output, shape index: {}]  }
   0x1   :  { %13 = vsyncpa [#allocation5], 0 }
   0x2   :  { %14 = vsyncpa [#allocation8], 0  ;;  %s35_s26 = sshll.u32 %s6307_s2, 4  ;;  %s36_s26 = int_to_ptr.hbm [resolvable:$true] %s35_s26 }
   0x3   :  { %15 = vsyncpa [#allocation11], 0  ;;  %s6070_s27 = smov [#allocation4]   ;;  %s61_s8 = sshll.u32 %s6309_s4, 4  ;;  %s62_s8 = int_to_ptr.hbm [resolvable:$true] %s61_s8 }
   0x4   :  { %s37_s28 = sshll.u32 %s6070_s27, 4  ;;  %s6071_s9 = smov 256   ;;  %s38_s28 = int_to_ptr.vmem [resolvable:$true] %s37_s28 }
   0x5   :  { %s6072_s10 = smov 16   ;;  %s6073_s11 = smov [#allocation7]  }
   0x6   :  { %43 = dma.hbm_to_vmem [thread:$0]  %s36_s26, 32768, %s38_s28, [#allocation5], %s6071_s9, %s6071_s9, %s6072_s10  }
   0x7   :  { %s63_s12 = sshll.u32 %s6073_s11, 4  ;;  %s22_s15 = sshll.u32 %s6306_s1, 4  ;;  %s64_s12 = int_to_ptr.vmem [resolvable:$true] %s63_s12  ;;  %s23_s15 = int_to_ptr.hbm [resolvable:$true] %s22_s15 }
   0x8   :  { %69 = dma.hbm_to_vmem [thread:$0]  %s62_s8, 8192, %s64_s12, [#allocation8], %s6071_s9, %s6071_s9, %s6072_s10  }
   0x9   :  { %s6074_s2 = smov [#allocation2]   ;;  %s48_s4 = sshll.u32 %s6308_s3, 4  ;;  %s49_s4 = int_to_ptr.hbm [resolvable:$true] %s48_s4 }
   0xa   :  { %s24_s16 = sshll.u32 %s6074_s2, 4  ;;  %s6075_s19 = smov 512   ;;  %s25_s16 = int_to_ptr.vmem [resolvable:$true] %s24_s16 }
   0xb   :  { %s6076_s20 = smov 32   ;;  %s6077_s21 = smov [#allocation6]  }
   0xc   :  { %30 = dma.hbm_to_vmem [thread:$0]  %s23_s15, 2048, %s25_s16, [#allocation3], %s6075_s19, %s6075_s19, %s6076_s20  }
   0xd   :  { %s50_s22 = sshll.u32 %s6077_s21, 4  ;;  %s6078_s23 = smov 128   ;;  %s51_s22 = int_to_ptr.vmem [resolvable:$true] %s50_s22 }
   0xe   :  { %s6079_s24 = smov 8   ;;  %s74_s26 = sshll.u32 %s6310_s5, 4  ;;  %s75_s26 = int_to_ptr.hbm [resolvable:$true] %s74_s26 }
   0xf   :  { %56 = dma.hbm_to_vmem [thread:$0]  %s49_s4, 8192, %s51_s22, [#allocation5], %s6078_s23, %s6078_s23, %s6079_s24  }
  0x10   :  { %s6080_s27 = smov [#allocation9]   ;;  %s88_s30 = sshll.u32 %s6311_s6, 4  ;;  %s89_s30 = int_to_ptr.hbm [resolvable:$true] %s88_s30 }
  0x11   :  { %s76_s28 = sshll.u32 %s6080_s27, 4  ;;  %s6081_s8 = smov 64   ;;  %s77_s28 = int_to_ptr.vmem [resolvable:$true] %s76_s28 }
  0x12   :  { %s6082_s9 = smov 4   ;;  %s6083_s10 = smov [#allocation10]  }
  0x13   :  { %82 = dma.hbm_to_vmem [thread:$0]  %s75_s26, 4096, %s77_s28, [#allocation8], %s6081_s8, %s6081_s8, %s6082_s9  }
  0x14   :  { %s90_s11 = sshll.u32 %s6083_s10, 4  ;;  %s91_s11 = int_to_ptr.vmem [resolvable:$true] %s90_s11 }
  0x15   :  { %93 = dma.hbm_to_vmem [thread:$0]  %s89_s30, 1024, %s91_s11, [#allocation11]  }
  0x16   :  { %6062 = dma.done.wait [#allocation3], 2048  }
  0x17   :  { %6063 = vsyncadd [#allocation3], 4294965248 }
  0x18   :  { %6064 = dma.done.wait [#allocation5], 40960  }
  0x19   :  { %6065 = vsyncadd [#allocation5], 4294926336 }
  0x1a   :  { %6066 = dma.done.wait [#allocation8], 12288  }
  0x1b   :  { %6067 = vsyncadd [#allocation8], 4294955008 }
  0x1c   :  { %6068 = dma.done.wait [#allocation11], 1024  }
  0x1d   :  { %6069 = vsyncadd [#allocation11], 4294966272  ;;  %v3770_v0 = vld [vmem:[#allocation2 + $0x40] sm:$0xf]  ;;  %v5480_v2 = vld [vmem:[#allocation2 + $0x44] sm:$0xf] }
  0x1e   :  { %v5484_v1 = vld [vmem:[#allocation2 + $0x5c] sm:$0xf0]  ;;  %v3772_v4 = vld [vmem:[#allocation2 + $0x60] sm:$0xf0]  ;;  %v3778_v5 = vld [vmem:[#allocation2 + $0x48] sm:$0xf] }
  0x1f   :  { %v3771_v3 = vor.u32 %v5484_v1, %v3770_v0  ;;  %v5485_v6 = vld [vmem:[#allocation2 + $0x64] sm:$0xf0]  ;;  %v3775_v7 = vor.u32 %v5480_v2, %v3772_v4  ;;  %v5481_v9 = vld [vmem:[#allocation2 + $0x4c] sm:$0xf]  ;;  %v3738_v11 = vld [vmem:[#allocation2] sm:$0xf] }
  0x20   :  { %v3779_v8 = vor.u32 %v5485_v6, %v3778_v5  ;;  %v3780_v10 = vld [vmem:[#allocation2 + $0x68] sm:$0xf0]  ;;  %v5476_v13 = vld [vmem:[#allocation2 + $0x1c] sm:$0xf0]  ;;  %v5472_v14 = vld [vmem:[#allocation2 + $0x4] sm:$0xf] }
  0x21   :  { %255 = vmatpush.bf16.msra.mxu0 %v3771_v3  ;;  %v3783_v12 = vor.u32 %v5481_v9, %v3780_v10  ;;  %v3740_v15 = vld [vmem:[#allocation2 + $0x20] sm:$0xf0]  ;;  %269 = vmatpush.bf16.msra.mxu1 %v3775_v7  ;;  %v3739_v16 = vor.u32 %v5476_v13, %v3738_v11  ;;  %v3746_v18 = vld [vmem:[#allocation2 + $0x8] sm:$0xf]  ;;  %v5473_v20 = vld [vmem:[#allocation2 + $0xc] sm:$0xf] }
  0x22   :  { %283 = vmatpush.bf16.msra.mxu2 %v3779_v8  ;;  %v3743_v17 = vor.u32 %v5472_v14, %v3740_v15  ;;  %v5477_v19 = vld [vmem:[#allocation2 + $0x24] sm:$0xf0]  ;;  %v3748_v22 = vld [vmem:[#allocation2 + $0x28] sm:$0xf0]  ;;  %v129_v23 = vld [vmem:[%s6305_s0] sm:$0xff]  ;;  %vm245_vm0 = vcmask 261120  }
  0x23   :  { %297 = vmatpush.bf16.msra.mxu3 %v3783_v12  ;;  %v3747_v21 = vor.u32 %v5477_v19, %v3746_v18  ;;  %v130_v24 = vld [vmem:[%s6305_s0 + $0x8] sm:$0xff]  ;;  %v3751_v25 = vor.u32 %v5473_v20, %v3748_v22  ;;  %v3786_v27 = vld [vmem:[#allocation2 + $0x50] sm:$0xf]  ;;  %v5482_v29 = vld [vmem:[#allocation2 + $0x54] sm:$0xf] }
  0x24   :  { %v6148_v26 = vpack.c.bf16 %v130_v24, %v129_v23  ;;  %v5486_v28 = vld [vmem:[#allocation2 + $0x6c] sm:$0xf0]  ;;  %v3788_v31 = vld [vmem:[#allocation2 + $0x70] sm:$0xf0]  ;;  %v3794_v32 = vld [vmem:[#allocation2 + $0x58] sm:$0xf] }
  0x25   :  { %256 = vmatpush.bf16.msra.mxu0 %v3739_v16  ;;  %v3787_v30 = vor.u32 %v5486_v28, %v3786_v27  ;;  %v5487_v33 = vld [vmem:[#allocation2 + $0x74] sm:$0xf0]  ;;  %270 = vmatpush.bf16.msra.mxu1 %v3743_v17  ;;  %v3791_v34 = vor.u32 %v5482_v29, %v3788_v31  ;;  %v5483_v36 = vld [vmem:[#allocation2 + $0x5c] sm:$0xf]  ;;  %v3754_v38 = vld [vmem:[#allocation2 + $0x10] sm:$0xf] }
  0x26   :  { %284 = vmatpush.bf16.msra.mxu2 %v3747_v21  ;;  %v3795_v35 = vor.u32 %v5487_v33, %v3794_v32  ;;  %v3796_v37 = vld [vmem:[#allocation2 + $0x78] sm:$0xf0]  ;;  %v5478_v40 = vld [vmem:[#allocation2 + $0x2c] sm:$0xf0]  ;;  %v5474_v41 = vld [vmem:[#allocation2 + $0x14] sm:$0xf] }
  0x27   :  { %298 = vmatpush.bf16.msra.mxu3 %v3751_v25  ;;  %v3799_v39 = vor.u32 %v5483_v36, %v3796_v37  ;;  %v3756_v42 = vld [vmem:[#allocation2 + $0x30] sm:$0xf0]  ;;  %v3755_v43 = vor.u32 %v5478_v40, %v3754_v38  ;;  %v3762_v45 = vld [vmem:[#allocation2 + $0x18] sm:$0xf]  ;;  %v5475_v47 = vld [vmem:[#allocation2 + $0x1c] sm:$0xf] }
  0x28   :  { %3800 = vmatmul.msk.bf16.vlgmr.msra.gmra.mxu0 %vm245_vm0, %v6148_v26  ;;  %v3759_v44 = vor.u32 %v5474_v41, %v3756_v42  ;;  %v5479_v46 = vld [vmem:[#allocation2 + $0x34] sm:$0xf0]  ;;  %3801 = vmatmul.msk.bf16.vlgmr.msra.gmra.mxu1 %vm245_vm0, %v6148_v26  ;;  %v3764_v48 = vld [vmem:[#allocation2 + $0x38] sm:$0xf0]  ;;  %v3922_v49 = vld [vmem:[#allocation4 + $0xe0] sm:$0xf] }
  0x29   :  { %311 = vmatpush.bf16.msrb.mxu0 %v3787_v30  ;;  %325 = vmatpush.bf16.msrb.mxu1 %v3791_v34  ;;  %v5518_v50 = vld [vmem:[#allocation4 + $0xec] sm:$0xf0]  ;;  %v3763_v51 = vor.u32 %v5479_v46, %v3762_v45  ;;  %v4050_v53 = vld [vmem:[#allocation4 + $0x1e0] sm:$0xf]  ;;  %v3767_v56 = vor.u32 %v5475_v47, %v3764_v48 }
  0x2a   :  { %3802 = vmatmul.msk.bf16.vlgmr.msra.gmra.mxu2 %vm245_vm0, %v6148_v26  ;;  %3803 = vmatmul.msk.bf16.vlgmr.msra.gmra.mxu3 %vm245_vm0, %v6148_v26  ;;  %v3923_v52 = vor.u32 %v5518_v50, %v3922_v49  ;;  %v5550_v54 = vld [vmem:[#allocation4 + $0x1ec] sm:$0xf0]  ;;  %v3906_v55 = vld [vmem:[#allocation4 + $0xc0] sm:$0xf] }
  0x2b   :  { %339 = vmatpush.bf16.msrb.mxu2 %v3795_v35  ;;  %353 = vmatpush.bf16.msrb.mxu3 %v3799_v39  ;;  %v4051_v57 = vor.u32 %v5550_v54, %v4050_v53  ;;  %v5514_v58 = vld [vmem:[#allocation4 + $0xcc] sm:$0xf0]  ;;  %v4034_v59 = vld [vmem:[#allocation4 + $0x1c0] sm:$0xf] }
  0x2c   :  { %v5546_v60 = vld [vmem:[#allocation4 + $0x1cc] sm:$0xf0]  ;;  %v3907_v61 = vor.u32 %v5514_v58, %v3906_v55  ;;  %v4178_v62 = vld [vmem:[#allocation4 + $0x2e0] sm:$0xf] }
  0x2d   :  { %312 = vmatpush.bf16.msrb.mxu0 %v3755_v43  ;;  %326 = vmatpush.bf16.msrb.mxu1 %v3759_v44  ;;  %v5582_v63 = vld [vmem:[#allocation4 + $0x2ec] sm:$0xf0]  ;;  %v4306_v0 = vld [vmem:[#allocation4 + $0x3e0] sm:$0xf]  ;;  %v4035_v1 = vor.u32 %v5546_v60, %v4034_v59 }
  0x2e   :  { %v4179_v2 = vor.u32 %v5582_v63, %v4178_v62  ;;  %v5614_v3 = vld [vmem:[#allocation4 + $0x3ec] sm:$0xf0]  ;;  %v3890_v4 = vld [vmem:[#allocation4 + $0xa0] sm:$0xf] }
  0x2f   :  { %v5510_v5 = vld [vmem:[#allocation4 + $0xac] sm:$0xf0]  ;;  %340 = vmatpush.bf16.msrb.mxu2 %v3763_v51  ;;  %v4307_v6 = vor.u32 %v5614_v3, %v4306_v0  ;;  %v4018_v7 = vld [vmem:[#allocation4 + $0x1a0] sm:$0xf]  ;;  %354 = vmatpush.bf16.msrb.mxu3 %v3767_v56 }
  0x30   :  { %v5542_v8 = vld [vmem:[#allocation4 + $0x1ac] sm:$0xf0]  ;;  %v4162_v9 = vld [vmem:[#allocation4 + $0x2c0] sm:$0xf]  ;;  %v3891_v13 = vor.u32 %v5510_v5, %v3890_v4 }
  0x31   :  { %1930 = vmatpush.bf16.msra.mxu0 %v3923_v52  ;;  %1944 = vmatpush.bf16.msra.mxu1 %v4051_v57  ;;  %v5578_v10 = vld [vmem:[#allocation4 + $0x2cc] sm:$0xf0]  ;;  %v4290_v11 = vld [vmem:[#allocation4 + $0x3c0] sm:$0xf]  ;;  %v4019_v16 = vor.u32 %v5542_v8, %v4018_v7 }
  0x32   :  { %v5610_v12 = vld [vmem:[#allocation4 + $0x3cc] sm:$0xf0]  ;;  %v4163_v14 = vor.u32 %v5578_v10, %v4162_v9  ;;  %v4146_v17 = vld [vmem:[#allocation4 + $0x2a0] sm:$0xf] }
  0x33   :  { %1958 = vmatpush.bf16.msra.mxu2 %v4179_v2  ;;  %1972 = vmatpush.bf16.msra.mxu3 %v4307_v6  ;;  %v4291_v15 = vor.u32 %v5610_v12, %v4290_v11  ;;  %v5574_v18 = vld [vmem:[#allocation4 + $0x2ac] sm:$0xf0]  ;;  %v4274_v19 = vld [vmem:[#allocation4 + $0x3a0] sm:$0xf] }
  0x34   :  { %v5606_v20 = vld [vmem:[#allocation4 + $0x3ac] sm:$0xf0]  ;;  %v3874_v21 = vld [vmem:[#allocation4 + $0x80] sm:$0xf]  ;;  %v4147_v24 = vor.u32 %v5574_v18, %v4146_v17 }
  0x35   :  { %1931 = vmatpush.bf16.msra.mxu0 %v3907_v61  ;;  %1945 = vmatpush.bf16.msra.mxu1 %v4035_v1  ;;  %v5506_v22 = vld [vmem:[#allocation4 + $0x8c] sm:$0xf0]  ;;  %v4002_v23 = vld [vmem:[#allocation4 + $0x180] sm:$0xf]  ;;  %v4275_v27 = vor.u32 %v5606_v20, %v4274_v19 }
  0x36   :  { %v5538_v25 = vld [vmem:[#allocation4 + $0x18c] sm:$0xf0]  ;;  %v4130_v28 = vld [vmem:[#allocation4 + $0x280] sm:$0xf]  ;;  %v3875_v32 = vor.u32 %v5506_v22, %v3874_v21 }
  0x37   :  { %1959 = vmatpush.bf16.msra.mxu2 %v4163_v14  ;;  %1973 = vmatpush.bf16.msra.mxu3 %v4291_v15  ;;  %v5570_v29 = vld [vmem:[#allocation4 + $0x28c] sm:$0xf0]  ;;  %v4258_v30 = vld [vmem:[#allocation4 + $0x380] sm:$0xf]  ;;  %v4003_v33 = vor.u32 %v5538_v25, %v4002_v23 }
  0x38   :  { %v5602_v31 = vld [vmem:[#allocation4 + $0x38c] sm:$0xf0]  ;;  %v3858_v34 = vld [vmem:[#allocation4 + $0x60] sm:$0xf]  ;;  %v4131_v37 = vor.u32 %v5570_v29, %v4130_v28  ;;  %3804 = vmatmul.msk.bf16.vlgmr.msrb.gmra.mxu0 %vm245_vm0, %v6148_v26  ;;  %3805 = vmatmul.msk.bf16.vlgmr.msrb.gmra.mxu1 %vm245_vm0, %v6148_v26 }
  0x39   :  { %1932 = vmatpush.bf16.msra.mxu0 %v3891_v13  ;;  %1946 = vmatpush.bf16.msra.mxu1 %v4019_v16  ;;  %v5502_v35 = vld [vmem:[#allocation4 + $0x6c] sm:$0xf0]  ;;  %v3986_v36 = vld [vmem:[#allocation4 + $0x160] sm:$0xf]  ;;  %v4259_v39 = vor.u32 %v5602_v31, %v4258_v30 }
  0x3a   :  { %v5534_v38 = vld [vmem:[#allocation4 + $0x16c] sm:$0xf0]  ;;  %v4114_v40 = vld [vmem:[#allocation4 + $0x260] sm:$0xf]  ;;  %3806 = vmatmul.msk.bf16.vlgmr.msrb.gmra.mxu2 %vm245_vm0, %v6148_v26  ;;  %3807 = vmatmul.msk.bf16.vlgmr.msrb.gmra.mxu3 %vm245_vm0, %v6148_v26  ;;  %v3859_v44 = vor.u32 %v5502_v35, %v3858_v34 }
  0x3b   :  { %1960 = vmatpush.bf16.msra.mxu2 %v4147_v24  ;;  %1974 = vmatpush.bf16.msra.mxu3 %v4275_v27  ;;  %v5566_v41 = vld [vmem:[#allocation4 + $0x26c] sm:$0xf0]  ;;  %v4242_v42 = vld [vmem:[#allocation4 + $0x360] sm:$0xf]  ;;  %v3987_v45 = vor.u32 %v5534_v38, %v3986_v36 }
  0x3c   :  { %v5598_v43 = vld [vmem:[#allocation4 + $0x36c] sm:$0xf0]  ;;  %v3842_v46 = vld [vmem:[#allocation4 + $0x40] sm:$0xf]  ;;  %v4115_v49 = vor.u32 %v5566_v41, %v4114_v40 }
  0x3d   :  { %1933 = vmatpush.bf16.msra.mxu0 %v3875_v32  ;;  %1947 = vmatpush.bf16.msra.mxu1 %v4003_v33  ;;  %v5498_v47 = vld [vmem:[#allocation4 + $0x4c] sm:$0xf0]  ;;  %v3970_v48 = vld [vmem:[#allocation4 + $0x140] sm:$0xf]  ;;  %v4243_v51 = vor.u32 %v5598_v43, %v4242_v42 }
  0x3e   :  { %v5530_v50 = vld [vmem:[#allocation4 + $0x14c] sm:$0xf0]  ;;  %v4098_v52 = vld [vmem:[#allocation4 + $0x240] sm:$0xf]  ;;  %v3843_v56 = vor.u32 %v5498_v47, %v3842_v46 }
  0x3f   :  { %1961 = vmatpush.bf16.msra.mxu2 %v4131_v37  ;;  %1975 = vmatpush.bf16.msra.mxu3 %v4259_v39  ;;  %v5562_v53 = vld [vmem:[#allocation4 + $0x24c] sm:$0xf0]  ;;  %v4226_v54 = vld [vmem:[#allocation4 + $0x340] sm:$0xf]  ;;  %v3971_v26 = vor.u32 %v5530_v50, %v3970_v48 }
  0x40   :  { %v5594_v55 = vld [vmem:[#allocation4 + $0x34c] sm:$0xf0]  ;;  %v3826_v57 = vld [vmem:[#allocation4 + $0x20] sm:$0xf]  ;;  %v4099_v60 = vor.u32 %v5562_v53, %v4098_v52 }
  0x41   :  { %1934 = vmatpush.bf16.msra.mxu0 %v3859_v44  ;;  %1948 = vmatpush.bf16.msra.mxu1 %v3987_v45  ;;  %v5494_v58 = vld [vmem:[#allocation4 + $0x2c] sm:$0xf0]  ;;  %v3954_v59 = vld [vmem:[#allocation4 + $0x120] sm:$0xf]  ;;  %v4227_v62 = vor.u32 %v5594_v55, %v4226_v54 }
  0x42   :  { %v5526_v61 = vld [vmem:[#allocation4 + $0x12c] sm:$0xf0]  ;;  %v4082_v63 = vld [vmem:[#allocation4 + $0x220] sm:$0xf]  ;;  %v3827_v3 = vor.u32 %v5494_v58, %v3826_v57 }
  0x43   :  { %1962 = vmatpush.bf16.msra.mxu2 %v4115_v49  ;;  %1976 = vmatpush.bf16.msra.mxu3 %v4243_v51  ;;  %v5558_v0 = vld [vmem:[#allocation4 + $0x22c] sm:$0xf0]  ;;  %v4210_v1 = vld [vmem:[#allocation4 + $0x320] sm:$0xf]  ;;  %v3955_v6 = vor.u32 %v5526_v61, %v3954_v59 }
  0x44   :  { %v5590_v2 = vld [vmem:[#allocation4 + $0x32c] sm:$0xf0]  ;;  %v3810_v4 = vld [vmem:[#allocation4] sm:$0xf]  ;;  %v4083_v10 = vor.u32 %v5558_v0, %v4082_v63 }
  0x45   :  { %1935 = vmatpush.bf16.msra.mxu0 %v3843_v56  ;;  %v5490_v5 = vld [vmem:[#allocation4 + $0xc] sm:$0xf0]  ;;  %1949 = vmatpush.bf16.msra.mxu1 %v3971_v26  ;;  %v3938_v7 = vld [vmem:[#allocation4 + $0x100] sm:$0xf]  ;;  %v4211_v14 = vor.u32 %v5590_v2, %v4210_v1 }
  0x46   :  { %v5522_v8 = vld [vmem:[#allocation4 + $0x10c] sm:$0xf0]  ;;  %v4434_v9 = vld [vmem:[#allocation4 + $0x4e0] sm:$0xf]  ;;  %v3811_v18 = vor.u32 %v5490_v5, %v3810_v4 }
  0x47   :  { %1963 = vmatpush.bf16.msra.mxu2 %v4099_v60  ;;  %1977 = vmatpush.bf16.msra.mxu3 %v4227_v62  ;;  %v5646_v11 = vld [vmem:[#allocation4 + $0x4ec] sm:$0xf0]  ;;  %v4562_v12 = vld [vmem:[#allocation4 + $0x5e0] sm:$0xf]  ;;  %v3939_v22 = vor.u32 %v5522_v8, %v3938_v7 }
  0x48   :  { %v5678_v13 = vld [vmem:[#allocation4 + $0x5ec] sm:$0xf0]  ;;  %v4066_v15 = vld [vmem:[#allocation4 + $0x200] sm:$0xf]  ;;  %v4435_v23 = vor.u32 %v5646_v11, %v4434_v9 }
  0x49   :  { %v5554_v16 = vld [vmem:[#allocation4 + $0x20c] sm:$0xf0]  ;;  %v4194_v17 = vld [vmem:[#allocation4 + $0x300] sm:$0xf]  ;;  %1936 = vmatpush.bf16.msra.mxu0 %v3827_v3  ;;  %1950 = vmatpush.bf16.msra.mxu1 %v3955_v6  ;;  %v4563_v27 = vor.u32 %v5678_v13, %v4562_v12 }
  0x4a   :  { %v5586_v19 = vld [vmem:[#allocation4 + $0x30c] sm:$0xf0]  ;;  %v4690_v20 = vld [vmem:[#allocation4 + $0x6e0] sm:$0xf]  ;;  %v4067_v30 = vor.u32 %v5554_v16, %v4066_v15 }
  0x4b   :  { %v5710_v21 = vld [vmem:[#allocation4 + $0x6ec] sm:$0xf0]  ;;  %1964 = vmatpush.bf16.msra.mxu2 %v4083_v10  ;;  %v4818_v24 = vld [vmem:[#allocation4 + $0x7e0] sm:$0xf]  ;;  %1978 = vmatpush.bf16.msra.mxu3 %v4211_v14  ;;  %v4195_v33 = vor.u32 %v5586_v19, %v4194_v17 }
  0x4c   :  { %v5742_v25 = vld [vmem:[#allocation4 + $0x7ec] sm:$0xf0]  ;;  %v4418_v28 = vld [vmem:[#allocation4 + $0x4c0] sm:$0xf]  ;;  %v4691_v34 = vor.u32 %v5710_v21, %v4690_v20 }
  0x4d   :  { %v5642_v29 = vld [vmem:[#allocation4 + $0x4cc] sm:$0xf0]  ;;  %v4546_v31 = vld [vmem:[#allocation4 + $0x5c0] sm:$0xf]  ;;  %1937 = vmatpush.bf16.msra.mxu0 %v3811_v18  ;;  %v4819_v35 = vor.u32 %v5742_v25, %v4818_v24  ;;  %1951 = vmatpush.bf16.msra.mxu1 %v3939_v22 }
  0x4e   :  { %v5674_v32 = vld [vmem:[#allocation4 + $0x5cc] sm:$0xf0]  ;;  %v4674_v36 = vld [vmem:[#allocation4 + $0x6c0] sm:$0xf]  ;;  %v4419_v38 = vor.u32 %v5642_v29, %v4418_v28 }
  0x4f   :  { %v5706_v37 = vld [vmem:[#allocation4 + $0x6cc] sm:$0xf0]  ;;  %v4802_v39 = vld [vmem:[#allocation4 + $0x7c0] sm:$0xf]  ;;  %v4547_v41 = vor.u32 %v5674_v32, %v4546_v31  ;;  %1965 = vmatpush.bf16.msra.mxu2 %v4067_v30  ;;  %1979 = vmatpush.bf16.msra.mxu3 %v4195_v33 }
  0x50   :  { %v5738_v40 = vld [vmem:[#allocation4 + $0x7cc] sm:$0xf0]  ;;  %v4402_v42 = vld [vmem:[#allocation4 + $0x4a0] sm:$0xf]  ;;  %v4675_v46 = vor.u32 %v5706_v37, %v4674_v36 }
  0x51   :  { %1986 = vmatpush.bf16.msrb.mxu0 %v4435_v23  ;;  %2000 = vmatpush.bf16.msrb.mxu1 %v4563_v27  ;;  %v5638_v43 = vld [vmem:[#allocation4 + $0x4ac] sm:$0xf0]  ;;  %v4530_v44 = vld [vmem:[#allocation4 + $0x5a0] sm:$0xf]  ;;  %v4803_v47 = vor.u32 %v5738_v40, %v4802_v39 }
  0x52   :  { %v5670_v45 = vld [vmem:[#allocation4 + $0x5ac] sm:$0xf0]  ;;  %v4403_v48 = vor.u32 %v5638_v43, %v4402_v42  ;;  %v4386_v50 = vld [vmem:[#allocation4 + $0x480] sm:$0xf] }
  0x53   :  { %2014 = vmatpush.bf16.msrb.mxu2 %v4691_v34  ;;  %2028 = vmatpush.bf16.msrb.mxu3 %v4819_v35  ;;  %v4531_v49 = vor.u32 %v5670_v45, %v4530_v44  ;;  %v5634_v51 = vld [vmem:[#allocation4 + $0x48c] sm:$0xf0]  ;;  %v4514_v52 = vld [vmem:[#allocation4 + $0x580] sm:$0xf] }
  0x54   :  { %v5666_v53 = vld [vmem:[#allocation4 + $0x58c] sm:$0xf0]  ;;  %v4387_v54 = vor.u32 %v5634_v51, %v4386_v50  ;;  %v4658_v56 = vld [vmem:[#allocation4 + $0x6a0] sm:$0xf] }
  0x55   :  { %1987 = vmatpush.bf16.msrb.mxu0 %v4419_v38  ;;  %2001 = vmatpush.bf16.msrb.mxu1 %v4547_v41  ;;  %v4515_v55 = vor.u32 %v5666_v53, %v4514_v52  ;;  %v5702_v26 = vld [vmem:[#allocation4 + $0x6ac] sm:$0xf0]  ;;  %v4786_v57 = vld [vmem:[#allocation4 + $0x7a0] sm:$0xf] }
  0x56   :  { %v4659_v58 = vor.u32 %v5702_v26, %v4658_v56  ;;  %v5734_v59 = vld [vmem:[#allocation4 + $0x7ac] sm:$0xf0]  ;;  %v4370_v61 = vld [vmem:[#allocation4 + $0x460] sm:$0xf] }
  0x57   :  { %2015 = vmatpush.bf16.msrb.mxu2 %v4675_v46  ;;  %2029 = vmatpush.bf16.msrb.mxu3 %v4803_v47  ;;  %v4787_v60 = vor.u32 %v5734_v59, %v4786_v57  ;;  %v5630_v62 = vld [vmem:[#allocation4 + $0x46c] sm:$0xf0]  ;;  %v4498_v63 = vld [vmem:[#allocation4 + $0x560] sm:$0xf] }
  0x58   :  { %v4371_v0 = vor.u32 %v5630_v62, %v4370_v61  ;;  %v5662_v1 = vld [vmem:[#allocation4 + $0x56c] sm:$0xf0]  ;;  %v4642_v3 = vld [vmem:[#allocation4 + $0x680] sm:$0xf] }
  0x59   :  { %1988 = vmatpush.bf16.msrb.mxu0 %v4403_v48  ;;  %2002 = vmatpush.bf16.msrb.mxu1 %v4531_v49  ;;  %v4499_v2 = vor.u32 %v5662_v1, %v4498_v63  ;;  %v5698_v4 = vld [vmem:[#allocation4 + $0x68c] sm:$0xf0]  ;;  %v4770_v6 = vld [vmem:[#allocation4 + $0x780] sm:$0xf] }
  0x5a   :  { %v4643_v5 = vor.u32 %v5698_v4, %v4642_v3  ;;  %v5730_v7 = vld [vmem:[#allocation4 + $0x78c] sm:$0xf0]  ;;  %v4354_v9 = vld [vmem:[#allocation4 + $0x440] sm:$0xf]  ;;  %v3924_v3 = vld [vmem:[#allocation4 + $0xf0] sm:$0xf0] }
  0x5b   :  { %2016 = vmatpush.bf16.msrb.mxu2 %v4659_v58  ;;  %2030 = vmatpush.bf16.msrb.mxu3 %v4787_v60  ;;  %v4771_v8 = vor.u32 %v5730_v7, %v4770_v6  ;;  %v5626_v10 = vld [vmem:[#allocation4 + $0x44c] sm:$0xf0]  ;;  %v4482_v11 = vld [vmem:[#allocation4 + $0x540] sm:$0xf]  ;;  %v5548_v7 = vld [vmem:[#allocation4 + $0x1e4] sm:$0xf] }
  0x5c   :  { %v4355_v12 = vor.u32 %v5626_v10, %v4354_v9  ;;  %v5658_v13 = vld [vmem:[#allocation4 + $0x54c] sm:$0xf0]  ;;  %v4626_v15 = vld [vmem:[#allocation4 + $0x660] sm:$0xf] }
  0x5d   :  { %1989 = vmatpush.bf16.msrb.mxu0 %v4387_v54  ;;  %2003 = vmatpush.bf16.msrb.mxu1 %v4515_v55  ;;  %v4483_v14 = vor.u32 %v5658_v13, %v4482_v11  ;;  %v5694_v16 = vld [vmem:[#allocation4 + $0x66c] sm:$0xf0]  ;;  %v4754_v17 = vld [vmem:[#allocation4 + $0x760] sm:$0xf] }
  0x5e   :  { %v4627_v18 = vor.u32 %v5694_v16, %v4626_v15  ;;  %v5726_v19 = vld [vmem:[#allocation4 + $0x76c] sm:$0xf0]  ;;  %v4338_v21 = vld [vmem:[#allocation4 + $0x420] sm:$0xf]  ;;  %v5512_v15 = vld [vmem:[#allocation4 + $0xc4] sm:$0xf] }
  0x5f   :  { %2017 = vmatpush.bf16.msrb.mxu2 %v4643_v5  ;;  %2031 = vmatpush.bf16.msrb.mxu3 %v4771_v8  ;;  %v4755_v20 = vor.u32 %v5726_v19, %v4754_v17  ;;  %v5622_v22 = vld [vmem:[#allocation4 + $0x42c] sm:$0xf0]  ;;  %v4466_v24 = vld [vmem:[#allocation4 + $0x520] sm:$0xf]  ;;  %v4052_v8 = vld [vmem:[#allocation4 + $0x1f0] sm:$0xf0] }
  0x60   :  { %v4339_v23 = vor.u32 %v5622_v22, %v4338_v21  ;;  %v5654_v25 = vld [vmem:[#allocation4 + $0x52c] sm:$0xf0]  ;;  %v4610_v28 = vld [vmem:[#allocation4 + $0x640] sm:$0xf]  ;;  %v3908_v16 = vld [vmem:[#allocation4 + $0xd0] sm:$0xf0] }
  0x61   :  { %1990 = vmatpush.bf16.msrb.mxu0 %v4371_v0  ;;  %2004 = vmatpush.bf16.msrb.mxu1 %v4499_v2  ;;  %v4467_v27 = vor.u32 %v5654_v25, %v4466_v24  ;;  %v5690_v29 = vld [vmem:[#allocation4 + $0x64c] sm:$0xf0]  ;;  %v4738_v30 = vld [vmem:[#allocation4 + $0x740] sm:$0xf]  ;;  %v5516_v2 = vld [vmem:[#allocation4 + $0xe4] sm:$0xf] }
  0x62   :  { %v4611_v31 = vor.u32 %v5690_v29, %v4610_v28  ;;  %v5722_v32 = vld [vmem:[#allocation4 + $0x74c] sm:$0xf0]  ;;  %v4322_v34 = vld [vmem:[#allocation4 + $0x400] sm:$0xf]  ;;  %v5544_v19 = vld [vmem:[#allocation4 + $0x1c4] sm:$0xf] }
  0x63   :  { %2018 = vmatpush.bf16.msrb.mxu2 %v4627_v18  ;;  %2032 = vmatpush.bf16.msrb.mxu3 %v4755_v20  ;;  %v4739_v33 = vor.u32 %v5722_v32, %v4738_v30  ;;  %v5618_v35 = vld [vmem:[#allocation4 + $0x40c] sm:$0xf0]  ;;  %v4450_v36 = vld [vmem:[#allocation4 + $0x500] sm:$0xf]  ;;  %v4036_v20 = vld [vmem:[#allocation4 + $0x1d0] sm:$0xf0]  ;;  %v3911_v30 = vor.u32 %v5512_v15, %v3908_v16 }
  0x64   :  { %v4323_v37 = vor.u32 %v5618_v35, %v4322_v34  ;;  %v5650_v38 = vld [vmem:[#allocation4 + $0x50c] sm:$0xf0]  ;;  %v4594_v40 = vld [vmem:[#allocation4 + $0x620] sm:$0xf]  ;;  %v5612_v32 = vld [vmem:[#allocation4 + $0x3e4] sm:$0xf]  ;;  %v4039_v35 = vor.u32 %v5544_v19, %v4036_v20 }
  0x65   :  { %1991 = vmatpush.bf16.msrb.mxu0 %v4355_v12  ;;  %2005 = vmatpush.bf16.msrb.mxu1 %v4483_v14  ;;  %v4451_v39 = vor.u32 %v5650_v38, %v4450_v36  ;;  %v5686_v41 = vld [vmem:[#allocation4 + $0x62c] sm:$0xf0]  ;;  %v4722_v42 = vld [vmem:[#allocation4 + $0x720] sm:$0xf]  ;;  %v3927_v12 = vor.u32 %v5516_v2, %v3924_v3  ;;  %v4055_v14 = vor.u32 %v5548_v7, %v4052_v8  ;;  %v4308_v36 = vld [vmem:[#allocation4 + $0x3f0] sm:$0xf0] }
  0x66   :  { %v5718_v43 = vld [vmem:[#allocation4 + $0x72c] sm:$0xf0]  ;;  %v4595_v44 = vor.u32 %v5686_v41, %v4594_v40  ;;  %v4578_v46 = vld [vmem:[#allocation4 + $0x600] sm:$0xf]  ;;  %v3892_v38 = vld [vmem:[#allocation4 + $0xb0] sm:$0xf0] }
  0x67   :  { %2019 = vmatpush.bf16.msrb.mxu2 %v4611_v31  ;;  %2033 = vmatpush.bf16.msrb.mxu3 %v4739_v33  ;;  %v4723_v45 = vor.u32 %v5718_v43, %v4722_v42  ;;  %v5682_v47 = vld [vmem:[#allocation4 + $0x60c] sm:$0xf0]  ;;  %v4706_v49 = vld [vmem:[#allocation4 + $0x700] sm:$0xf]  ;;  %v4180_v31 = vld [vmem:[#allocation4 + $0x2f0] sm:$0xf0] }
  0x68   :  { %v4579_v48 = vor.u32 %v5682_v47, %v4578_v46  ;;  %v5714_v50 = vld [vmem:[#allocation4 + $0x70c] sm:$0xf0]  ;;  %v5540_v41 = vld [vmem:[#allocation4 + $0x1a4] sm:$0xf]  ;;  %v4020_v42 = vld [vmem:[#allocation4 + $0x1b0] sm:$0xf0]  ;;  %v4311_v47 = vor.u32 %v5612_v32, %v4308_v36 }
  0x69   :  { %1992 = vmatpush.bf16.msrb.mxu0 %v4339_v23  ;;  %2006 = vmatpush.bf16.msrb.mxu1 %v4467_v27  ;;  %v4707_v51 = vor.u32 %v5714_v50, %v4706_v49  ;;  %v119_v52 = vld [vmem:[#allocation10] ss:$8 sm:$0xf]  ;;  %v5580_v23 = vld [vmem:[#allocation4 + $0x2e4] sm:$0xf] }
  0x6a   :  { %v120_v53 = vld [vmem:[#allocation10] ss:$8 sm:$0xf0]  ;;  %v5576_v49 = vld [vmem:[#allocation4 + $0x2c4] sm:$0xf] }
  0x6b   :  { %2020 = vmatpush.bf16.msrb.mxu2 %v4595_v44  ;;  %2034 = vmatpush.bf16.msrb.mxu3 %v4723_v45  ;;  %v6166_v54 = vor.u32 %v120_v53, %v119_v52  ;;  %v4183_v45 = vor.u32 %v5580_v23, %v4180_v31  ;;  %v4164_v50 = vld [vmem:[#allocation4 + $0x2d0] sm:$0xf0]  ;;  %v5532_v19 = vld [vmem:[#allocation4 + $0x164] sm:$0xf] }
  0x6c   :  { %v4276_v7 = vld [vmem:[#allocation4 + $0x3b0] sm:$0xf0] }
  0x6d   :  { %1993 = vmatpush.bf16.msrb.mxu0 %v4323_v37  ;;  %2007 = vmatpush.bf16.msrb.mxu1 %v4451_v39  ;;  %v149_v56 = vperm.slane %v6166_v54, 0  ;;  %v150_v57 = vperm.slane %v6166_v54, 1  ;;  %v151_v5 = vperm.slane %v6166_v54, 2  ;;  %v152_v9 = vperm.slane %v6166_v54, 3  ;;  %v5508_v37 = vld [vmem:[#allocation4 + $0xa4] sm:$0xf] }
  0x6e   :  { %v153_v27 = vperm.slane %v6166_v54, 4  ;;  %v154_v29 = vperm.slane %v6166_v54, 5  ;;  %v3860_v15 = vld [vmem:[#allocation4 + $0x70] sm:$0xf0] }
  0x6f   :  { %2021 = vmatpush.bf16.msrb.mxu2 %v4579_v48  ;;  %2035 = vmatpush.bf16.msrb.mxu3 %v4707_v51  ;;  %v3895_v48 = vor.u32 %v5508_v37, %v3892_v38  ;;  %v5608_v51 = vld [vmem:[#allocation4 + $0x3c4] sm:$0xf]  ;;  %v3988_v20 = vld [vmem:[#allocation4 + $0x170] sm:$0xf0] }
  0x70   :  { %v3991_v32 = vor.u32 %v5532_v19, %v3988_v20  ;;  %v3844_v36 = vld [vmem:[#allocation4 + $0x50] sm:$0xf0]  ;;  %v5528_v37 = vld [vmem:[#allocation4 + $0x144] sm:$0xf] }
  0x71   :  { %v3972_v38 = vld [vmem:[#allocation4 + $0x150] sm:$0xf0]  ;;  %v5556_v19 = vld [vmem:[#allocation4 + $0x224] sm:$0xf] }
  0x72   :  { %v4084_v20 = vld [vmem:[#allocation4 + $0x230] sm:$0xf0] }
  0xa5   :  { %v258_v55 = vpop.f32.mrf.mxu0  ;;  %v272_v26 = vpop.f32.mrf.mxu1 }
  0xa6   :  { %v259_v58 = vadd.f32 %v258_v55, %v149_v56  ;;  %v273_v59 = vadd.f32 %v272_v26, %v150_v57  ;;  %v4023_v55 = vor.u32 %v5540_v41, %v4020_v42  ;;  %v5504_v26 = vld [vmem:[#allocation4 + $0x84] sm:$0xf]  ;;  %v4116_v42 = vld [vmem:[#allocation4 + $0x270] sm:$0xf0] }
  0xa7   :  { %v5564_v41 = vld [vmem:[#allocation4 + $0x264] sm:$0xf] }
  0xa8   :  { %v361_v63 = vmax.f32 %v259_v58, 0.0  ;;  %v362_v4 = vmax.f32 %v273_v59, 0.0  ;;  %v5536_v59 = vld [vmem:[#allocation4 + $0x184] sm:$0xf] }
  0xad   :  { %v286_v60 = vpop.f32.mrf.mxu2  ;;  %v300_v61 = vpop.f32.mrf.mxu3 }
  0xae   :  { %v260_v62 = vpop.f32.mrf.mxu0  ;;  %v274_v1 = vpop.f32.mrf.mxu1  ;;  %v287_v17 = vadd.f32 %v286_v60, %v151_v5  ;;  %v301_v21 = vadd.f32 %v300_v61, %v152_v9  ;;  %v4004_v60 = vld [vmem:[#allocation4 + $0x190] sm:$0xf0]  ;;  %v155_v61 = vperm.slane %v6166_v54, 6 }
  0xaf   :  { %v261_v0 = vadd.f32 %v260_v62, %v149_v56  ;;  %v275_v6 = vadd.f32 %v274_v1, %v150_v57  ;;  %v4292_v56 = vld [vmem:[#allocation4 + $0x3d0] sm:$0xf0] }
  0xb0   :  { %v363_v39 = vmax.f32 %v287_v17, 0.0  ;;  %v364_v43 = vmax.f32 %v301_v21, 0.0  ;;  %v3876_v57 = vld [vmem:[#allocation4 + $0x90] sm:$0xf0]  ;;  %v4295_v3 = vor.u32 %v5608_v51, %v4292_v56  ;;  %v5492_v56 = vld [vmem:[#allocation4 + $0x24] sm:$0xf] }
  0xb1   :  { %v369_v10 = vmax.f32 %v261_v0, 0.0  ;;  %v370_v11 = vmax.f32 %v275_v6, 0.0  ;;  %v5572_v0 = vld [vmem:[#allocation4 + $0x2a4] sm:$0xf] }
  0xb2   :  { %v5604_v6 = vld [vmem:[#allocation4 + $0x3a4] sm:$0xf] }
  0xb3   :  { %v6172_v13 = vpack.c.bf16 %v369_v10, %v361_v63  ;;  %v6174_v18 = vpack.c.bf16 %v370_v11, %v362_v4  ;;  %v4167_v63 = vor.u32 %v5576_v49, %v4164_v50  ;;  %v3879_v4 = vor.u32 %v5504_v26, %v3876_v57  ;;  %v4244_v49 = vld [vmem:[#allocation4 + $0x370] sm:$0xf0] }
  0xb4   :  { %v3828_v26 = vld [vmem:[#allocation4 + $0x30] sm:$0xf0] }
  0xb5   :  { %v288_v22 = vpop.f32.mrf.mxu2  ;;  %1938 = vmatmul.bf16.vlgmr.msra.gmra.mxu0 %v6172_v13  ;;  %v302_v25 = vpop.f32.mrf.mxu3  ;;  %1952 = vmatmul.bf16.vlgmr.msra.gmra.mxu1 %v6174_v18 }
  0xb6   :  { %v289_v24 = vadd.f32 %v288_v22, %v151_v5  ;;  %2042 = vmatpush.bf16.msra.mxu0 %v3927_v12  ;;  %v314_v28 = vpop.f32.mrf.mxu0  ;;  %v303_v33 = vadd.f32 %v302_v25, %v152_v9  ;;  %2056 = vmatpush.bf16.msra.mxu1 %v4055_v14  ;;  %v328_v34 = vpop.f32.mrf.mxu1  ;;  %v4148_v5 = vld [vmem:[#allocation4 + $0x2b0] sm:$0xf0]  ;;  %v156_v9 = vperm.slane %v6166_v54, 7  ;;  %v4007_v12 = vor.u32 %v5536_v59, %v4004_v60  ;;  %v5500_v14 = vld [vmem:[#allocation4 + $0x64] sm:$0xf] }
  0xb7   :  { %v315_v53 = vadd.f32 %v314_v28, %v153_v27  ;;  %v329_v58 = vadd.f32 %v328_v34, %v154_v29  ;;  %v4151_v22 = vor.u32 %v5572_v0, %v4148_v5  ;;  %v4279_v25 = vor.u32 %v5604_v6, %v4276_v7  ;;  %v5568_v28 = vld [vmem:[#allocation4 + $0x284] sm:$0xf]  ;;  %v4132_v54 = vld [vmem:[#allocation4 + $0x290] sm:$0xf0] }
  0xb8   :  { %v371_v40 = vmax.f32 %v289_v24, 0.0  ;;  %v372_v44 = vmax.f32 %v303_v33, 0.0  ;;  %v3863_v31 = vor.u32 %v5500_v14, %v3860_v15  ;;  %v5600_v33 = vld [vmem:[#allocation4 + $0x384] sm:$0xf]  ;;  %v3956_v59 = vld [vmem:[#allocation4 + $0x130] sm:$0xf0] }
  0xb9   :  { %v365_v8 = vmax.f32 %v315_v53, 0.0  ;;  %v366_v16 = vmax.f32 %v329_v58, 0.0  ;;  %v5496_v34 = vld [vmem:[#allocation4 + $0x44] sm:$0xf]  ;;  %v4228_v6 = vld [vmem:[#allocation4 + $0x350] sm:$0xf0] }
  0xba   :  { %v6180_v46 = vpack.c.bf16 %v371_v40, %v363_v39  ;;  %2043 = vmatpush.bf16.msra.mxu0 %v3911_v30  ;;  %v6182_v52 = vpack.c.bf16 %v372_v44, %v364_v43  ;;  %2057 = vmatpush.bf16.msra.mxu1 %v4039_v35  ;;  %v4135_v40 = vor.u32 %v5568_v28, %v4132_v54  ;;  %v5524_v58 = vld [vmem:[#allocation4 + $0x124] sm:$0xf]  ;;  %v4436_v14 = vld [vmem:[#allocation4 + $0x4f0] sm:$0xf0] }
  0xbb   :  { %v3847_v53 = vor.u32 %v5496_v34, %v3844_v36  ;;  %v5560_v0 = vld [vmem:[#allocation4 + $0x244] sm:$0xf]  ;;  %v3959_v5 = vor.u32 %v5524_v58, %v3956_v59  ;;  %v4068_v36 = vld [vmem:[#allocation4 + $0x210] sm:$0xf0] }
  0xbc   :  { %1966 = vmatmul.bf16.vlgmr.msra.gmra.mxu2 %v6180_v46  ;;  %1980 = vmatmul.bf16.vlgmr.msra.gmra.mxu3 %v6182_v52  ;;  %v5488_v7 = vld [vmem:[#allocation4 + $0x4] sm:$0xf] }
  0xbd   :  { %2070 = vmatpush.bf16.msra.mxu2 %v4183_v45  ;;  %v342_v62 = vpop.f32.mrf.mxu2  ;;  %2084 = vmatpush.bf16.msra.mxu3 %v4311_v47  ;;  %v356_v1 = vpop.f32.mrf.mxu3  ;;  %v5676_v15 = vld [vmem:[#allocation4 + $0x5e4] sm:$0xf] }
  0xbe   :  { %2044 = vmatpush.bf16.msra.mxu0 %v3895_v48  ;;  %v316_v2 = vpop.f32.mrf.mxu0  ;;  %2058 = vmatpush.bf16.msra.mxu1 %v4023_v55  ;;  %v330_v11 = vpop.f32.mrf.mxu1  ;;  %v343_v23 = vadd.f32 %v342_v62, %v155_v61  ;;  %v357_v30 = vadd.f32 %v356_v1, %v156_v9  ;;  %v5596_v48 = vld [vmem:[#allocation4 + $0x364] sm:$0xf]  ;;  %v3975_v55 = vor.u32 %v5528_v37, %v3972_v38  ;;  %v4100_v1 = vld [vmem:[#allocation4 + $0x250] sm:$0xf0] }
  0xbf   :  { %v317_v10 = vadd.f32 %v316_v2, %v153_v27  ;;  %v331_v17 = vadd.f32 %v330_v11, %v154_v29  ;;  %v4260_v29 = vld [vmem:[#allocation4 + $0x390] sm:$0xf0]  ;;  %v5592_v2 = vld [vmem:[#allocation4 + $0x344] sm:$0xf] }
  0xc0   :  { %v367_v43 = vmax.f32 %v343_v23, 0.0  ;;  %v4263_v47 = vor.u32 %v5600_v33, %v4260_v29  ;;  %v368_v50 = vmax.f32 %v357_v30, 0.0  ;;  %v5644_v11 = vld [vmem:[#allocation4 + $0x4e4] sm:$0xf]  ;;  %v4087_v30 = vor.u32 %v5556_v19, %v4084_v20  ;;  %v4548_v33 = vld [vmem:[#allocation4 + $0x5d0] sm:$0xf0] }
  0xc1   :  { %v373_v21 = vmax.f32 %v317_v10, 0.0  ;;  %2071 = vmatpush.bf16.msra.mxu2 %v4167_v63  ;;  %v374_v24 = vmax.f32 %v331_v17, 0.0  ;;  %2085 = vmatpush.bf16.msra.mxu3 %v4295_v3  ;;  %v4247_v63 = vor.u32 %v5596_v48, %v4244_v49  ;;  %v3940_v10 = vld [vmem:[#allocation4 + $0x110] sm:$0xf0]  ;;  %v4231_v17 = vor.u32 %v5592_v2, %v4228_v6  ;;  %v5588_v23 = vld [vmem:[#allocation4 + $0x324] sm:$0xf] }
  0xc2   :  { %2045 = vmatpush.bf16.msra.mxu0 %v3879_v4  ;;  %2059 = vmatpush.bf16.msra.mxu1 %v4007_v12  ;;  %v3831_v4 = vor.u32 %v5492_v56, %v3828_v26  ;;  %v4103_v12 = vor.u32 %v5560_v0, %v4100_v1  ;;  %v5640_v54 = vld [vmem:[#allocation4 + $0x4c4] sm:$0xf]  ;;  %v4196_v38 = vld [vmem:[#allocation4 + $0x310] sm:$0xf0] }
  0xc3   :  { %v6188_v27 = vpack.c.bf16 %v373_v21, %v365_v8  ;;  %v6190_v35 = vpack.c.bf16 %v374_v24, %v366_v16  ;;  %v3812_v8 = vld [vmem:[#allocation4 + $0x10] sm:$0xf0]  ;;  %v5552_v34 = vld [vmem:[#allocation4 + $0x204] sm:$0xf] }
  0xc4   :  { %v4564_v16 = vld [vmem:[#allocation4 + $0x5f0] sm:$0xf0]  ;;  %v3815_v21 = vor.u32 %v5488_v7, %v3812_v8  ;;  %v5584_v37 = vld [vmem:[#allocation4 + $0x304] sm:$0xf] }
  0xc5   :  { %2072 = vmatpush.bf16.msra.mxu2 %v4151_v22  ;;  %v344_v39 = vpop.f32.mrf.mxu2  ;;  %1994 = vmatmul.bf16.vlgmr.msrb.gmra.mxu0 %v6188_v27  ;;  %v358_v45 = vpop.f32.mrf.mxu3  ;;  %v4212_v24 = vld [vmem:[#allocation4 + $0x330] sm:$0xf0]  ;;  %v4567_v28 = vor.u32 %v5676_v15, %v4564_v16  ;;  %v5668_v49 = vld [vmem:[#allocation4 + $0x5a4] sm:$0xf] }
  0xc6   :  { %2086 = vmatpush.bf16.msra.mxu3 %v4279_v25  ;;  %v345_v44 = vadd.f32 %v344_v39, %v155_v61  ;;  %2008 = vmatmul.bf16.vlgmr.msrb.gmra.mxu1 %v6190_v35  ;;  %v359_v51 = vadd.f32 %v358_v45, %v156_v9  ;;  %v4119_v61 = vor.u32 %v5564_v41, %v4116_v42  ;;  %v5520_v9 = vld [vmem:[#allocation4 + $0x104] sm:$0xf]  ;;  %v4404_v48 = vld [vmem:[#allocation4 + $0x4b0] sm:$0xf0] }
  0xc7   :  { %2046 = vmatpush.bf16.msra.mxu0 %v3863_v31  ;;  %2060 = vmatpush.bf16.msra.mxu1 %v3991_v32  ;;  %v3943_v22 = vor.u32 %v5520_v9, %v3940_v10  ;;  %v4439_v25 = vor.u32 %v5644_v11, %v4436_v14  ;;  %v4420_v31 = vld [vmem:[#allocation4 + $0x4d0] sm:$0xf0]  ;;  %v5672_v32 = vld [vmem:[#allocation4 + $0x5c4] sm:$0xf]  ;;  %v4215_v29 = vor.u32 %v5588_v23, %v4212_v24 }
  0xc8   :  { %v375_v57 = vmax.f32 %v345_v44, 0.0  ;;  %v376_v60 = vmax.f32 %v359_v51, 0.0  ;;  %v5708_v39 = vld [vmem:[#allocation4 + $0x6e4] sm:$0xf]  ;;  %v4423_v41 = vor.u32 %v5640_v54, %v4420_v31  ;;  %v4551_v42 = vor.u32 %v5672_v32, %v4548_v33  ;;  %v4820_v44 = vld [vmem:[#allocation4 + $0x7f0] sm:$0xf0] }
  0xc9   :  { %2073 = vmatpush.bf16.msra.mxu2 %v4135_v40  ;;  %v4692_v40 = vld [vmem:[#allocation4 + $0x6f0] sm:$0xf0]  ;;  %v5636_v45 = vld [vmem:[#allocation4 + $0x4a4] sm:$0xf]  ;;  %v4199_v51 = vor.u32 %v5584_v37, %v4196_v38 }
  0xca   :  { %v6194_v62 = vpack.c.bf16 %v375_v57, %v367_v43  ;;  %2087 = vmatpush.bf16.msra.mxu3 %v4263_v47  ;;  %v6196_v3 = vpack.c.bf16 %v376_v60, %v368_v50  ;;  %v5740_v43 = vld [vmem:[#allocation4 + $0x7e4] sm:$0xf]  ;;  %v4071_v47 = vor.u32 %v5552_v34, %v4068_v36  ;;  %v4532_v50 = vld [vmem:[#allocation4 + $0x5b0] sm:$0xf0]  ;;  %v4407_v57 = vor.u32 %v5636_v45, %v4404_v48 }
  0xcb   :  { %2047 = vmatpush.bf16.msra.mxu0 %v3847_v53  ;;  %2061 = vmatpush.bf16.msra.mxu1 %v3975_v55  ;;  %v4695_v53 = vor.u32 %v5708_v39, %v4692_v40  ;;  %v4823_v55 = vor.u32 %v5740_v43, %v4820_v44  ;;  %v5704_v56 = vld [vmem:[#allocation4 + $0x6c4] sm:$0xf]  ;;  %v4676_v26 = vld [vmem:[#allocation4 + $0x6d0] sm:$0xf0]  ;;  %v4535_v58 = vor.u32 %v5668_v49, %v4532_v50 }
  0xcc   :  { %2022 = vmatmul.bf16.vlgmr.msrb.gmra.mxu2 %v6194_v62  ;;  %2036 = vmatmul.bf16.vlgmr.msrb.gmra.mxu3 %v6196_v3  ;;  %v5736_v59 = vld [vmem:[#allocation4 + $0x7c4] sm:$0xf]  ;;  %v4804_v60 = vld [vmem:[#allocation4 + $0x7d0] sm:$0xf0]  ;;  %v4679_v2 = vor.u32 %v5704_v56, %v4676_v26 }
  0xcd   :  { %2074 = vmatpush.bf16.msra.mxu2 %v4119_v61  ;;  %v5632_v61 = vld [vmem:[#allocation4 + $0x484] sm:$0xf]  ;;  %v4516_v1 = vld [vmem:[#allocation4 + $0x590] sm:$0xf0] }
  0xce   :  { %2088 = vmatpush.bf16.msra.mxu3 %v4247_v63  ;;  %v4388_v63 = vld [vmem:[#allocation4 + $0x490] sm:$0xf0]  ;;  %v5664_v0 = vld [vmem:[#allocation4 + $0x584] sm:$0xf] }
  0xcf   :  { %2048 = vmatpush.bf16.msra.mxu0 %v3831_v4  ;;  %2062 = vmatpush.bf16.msra.mxu1 %v3959_v5  ;;  %v4807_v4 = vor.u32 %v5736_v59, %v4804_v60  ;;  %v5700_v5 = vld [vmem:[#allocation4 + $0x6a4] sm:$0xf]  ;;  %v4660_v6 = vld [vmem:[#allocation4 + $0x6b0] sm:$0xf0]  ;;  %v4391_v7 = vor.u32 %v5632_v61, %v4388_v63  ;;  %v4519_v8 = vor.u32 %v5664_v0, %v4516_v1  ;;  %v5519_v59 = vld [vmem:[#allocation4 + $0xf4] sm:$0xf0] }
  0xd0   :  { %v5732_v9 = vld [vmem:[#allocation4 + $0x7a4] sm:$0xf]  ;;  %v4788_v10 = vld [vmem:[#allocation4 + $0x7b0] sm:$0xf0]  ;;  %v4663_v16 = vor.u32 %v5700_v5, %v4660_v6  ;;  %v4058_v60 = vld [vmem:[#allocation4 + $0x1e8] sm:$0xf] }
  0xd1   :  { %2075 = vmatpush.bf16.msra.mxu2 %v4103_v12  ;;  %v5628_v11 = vld [vmem:[#allocation4 + $0x464] sm:$0xf]  ;;  %v4372_v12 = vld [vmem:[#allocation4 + $0x470] sm:$0xf0]  ;;  %v5551_v61 = vld [vmem:[#allocation4 + $0x1f4] sm:$0xf0] }
  0xd2   :  { %2089 = vmatpush.bf16.msra.mxu3 %v4231_v17  ;;  %v5660_v14 = vld [vmem:[#allocation4 + $0x564] sm:$0xf]  ;;  %v4500_v15 = vld [vmem:[#allocation4 + $0x570] sm:$0xf0]  ;;  %v4791_v17 = vor.u32 %v5732_v9, %v4788_v10  ;;  %v3914_v9 = vld [vmem:[#allocation4 + $0xc8] sm:$0xf] }
  0xd3   :  { %2049 = vmatpush.bf16.msra.mxu0 %v3815_v21  ;;  %2063 = vmatpush.bf16.msra.mxu1 %v3943_v22  ;;  %v5696_v19 = vld [vmem:[#allocation4 + $0x684] sm:$0xf]  ;;  %v4644_v20 = vld [vmem:[#allocation4 + $0x690] sm:$0xf0]  ;;  %v4375_v21 = vor.u32 %v5628_v11, %v4372_v12  ;;  %v4503_v22 = vor.u32 %v5660_v14, %v4500_v15  ;;  %v5515_v11 = vld [vmem:[#allocation4 + $0xd4] sm:$0xf0] }
  0xd4   :  { %v5728_v23 = vld [vmem:[#allocation4 + $0x784] sm:$0xf]  ;;  %v4772_v24 = vld [vmem:[#allocation4 + $0x790] sm:$0xf0]  ;;  %v4647_v31 = vor.u32 %v5696_v19, %v4644_v20  ;;  %v4042_v12 = vld [vmem:[#allocation4 + $0x1c8] sm:$0xf] }
  0xd5   :  { %2076 = vmatpush.bf16.msra.mxu2 %v4087_v30  ;;  %v5656_v54 = vld [vmem:[#allocation4 + $0x544] sm:$0xf]  ;;  %v4484_v30 = vld [vmem:[#allocation4 + $0x550] sm:$0xf0]  ;;  %v4775_v32 = vor.u32 %v5728_v23, %v4772_v24  ;;  %v5547_v14 = vld [vmem:[#allocation4 + $0x1d4] sm:$0xf0]  ;;  %v3915_v23 = vor.u32 %v5515_v11, %v3914_v9 }
  0xd6   :  { %2090 = vmatpush.bf16.msra.mxu3 %v4215_v29  ;;  %2050 = vmatmul.bf16.vlgmr.msra.gmra.mxu0 %v6172_v13  ;;  %v5692_v33 = vld [vmem:[#allocation4 + $0x664] sm:$0xf]  ;;  %v4628_v29 = vld [vmem:[#allocation4 + $0x670] sm:$0xf0]  ;;  %v4487_v36 = vor.u32 %v5656_v54, %v4484_v30  ;;  %v4043_v24 = vor.u32 %v5547_v14, %v4042_v12  ;;  %v3898_v30 = vld [vmem:[#allocation4 + $0xa8] sm:$0xf] }
  0xd7   :  { %2098 = vmatpush.bf16.msrb.mxu0 %v4439_v25  ;;  %2112 = vmatpush.bf16.msrb.mxu1 %v4567_v28  ;;  %v5624_v25 = vld [vmem:[#allocation4 + $0x444] sm:$0xf]  ;;  %v4356_v28 = vld [vmem:[#allocation4 + $0x450] sm:$0xf0]  ;;  %v4631_v43 = vor.u32 %v5692_v33, %v4628_v29  ;;  %v4026_v29 = vld [vmem:[#allocation4 + $0x1a8] sm:$0xf] }
  0xd8   :  { %2064 = vmatmul.bf16.vlgmr.msra.gmra.mxu1 %v6174_v18  ;;  %v4359_v34 = vor.u32 %v5624_v25, %v4356_v28  ;;  %v5724_v37 = vld [vmem:[#allocation4 + $0x764] sm:$0xf]  ;;  %v4756_v38 = vld [vmem:[#allocation4 + $0x770] sm:$0xf0]  ;;  %v4314_v25 = vld [vmem:[#allocation4 + $0x3e8] sm:$0xf] }
  0xd9   :  { %2077 = vmatpush.bf16.msra.mxu2 %v4071_v47  ;;  %v5620_v39 = vld [vmem:[#allocation4 + $0x424] sm:$0xf]  ;;  %v4340_v40 = vld [vmem:[#allocation4 + $0x430] sm:$0xf0]  ;;  %v4759_v44 = vor.u32 %v5724_v37, %v4756_v38  ;;  %v5615_v28 = vld [vmem:[#allocation4 + $0x3f4] sm:$0xf0] }
  0xda   :  { %2091 = vmatpush.bf16.msra.mxu3 %v4199_v51  ;;  %v5688_v45 = vld [vmem:[#allocation4 + $0x644] sm:$0xf]  ;;  %v4612_v47 = vld [vmem:[#allocation4 + $0x650] sm:$0xf0]  ;;  %v4343_v49 = vor.u32 %v5620_v39, %v4340_v40  ;;  %v4170_v37 = vld [vmem:[#allocation4 + $0x2c8] sm:$0xf] }
  0xdb   :  { %2099 = vmatpush.bf16.msrb.mxu0 %v4423_v41  ;;  %2113 = vmatpush.bf16.msrb.mxu1 %v4551_v42  ;;  %v5652_v41 = vld [vmem:[#allocation4 + $0x524] sm:$0xf]  ;;  %v4468_v42 = vld [vmem:[#allocation4 + $0x530] sm:$0xf0]  ;;  %v5579_v38 = vld [vmem:[#allocation4 + $0x2d4] sm:$0xf0] }
  0xdc   :  { %2078 = vmatmul.bf16.vlgmr.msra.gmra.mxu2 %v6180_v46  ;;  %v5720_v48 = vld [vmem:[#allocation4 + $0x744] sm:$0xf]  ;;  %v4471_v50 = vor.u32 %v5652_v41, %v4468_v42  ;;  %v4740_v51 = vld [vmem:[#allocation4 + $0x750] sm:$0xf0]  ;;  %v4298_v40 = vld [vmem:[#allocation4 + $0x3c8] sm:$0xf] }
  0xdd   :  { %2126 = vmatpush.bf16.msrb.mxu2 %v4695_v53  ;;  %2092 = vmatmul.bf16.vlgmr.msra.gmra.mxu3 %v6182_v52  ;;  %v5616_v53 = vld [vmem:[#allocation4 + $0x404] sm:$0xf]  ;;  %v4452_v26 = vld [vmem:[#allocation4 + $0x510] sm:$0xf0]  ;;  %v4743_v63 = vor.u32 %v5720_v48, %v4740_v51  ;;  %v5611_v41 = vld [vmem:[#allocation4 + $0x3d4] sm:$0xf0] }
  0xde   :  { %2140 = vmatpush.bf16.msrb.mxu3 %v4823_v55  ;;  %v4324_v55 = vld [vmem:[#allocation4 + $0x410] sm:$0xf0]  ;;  %v5648_v56 = vld [vmem:[#allocation4 + $0x504] sm:$0xf]  ;;  %v5539_v48 = vld [vmem:[#allocation4 + $0x194] sm:$0xf0] }
  0xdf   :  { %2100 = vmatpush.bf16.msrb.mxu0 %v4407_v57  ;;  %2114 = vmatpush.bf16.msrb.mxu1 %v4535_v58  ;;  %v3930_v57 = vld [vmem:[#allocation4 + $0xe8] sm:$0xf]  ;;  %v4615_v58 = vor.u32 %v5688_v45, %v4612_v47  ;;  %v5684_v0 = vld [vmem:[#allocation4 + $0x624] sm:$0xf]  ;;  %v4596_v1 = vld [vmem:[#allocation4 + $0x630] sm:$0xf0]  ;;  %v4171_v45 = vor.u32 %v5579_v38, %v4170_v37 }
  0xe0   :  { %v5716_v5 = vld [vmem:[#allocation4 + $0x724] sm:$0xf]  ;;  %v4724_v6 = vld [vmem:[#allocation4 + $0x730] sm:$0xf0]  ;;  %v4599_v10 = vor.u32 %v5684_v0, %v4596_v1  ;;  %v4010_v47 = vld [vmem:[#allocation4 + $0x188] sm:$0xf] }
  0xe1   :  { %2127 = vmatpush.bf16.msrb.mxu2 %v4679_v2  ;;  %v4327_v2 = vor.u32 %v5616_v53, %v4324_v55  ;;  %v4727_v15 = vor.u32 %v5716_v5, %v4724_v6  ;;  %v5712_v19 = vld [vmem:[#allocation4 + $0x704] sm:$0xf]  ;;  %v4708_v20 = vld [vmem:[#allocation4 + $0x710] sm:$0xf0]  ;;  %v5575_v51 = vld [vmem:[#allocation4 + $0x2b4] sm:$0xf0] }
  0xe2   :  { %2141 = vmatpush.bf16.msrb.mxu3 %v4807_v4  ;;  %v4455_v4 = vor.u32 %v5648_v56, %v4452_v26  ;;  %v4282_v55 = vld [vmem:[#allocation4 + $0x3a8] sm:$0xf]  ;;  %v5607_v56 = vld [vmem:[#allocation4 + $0x3b4] sm:$0xf0]  ;;  %v4011_v26 = vor.u32 %v5539_v48, %v4010_v47 }
  0xe3   :  { %2101 = vmatpush.bf16.msrb.mxu0 %v4391_v7  ;;  %2115 = vmatpush.bf16.msrb.mxu1 %v4519_v8  ;;  %v3931_v7 = vor.u32 %v5519_v59, %v3930_v57  ;;  %v4059_v8 = vor.u32 %v5551_v61, %v4058_v60  ;;  %v3866_v57 = vld [vmem:[#allocation4 + $0x68] sm:$0xf]  ;;  %v5535_v61 = vld [vmem:[#allocation4 + $0x174] sm:$0xf0] }
  0xe4   :  { %v3994_v60 = vld [vmem:[#allocation4 + $0x168] sm:$0xf]  ;;  %v5571_v1 = vld [vmem:[#allocation4 + $0x294] sm:$0xf0] }
  0xe5   :  { %2128 = vmatpush.bf16.msrb.mxu2 %v4663_v16  ;;  %v5680_v16 = vld [vmem:[#allocation4 + $0x604] sm:$0xf]  ;;  %v4138_v0 = vld [vmem:[#allocation4 + $0x288] sm:$0xf]  ;;  %v5603_v5 = vld [vmem:[#allocation4 + $0x394] sm:$0xf0]  ;;  %v3995_v6 = vor.u32 %v5535_v61, %v3994_v60 }
  0xe6   :  { %2142 = vmatpush.bf16.msrb.mxu3 %v4791_v17  ;;  %v4580_v17 = vld [vmem:[#allocation4 + $0x610] sm:$0xf0]  ;;  %v4139_v9 = vor.u32 %v5571_v1, %v4138_v0  ;;  %v5531_v11 = vld [vmem:[#allocation4 + $0x154] sm:$0xf0]  ;;  %v4122_v14 = vld [vmem:[#allocation4 + $0x268] sm:$0xf] }
  0xe7   :  { %2102 = vmatpush.bf16.msrb.mxu0 %v4375_v21  ;;  %2116 = vmatpush.bf16.msrb.mxu1 %v4503_v22  ;;  %v4186_v21 = vld [vmem:[#allocation4 + $0x2e8] sm:$0xf]  ;;  %v5583_v22 = vld [vmem:[#allocation4 + $0x2f4] sm:$0xf0]  ;;  %v4583_v54 = vor.u32 %v5680_v16, %v4580_v17 }
  0xe8   :  { %v4187_v33 = vor.u32 %v5583_v22, %v4186_v21  ;;  %v4250_v17 = vld [vmem:[#allocation4 + $0x368] sm:$0xf]  ;;  %v5495_v22 = vld [vmem:[#allocation4 + $0x34] sm:$0xf0] }
  0xe9   :  { %2129 = vmatpush.bf16.msrb.mxu2 %v4647_v31  ;;  %v5511_v31 = vld [vmem:[#allocation4 + $0xb4] sm:$0xf0]  ;;  %v3834_v21 = vld [vmem:[#allocation4 + $0x28] sm:$0xf] }
  0xea   :  { %2143 = vmatpush.bf16.msrb.mxu3 %v4775_v32  ;;  %v4711_v32 = vor.u32 %v5712_v19, %v4708_v20  ;;  %v3899_v39 = vor.u32 %v5511_v31, %v3898_v30  ;;  %v5599_v19 = vld [vmem:[#allocation4 + $0x374] sm:$0xf0]  ;;  %v3835_v31 = vor.u32 %v5495_v22, %v3834_v21  ;;  %v3946_v37 = vld [vmem:[#allocation4 + $0x108] sm:$0xf] }
  0xeb   :  { %2103 = vmatpush.bf16.msrb.mxu0 %v4359_v34  ;;  %2117 = vmatpush.bf16.msrb.mxu1 %v4487_v36  ;;  %v5543_v34 = vld [vmem:[#allocation4 + $0x1b4] sm:$0xf0]  ;;  %v4315_v36 = vor.u32 %v5615_v28, %v4314_v25  ;;  %v4251_v28 = vor.u32 %v5599_v19, %v4250_v17  ;;  %v4074_v61 = vld [vmem:[#allocation4 + $0x208] sm:$0xf] }
  0xec   :  { %v4027_v42 = vor.u32 %v5543_v34, %v4026_v29  ;;  %v5527_v25 = vld [vmem:[#allocation4 + $0x134] sm:$0xf0]  ;;  %v3818_v29 = vld [vmem:[#allocation4 + $0x8] sm:$0xf] }
  0xed   :  { %2130 = vmatpush.bf16.msrb.mxu2 %v4631_v43  ;;  %v3882_v43 = vld [vmem:[#allocation4 + $0x88] sm:$0xf]  ;;  %v5563_v30 = vld [vmem:[#allocation4 + $0x254] sm:$0xf0] }
  0xee   :  { %2144 = vmatpush.bf16.msrb.mxu3 %v4759_v44  ;;  %v5507_v44 = vld [vmem:[#allocation4 + $0x94] sm:$0xf0]  ;;  %v4202_v0 = vld [vmem:[#allocation4 + $0x308] sm:$0xf] }
  0xef   :  { %2104 = vmatpush.bf16.msrb.mxu0 %v4343_v49  ;;  %2118 = vmatpush.bf16.msrb.mxu1 %v4471_v50  ;;  %v4299_v49 = vor.u32 %v5611_v41, %v4298_v40  ;;  %v4154_v50 = vld [vmem:[#allocation4 + $0x2a8] sm:$0xf]  ;;  %v3883_v53 = vor.u32 %v5507_v44, %v3882_v43  ;;  %v5523_v38 = vld [vmem:[#allocation4 + $0x114] sm:$0xf0] }
  0xf0   :  { %v4155_v59 = vor.u32 %v5575_v51, %v4154_v50  ;;  %v4442_v40 = vld [vmem:[#allocation4 + $0x4e8] sm:$0xf]  ;;  %v5647_v41 = vld [vmem:[#allocation4 + $0x4f4] sm:$0xf0]  ;;  %v3947_v51 = vor.u32 %v5523_v38, %v3946_v37 }
  0xf1   :  { %2131 = vmatpush.bf16.msrb.mxu2 %v4615_v58  ;;  %v5503_v58 = vld [vmem:[#allocation4 + $0x74] sm:$0xf0]  ;;  %v4682_v19 = vld [vmem:[#allocation4 + $0x6c8] sm:$0xf] }
  0xf2   :  { %2145 = vmatpush.bf16.msrb.mxu3 %v4743_v63  ;;  %v4283_v63 = vor.u32 %v5607_v56, %v4282_v55  ;;  %v5679_v44 = vld [vmem:[#allocation4 + $0x5f4] sm:$0xf0]  ;;  %v4426_v55 = vld [vmem:[#allocation4 + $0x4c8] sm:$0xf] }
  0xf3   :  { %2105 = vmatpush.bf16.msrb.mxu0 %v4327_v2  ;;  %2119 = vmatpush.bf16.msrb.mxu1 %v4455_v4  ;;  %v3867_v2 = vor.u32 %v5503_v58, %v3866_v57  ;;  %v4266_v4 = vld [vmem:[#allocation4 + $0x388] sm:$0xf]  ;;  %v5559_v47 = vld [vmem:[#allocation4 + $0x234] sm:$0xf0] }
  0xf4   :  { %v4267_v12 = vor.u32 %v5603_v5, %v4266_v4  ;;  %v5591_v50 = vld [vmem:[#allocation4 + $0x334] sm:$0xf0]  ;;  %v4554_v58 = vld [vmem:[#allocation4 + $0x5c8] sm:$0xf] }
  0xf5   :  { %2132 = vmatpush.bf16.msrb.mxu2 %v4599_v10  ;;  %v3978_v10 = vld [vmem:[#allocation4 + $0x148] sm:$0xf]  ;;  %v5643_v57 = vld [vmem:[#allocation4 + $0x4d4] sm:$0xf0] }
  0xf6   :  { %2146 = vmatpush.bf16.msrb.mxu3 %v4727_v15  ;;  %2106 = vmatmul.bf16.vlgmr.msrb.gmra.mxu0 %v6188_v27  ;;  %v5567_v15 = vld [vmem:[#allocation4 + $0x274] sm:$0xf0]  ;;  %v3979_v20 = vor.u32 %v5531_v11, %v3978_v10  ;;  %v4427_v5 = vor.u32 %v5643_v57, %v4426_v55  ;;  %v4410_v10 = vld [vmem:[#allocation4 + $0x4a8] sm:$0xf] }
  0xf7   :  { %2154 = vmatpush.bf16.msra.mxu0 %v3931_v7  ;;  %2168 = vmatpush.bf16.msra.mxu1 %v4059_v8  ;;  %v3850_v7 = vld [vmem:[#allocation4 + $0x48] sm:$0xf]  ;;  %v5499_v8 = vld [vmem:[#allocation4 + $0x54] sm:$0xf0] }
  0xf8   :  { %2120 = vmatmul.bf16.vlgmr.msrb.gmra.mxu1 %v6190_v35  ;;  %v3851_v16 = vor.u32 %v5499_v8, %v3850_v7  ;;  %v5587_v1 = vld [vmem:[#allocation4 + $0x314] sm:$0xf0]  ;;  %v4810_v22 = vld [vmem:[#allocation4 + $0x7c8] sm:$0xf] }
  0xf9   :  { %2133 = vmatpush.bf16.msrb.mxu2 %v4583_v54  ;;  %v4106_v54 = vld [vmem:[#allocation4 + $0x248] sm:$0xf]  ;;  %v5711_v4 = vld [vmem:[#allocation4 + $0x6f4] sm:$0xf0] }
  0xfa   :  { %2147 = vmatpush.bf16.msrb.mxu3 %v4711_v32  ;;  %v4234_v32 = vld [vmem:[#allocation4 + $0x348] sm:$0xf]  ;;  %v5743_v7 = vld [vmem:[#allocation4 + $0x7f4] sm:$0xf0] }
  0xfb   :  { %2155 = vmatpush.bf16.msra.mxu0 %v3915_v23  ;;  %2169 = vmatpush.bf16.msra.mxu1 %v4043_v24  ;;  %v4123_v23 = vor.u32 %v5567_v15, %v4122_v14  ;;  %v3962_v24 = vld [vmem:[#allocation4 + $0x128] sm:$0xf]  ;;  %v5639_v11 = vld [vmem:[#allocation4 + $0x4b4] sm:$0xf0] }
  0xfc   :  { %2134 = vmatmul.bf16.vlgmr.msrb.gmra.mxu2 %v6194_v62  ;;  %v3963_v34 = vor.u32 %v5527_v25, %v3962_v24  ;;  %v4538_v15 = vld [vmem:[#allocation4 + $0x5a8] sm:$0xf]  ;;  %v4411_v21 = vor.u32 %v5639_v11, %v4410_v10  ;;  %v5735_v37 = vld [vmem:[#allocation4 + $0x7b4] sm:$0xf0] }
  0xfd   :  { %2182 = vmatpush.bf16.msra.mxu2 %v4187_v33  ;;  %2148 = vmatmul.bf16.vlgmr.msrb.gmra.mxu3 %v6196_v3  ;;  %v5595_v33 = vld [vmem:[#allocation4 + $0x354] sm:$0xf0]  ;;  %v4394_v25 = vld [vmem:[#allocation4 + $0x488] sm:$0xf] }
  0xfe   :  { %2196 = vmatpush.bf16.msra.mxu3 %v4315_v36  ;;  %v5491_v36 = vld [vmem:[#allocation4 + $0x14] sm:$0xf0]  ;;  %v4235_v43 = vor.u32 %v5595_v33, %v4234_v32  ;;  %v4666_v33 = vld [vmem:[#allocation4 + $0x6a8] sm:$0xf] }
  0xff   :  { %2156 = vmatpush.bf16.msra.mxu0 %v3899_v39  ;;  %2170 = vmatpush.bf16.msra.mxu1 %v4027_v42  ;;  %v4107_v39 = vor.u32 %v5563_v30, %v4106_v54  ;;  %v4570_v42 = vld [vmem:[#allocation4 + $0x5e8] sm:$0xf]  ;;  %v3819_v48 = vor.u32 %v5491_v36, %v3818_v29  ;;  %v5703_v29 = vld [vmem:[#allocation4 + $0x6b4] sm:$0xf0] }
 0x100   :  { %v4571_v56 = vor.u32 %v5679_v44, %v4570_v42  ;;  %v4522_v30 = vld [vmem:[#allocation4 + $0x588] sm:$0xf]  ;;  %v5627_v55 = vld [vmem:[#allocation4 + $0x454] sm:$0xf0] }
 0x101   :  { %2183 = vmatpush.bf16.msra.mxu2 %v4171_v45  ;;  %v4090_v45 = vld [vmem:[#allocation4 + $0x228] sm:$0xf]  ;;  %v5659_v57 = vld [vmem:[#allocation4 + $0x554] sm:$0xf0] }
 0x102   :  { %2197 = vmatpush.bf16.msra.mxu3 %v4299_v49  ;;  %v4218_v49 = vld [vmem:[#allocation4 + $0x328] sm:$0xf]  ;;  %v5691_v10 = vld [vmem:[#allocation4 + $0x654] sm:$0xf0] }
 0x103   :  { %2157 = vmatpush.bf16.msra.mxu0 %v3883_v53  ;;  %2171 = vmatpush.bf16.msra.mxu1 %v4011_v26  ;;  %v4443_v53 = vor.u32 %v5647_v41, %v4442_v40  ;;  %v4091_v26 = vor.u32 %v5559_v47, %v4090_v45  ;;  %v4219_v60 = vor.u32 %v5591_v50, %v4218_v49  ;;  %v4794_v36 = vld [vmem:[#allocation4 + $0x7a8] sm:$0xf]  ;;  %v5631_v40 = vld [vmem:[#allocation4 + $0x474] sm:$0xf0] }
 0x104   :  { %v4667_v41 = vor.u32 %v5703_v29, %v4666_v33  ;;  %v4506_v42 = vld [vmem:[#allocation4 + $0x568] sm:$0xf]  ;;  %v4795_v44 = vor.u32 %v5735_v37, %v4794_v36  ;;  %v5699_v47 = vld [vmem:[#allocation4 + $0x694] sm:$0xf0]  ;;  %v5513_v36 = vld [vmem:[#allocation4 + $0xcc] sm:$0xf] }
 0x105   :  { %2184 = vmatpush.bf16.msra.mxu2 %v4155_v59  ;;  %v5675_v59 = vld [vmem:[#allocation4 + $0x5d4] sm:$0xf0]  ;;  %v4650_v45 = vld [vmem:[#allocation4 + $0x688] sm:$0xf] }
 0x106   :  { %2198 = vmatpush.bf16.msra.mxu3 %v4283_v63  ;;  %v5555_v63 = vld [vmem:[#allocation4 + $0x214] sm:$0xf0]  ;;  %v4555_v8 = vor.u32 %v5675_v59, %v4554_v58  ;;  %v4778_v49 = vld [vmem:[#allocation4 + $0x788] sm:$0xf] }
 0x107   :  { %2158 = vmatpush.bf16.msra.mxu0 %v3867_v2  ;;  %2172 = vmatpush.bf16.msra.mxu1 %v3995_v6  ;;  %v4698_v2 = vld [vmem:[#allocation4 + $0x6e8] sm:$0xf]  ;;  %v5731_v50 = vld [vmem:[#allocation4 + $0x794] sm:$0xf0] }
 0x108   :  { %v4826_v6 = vld [vmem:[#allocation4 + $0x7e8] sm:$0xf]  ;;  %v4699_v14 = vor.u32 %v5711_v4, %v4698_v2  ;;  %v4779_v58 = vor.u32 %v5731_v50, %v4778_v49  ;;  %v5623_v4 = vld [vmem:[#allocation4 + $0x434] sm:$0xf0]  ;;  %v4188_v49 = vld [vmem:[#allocation4 + $0x2f8] sm:$0xf0] }
 0x109   :  { %2185 = vmatpush.bf16.msra.mxu2 %v4139_v9  ;;  %v4075_v9 = vor.u32 %v5555_v63, %v4074_v61  ;;  %v4827_v17 = vor.u32 %v5743_v7, %v4826_v6  ;;  %v4634_v59 = vld [vmem:[#allocation4 + $0x668] sm:$0xf]  ;;  %v5655_v7 = vld [vmem:[#allocation4 + $0x534] sm:$0xf0] }
 0x10a   :  { %2199 = vmatpush.bf16.msra.mxu3 %v4267_v12  ;;  %v4203_v12 = vor.u32 %v5587_v1, %v4202_v0  ;;  %v4762_v63 = vld [vmem:[#allocation4 + $0x768] sm:$0xf]  ;;  %v5727_v0 = vld [vmem:[#allocation4 + $0x774] sm:$0xf0] }
 0x10b   :  { %2159 = vmatpush.bf16.msra.mxu0 %v3851_v16  ;;  %2173 = vmatpush.bf16.msra.mxu1 %v3979_v20  ;;  %v5671_v16 = vld [vmem:[#allocation4 + $0x5b4] sm:$0xf0]  ;;  %v4346_v2 = vld [vmem:[#allocation4 + $0x428] sm:$0xf] }
 0x10c   :  { %v5707_v20 = vld [vmem:[#allocation4 + $0x6d4] sm:$0xf0]  ;;  %v4539_v24 = vor.u32 %v5671_v16, %v4538_v15  ;;  %v4474_v6 = vld [vmem:[#allocation4 + $0x528] sm:$0xf]  ;;  %v4347_v11 = vor.u32 %v5623_v4, %v4346_v2  ;;  %v5609_v4 = vld [vmem:[#allocation4 + $0x3cc] sm:$0xf] }
 0x10d   :  { %2186 = vmatpush.bf16.msra.mxu2 %v4123_v23  ;;  %v5739_v23 = vld [vmem:[#allocation4 + $0x7d4] sm:$0xf0]  ;;  %v4683_v54 = vor.u32 %v5707_v20, %v4682_v19  ;;  %v4330_v15 = vld [vmem:[#allocation4 + $0x408] sm:$0xf]  ;;  %v4475_v16 = vor.u32 %v5655_v7, %v4474_v6  ;;  %v5505_v7 = vld [vmem:[#allocation4 + $0x8c] sm:$0xf] }
 0x10e   :  { %2200 = vmatpush.bf16.msra.mxu3 %v4251_v28  ;;  %v5635_v28 = vld [vmem:[#allocation4 + $0x494] sm:$0xf0]  ;;  %v4811_v32 = vor.u32 %v5739_v23, %v4810_v22  ;;  %v4458_v19 = vld [vmem:[#allocation4 + $0x508] sm:$0xf]  ;;  %v5517_v22 = vld [vmem:[#allocation4 + $0xec] sm:$0xf] }
 0x10f   :  { %2160 = vmatpush.bf16.msra.mxu0 %v3835_v31  ;;  %2174 = vmatpush.bf16.msra.mxu1 %v3963_v34  ;;  %v5667_v31 = vld [vmem:[#allocation4 + $0x594] sm:$0xf0]  ;;  %v4395_v34 = vor.u32 %v5635_v28, %v4394_v25  ;;  %v3932_v23 = vld [vmem:[#allocation4 + $0xf8] sm:$0xf0] }
 0x110   :  { %v4523_v38 = vor.u32 %v5667_v31, %v4522_v30  ;;  %v5651_v20 = vld [vmem:[#allocation4 + $0x514] sm:$0xf0]  ;;  %v4060_v28 = vld [vmem:[#allocation4 + $0x1f8] sm:$0xf0] }
 0x111   :  { %2187 = vmatpush.bf16.msra.mxu2 %v4107_v39  ;;  %v4378_v39 = vld [vmem:[#allocation4 + $0x468] sm:$0xf]  ;;  %v5687_v30 = vld [vmem:[#allocation4 + $0x634] sm:$0xf0]  ;;  %v4459_v29 = vor.u32 %v5651_v20, %v4458_v19  ;;  %v4284_v19 = vld [vmem:[#allocation4 + $0x3b8] sm:$0xf0] }
 0x112   :  { %2201 = vmatpush.bf16.msra.mxu3 %v4235_v43  ;;  %v5663_v43 = vld [vmem:[#allocation4 + $0x574] sm:$0xf0] }
 0x113   :  { %2161 = vmatpush.bf16.msra.mxu0 %v3819_v48  ;;  %2175 = vmatpush.bf16.msra.mxu1 %v3947_v51  ;;  %v4379_v48 = vor.u32 %v5631_v40, %v4378_v39  ;;  %v4507_v51 = vor.u32 %v5663_v43, %v4506_v42  ;;  %v5719_v33 = vld [vmem:[#allocation4 + $0x734] sm:$0xf0]  ;;  %v3916_v39 = vld [vmem:[#allocation4 + $0xd8] sm:$0xf0]  ;;  %v5545_v40 = vld [vmem:[#allocation4 + $0x1cc] sm:$0xf] }
 0x114   :  { %v4586_v43 = vld [vmem:[#allocation4 + $0x608] sm:$0xf]  ;;  %v3919_v50 = vor.u32 %v5513_v36, %v3916_v39  ;;  %v5497_v36 = vld [vmem:[#allocation4 + $0x4c] sm:$0xf] }
 0x115   :  { %2188 = vmatpush.bf16.msra.mxu2 %v4091_v26  ;;  %v4490_v26 = vld [vmem:[#allocation4 + $0x548] sm:$0xf]  ;;  %v5529_v39 = vld [vmem:[#allocation4 + $0x14c] sm:$0xf] }
 0x116   :  { %2202 = vmatpush.bf16.msra.mxu3 %v4219_v60  ;;  %2162 = vmatmul.bf16.vlgmr.msra.gmra.mxu0 %v6172_v13  ;;  %v5695_v60 = vld [vmem:[#allocation4 + $0x674] sm:$0xf0]  ;;  %v4491_v1 = vor.u32 %v5659_v57, %v4490_v26  ;;  %v5509_v26 = vld [vmem:[#allocation4 + $0xac] sm:$0xf]  ;;  %v3900_v57 = vld [vmem:[#allocation4 + $0xb8] sm:$0xf0] }
 0x117   :  { %2210 = vmatpush.bf16.msrb.mxu0 %v4443_v53  ;;  %2224 = vmatpush.bf16.msrb.mxu1 %v4571_v56  ;;  %v4362_v53 = vld [vmem:[#allocation4 + $0x448] sm:$0xf]  ;;  %v4651_v56 = vor.u32 %v5699_v47, %v4650_v45  ;;  %v5715_v47 = vld [vmem:[#allocation4 + $0x714] sm:$0xf0]  ;;  %v3903_v2 = vor.u32 %v5509_v26, %v3900_v57  ;;  %v5561_v57 = vld [vmem:[#allocation4 + $0x24c] sm:$0xf] }
 0x118   :  { %2176 = vmatmul.bf16.vlgmr.msra.gmra.mxu1 %v6174_v18  ;;  %v4363_v61 = vor.u32 %v5627_v55, %v4362_v53  ;;  %v4714_v45 = vld [vmem:[#allocation4 + $0x708] sm:$0xf]  ;;  %v4316_v53 = vld [vmem:[#allocation4 + $0x3f8] sm:$0xf0] }
 0x119   :  { %2189 = vmatpush.bf16.msra.mxu2 %v4075_v9  ;;  %v4618_v9 = vld [vmem:[#allocation4 + $0x648] sm:$0xf] }
 0x11a   :  { %2203 = vmatpush.bf16.msra.mxu3 %v4203_v12  ;;  %v4746_v12 = vld [vmem:[#allocation4 + $0x748] sm:$0xf] }
 0x11b   :  { %2211 = vmatpush.bf16.msrb.mxu0 %v4427_v5  ;;  %2225 = vmatpush.bf16.msrb.mxu1 %v4555_v8  ;;  %v4635_v5 = vor.u32 %v5695_v60, %v4634_v59  ;;  %v4763_v8 = vor.u32 %v5727_v0, %v4762_v63  ;;  %v5541_v60 = vld [vmem:[#allocation4 + $0x1ac] sm:$0xf] }
 0x11c   :  { %2190 = vmatmul.bf16.vlgmr.msra.gmra.mxu2 %v6180_v46  ;;  %v5577_v0 = vld [vmem:[#allocation4 + $0x2cc] sm:$0xf] }
 0x11d   :  { %2238 = vmatpush.bf16.msrb.mxu2 %v4699_v14  ;;  %2204 = vmatmul.bf16.vlgmr.msra.gmra.mxu3 %v6182_v52  ;;  %v5723_v14 = vld [vmem:[#allocation4 + $0x754] sm:$0xf0] }
 0x11e   :  { %2252 = vmatpush.bf16.msrb.mxu3 %v4827_v17  ;;  %v5619_v17 = vld [vmem:[#allocation4 + $0x414] sm:$0xf0]  ;;  %v4747_v25 = vor.u32 %v5723_v14, %v4746_v12  ;;  %v5573_v14 = vld [vmem:[#allocation4 + $0x2ac] sm:$0xf] }
 0x11f   :  { %2212 = vmatpush.bf16.msrb.mxu0 %v4411_v21  ;;  %2226 = vmatpush.bf16.msrb.mxu1 %v4539_v24  ;;  %v4619_v21 = vor.u32 %v5691_v10, %v4618_v9  ;;  %v5549_v24 = vld [vmem:[#allocation4 + $0x1ec] sm:$0xf]  ;;  %v4331_v31 = vor.u32 %v5619_v17, %v4330_v15  ;;  %v4156_v15 = vld [vmem:[#allocation4 + $0x2b8] sm:$0xf0] }
 0x120   :  { %v4063_v37 = vor.u32 %v5549_v24, %v4060_v28  ;;  %v5537_v10 = vld [vmem:[#allocation4 + $0x18c] sm:$0xf] }
 0x121   :  { %2239 = vmatpush.bf16.msrb.mxu2 %v4683_v54  ;;  %v4602_v54 = vld [vmem:[#allocation4 + $0x628] sm:$0xf]  ;;  %v5605_v17 = vld [vmem:[#allocation4 + $0x3ac] sm:$0xf] }
 0x122   :  { %2253 = vmatpush.bf16.msrb.mxu3 %v4811_v32  ;;  %v4730_v32 = vld [vmem:[#allocation4 + $0x728] sm:$0xf]  ;;  %v5533_v24 = vld [vmem:[#allocation4 + $0x16c] sm:$0xf]  ;;  %v4287_v28 = vor.u32 %v5605_v17, %v4284_v19 }
 0x123   :  { %2213 = vmatpush.bf16.msrb.mxu0 %v4395_v34  ;;  %2227 = vmatpush.bf16.msrb.mxu1 %v4523_v38  ;;  %v3935_v34 = vor.u32 %v5517_v22, %v3932_v23  ;;  %v4603_v38 = vor.u32 %v5687_v30, %v4602_v54  ;;  %v4731_v42 = vor.u32 %v5719_v33, %v4730_v32  ;;  %v3868_v22 = vld [vmem:[#allocation4 + $0x78] sm:$0xf0]  ;;  %v5569_v54 = vld [vmem:[#allocation4 + $0x28c] sm:$0xf] }
 0x124   :  { %v4159_v23 = vor.u32 %v5573_v14, %v4156_v15  ;;  %v4140_v30 = vld [vmem:[#allocation4 + $0x298] sm:$0xf0]  ;;  %v5601_v32 = vld [vmem:[#allocation4 + $0x38c] sm:$0xf] }
 0x125   :  { %2240 = vmatpush.bf16.msrb.mxu2 %v4667_v41  ;;  %v4044_v41 = vld [vmem:[#allocation4 + $0x1d8] sm:$0xf0]  ;;  %v5557_v14 = vld [vmem:[#allocation4 + $0x22c] sm:$0xf] }
 0x126   :  { %2254 = vmatpush.bf16.msrb.mxu3 %v4795_v44  ;;  %v5683_v44 = vld [vmem:[#allocation4 + $0x614] sm:$0xf0]  ;;  %v4047_v55 = vor.u32 %v5545_v40, %v4044_v41  ;;  %v4268_v33 = vld [vmem:[#allocation4 + $0x398] sm:$0xf0]  ;;  %v5589_v19 = vld [vmem:[#allocation4 + $0x32c] sm:$0xf] }
 0x127   :  { %2214 = vmatpush.bf16.msrb.mxu0 %v4379_v48  ;;  %2228 = vmatpush.bf16.msrb.mxu1 %v4507_v51  ;;  %v5581_v48 = vld [vmem:[#allocation4 + $0x2ec] sm:$0xf]  ;;  %v3980_v40 = vld [vmem:[#allocation4 + $0x158] sm:$0xf0]  ;;  %v4271_v41 = vor.u32 %v5601_v32, %v4268_v33 }
 0x128   :  { %v5613_v51 = vld [vmem:[#allocation4 + $0x3ec] sm:$0xf]  ;;  %v4191_v59 = vor.u32 %v5581_v48, %v4188_v49  ;;  %v3983_v48 = vor.u32 %v5529_v39, %v3980_v40  ;;  %v4092_v15 = vld [vmem:[#allocation4 + $0x238] sm:$0xf0] }
 0x129   :  { %2241 = vmatpush.bf16.msrb.mxu2 %v4651_v56  ;;  %v4587_v56 = vor.u32 %v5683_v44, %v4586_v43  ;;  %v4319_v63 = vor.u32 %v5613_v51, %v4316_v53  ;;  %v4124_v43 = vld [vmem:[#allocation4 + $0x278] sm:$0xf0]  ;;  %v5493_v49 = vld [vmem:[#allocation4 + $0x2c] sm:$0xf] }
 0x12a   :  { %2255 = vmatpush.bf16.msrb.mxu3 %v4779_v58  ;;  %v4715_v58 = vor.u32 %v5715_v47, %v4714_v45  ;;  %v5597_v45 = vld [vmem:[#allocation4 + $0x36c] sm:$0xf]  ;;  %v4252_v47 = vld [vmem:[#allocation4 + $0x378] sm:$0xf0] }
 0x12b   :  { %2215 = vmatpush.bf16.msrb.mxu0 %v4363_v61  ;;  %2229 = vmatpush.bf16.msrb.mxu1 %v4491_v1  ;;  %v4028_v61 = vld [vmem:[#allocation4 + $0x1b8] sm:$0xf0]  ;;  %v5525_v53 = vld [vmem:[#allocation4 + $0x12c] sm:$0xf]  ;;  %v4255_v26 = vor.u32 %v5597_v45, %v4252_v47 }
 0x12c   :  { %v4172_v1 = vld [vmem:[#allocation4 + $0x2d8] sm:$0xf0]  ;;  %v4031_v6 = vor.u32 %v5541_v60, %v4028_v61  ;;  %v5593_v60 = vld [vmem:[#allocation4 + $0x34c] sm:$0xf] }
 0x12d   :  { %2242 = vmatpush.bf16.msrb.mxu2 %v4635_v5  ;;  %v4300_v5 = vld [vmem:[#allocation4 + $0x3d8] sm:$0xf0]  ;;  %v4175_v9 = vor.u32 %v5577_v0, %v4172_v1  ;;  %v5553_v32 = vld [vmem:[#allocation4 + $0x20c] sm:$0xf] }
 0x12e   :  { %2256 = vmatpush.bf16.msrb.mxu3 %v4763_v8  ;;  %v3884_v8 = vld [vmem:[#allocation4 + $0x98] sm:$0xf0]  ;;  %v4303_v12 = vor.u32 %v5609_v4, %v4300_v5  ;;  %v5637_v45 = vld [vmem:[#allocation4 + $0x4ac] sm:$0xf] }
 0x12f   :  { %2216 = vmatpush.bf16.msrb.mxu0 %v4347_v11  ;;  %2230 = vmatpush.bf16.msrb.mxu1 %v4475_v16  ;;  %v4012_v11 = vld [vmem:[#allocation4 + $0x198] sm:$0xf0]  ;;  %v3887_v16 = vor.u32 %v5505_v7, %v3884_v8  ;;  %v5677_v8 = vld [vmem:[#allocation4 + $0x5ec] sm:$0xf] }
 0x130   :  { %v4015_v20 = vor.u32 %v5537_v10, %v4012_v11  ;;  %v4236_v61 = vld [vmem:[#allocation4 + $0x358] sm:$0xf0] }
 0x131   :  { %2243 = vmatpush.bf16.msrb.mxu2 %v4619_v21  ;;  %v5501_v21 = vld [vmem:[#allocation4 + $0x6c] sm:$0xf]  ;;  %v3820_v1 = vld [vmem:[#allocation4 + $0x18] sm:$0xf0]  ;;  %v4239_v11 = vor.u32 %v5593_v60, %v4236_v61 }
 0x132   :  { %2257 = vmatpush.bf16.msrb.mxu3 %v4747_v25  ;;  %v3996_v25 = vld [vmem:[#allocation4 + $0x178] sm:$0xf0]  ;;  %v5737_v60 = vld [vmem:[#allocation4 + $0x7cc] sm:$0xf] }
 0x133   :  { %2217 = vmatpush.bf16.msrb.mxu0 %v4331_v31  ;;  %2231 = vmatpush.bf16.msrb.mxu1 %v4459_v29  ;;  %v3871_v31 = vor.u32 %v5501_v21, %v3868_v22  ;;  %v6216_v29 = vpop.f32.mrf.mxu0  ;;  %v3948_v4 = vld [vmem:[#allocation4 + $0x118] sm:$0xf0] }
 0x134   :  { %v4444_v7 = vld [vmem:[#allocation4 + $0x4f8] sm:$0xf0] }
 0x135   :  { %2244 = vmatpush.bf16.msrb.mxu2 %v4603_v38  ;;  %v4143_v38 = vor.u32 %v5569_v54, %v4140_v30  ;;  %v5673_v54 = vld [vmem:[#allocation4 + $0x5cc] sm:$0xf]  ;;  %v4556_v30 = vld [vmem:[#allocation4 + $0x5d8] sm:$0xf0] }
 0x136   :  { %2258 = vmatpush.bf16.msrb.mxu3 %v4731_v42  ;;  %2218 = vmatmul.bf16.vlgmr.msrb.gmra.mxu0 %v6188_v27  ;;  %v5565_v42 = vld [vmem:[#allocation4 + $0x26c] sm:$0xf]  ;;  %v4076_v33 = vld [vmem:[#allocation4 + $0x218] sm:$0xf0] }
 0x137   :  { %2266 = vmatpush.bf16.msra.mxu0 %v3935_v34  ;;  %2280 = vmatpush.bf16.msra.mxu1 %v4063_v37  ;;  %v3999_v34 = vor.u32 %v5533_v24, %v3996_v25  ;;  %v3852_v37 = vld [vmem:[#allocation4 + $0x58] sm:$0xf0]  ;;  %v4127_v51 = vor.u32 %v5565_v42, %v4124_v43  ;;  %v4095_v25 = vor.u32 %v5557_v14, %v4092_v15  ;;  %v5629_v15 = vld [vmem:[#allocation4 + $0x46c] sm:$0xf] }
 0x138   :  { %2232 = vmatmul.bf16.vlgmr.msrb.gmra.mxu1 %v6190_v35  ;;  %v3855_v44 = vor.u32 %v5497_v36, %v3852_v37  ;;  %v4204_v36 = vld [vmem:[#allocation4 + $0x318] sm:$0xf0]  ;;  %v5709_v37 = vld [vmem:[#allocation4 + $0x6ec] sm:$0xf]  ;;  %v4559_v43 = vor.u32 %v5673_v54, %v4556_v30 }
 0x139   :  { %2245 = vmatpush.bf16.msrb.mxu2 %v4587_v56  ;;  %v6218_v56 = vpop.f32.mrf.mxu1  ;;  %v4828_v42 = vld [vmem:[#allocation4 + $0x7f8] sm:$0xf0]  ;;  %v5625_v30 = vld [vmem:[#allocation4 + $0x44c] sm:$0xf] }
 0x13a   :  { %2259 = vmatpush.bf16.msrb.mxu3 %v4715_v58  ;;  %v4108_v58 = vld [vmem:[#allocation4 + $0x258] sm:$0xf0] }
 0x13b   :  { %2267 = vmatpush.bf16.msra.mxu0 %v3919_v50  ;;  %2281 = vmatpush.bf16.msra.mxu1 %v4047_v55  ;;  %v3836_v50 = vld [vmem:[#allocation4 + $0x38] sm:$0xf0]  ;;  %v4111_v5 = vor.u32 %v5561_v57, %v4108_v58 }
 0x13c   :  { %2246 = vmatmul.bf16.vlgmr.msrb.gmra.mxu2 %v6194_v62  ;;  %v3964_v55 = vld [vmem:[#allocation4 + $0x138] sm:$0xf0] }
 0x13d   :  { %2294 = vmatpush.bf16.msra.mxu2 %v4191_v59  ;;  %2260 = vmatmul.bf16.vlgmr.msrb.gmra.mxu3 %v6196_v3  ;;  %v3839_v59 = vor.u32 %v5493_v49, %v3836_v50  ;;  %v3967_v0 = vor.u32 %v5525_v53, %v3964_v55  ;;  %v4412_v47 = vld [vmem:[#allocation4 + $0x4b8] sm:$0xf0]  ;;  %v5669_v50 = vld [vmem:[#allocation4 + $0x5ac] sm:$0xf] }
 0x13e   :  { %2308 = vmatpush.bf16.msra.mxu3 %v4319_v63  ;;  %v5489_v63 = vld [vmem:[#allocation4 + $0xc] sm:$0xf]  ;;  %v4812_v61 = vld [vmem:[#allocation4 + $0x7d8] sm:$0xf0] }
 0x13f   :  { %2268 = vmatpush.bf16.msra.mxu0 %v3903_v2  ;;  %2282 = vmatpush.bf16.msra.mxu1 %v4031_v6  ;;  %v5521_v2 = vld [vmem:[#allocation4 + $0x10c] sm:$0xf]  ;;  %v6222_v10 = vpop.f32.mrf.mxu2  ;;  %v3823_v17 = vor.u32 %v5489_v63, %v3820_v1  ;;  %v4396_v1 = vld [vmem:[#allocation4 + $0x498] sm:$0xf0] }
 0x140   :  { %v5645_v6 = vld [vmem:[#allocation4 + $0x4ec] sm:$0xf]  ;;  %v3951_v21 = vor.u32 %v5521_v2, %v3948_v4  ;;  %v4524_v4 = vld [vmem:[#allocation4 + $0x598] sm:$0xf0] }
 0x141   :  { %2295 = vmatpush.bf16.msra.mxu2 %v4175_v9  ;;  %v6220_v9 = vpop.f32.mrf.mxu0  ;;  %v4447_v22 = vor.u32 %v5645_v6, %v4444_v7  ;;  %v6226_v39 = vpop.f32.mrf.mxu1  ;;  %v5705_v55 = vld [vmem:[#allocation4 + $0x6cc] sm:$0xf]  ;;  %v4668_v7 = vld [vmem:[#allocation4 + $0x6b8] sm:$0xf0] }
 0x142   :  { %2309 = vmatpush.bf16.msra.mxu3 %v4303_v12  ;;  %v4572_v12 = vld [vmem:[#allocation4 + $0x5f8] sm:$0xf0]  ;;  %v5665_v2 = vld [vmem:[#allocation4 + $0x58c] sm:$0xf] }
 0x143   :  { %2269 = vmatpush.bf16.msra.mxu0 %v3887_v16  ;;  %2283 = vmatpush.bf16.msra.mxu1 %v4015_v20  ;;  %v6224_v16 = vpop.f32.mrf.mxu3  ;;  %v4220_v20 = vld [vmem:[#allocation4 + $0x338] sm:$0xf0]  ;;  %v4575_v24 = vor.u32 %v5677_v8, %v4572_v12  ;;  %v5701_v6 = vld [vmem:[#allocation4 + $0x6ac] sm:$0xf]  ;;  %v4527_v14 = vor.u32 %v5665_v2, %v4524_v4 }
 0x144   :  { %v4796_v12 = vld [vmem:[#allocation4 + $0x7b8] sm:$0xf0] }
 0x145   :  { %2296 = vmatpush.bf16.msra.mxu2 %v4159_v23  ;;  %v5641_v23 = vld [vmem:[#allocation4 + $0x4cc] sm:$0xf]  ;;  %v4780_v54 = vld [vmem:[#allocation4 + $0x798] sm:$0xf0] }
 0x146   :  { %2310 = vmatpush.bf16.msra.mxu3 %v4287_v28  ;;  %v4428_v28 = vld [vmem:[#allocation4 + $0x4d8] sm:$0xf0] }
 0x147   :  { %2270 = vmatpush.bf16.msra.mxu0 %v3871_v31  ;;  %2284 = vmatpush.bf16.msra.mxu1 %v3999_v34  ;;  %v4223_v31 = vor.u32 %v5589_v19, %v4220_v20  ;;  %v5585_v34 = vld [vmem:[#allocation4 + $0x30c] sm:$0xf]  ;;  %v4431_v40 = vor.u32 %v5641_v23, %v4428_v28  ;;  %v6232_v58 = vpop.f32.mrf.mxu2  ;;  %v4671_v20 = vor.u32 %v5701_v6, %v4668_v7  ;;  %v4332_v4 = vld [vmem:[#allocation4 + $0x418] sm:$0xf0] }
 0x148   :  { %v5729_v28 = vld [vmem:[#allocation4 + $0x78c] sm:$0xf]  ;;  %v4460_v6 = vld [vmem:[#allocation4 + $0x518] sm:$0xf0] }
 0x149   :  { %2297 = vmatpush.bf16.msra.mxu2 %v4143_v38  ;;  %v4700_v38 = vld [vmem:[#allocation4 + $0x6f8] sm:$0xf0]  ;;  %v6230_v57 = vpop.f32.mrf.mxu0  ;;  %v6238_v19 = vpop.f32.mrf.mxu1 }
 0x14a   :  { %2311 = vmatpush.bf16.msra.mxu3 %v4271_v41  ;;  %v5741_v41 = vld [vmem:[#allocation4 + $0x7ec] sm:$0xf]  ;;  %v4703_v49 = vor.u32 %v5709_v37, %v4700_v38  ;;  %v4492_v37 = vld [vmem:[#allocation4 + $0x558] sm:$0xf0] }
 0x14b   :  { %2271 = vmatpush.bf16.msra.mxu0 %v3855_v44  ;;  %2285 = vmatpush.bf16.msra.mxu1 %v3983_v48  ;;  %v4079_v44 = vor.u32 %v5553_v32, %v4076_v33  ;;  %v4207_v48 = vor.u32 %v5585_v34, %v4204_v36  ;;  %v4831_v53 = vor.u32 %v5741_v41, %v4828_v42  ;;  %v6234_v63 = vpop.f32.mrf.mxu3  ;;  %v5657_v36 = vld [vmem:[#allocation4 + $0x54c] sm:$0xf]  ;;  %v4636_v42 = vld [vmem:[#allocation4 + $0x678] sm:$0xf0] }
 0x14c   :  { %v5693_v41 = vld [vmem:[#allocation4 + $0x66c] sm:$0xf] }
 0x14d   :  { %2298 = vmatpush.bf16.msra.mxu2 %v4127_v51  ;;  %v4540_v51 = vld [vmem:[#allocation4 + $0x5b8] sm:$0xf0] }
 0x14e   :  { %2312 = vmatpush.bf16.msra.mxu3 %v4255_v26  ;;  %v4684_v26 = vld [vmem:[#allocation4 + $0x6d8] sm:$0xf0] }
 0x14f   :  { %2272 = vmatpush.bf16.msra.mxu0 %v3839_v59  ;;  %2286 = vmatpush.bf16.msra.mxu1 %v3967_v0  ;;  %v4415_v59 = vor.u32 %v5637_v45, %v4412_v47  ;;  %v5633_v0 = vld [vmem:[#allocation4 + $0x48c] sm:$0xf]  ;;  %v6242_v33 = vpop.f32.mrf.mxu2  ;;  %v4764_v45 = vld [vmem:[#allocation4 + $0x778] sm:$0xf0]  ;;  %v4495_v47 = vor.u32 %v5657_v36, %v4492_v37  ;;  %v4882_v36 = vld [vmem:[#allocation6 + $0x60] sm:$0xf] }
 0x150   :  { %v4399_v8 = vor.u32 %v5633_v0, %v4396_v1  ;;  %v5721_v0 = vld [vmem:[#allocation4 + $0x74c] sm:$0xf]  ;;  %v4748_v1 = vld [vmem:[#allocation4 + $0x758] sm:$0xf0]  ;;  %v5757_v37 = vld [vmem:[#allocation6 + $0x64] sm:$0xf0] }
 0x151   :  { %2299 = vmatpush.bf16.msra.mxu2 %v4111_v5  ;;  %v4815_v5 = vor.u32 %v5737_v60, %v4812_v61  ;;  %v6240_v32 = vpop.f32.mrf.mxu0  ;;  %v4620_v60 = vld [vmem:[#allocation4 + $0x658] sm:$0xf0]  ;;  %v6248_v61 = vpop.f32.mrf.mxu1 }
 0x152   :  { %2313 = vmatpush.bf16.msra.mxu3 %v4239_v11  ;;  %v5733_v11 = vld [vmem:[#allocation4 + $0x7ac] sm:$0xf] }
 0x153   :  { %2273 = vmatpush.bf16.msra.mxu0 %v3823_v17  ;;  %2287 = vmatpush.bf16.msra.mxu1 %v3951_v21  ;;  %v4380_v17 = vld [vmem:[#allocation4 + $0x478] sm:$0xf0]  ;;  %v5661_v21 = vld [vmem:[#allocation4 + $0x56c] sm:$0xf]  ;;  %v4799_v23 = vor.u32 %v5733_v11, %v4796_v12  ;;  %v6244_v38 = vpop.f32.mrf.mxu3  ;;  %v5759_v11 = vld [vmem:[#allocation6 + $0x74] sm:$0xf0] }
 0x154   :  { %v4954_v12 = vld [vmem:[#allocation6 + $0xf0] sm:$0xf] }
 0x155   :  { %2300 = vmatpush.bf16.msra.mxu2 %v4095_v25  ;;  %v4383_v25 = vor.u32 %v5629_v15, %v4380_v17  ;;  %v5775_v15 = vld [vmem:[#allocation6 + $0xf4] sm:$0xf0]  ;;  %v5685_v17 = vld [vmem:[#allocation4 + $0x62c] sm:$0xf] }
 0x156   :  { %2314 = vmatpush.bf16.msra.mxu3 %v4223_v31  ;;  %2274 = vmatmul.bf16.vlgmr.msra.gmra.mxu0 %v6172_v13  ;;  %v4543_v13 = vor.u32 %v5669_v50, %v4540_v51  ;;  %v4364_v31 = vld [vmem:[#allocation4 + $0x458] sm:$0xf0]  ;;  %v4639_v50 = vor.u32 %v5693_v41, %v4636_v42  ;;  %v5653_v51 = vld [vmem:[#allocation4 + $0x52c] sm:$0xf]  ;;  %v5773_v42 = vld [vmem:[#allocation6 + $0xe4] sm:$0xf0] }
 0x157   :  { %2322 = vmatpush.bf16.msrb.mxu0 %v4447_v22  ;;  %2336 = vmatpush.bf16.msrb.mxu1 %v4575_v24  ;;  %v4508_v22 = vld [vmem:[#allocation4 + $0x578] sm:$0xf0]  ;;  %v5697_v24 = vld [vmem:[#allocation4 + $0x68c] sm:$0xf] }
 0x158   :  { %2288 = vmatmul.bf16.vlgmr.msra.gmra.mxu1 %v6174_v18  ;;  %v4687_v18 = vor.u32 %v5705_v55, %v4684_v26  ;;  %v6246_v55 = vld [vmem:[#allocation10 + $0x1] ss:$8 sm:$0xf] }
 0x159   :  { %2301 = vmatpush.bf16.msra.mxu2 %v4079_v44  ;;  %v5725_v44 = vld [vmem:[#allocation4 + $0x76c] sm:$0xf] }
 0x15a   :  { %2315 = vmatpush.bf16.msra.mxu3 %v4207_v48  ;;  %v5621_v48 = vld [vmem:[#allocation4 + $0x42c] sm:$0xf]  ;;  %v4767_v26 = vor.u32 %v5725_v44, %v4764_v45  ;;  %v4588_v44 = vld [vmem:[#allocation4 + $0x618] sm:$0xf0] }
 0x15b   :  { %2323 = vmatpush.bf16.msrb.mxu0 %v4431_v40  ;;  %2337 = vmatpush.bf16.msrb.mxu1 %v4559_v43  ;;  %v4783_v40 = vor.u32 %v5729_v28, %v4780_v54  ;;  %v4367_v43 = vor.u32 %v5625_v30, %v4364_v31  ;;  %v6255_v28 = vpop.f32.mrf.mxu3  ;;  %v4955_v31 = vor.u32 %v5775_v15, %v4954_v12  ;;  %v5751_v15 = vld [vmem:[#allocation6 + $0x34] sm:$0xf0] }
 0x15c   :  { %2302 = vmatmul.bf16.vlgmr.msra.gmra.mxu2 %v6180_v46  ;;  %v4652_v46 = vld [vmem:[#allocation4 + $0x698] sm:$0xf0] }
 0x15d   :  { %2350 = vmatpush.bf16.msrb.mxu2 %v4703_v49  ;;  %2316 = vmatmul.bf16.vlgmr.msra.gmra.mxu3 %v6182_v52  ;;  %v4511_v52 = vor.u32 %v5661_v21, %v4508_v22  ;;  %v4655_v34 = vor.u32 %v5697_v24, %v4652_v46  ;;  %v4348_v49 = vld [vmem:[#allocation4 + $0x438] sm:$0xf0]  ;;  %v642_v21 = vperm.slane %v6246_v55, 0  ;;  %v6251_v22 = vpop.f32.mrf.mxu0  ;;  %v5717_v46 = vld [vmem:[#allocation4 + $0x72c] sm:$0xf] }
 0x15e   :  { %2364 = vmatpush.bf16.msrb.mxu3 %v4831_v53  ;;  %v4476_v53 = vld [vmem:[#allocation4 + $0x538] sm:$0xf0] }
 0x15f   :  { %2324 = vmatpush.bf16.msrb.mxu0 %v4415_v59  ;;  %2338 = vmatpush.bf16.msrb.mxu1 %v4543_v13  ;;  %v5689_v59 = vld [vmem:[#allocation4 + $0x64c] sm:$0xf]  ;;  %v4351_v13 = vor.u32 %v5621_v48, %v4348_v49  ;;  %v4479_v2 = vor.u32 %v5653_v51, %v4476_v53  ;;  %v1942_v30 = vadd.f32 %v6220_v9, %v642_v21  ;;  %v4716_v48 = vld [vmem:[#allocation4 + $0x718] sm:$0xf0] }
 0x160   :  { %v4623_v7 = vor.u32 %v5689_v59, %v4620_v60  ;;  %v1940_v45 = vadd.f32 %v6216_v29, %v642_v21  ;;  %v4883_v49 = vor.u32 %v5757_v37, %v4882_v36  ;;  %v5755_v59 = vld [vmem:[#allocation6 + $0x54] sm:$0xf0]  ;;  %v4938_v29 = vld [vmem:[#allocation6 + $0xd0] sm:$0xf] }
 0x161   :  { %2351 = vmatpush.bf16.msrb.mxu2 %v4687_v18  ;;  %v5617_v18 = vld [vmem:[#allocation4 + $0x40c] sm:$0xf]  ;;  %v1956_v9 = vadd.f32 %v6226_v39, %v1942_v30  ;;  %v5767_v21 = vld [vmem:[#allocation6 + $0xb4] sm:$0xf0] }
 0x162   :  { %2365 = vmatpush.bf16.msrb.mxu3 %v4815_v5  ;;  %v5649_v5 = vld [vmem:[#allocation4 + $0x50c] sm:$0xf]  ;;  %v4335_v24 = vor.u32 %v5617_v18, %v4332_v4 }
 0x163   :  { %2325 = vmatpush.bf16.msrb.mxu0 %v4399_v8  ;;  %2339 = vmatpush.bf16.msrb.mxu1 %v4527_v14  ;;  %v4890_v8 = vld [vmem:[#allocation6 + $0x70] sm:$0xf]  ;;  %v4751_v14 = vor.u32 %v5721_v0, %v4748_v1  ;;  %v4463_v54 = vor.u32 %v5649_v5, %v4460_v6  ;;  %v1954_v0 = vadd.f32 %v6218_v56, %v1940_v45  ;;  %v4866_v6 = vld [vmem:[#allocation6 + $0x40] sm:$0xf] }
 0x164   :  { %v1970_v1 = vadd.f32 %v6232_v58, %v1956_v9  ;;  %v4930_v56 = vld [vmem:[#allocation6 + $0xc0] sm:$0xf] }
 0x165   :  { %2352 = vmatpush.bf16.msrb.mxu2 %v4671_v20  ;;  %v4604_v20 = vld [vmem:[#allocation4 + $0x638] sm:$0xf0]  ;;  %v1968_v18 = vadd.f32 %v6222_v10, %v1954_v0 }
 0x166   :  { %2366 = vmatpush.bf16.msrb.mxu3 %v4799_v23  ;;  %v6253_v23 = vpop.f32.mrf.mxu2  ;;  %v1984_v58 = vadd.f32 %v6234_v63, %v1970_v1  ;;  %v5761_v1 = vld [vmem:[#allocation6 + $0x84] sm:$0xf0] }
 0x167   :  { %2326 = vmatpush.bf16.msrb.mxu0 %v4383_v25  ;;  %2340 = vmatpush.bf16.msrb.mxu1 %v4511_v52  ;;  %v4732_v25 = vld [vmem:[#allocation4 + $0x738] sm:$0xf0]  ;;  %v4891_v52 = vor.u32 %v5759_v11, %v4890_v8  ;;  %v2093_v8 = vpop.f32.mrf.mxu3  ;;  %v5769_v11 = vld [vmem:[#allocation6 + $0xc4] sm:$0xf0]  ;;  %v1982_v10 = vadd.f32 %v6224_v16, %v1968_v18 }
 0x168   :  { %v4735_v41 = vor.u32 %v5717_v46, %v4732_v25  ;;  %v4931_v12 = vor.u32 %v5769_v11, %v4930_v56  ;;  %v4892_v18 = vld [vmem:[#allocation6 + $0x78] sm:$0xf0]  ;;  %v5789_v56 = vld [vmem:[#allocation6 + $0x164] sm:$0xf0] }
 0x169   :  { %2353 = vmatpush.bf16.msrb.mxu2 %v4655_v34  ;;  %v4607_v34 = vor.u32 %v5685_v17, %v4604_v20  ;;  %v4922_v20 = vld [vmem:[#allocation6 + $0xb0] sm:$0xf] }
 0x16a   :  { %2367 = vmatpush.bf16.msrb.mxu3 %v4783_v40  ;;  %v4946_v40 = vld [vmem:[#allocation6 + $0xe0] sm:$0xf]  ;;  %v4923_v16 = vor.u32 %v5767_v21, %v4922_v20  ;;  %v5772_v21 = vld [vmem:[#allocation6 + $0xe4] sm:$0xf] }
 0x16b   :  { %2327 = vmatpush.bf16.msrb.mxu0 %v4367_v43  ;;  %2341 = vmatpush.bf16.msrb.mxu1 %v4495_v47  ;;  %v5681_v43 = vld [vmem:[#allocation4 + $0x60c] sm:$0xf]  ;;  %v4947_v51 = vor.u32 %v5773_v42, %v4946_v40 }
 0x16c   :  { %v5713_v47 = vld [vmem:[#allocation4 + $0x70c] sm:$0xf]  ;;  %v4591_v53 = vor.u32 %v5681_v43, %v4588_v44  ;;  %v4842_v43 = vld [vmem:[#allocation6 + $0x10] sm:$0xf]  ;;  %v5747_v44 = vld [vmem:[#allocation6 + $0x14] sm:$0xf0] }
 0x16d   :  { %2354 = vmatpush.bf16.msrb.mxu2 %v4639_v50  ;;  %v2065_v50 = vpop.f32.mrf.mxu1  ;;  %v4719_v60 = vor.u32 %v5713_v47, %v4716_v48  ;;  %v4906_v47 = vld [vmem:[#allocation6 + $0x90] sm:$0xf]  ;;  %v5763_v48 = vld [vmem:[#allocation6 + $0x94] sm:$0xf0] }
 0x16e   :  { %2368 = vmatpush.bf16.msrb.mxu3 %v4767_v26  ;;  %v4874_v26 = vld [vmem:[#allocation6 + $0x50] sm:$0xf]  ;;  %v2079_v4 = vpop.f32.mrf.mxu2 }
 0x16f   :  { %2328 = vmatpush.bf16.msrb.mxu0 %v4351_v13  ;;  %2342 = vmatpush.bf16.msrb.mxu1 %v4479_v2  ;;  %v5771_v13 = vld [vmem:[#allocation6 + $0xd4] sm:$0xf0]  ;;  %v4875_v39 = vor.u32 %v5755_v59, %v4874_v26  ;;  %v2053_v2 = vpop.f32.mrf.mxu0  ;;  %v2095_v40 = vpop.f32.mrf.mxu3  ;;  %v4834_v59 = vld [vmem:[#allocation6] sm:$0xf] }
 0x170   :  { %v4939_v5 = vor.u32 %v5771_v13, %v4938_v29  ;;  %v5791_v26 = vld [vmem:[#allocation6 + $0x174] sm:$0xf0]  ;;  %v4898_v29 = vld [vmem:[#allocation6 + $0x80] sm:$0xf] }
 0x171   :  { %2355 = vmatpush.bf16.msrb.mxu2 %v4623_v7  ;;  %v643_v7 = vperm.slane %v6246_v55, 1 }
 0x172   :  { %2369 = vmatpush.bf16.msrb.mxu3 %v4751_v14  ;;  %v4858_v14 = vld [vmem:[#allocation6 + $0x30] sm:$0xf] }
 0x173   :  { %2329 = vmatpush.bf16.msrb.mxu0 %v4335_v24  ;;  %2343 = vmatpush.bf16.msrb.mxu1 %v4463_v54  ;;  %v2052_v17 = vadd.f32 %v6251_v22, %v643_v7  ;;  %v1998_v24 = vadd.f32 %v6240_v32, %v1984_v58  ;;  %v4859_v63 = vor.u32 %v5751_v15, %v4858_v14  ;;  %v4850_v54 = vld [vmem:[#allocation6 + $0x20] sm:$0xf] }
 0x174   :  { %v2054_v30 = vadd.f32 %v2053_v2, %v643_v7  ;;  %v4899_v58 = vor.u32 %v5761_v1, %v4898_v29  ;;  %v5750_v29 = vld [vmem:[#allocation6 + $0x34] sm:$0xf]  ;;  %v4924_v1 = vld [vmem:[#allocation6 + $0xb8] sm:$0xf0] }
 0x175   :  { %2356 = vmatpush.bf16.msrb.mxu2 %v4607_v34  ;;  %v2067_v46 = vpop.f32.mrf.mxu1  ;;  %v5765_v34 = vld [vmem:[#allocation6 + $0xa4] sm:$0xf0]  ;;  %v2012_v22 = vadd.f32 %v6248_v61, %v1998_v24  ;;  %v4948_v24 = vld [vmem:[#allocation6 + $0xe8] sm:$0xf0] }
 0x176   :  { %2370 = vmatpush.bf16.msrb.mxu3 %v4735_v41  ;;  %2330 = vmatmul.bf16.vlgmr.msrb.gmra.mxu0 %v6188_v27  ;;  %v5753_v27 = vld [vmem:[#allocation6 + $0x44] sm:$0xf0]  ;;  %v2081_v36 = vpop.f32.mrf.mxu2  ;;  %v2068_v45 = vadd.f32 %v2067_v46, %v2054_v30  ;;  %v4951_v30 = vor.u32 %v5772_v21, %v4948_v24  ;;  %v5790_v21 = vld [vmem:[#allocation6 + $0x174] sm:$0xf]  ;;  %v5020_v24 = vld [vmem:[#allocation6 + $0x178] sm:$0xf0] }
 0x177   :  { %2779 = vmatpush.bf16.msra.mxu0 %v4891_v52  ;;  %2793 = vmatpush.bf16.msra.mxu1 %v4955_v31  ;;  %v2107_v25 = vpop.f32.mrf.mxu0  ;;  %v2066_v52 = vadd.f32 %v2065_v50, %v2052_v17  ;;  %v4914_v31 = vld [vmem:[#allocation6 + $0xa0] sm:$0xf]  ;;  %v4884_v17 = vld [vmem:[#allocation6 + $0x68] sm:$0xf0] }
 0x178   :  { %2344 = vmatmul.bf16.vlgmr.msrb.gmra.mxu1 %v6190_v35  ;;  %v4867_v35 = vor.u32 %v5753_v27, %v4866_v6  ;;  %v4915_v42 = vor.u32 %v5765_v34, %v4914_v31  ;;  %v2082_v50 = vadd.f32 %v2081_v36, %v2068_v45  ;;  %v4956_v6 = vld [vmem:[#allocation6 + $0xf8] sm:$0xf0]  ;;  %v5754_v31 = vld [vmem:[#allocation6 + $0x54] sm:$0xf] }
 0x179   :  { %2357 = vmatpush.bf16.msrb.mxu2 %v4591_v53  ;;  %v2080_v37 = vadd.f32 %v2079_v4, %v2066_v52  ;;  %v5018_v53 = vld [vmem:[#allocation6 + $0x170] sm:$0xf]  ;;  %v4876_v34 = vld [vmem:[#allocation6 + $0x58] sm:$0xf0] }
 0x17a   :  { %2371 = vmatpush.bf16.msrb.mxu3 %v4719_v60  ;;  %v5745_v60 = vld [vmem:[#allocation6 + $0x4] sm:$0xf0]  ;;  %v5019_v13 = vor.u32 %v5791_v26, %v5018_v53  ;;  %v2096_v27 = vadd.f32 %v2095_v40, %v2082_v50  ;;  %v4994_v40 = vld [vmem:[#allocation6 + $0x140] sm:$0xf]  ;;  %v4986_v53 = vld [vmem:[#allocation6 + $0x130] sm:$0xf] }
 0x17b   :  { %2780 = vmatpush.bf16.msra.mxu0 %v4883_v49  ;;  %2794 = vmatpush.bf16.msra.mxu1 %v4947_v51  ;;  %v2094_v61 = vadd.f32 %v2093_v8, %v2080_v37  ;;  %v4843_v51 = vor.u32 %v5747_v44, %v4842_v43  ;;  %v5010_v8 = vld [vmem:[#allocation6 + $0x160] sm:$0xf]  ;;  %v4940_v37 = vld [vmem:[#allocation6 + $0xd8] sm:$0xf0]  ;;  %v4879_v44 = vor.u32 %v5754_v31, %v4876_v34  ;;  %v5783_v26 = vld [vmem:[#allocation6 + $0x134] sm:$0xf0] }
 0x17c   :  { %2358 = vmatmul.bf16.vlgmr.msrb.gmra.mxu2 %v6194_v62  ;;  %v1996_v62 = vadd.f32 %v6230_v57, %v1982_v10  ;;  %v2026_v57 = vadd.f32 %v6253_v23, %v2012_v22  ;;  %v4907_v23 = vor.u32 %v5763_v48, %v4906_v47  ;;  %v5011_v10 = vor.u32 %v5789_v56, %v5010_v8  ;;  %v5770_v22 = vld [vmem:[#allocation6 + $0xd4] sm:$0xf]  ;;  %v5752_v48 = vld [vmem:[#allocation6 + $0x44] sm:$0xf]  ;;  %v5779_v8 = vld [vmem:[#allocation6 + $0x114] sm:$0xf0] }
 0x17d   :  { %2372 = vmatmul.bf16.vlgmr.msrb.gmra.mxu3 %v6196_v3  ;;  %v5749_v3 = vld [vmem:[#allocation6 + $0x24] sm:$0xf0]  ;;  %v2121_v9 = vpop.f32.mrf.mxu1  ;;  %v2108_v0 = vadd.f32 %v2107_v25, %v2094_v61  ;;  %2807 = vmatpush.bf16.msra.mxu2 %v5019_v13  ;;  %v4943_v47 = vor.u32 %v5770_v22, %v4940_v37  ;;  %v4932_v61 = vld [vmem:[#allocation6 + $0xc8] sm:$0xf0]  ;;  %v4860_v13 = vld [vmem:[#allocation6 + $0x38] sm:$0xf0] }
 0x17e   :  { %v4851_v32 = vor.u32 %v5749_v3, %v4850_v54  ;;  %v2010_v41 = vadd.f32 %v6238_v19, %v1996_v62  ;;  %v2040_v19 = vadd.f32 %v6255_v28, %v2026_v57  ;;  %v4835_v28 = vor.u32 %v5745_v60, %v4834_v59  ;;  %v5787_v62 = vld [vmem:[#allocation6 + $0x154] sm:$0xf0]  ;;  %v5788_v31 = vld [vmem:[#allocation6 + $0x164] sm:$0xf]  ;;  %v5012_v34 = vld [vmem:[#allocation6 + $0x168] sm:$0xf0] }
 0x17f   :  { %2781 = vmatpush.bf16.msra.mxu0 %v4875_v39  ;;  %2795 = vmatpush.bf16.msra.mxu1 %v4939_v5  ;;  %v5758_v39 = vld [vmem:[#allocation6 + $0x74] sm:$0xf]  ;;  %v2109_v2 = vpop.f32.mrf.mxu0  ;;  %v2135_v4 = vpop.f32.mrf.mxu2 }
 0x180   :  { %v2024_v49 = vadd.f32 %v6242_v33, %v2010_v41  ;;  %v5774_v5 = vld [vmem:[#allocation6 + $0xf4] sm:$0xf]  ;;  %v2149_v7 = vpop.f32.mrf.mxu3  ;;  %v2382_v11 = vmax.f32 %v2040_v19, 0.0  ;;  %v2110_v14 = vadd.f32 %v2109_v2, %v2096_v27  ;;  %v5764_v27 = vld [vmem:[#allocation6 + $0xa4] sm:$0xf] }
 0x181   :  { %v4959_v15 = vor.u32 %v5774_v5, %v4956_v6  ;;  %2808 = vmatpush.bf16.msra.mxu2 %v5011_v10  ;;  %v5748_v5 = vld [vmem:[#allocation6 + $0x24] sm:$0xf]  ;;  %v4852_v6 = vld [vmem:[#allocation6 + $0x28] sm:$0xf0]  ;;  %v4844_v10 = vld [vmem:[#allocation6 + $0x18] sm:$0xf0] }
 0x182   :  { %v2038_v33 = vadd.f32 %v6244_v38, %v2024_v49  ;;  %v5756_v38 = vld [vmem:[#allocation6 + $0x64] sm:$0xf]  ;;  %v4868_v49 = vld [vmem:[#allocation6 + $0x48] sm:$0xf0]  ;;  %v4855_v56 = vor.u32 %v5748_v5, %v4852_v6  ;;  %v5786_v37 = vld [vmem:[#allocation6 + $0x154] sm:$0xf] }
 0x183   :  { %2782 = vmatpush.bf16.msra.mxu0 %v4867_v35  ;;  %2796 = vmatpush.bf16.msra.mxu1 %v4931_v12  ;;  %v4895_v35 = vor.u32 %v5758_v39, %v4892_v18  ;;  %v2122_v12 = vadd.f32 %v2121_v9, %v2108_v0  ;;  %v4887_v54 = vor.u32 %v5756_v38, %v4884_v17  ;;  %v5768_v9 = vld [vmem:[#allocation6 + $0xc4] sm:$0xf]  ;;  %v5766_v0 = vld [vmem:[#allocation6 + $0xb4] sm:$0xf]  ;;  %v4978_v39 = vld [vmem:[#allocation6 + $0x120] sm:$0xf] }
 0x184   :  { %v2378_v20 = vmax.f32 %v2038_v33, 0.0  ;;  %v4871_v19 = vor.u32 %v5752_v48, %v4868_v49  ;;  %v4935_v60 = vor.u32 %v5768_v9, %v4932_v61  ;;  %v5781_v18 = vld [vmem:[#allocation6 + $0x124] sm:$0xf0]  ;;  %v4863_v33 = vor.u32 %v5750_v29, %v4860_v13  ;;  %v5782_v49 = vld [vmem:[#allocation6 + $0x134] sm:$0xf] }
 0x185   :  { %v2136_v46 = vadd.f32 %v2135_v4, %v2122_v12  ;;  %v4979_v2 = vor.u32 %v5781_v18, %v4978_v39  ;;  %v4927_v4 = vor.u32 %v5766_v0, %v4924_v1  ;;  %v5762_v12 = vld [vmem:[#allocation6 + $0x94] sm:$0xf]  ;;  %v5777_v38 = vld [vmem:[#allocation6 + $0x104] sm:$0xf0]  ;;  %v4988_v9 = vld [vmem:[#allocation6 + $0x138] sm:$0xf0] }
 0x186   :  { %v6279_v25 = vpack.c.bf16 %v2382_v11, %v2378_v20  ;;  %v4991_v61 = vor.u32 %v5782_v49, %v4988_v9  ;;  %v5778_v29 = vld [vmem:[#allocation6 + $0x114] sm:$0xf]  ;;  %v4972_v13 = vld [vmem:[#allocation6 + $0x118] sm:$0xf0]  ;;  %v5026_v49 = vld [vmem:[#allocation6 + $0x180] sm:$0xf] }
 0x187   :  { %2783 = vmatpush.bf16.msra.mxu0 %v4859_v63  ;;  %2797 = vmatpush.bf16.msra.mxu1 %v4923_v16  ;;  %v5002_v63 = vld [vmem:[#allocation6 + $0x150] sm:$0xf]  ;;  %v2123_v16 = vpop.f32.mrf.mxu1  ;;  %v2137_v36 = vpop.f32.mrf.mxu2  ;;  %v2150_v41 = vadd.f32 %v2149_v7, %v2136_v46  ;;  %v4916_v7 = vld [vmem:[#allocation6 + $0xa8] sm:$0xf0]  ;;  %v4975_v39 = vor.u32 %v5778_v29, %v4972_v13  ;;  %v5793_v9 = vld [vmem:[#allocation6 + $0x184] sm:$0xf0] }
 0x188   :  { %v5003_v3 = vor.u32 %v5787_v62, %v5002_v63  ;;  %v2124_v52 = vadd.f32 %v2123_v16, %v2110_v14  ;;  %v2151_v43 = vpop.f32.mrf.mxu3  ;;  %v4908_v14 = vld [vmem:[#allocation6 + $0x98] sm:$0xf0]  ;;  %v5744_v63 = vld [vmem:[#allocation6 + $0x4] sm:$0xf]  ;;  %v4836_v62 = vld [vmem:[#allocation6 + $0x8] sm:$0xf0]  ;;  %v5023_v16 = vor.u32 %v5790_v21, %v5020_v24 }
 0x189   :  { %v2379_v50 = vmax.f32 %v2150_v41, 0.0  ;;  %v4911_v46 = vor.u32 %v5762_v12, %v4908_v14  ;;  %v5074_v12 = vld [vmem:[#allocation6 + $0x1e0] sm:$0xf]  ;;  %v5805_v14 = vld [vmem:[#allocation6 + $0x1e4] sm:$0xf0] }
 0x18a   :  { %2809 = vmatpush.bf16.msra.mxu2 %v5003_v3  ;;  %v2138_v57 = vadd.f32 %v2137_v36, %v2124_v52  ;;  %v4900_v3 = vld [vmem:[#allocation6 + $0x88] sm:$0xf0]  ;;  %v5015_v36 = vor.u32 %v5788_v31, %v5012_v34  ;;  %v5066_v21 = vld [vmem:[#allocation6 + $0x1d0] sm:$0xf]  ;;  %v5803_v24 = vld [vmem:[#allocation6 + $0x1d4] sm:$0xf0] }
 0x18b   :  { %2784 = vmatpush.bf16.msra.mxu0 %v4851_v32  ;;  %2798 = vmatpush.bf16.msra.mxu1 %v4915_v42  ;;  %v5785_v32 = vld [vmem:[#allocation6 + $0x144] sm:$0xf0] }
 0x18c   :  { %v4995_v42 = vor.u32 %v5785_v32, %v4994_v40  ;;  %v2152_v45 = vadd.f32 %v2151_v43, %v2138_v57  ;;  %v5004_v40 = vld [vmem:[#allocation6 + $0x158] sm:$0xf0]  ;;  %v5784_v57 = vld [vmem:[#allocation6 + $0x144] sm:$0xf] }
 0x18d   :  { %v5007_v32 = vor.u32 %v5786_v37, %v5004_v40  ;;  %v5050_v40 = vld [vmem:[#allocation6 + $0x1b0] sm:$0xf] }
 0x18e   :  { %2810 = vmatpush.bf16.msra.mxu2 %v4995_v42  ;;  %v4996_v42 = vld [vmem:[#allocation6 + $0x148] sm:$0xf0] }
 0x18f   :  { %2785 = vmatpush.bf16.msra.mxu0 %v4843_v51  ;;  %2799 = vmatpush.bf16.msra.mxu1 %v4907_v23  ;;  %v2383_v51 = vmax.f32 %v2152_v45, 0.0  ;;  %v4987_v23 = vor.u32 %v5783_v26, %v4986_v53  ;;  %v4999_v43 = vor.u32 %v5784_v57, %v4996_v42  ;;  %v5780_v53 = vld [vmem:[#allocation6 + $0x124] sm:$0xf]  ;;  %v5042_v42 = vld [vmem:[#allocation6 + $0x1a0] sm:$0xf] }
 0x191   :  { %v6282_v59 = vpack.c.bf16 %v2383_v51, %v2379_v50 }
 0x192   :  { %2811 = vmatpush.bf16.msra.mxu2 %v4987_v23 }
 0x193   :  { %2786 = vmatpush.bf16.msra.mxu0 %v4835_v28  ;;  %2800 = vmatpush.bf16.msra.mxu1 %v4899_v58  ;;  %v4970_v28 = vld [vmem:[#allocation6 + $0x110] sm:$0xf]  ;;  %v4919_v58 = vor.u32 %v5764_v27, %v4916_v7  ;;  %v2163_v52 = vpop.f32.mrf.mxu0 }
 0x194   :  { %v4971_v11 = vor.u32 %v5779_v8, %v4970_v28  ;;  %v5082_v7 = vld [vmem:[#allocation6 + $0x1f0] sm:$0xf]  ;;  %v5807_v28 = vld [vmem:[#allocation6 + $0x1f4] sm:$0xf0] }
 0x195   :  { %v2177_v41 = vpop.f32.mrf.mxu1  ;;  %v5083_v8 = vor.u32 %v5807_v28, %v5082_v7  ;;  %v5796_v7 = vld [vmem:[#allocation6 + $0x1a4] sm:$0xf]  ;;  %v5044_v28 = vld [vmem:[#allocation6 + $0x1a8] sm:$0xf0] }
 0x196   :  { %2787 = vmatmul.bf16.vlgmr.msra.gmra.mxu0 %v6279_v25  ;;  %2801 = vmatmul.bf16.vlgmr.msra.gmra.mxu1 %v6282_v59 }
 0x197   :  { %2835 = vmatpush.bf16.msrb.mxu0 %v4895_v35  ;;  %2849 = vmatpush.bf16.msrb.mxu1 %v4959_v15  ;;  %v5746_v35 = vld [vmem:[#allocation6 + $0x14] sm:$0xf]  ;;  %v4962_v15 = vld [vmem:[#allocation6 + $0x100] sm:$0xf] }
 0x198   :  { %2812 = vmatpush.bf16.msra.mxu2 %v4979_v2  ;;  %v4847_v17 = vor.u32 %v5746_v35, %v4844_v10  ;;  %v4963_v20 = vor.u32 %v5777_v38, %v4962_v15  ;;  %v5776_v2 = vld [vmem:[#allocation6 + $0x104] sm:$0xf]  ;;  %2821 = vmatpush.bf16.msra.mxu3 %v5083_v8  ;;  %v5075_v15 = vor.u32 %v5805_v14, %v5074_v12  ;;  %v5794_v14 = vld [vmem:[#allocation6 + $0x194] sm:$0xf] }
 0x19b   :  { %2836 = vmatpush.bf16.msrb.mxu0 %v4887_v54  ;;  %2850 = vmatpush.bf16.msrb.mxu1 %v4951_v30  ;;  %v5760_v54 = vld [vmem:[#allocation6 + $0x84] sm:$0xf]  ;;  %v4839_v30 = vor.u32 %v5744_v63, %v4836_v62  ;;  %v5067_v63 = vor.u32 %v5803_v24, %v5066_v21  ;;  %v5028_v24 = vld [vmem:[#allocation6 + $0x188] sm:$0xf0] }
 0x19c   :  { %2813 = vmatpush.bf16.msra.mxu2 %v4971_v11  ;;  %v4903_v22 = vor.u32 %v5760_v54, %v4900_v3  ;;  %2822 = vmatpush.bf16.msra.mxu3 %v5075_v15  ;;  %v5058_v54 = vld [vmem:[#allocation6 + $0x1c0] sm:$0xf]  ;;  %v5801_v3 = vld [vmem:[#allocation6 + $0x1c4] sm:$0xf0]  ;;  %v5036_v15 = vld [vmem:[#allocation6 + $0x198] sm:$0xf0] }
 0x19d   :  { %v2179_v51 = vpop.f32.mrf.mxu1  ;;  %v5059_v31 = vor.u32 %v5801_v3, %v5058_v54  ;;  %v5792_v21 = vld [vmem:[#allocation6 + $0x184] sm:$0xf] }
 0x19f   :  { %2837 = vmatpush.bf16.msrb.mxu0 %v4879_v44  ;;  %2851 = vmatpush.bf16.msrb.mxu1 %v4943_v47  ;;  %v2165_v44 = vpop.f32.mrf.mxu0  ;;  %v2191_v45 = vpop.f32.mrf.mxu2  ;;  %v644_v47 = vperm.slane %v6246_v55, 2 }
 0x1a0   :  { %2814 = vmatpush.bf16.msra.mxu2 %v4963_v20  ;;  %v2205_v48 = vpop.f32.mrf.mxu3  ;;  %2823 = vmatpush.bf16.msra.mxu3 %v5067_v63  ;;  %v5031_v63 = vor.u32 %v5792_v21, %v5028_v24  ;;  %v5860_v21 = vld [vmem:[#allocation7 + $0x1a4] sm:$0xf] }
 0x1a1   :  { %v2164_v50 = vadd.f32 %v2163_v52, %v644_v47  ;;  %v5820_v24 = vld [vmem:[#allocation7 + $0x64] sm:$0xf] }
 0x1a3   :  { %2838 = vmatpush.bf16.msrb.mxu0 %v4871_v19  ;;  %2852 = vmatpush.bf16.msrb.mxu1 %v4935_v60  ;;  %v2178_v23 = vadd.f32 %v2177_v41, %v2164_v50  ;;  %v5806_v50 = vld [vmem:[#allocation6 + $0x1f4] sm:$0xf] }
 0x1a4   :  { %2863 = vmatpush.bf16.msrb.mxu2 %v5023_v16  ;;  %2824 = vmatpush.bf16.msra.mxu3 %v5059_v31 }
 0x1a5   :  { %v2192_v0 = vadd.f32 %v2191_v45, %v2178_v23  ;;  %v5034_v45 = vld [vmem:[#allocation6 + $0x190] sm:$0xf] }
 0x1a7   :  { %2839 = vmatpush.bf16.msrb.mxu0 %v4863_v33  ;;  %2853 = vmatpush.bf16.msrb.mxu1 %v4927_v4  ;;  %v2193_v60 = vpop.f32.mrf.mxu2  ;;  %v4964_v4 = vld [vmem:[#allocation6 + $0x108] sm:$0xf0]  ;;  %v2206_v5 = vadd.f32 %v2205_v48, %v2192_v0  ;;  %v5800_v0 = vld [vmem:[#allocation6 + $0x1c4] sm:$0xf] }
 0x1a8   :  { %2864 = vmatpush.bf16.msrb.mxu2 %v5015_v36  ;;  %v2207_v1 = vpop.f32.mrf.mxu3  ;;  %v4967_v27 = vor.u32 %v5776_v2, %v4964_v4  ;;  %v645_v2 = vperm.slane %v6246_v55, 3 }
 0x1ab   :  { %2840 = vmatpush.bf16.msrb.mxu0 %v4855_v56  ;;  %2854 = vmatpush.bf16.msrb.mxu1 %v4919_v58 }
 0x1ac   :  { %2865 = vmatpush.bf16.msrb.mxu2 %v5007_v32  ;;  %v5799_v32 = vld [vmem:[#allocation6 + $0x1b4] sm:$0xf0] }
 0x1ad   :  { %v5051_v41 = vor.u32 %v5799_v32, %v5050_v40 }
 0x1af   :  { %2841 = vmatpush.bf16.msrb.mxu0 %v4847_v17  ;;  %2855 = vmatpush.bf16.msrb.mxu1 %v4911_v46 }
 0x1b0   :  { %2866 = vmatpush.bf16.msrb.mxu2 %v4999_v43  ;;  %2825 = vmatpush.bf16.msra.mxu3 %v5051_v41  ;;  %v5797_v43 = vld [vmem:[#allocation6 + $0x1a4] sm:$0xf0] }
 0x1b3   :  { %2842 = vmatpush.bf16.msrb.mxu0 %v4839_v30  ;;  %2856 = vmatpush.bf16.msrb.mxu1 %v4903_v22  ;;  %v2219_v19 = vpop.f32.mrf.mxu0 }
 0x1b4   :  { %2867 = vmatpush.bf16.msrb.mxu2 %v4991_v61  ;;  %v2220_v56 = vadd.f32 %v2219_v19, %v2206_v5  ;;  %v5027_v61 = vor.u32 %v5793_v9, %v5026_v49  ;;  %v5076_v19 = vld [vmem:[#allocation6 + $0x1e8] sm:$0xf0]  ;;  %v5798_v5 = vld [vmem:[#allocation6 + $0x1b4] sm:$0xf]  ;;  %v5838_v49 = vld [vmem:[#allocation7 + $0xec] sm:$0xf0] }
 0x1b5   :  { %v2233_v33 = vpop.f32.mrf.mxu1  ;;  %v5836_v9 = vld [vmem:[#allocation7 + $0xe4] sm:$0xf] }
 0x1b6   :  { %2843 = vmatmul.bf16.vlgmr.msrb.gmra.mxu0 %v6279_v25  ;;  %2857 = vmatmul.bf16.vlgmr.msrb.gmra.mxu1 %v6282_v59  ;;  %v4980_v25 = vld [vmem:[#allocation6 + $0x128] sm:$0xf0]  ;;  %v2166_v59 = vadd.f32 %v2165_v44, %v644_v47  ;;  %v2234_v38 = vadd.f32 %v2233_v33, %v2220_v56  ;;  %v5043_v44 = vor.u32 %v5797_v43, %v5042_v42  ;;  %v5795_v47 = vld [vmem:[#allocation6 + $0x194] sm:$0xf0] }
 0x1b7   :  { %v4983_v26 = vor.u32 %v5780_v53, %v4980_v25  ;;  %v5035_v48 = vor.u32 %v5795_v47, %v5034_v45  ;;  %v5047_v56 = vor.u32 %v5796_v7, %v5044_v28  ;;  %v5314_v28 = vld [vmem:[#allocation7 + $0x1c0] sm:$0xf] }
 0x1b8   :  { %v2180_v18 = vadd.f32 %v2179_v51, %v2166_v59  ;;  %2826 = vmatpush.bf16.msra.mxu3 %v5043_v44  ;;  %v5084_v51 = vld [vmem:[#allocation6 + $0x1f8] sm:$0xf0]  ;;  %v5802_v59 = vld [vmem:[#allocation6 + $0x1d4] sm:$0xf] }
 0x1b9   :  { %2868 = vmatpush.bf16.msrb.mxu2 %v4983_v26  ;;  %v5087_v53 = vor.u32 %v5806_v50, %v5084_v51  ;;  %v5804_v26 = vld [vmem:[#allocation6 + $0x1e4] sm:$0xf]  ;;  %v5204_v50 = vld [vmem:[#allocation7 + $0xf0] sm:$0xf0]  ;;  %v5186_v51 = vld [vmem:[#allocation7 + $0xc0] sm:$0xf] }
 0x1ba   :  { %v2194_v6 = vadd.f32 %v2193_v60, %v2180_v18  ;;  %v5079_v23 = vor.u32 %v5804_v26, %v5076_v19  ;;  %v5068_v60 = vld [vmem:[#allocation6 + $0x1d8] sm:$0xf0]  ;;  %v5832_v26 = vld [vmem:[#allocation7 + $0xc4] sm:$0xf]  ;;  %v5188_v19 = vld [vmem:[#allocation7 + $0xd0] sm:$0xf0] }
 0x1bb   :  { %v2221_v11 = vpop.f32.mrf.mxu0  ;;  %v5071_v29 = vor.u32 %v5802_v59, %v5068_v60  ;;  %v5191_v59 = vor.u32 %v5832_v26, %v5188_v19  ;;  %v5170_v60 = vld [vmem:[#allocation7 + $0xa0] sm:$0xf]  ;;  %v5210_v26 = vld [vmem:[#allocation7 + $0xe8] sm:$0xf]  ;;  %v5839_v19 = vld [vmem:[#allocation7 + $0xf4] sm:$0xf0] }
 0x1bc   :  { %v2208_v35 = vadd.f32 %v2207_v1, %v2194_v6  ;;  %2827 = vmatpush.bf16.msra.mxu3 %v5035_v48  ;;  %v5060_v1 = vld [vmem:[#allocation6 + $0x1c8] sm:$0xf0]  ;;  %v5052_v6 = vld [vmem:[#allocation6 + $0x1b8] sm:$0xf0]  ;;  %v5202_v48 = vld [vmem:[#allocation7 + $0xe0] sm:$0xf] }
 0x1bd   :  { %2869 = vmatpush.bf16.msrb.mxu2 %v4975_v39  ;;  %v2235_v46 = vpop.f32.mrf.mxu1  ;;  %v5063_v39 = vor.u32 %v5800_v0, %v5060_v1  ;;  %v5172_v0 = vld [vmem:[#allocation7 + $0xb0] sm:$0xf0]  ;;  %v5330_v1 = vld [vmem:[#allocation7 + $0x1e0] sm:$0xf] }
 0x1be   :  { %v2222_v17 = vadd.f32 %v2221_v11, %v2208_v35 }
 0x1bf   :  { %v2247_v58 = vpop.f32.mrf.mxu2 }
 0x1c0   :  { %v2261_v10 = vpop.f32.mrf.mxu3  ;;  %v2248_v20 = vadd.f32 %v2247_v58, %v2234_v38  ;;  %v2236_v62 = vadd.f32 %v2235_v46, %v2222_v17  ;;  %2828 = vmatpush.bf16.msra.mxu3 %v5027_v61  ;;  %v5039_v17 = vor.u32 %v5794_v14, %v5036_v15  ;;  %v5203_v61 = vor.u32 %v5838_v49, %v5202_v48  ;;  %v5298_v15 = vld [vmem:[#allocation7 + $0x1a0] sm:$0xf] }
 0x1c1   :  { %2870 = vmatpush.bf16.msrb.mxu2 %v4967_v27  ;;  %v5055_v27 = vor.u32 %v5798_v5, %v5052_v6  ;;  %v5154_v6 = vld [vmem:[#allocation7 + $0x80] sm:$0xf] }
 0x1c2   :  { %v2262_v52 = vadd.f32 %v2261_v10, %v2248_v20  ;;  %3290 = vmatpush.bf16.msra.mxu0 %v5203_v61  ;;  %v5810_v61 = vld [vmem:[#allocation7 + $0xc] sm:$0xf0] }
 0x1c4   :  { %v2380_v36 = vmax.f32 %v2262_v52, 0.0  ;;  %2877 = vmatpush.bf16.msrb.mxu3 %v5087_v53  ;;  %v5834_v53 = vld [vmem:[#allocation7 + $0xcc] sm:$0xf0] }
 0x1c7   :  { %v2249_v16 = vpop.f32.mrf.mxu2 }
 0x1c8   :  { %v2250_v30 = vadd.f32 %v2249_v16, %v2236_v62  ;;  %v2263_v34 = vpop.f32.mrf.mxu3  ;;  %2878 = vmatpush.bf16.msrb.mxu3 %v5079_v23  ;;  %v5187_v23 = vor.u32 %v5834_v53, %v5186_v51  ;;  %v5092_v51 = vld [vmem:[#allocation7 + $0x10] sm:$0xf0] }
 0x1ca   :  { %v2264_v22 = vadd.f32 %v2263_v34, %v2250_v30  ;;  %3291 = vmatpush.bf16.msra.mxu0 %v5187_v23  ;;  %v5837_v23 = vld [vmem:[#allocation7 + $0xec] sm:$0xf] }
 0x1cc   :  { %v2384_v37 = vmax.f32 %v2264_v22, 0.0  ;;  %2879 = vmatpush.bf16.msrb.mxu3 %v5071_v29  ;;  %v5830_v29 = vld [vmem:[#allocation7 + $0xac] sm:$0xf0] }
 0x1ce   :  { %v2388_v57 = vpack.c.bf16 %v2384_v37, %v2380_v36 }
 0x1d0   :  { %2815 = vmatmul.bf16.vlgmr.msra.gmra.mxu2 %v2388_v57  ;;  %2880 = vmatpush.bf16.msrb.mxu3 %v5063_v39  ;;  %v5870_v39 = vld [vmem:[#allocation7 + $0x1ec] sm:$0xf0] }
 0x1d3   :  { %v2275_v25 = vpop.f32.mrf.mxu0 }
 0x1d4   :  { %v2276_v8 = vadd.f32 %v2275_v25, %v645_v2  ;;  %2881 = vmatpush.bf16.msrb.mxu3 %v5055_v27  ;;  %v5207_v25 = vor.u32 %v5836_v9, %v5204_v50  ;;  %v5826_v27 = vld [vmem:[#allocation7 + $0x8c] sm:$0xf0]  ;;  %v5090_v9 = vld [vmem:[#allocation7] sm:$0xf]  ;;  %v5808_v50 = vld [vmem:[#allocation7 + $0x4] sm:$0xf] }
 0x1d5   :  { %v2289_v13 = vpop.f32.mrf.mxu1  ;;  %v5091_v53 = vor.u32 %v5810_v61, %v5090_v9 }
 0x1d6   :  { %v2290_v35 = vadd.f32 %v2289_v13, %v2276_v8  ;;  %3318 = vmatpush.bf16.msra.mxu2 %v5207_v25  ;;  %v5828_v13 = vld [vmem:[#allocation7 + $0xa4] sm:$0xf]  ;;  %v5095_v25 = vor.u32 %v5808_v50, %v5092_v51  ;;  %v5130_v51 = vld [vmem:[#allocation7 + $0x48] sm:$0xf] }
 0x1d7   :  { %v5175_v5 = vor.u32 %v5828_v13, %v5172_v0  ;;  %v5824_v8 = vld [vmem:[#allocation7 + $0x84] sm:$0xf]  ;;  %v5266_v13 = vld [vmem:[#allocation7 + $0x160] sm:$0xf]  ;;  %v5854_v0 = vld [vmem:[#allocation7 + $0x16c] sm:$0xf0] }
 0x1d8   :  { %2882 = vmatpush.bf16.msrb.mxu3 %v5047_v56  ;;  %v5156_v56 = vld [vmem:[#allocation7 + $0x90] sm:$0xf0] }
 0x1da   :  { %3319 = vmatpush.bf16.msra.mxu2 %v5191_v59  ;;  %v5211_v59 = vor.u32 %v5839_v19, %v5210_v26  ;;  %v5867_v19 = vld [vmem:[#allocation7 + $0x1d4] sm:$0xf0] }
 0x1db   :  { %v2277_v18 = vpop.f32.mrf.mxu0 }
 0x1dc   :  { %v2278_v10 = vadd.f32 %v2277_v18, %v645_v2  ;;  %2883 = vmatpush.bf16.msrb.mxu3 %v5039_v17  ;;  %v5171_v18 = vor.u32 %v5830_v29, %v5170_v60  ;;  %v5868_v2 = vld [vmem:[#allocation7 + $0x1e4] sm:$0xf]  ;;  %v5138_v17 = vld [vmem:[#allocation7 + $0x60] sm:$0xf]  ;;  %v5212_v60 = vld [vmem:[#allocation7 + $0xf8] sm:$0xf0] }
 0x1dd   :  { %v2291_v11 = vpop.f32.mrf.mxu1  ;;  %v5215_v29 = vor.u32 %v5837_v23, %v5212_v60  ;;  %v5817_v23 = vld [vmem:[#allocation7 + $0x4c] sm:$0xf] }
 0x1de   :  { %v2292_v20 = vadd.f32 %v2291_v11, %v2278_v10  ;;  %v5866_v11 = vld [vmem:[#allocation7 + $0x1cc] sm:$0xf0]  ;;  %v5316_v10 = vld [vmem:[#allocation7 + $0x1d0] sm:$0xf0]  ;;  %3292 = vmatpush.bf16.msra.mxu0 %v5171_v18  ;;  %3320 = vmatpush.bf16.msra.mxu2 %v5175_v5 }
 0x1df   :  { %v2303_v33 = vpop.f32.mrf.mxu2  ;;  %v5268_v18 = vld [vmem:[#allocation7 + $0x170] sm:$0xf0] }
 0x1e0   :  { %2871 = vmatmul.bf16.vlgmr.msrb.gmra.mxu2 %v2388_v57  ;;  %v2317_v4 = vpop.f32.mrf.mxu3  ;;  %v2304_v38 = vadd.f32 %v2303_v33, %v2290_v35  ;;  %2884 = vmatpush.bf16.msrb.mxu3 %v5031_v63  ;;  %v5331_v33 = vor.u32 %v5870_v39, %v5330_v1  ;;  %v5864_v35 = vld [vmem:[#allocation7 + $0x1c4] sm:$0xf]  ;;  %v5267_v39 = vor.u32 %v5854_v0, %v5266_v13  ;;  %v5865_v13 = vld [vmem:[#allocation7 + $0x1cc] sm:$0xf]  ;;  %v5324_v0 = vld [vmem:[#allocation7 + $0x1d8] sm:$0xf0] }
 0x1e1   :  { %v5319_v14 = vor.u32 %v5864_v35, %v5316_v10  ;;  %v5852_v1 = vld [vmem:[#allocation7 + $0x164] sm:$0xf]  ;;  %v5178_v10 = vld [vmem:[#allocation7 + $0xa8] sm:$0xf] }
 0x1e2   :  { %v2318_v62 = vadd.f32 %v2317_v4, %v2304_v38  ;;  %v5332_v4 = vld [vmem:[#allocation7 + $0x1f0] sm:$0xf0]  ;;  %3304 = vmatpush.bf16.msra.mxu1 %v5331_v33  ;;  %v5862_v38 = vld [vmem:[#allocation7 + $0x1ac] sm:$0xf0]  ;;  %v5194_v33 = vld [vmem:[#allocation7 + $0xc8] sm:$0xf] }
 0x1e3   :  { %v5335_v7 = vor.u32 %v5868_v2, %v5332_v4  ;;  %v5299_v63 = vor.u32 %v5862_v38, %v5298_v15  ;;  %v5835_v2 = vld [vmem:[#allocation7 + $0xd4] sm:$0xf0]  ;;  %v5271_v4 = vor.u32 %v5852_v1, %v5268_v18  ;;  %v5180_v38 = vld [vmem:[#allocation7 + $0xb8] sm:$0xf0]  ;;  %v5327_v1 = vor.u32 %v5865_v13, %v5324_v0  ;;  %v5114_v18 = vld [vmem:[#allocation7 + $0x28] sm:$0xf] }
 0x1e4   :  { %v5195_v5 = vor.u32 %v5835_v2, %v5194_v33  ;;  %v5815_v33 = vld [vmem:[#allocation7 + $0x34] sm:$0xf0]  ;;  %v5306_v2 = vld [vmem:[#allocation7 + $0x1a8] sm:$0xf]  ;;  %v5841_v0 = vld [vmem:[#allocation7 + $0x10c] sm:$0xf] }
 0x1e7   :  { %v2305_v12 = vpop.f32.mrf.mxu2 }
 0x1e8   :  { %v2319_v55 = vpop.f32.mrf.mxu3  ;;  %v2306_v16 = vadd.f32 %v2305_v12, %v2292_v20  ;;  %v5155_v12 = vor.u32 %v5826_v27, %v5154_v6  ;;  %v5822_v20 = vld [vmem:[#allocation7 + $0x6c] sm:$0xf0]  ;;  %v5833_v6 = vld [vmem:[#allocation7 + $0xcc] sm:$0xf]  ;;  %v5196_v27 = vld [vmem:[#allocation7 + $0xd8] sm:$0xf0] }
 0x1ea   :  { %v2320_v30 = vadd.f32 %v2319_v55, %v2306_v16  ;;  %v5159_v55 = vor.u32 %v5824_v8, %v5156_v56  ;;  %3293 = vmatpush.bf16.msra.mxu0 %v5155_v12  ;;  %v5850_v8 = vld [vmem:[#allocation7 + $0x14c] sm:$0xf0]  ;;  %v5848_v56 = vld [vmem:[#allocation7 + $0x144] sm:$0xf]  ;;  %v5831_v12 = vld [vmem:[#allocation7 + $0xb4] sm:$0xf0] }
 0x1eb   :  { %v5179_v15 = vor.u32 %v5831_v12, %v5178_v10  ;;  %v5098_v10 = vld [vmem:[#allocation7 + $0x8] sm:$0xf]  ;;  %v5811_v12 = vld [vmem:[#allocation7 + $0x14] sm:$0xf0] }
 0x1ec   :  { %3321 = vmatpush.bf16.msra.mxu2 %v5159_v55 }
 0x1f3   :  { %v2331_v58 = vpop.f32.mrf.mxu0 }
 0x1f4   :  { %v2332_v54 = vadd.f32 %v2331_v58, %v2318_v62  ;;  %v5315_v58 = vor.u32 %v5866_v11, %v5314_v28  ;;  %v5300_v62 = vld [vmem:[#allocation7 + $0x1b0] sm:$0xf0]  ;;  %v5199_v28 = vor.u32 %v5833_v6, %v5196_v27  ;;  %v5813_v6 = vld [vmem:[#allocation7 + $0x2c] sm:$0xf]  ;;  %v5116_v27 = vld [vmem:[#allocation7 + $0x38] sm:$0xf0] }
 0x1f5   :  { %v2345_v46 = vpop.f32.mrf.mxu1  ;;  %v5303_v16 = vor.u32 %v5860_v21, %v5300_v62  ;;  %v5252_v11 = vld [vmem:[#allocation7 + $0x150] sm:$0xf0]  ;;  %v5844_v21 = vld [vmem:[#allocation7 + $0x124] sm:$0xf]  ;;  %v5827_v62 = vld [vmem:[#allocation7 + $0x94] sm:$0xf0] }
 0x1f6   :  { %v2346_v34 = vadd.f32 %v2345_v46, %v2332_v54  ;;  %v5140_v46 = vld [vmem:[#allocation7 + $0x70] sm:$0xf0]  ;;  %3305 = vmatpush.bf16.msra.mxu1 %v5315_v58  ;;  %v5282_v54 = vld [vmem:[#allocation7 + $0x180] sm:$0xf]  ;;  %v5255_v35 = vor.u32 %v5848_v56, %v5252_v11  ;;  %v5861_v56 = vld [vmem:[#allocation7 + $0x1ac] sm:$0xf] }
 0x1f7   :  { %v5308_v11 = vld [vmem:[#allocation7 + $0x1b8] sm:$0xf0] }
 0x1fa   :  { %3306 = vmatpush.bf16.msra.mxu1 %v5299_v63  ;;  %v5162_v63 = vld [vmem:[#allocation7 + $0x88] sm:$0xf] }
 0x1fb   :  { %v2333_v3 = vpop.f32.mrf.mxu0 }
 0x1fc   :  { %v2334_v22 = vadd.f32 %v2333_v3, %v2320_v30  ;;  %v5858_v3 = vld [vmem:[#allocation7 + $0x18c] sm:$0xf0]  ;;  %v5856_v30 = vld [vmem:[#allocation7 + $0x184] sm:$0xf] }
 0x1fd   :  { %v2347_v37 = vpop.f32.mrf.mxu1 }
 0x1fe   :  { %v2348_v40 = vadd.f32 %v2347_v37, %v2334_v22  ;;  %v5122_v22 = vld [vmem:[#allocation7 + $0x40] sm:$0xf]  ;;  %v5816_v37 = vld [vmem:[#allocation7 + $0x44] sm:$0xf] }
 0x1ff   :  { %v2359_v52 = vpop.f32.mrf.mxu2 }
 0x200   :  { %v2373_v31 = vpop.f32.mrf.mxu3  ;;  %v2360_v36 = vadd.f32 %v2359_v52, %v2346_v34  ;;  %v5139_v52 = vor.u32 %v5822_v20, %v5138_v17  ;;  %v5143_v34 = vor.u32 %v5820_v24, %v5140_v46  ;;  %v5234_v17 = vld [vmem:[#allocation7 + $0x120] sm:$0xf]  ;;  %v5846_v20 = vld [vmem:[#allocation7 + $0x12c] sm:$0xf0]  ;;  %v5236_v46 = vld [vmem:[#allocation7 + $0x130] sm:$0xf0] }
 0x201   :  { %v5235_v24 = vor.u32 %v5846_v20, %v5234_v17  ;;  %v5100_v17 = vld [vmem:[#allocation7 + $0x18] sm:$0xf0] }
 0x202   :  { %v2374_v41 = vadd.f32 %v2373_v31, %v2360_v36  ;;  %v5284_v31 = vld [vmem:[#allocation7 + $0x190] sm:$0xf0]  ;;  %v5818_v36 = vld [vmem:[#allocation7 + $0x4c] sm:$0xf0]  ;;  %3294 = vmatpush.bf16.msra.mxu0 %v5139_v52  ;;  %3322 = vmatpush.bf16.msra.mxu2 %v5143_v34  ;;  %v5164_v52 = vld [vmem:[#allocation7 + $0x98] sm:$0xf0] }
 0x203   :  { %v5842_v34 = vld [vmem:[#allocation7 + $0x10c] sm:$0xf0] }
 0x204   :  { %v2381_v44 = vmax.f32 %v2374_v41, 0.0  ;;  %v5287_v41 = vor.u32 %v5856_v30, %v5284_v31  ;;  %v5218_v31 = vld [vmem:[#allocation7 + $0x100] sm:$0xf] }
 0x207   :  { %v2361_v32 = vpop.f32.mrf.mxu2 }
 0x208   :  { %v2362_v57 = vadd.f32 %v2361_v32, %v2348_v40  ;;  %v2375_v42 = vpop.f32.mrf.mxu3  ;;  %v5124_v40 = vld [vmem:[#allocation7 + $0x50] sm:$0xf0]  ;;  %v5283_v32 = vor.u32 %v5858_v3, %v5282_v54  ;;  %v5163_v54 = vor.u32 %v5827_v62, %v5162_v63  ;;  %v5825_v3 = vld [vmem:[#allocation7 + $0x8c] sm:$0xf]  ;;  %v5292_v63 = vld [vmem:[#allocation7 + $0x198] sm:$0xf0] }
 0x209   :  { %v5167_v30 = vor.u32 %v5825_v3, %v5164_v52  ;;  %v5855_v3 = vld [vmem:[#allocation7 + $0x174] sm:$0xf0]  ;;  %v5853_v52 = vld [vmem:[#allocation7 + $0x16c] sm:$0xf] }
 0x20a   :  { %v2376_v43 = vadd.f32 %v2375_v42, %v2362_v57  ;;  %v5123_v57 = vor.u32 %v5818_v36, %v5122_v22  ;;  %v5127_v42 = vor.u32 %v5816_v37, %v5124_v40  ;;  %3307 = vmatpush.bf16.msra.mxu1 %v5283_v32  ;;  %v5840_v22 = vld [vmem:[#allocation7 + $0x104] sm:$0xf]  ;;  %v5219_v36 = vor.u32 %v5842_v34, %v5218_v31  ;;  %v5220_v37 = vld [vmem:[#allocation7 + $0x110] sm:$0xf0]  ;;  %v5146_v40 = vld [vmem:[#allocation7 + $0x68] sm:$0xf] }
 0x20b   :  { %v5823_v32 = vld [vmem:[#allocation7 + $0x74] sm:$0xf0]  ;;  %v5276_v31 = vld [vmem:[#allocation7 + $0x178] sm:$0xf0] }
 0x20c   :  { %v2385_v45 = vmax.f32 %v2376_v43, 0.0  ;;  %v5106_v43 = vld [vmem:[#allocation7 + $0x20] sm:$0xf]  ;;  %3295 = vmatpush.bf16.msra.mxu0 %v5123_v57  ;;  %3323 = vmatpush.bf16.msra.mxu2 %v5127_v42  ;;  %v5147_v57 = vor.u32 %v5823_v32, %v5146_v40  ;;  %v5338_v42 = vld [vmem:[#allocation7 + $0x1e8] sm:$0xf] }
 0x20d   :  { %v5851_v40 = vld [vmem:[#allocation7 + $0x154] sm:$0xf0]  ;;  %v5849_v32 = vld [vmem:[#allocation7 + $0x14c] sm:$0xf] }
 0x20e   :  { %v2389_v47 = vpack.c.bf16 %v2385_v45, %v2381_v44  ;;  %v5814_v44 = vld [vmem:[#allocation7 + $0x2c] sm:$0xf0]  ;;  %v5812_v45 = vld [vmem:[#allocation7 + $0x24] sm:$0xf]  ;;  %3308 = vmatpush.bf16.msra.mxu1 %v5267_v39 }
 0x20f   :  { %v5107_v48 = vor.u32 %v5814_v44, %v5106_v43  ;;  %v5871_v43 = vld [vmem:[#allocation7 + $0x1f4] sm:$0xf0]  ;;  %v5821_v44 = vld [vmem:[#allocation7 + $0x6c] sm:$0xf] }
 0x210   :  { %2829 = vmatmul.bf16.vlgmr.msra.gmra.mxu3 %v2389_v47 }
 0x211   :  { %3332 = vmatpush.bf16.msra.mxu3 %v5335_v7  ;;  %3296 = vmatpush.bf16.msra.mxu0 %v5107_v48  ;;  %v5250_v7 = vld [vmem:[#allocation7 + $0x140] sm:$0xf]  ;;  %v5869_v48 = vld [vmem:[#allocation7 + $0x1ec] sm:$0xf] }
 0x212   :  { %v5251_v58 = vor.u32 %v5850_v8, %v5250_v7  ;;  %v5119_v8 = vor.u32 %v5813_v6, %v5116_v27 }
 0x213   :  { %v6289_v50 = vpop.f32.mrf.mxu0  ;;  %v2802_v7 = vpop.f32.mrf.mxu1 }
 0x214   :  { %3309 = vmatpush.bf16.msra.mxu1 %v5251_v58  ;;  %v6293_v58 = vld [vmem:[#allocation10 + $0x2] ss:$8 sm:$0x3] }
 0x215   :  { %3333 = vmatpush.bf16.msra.mxu3 %v5319_v14  ;;  %3297 = vmatpush.bf16.msra.mxu0 %v5091_v53  ;;  %v5829_v14 = vld [vmem:[#allocation7 + $0xac] sm:$0xf]  ;;  %v5819_v53 = vld [vmem:[#allocation7 + $0x54] sm:$0xf0]  ;;  %v2455_v62 = vperm.slane %v6293_v58, 0 }
 0x216   :  { %v5183_v55 = vor.u32 %v5829_v14, %v5180_v38  ;;  %v5131_v26 = vor.u32 %v5819_v53, %v5130_v51  ;;  %v5290_v14 = vld [vmem:[#allocation7 + $0x188] sm:$0xf]  ;;  %v5859_v38 = vld [vmem:[#allocation7 + $0x194] sm:$0xf0]  ;;  %v5244_v51 = vld [vmem:[#allocation7 + $0x138] sm:$0xf0] }
 0x218   :  { %3310 = vmatpush.bf16.msra.mxu1 %v5235_v24 }
 0x219   :  { %3334 = vmatpush.bf16.msra.mxu3 %v5303_v16  ;;  %3346 = vmatpush.bf16.msrb.mxu0 %v5211_v59  ;;  %v5239_v16 = vor.u32 %v5844_v21, %v5236_v46  ;;  %v5132_v59 = vld [vmem:[#allocation7 + $0x58] sm:$0xf0]  ;;  %v5291_v21 = vor.u32 %v5859_v38, %v5290_v14  ;;  %v5857_v46 = vld [vmem:[#allocation7 + $0x18c] sm:$0xf] }
 0x21b   :  { %v2790_v20 = vpop.f32.mrf.mxu0 }
 0x21c   :  { %3311 = vmatpush.bf16.msra.mxu1 %v5219_v36  ;;  %v5279_v36 = vor.u32 %v5853_v52, %v5276_v31  ;;  %v5875_v52 = vld [vmem:[#allocation9 + $0x18] sm:$0xff]  ;;  %v5884_v31 = vld [vmem:[#allocation9 + $0x60] sm:$0xff] }
 0x21d   :  { %3335 = vmatpush.bf16.msra.mxu3 %v5287_v41  ;;  %3347 = vmatpush.bf16.msrb.mxu0 %v5195_v5  ;;  %v5223_v41 = vor.u32 %v5840_v22, %v5220_v37  ;;  %v5863_v5 = vld [vmem:[#allocation7 + $0x1b4] sm:$0xf0]  ;;  %v5258_v37 = vld [vmem:[#allocation7 + $0x148] sm:$0xf] }
 0x220   :  { %2885 = vmatmul.bf16.vlgmr.msrb.gmra.mxu3 %v2389_v47  ;;  %v5108_v47 = vld [vmem:[#allocation7 + $0x30] sm:$0xf0] }
 0x221   :  { %v5111_v49 = vor.u32 %v5812_v45, %v5108_v47  ;;  %3336 = vmatpush.bf16.msra.mxu3 %v5271_v4  ;;  %3348 = vmatpush.bf16.msrb.mxu0 %v5179_v15  ;;  %v5339_v45 = vor.u32 %v5871_v43, %v5338_v42  ;;  %v5148_v47 = vld [vmem:[#allocation7 + $0x78] sm:$0xf0]  ;;  %v5115_v4 = vor.u32 %v5815_v33, %v5114_v18  ;;  %v2804_v42 = vpop.f32.mrf.mxu1 }
 0x222   :  { %v5151_v9 = vor.u32 %v5821_v44, %v5148_v47  ;;  %v5099_v15 = vor.u32 %v5811_v12, %v5098_v10  ;;  %v5259_v43 = vor.u32 %v5851_v40, %v5258_v37  ;;  %v2791_v44 = vadd.f32 %v2790_v20, %v2455_v62  ;;  %v5903_v37 = vld [vmem:[#allocation9 + $0xf8] sm:$0xff]  ;;  %v5873_v40 = vld [vmem:[#allocation9 + $0x8] sm:$0xff] }
 0x223   :  { %3324 = vmatpush.bf16.msra.mxu2 %v5111_v49  ;;  %v5340_v49 = vld [vmem:[#allocation7 + $0x1f8] sm:$0xf0]  ;;  %3360 = vmatpush.bf16.msrb.mxu1 %v5339_v45 }
 0x224   :  { %v5343_v61 = vor.u32 %v5869_v48, %v5340_v49  ;;  %v5242_v48 = vld [vmem:[#allocation7 + $0x128] sm:$0xf]  ;;  %v5847_v49 = vld [vmem:[#allocation7 + $0x134] sm:$0xf0]  ;;  %v2805_v53 = vadd.f32 %v2804_v42, %v2791_v44  ;;  %v5872_v42 = vld [vmem:[#allocation9] sm:$0xff] }
 0x225   :  { %3337 = vmatpush.bf16.msra.mxu3 %v5255_v35  ;;  %3349 = vmatpush.bf16.msrb.mxu0 %v5163_v54  ;;  %v5311_v35 = vor.u32 %v5861_v56, %v5308_v11  ;;  %v5274_v54 = vld [vmem:[#allocation7 + $0x168] sm:$0xf] }
 0x226   :  { %v5881_v44 = vld [vmem:[#allocation9 + $0x48] sm:$0xff] }
 0x227   :  { %3325 = vmatpush.bf16.msra.mxu2 %v5095_v25  ;;  %v5322_v25 = vld [vmem:[#allocation7 + $0x1c8] sm:$0xf] }
 0x228   :  { %v5323_v60 = vor.u32 %v5867_v19, %v5322_v25 }
 0x229   :  { %3338 = vmatpush.bf16.msra.mxu3 %v5239_v16  ;;  %3350 = vmatpush.bf16.msrb.mxu0 %v5147_v57  ;;  %v5295_v16 = vor.u32 %v5857_v46, %v5292_v63  ;;  %v5260_v57 = vld [vmem:[#allocation7 + $0x158] sm:$0xf0]  ;;  %v5878_v46 = vld [vmem:[#allocation9 + $0x30] sm:$0xff] }
 0x22a   :  { %3361 = vmatpush.bf16.msrb.mxu1 %v5323_v60  ;;  %v5263_v47 = vor.u32 %v5849_v32, %v5260_v57  ;;  %v5843_v60 = vld [vmem:[#allocation7 + $0x114] sm:$0xf0]  ;;  %v5893_v32 = vld [vmem:[#allocation9 + $0xa8] sm:$0xff]  ;;  %v5902_v57 = vld [vmem:[#allocation9 + $0xf0] sm:$0xff] }
 0x22b   :  { %3374 = vmatpush.bf16.msrb.mxu2 %v5215_v29  ;;  %v5135_v29 = vor.u32 %v5817_v23, %v5132_v59  ;;  %v5226_v59 = vld [vmem:[#allocation7 + $0x108] sm:$0xf]  ;;  %v5887_v63 = vld [vmem:[#allocation9 + $0x78] sm:$0xff] }
 0x22d   :  { %3339 = vmatpush.bf16.msra.mxu3 %v5223_v41  ;;  %3351 = vmatpush.bf16.msrb.mxu0 %v5131_v26  ;;  %v2789_v41 = vadd.f32 %v6289_v50, %v2455_v62  ;;  %v5243_v26 = vor.u32 %v5847_v49, %v5242_v48  ;;  %v5877_v62 = vld [vmem:[#allocation9 + $0x28] sm:$0xff]  ;;  %v5880_v48 = vld [vmem:[#allocation9 + $0x40] sm:$0xff] }
 0x22e   :  { %v5900_v49 = vld [vmem:[#allocation9 + $0xe0] sm:$0xff] }
 0x22f   :  { %3375 = vmatpush.bf16.msrb.mxu2 %v5199_v28  ;;  %v5307_v28 = vor.u32 %v5863_v5, %v5306_v2  ;;  %v2803_v45 = vadd.f32 %v2802_v7, %v2789_v41  ;;  %v5227_v2 = vor.u32 %v5843_v60, %v5226_v59  ;;  %v5882_v41 = vld [vmem:[#allocation9 + $0x50] sm:$0xff] }
 0x231   :  { %3388 = vmatpush.bf16.msrb.mxu3 %v5343_v61  ;;  %3352 = vmatpush.bf16.msrb.mxu0 %v5115_v4  ;;  %v5845_v61 = vld [vmem:[#allocation7 + $0x12c] sm:$0xf]  ;;  %v2456_v4 = vperm.slane %v6293_v58, 1 }
 0x232   :  { %3362 = vmatpush.bf16.msrb.mxu1 %v5307_v28  ;;  %v5247_v23 = vor.u32 %v5845_v61, %v5244_v51  ;;  %v5899_v61 = vld [vmem:[#allocation9 + $0xd8] sm:$0xff] }
 0x233   :  { %3376 = vmatpush.bf16.msrb.mxu2 %v5183_v55  ;;  %v5809_v55 = vld [vmem:[#allocation7 + $0xc] sm:$0xf]  ;;  %v2858_v18 = vpop.f32.mrf.mxu1 }
 0x234   :  { %v5103_v24 = vor.u32 %v5809_v55, %v5100_v17 }
 0x235   :  { %3389 = vmatpush.bf16.msrb.mxu3 %v5327_v1  ;;  %3353 = vmatpush.bf16.msrb.mxu0 %v5099_v15  ;;  %v5228_v1 = vld [vmem:[#allocation7 + $0x118] sm:$0xf0] }
 0x236   :  { %3363 = vmatpush.bf16.msrb.mxu1 %v5291_v21  ;;  %v5231_v6 = vor.u32 %v5841_v0, %v5228_v1 }
 0x237   :  { %3377 = vmatpush.bf16.msrb.mxu2 %v5167_v30  ;;  %v5275_v30 = vor.u32 %v5855_v3, %v5274_v54  ;;  %v5876_v54 = vld [vmem:[#allocation9 + $0x20] sm:$0xff]  ;;  %v5885_v3 = vld [vmem:[#allocation9 + $0x68] sm:$0xff] }
 0x239   :  { %3390 = vmatpush.bf16.msrb.mxu3 %v5311_v35 }
 0x23a   :  { %3364 = vmatpush.bf16.msrb.mxu1 %v5275_v30  ;;  %v5895_v30 = vld [vmem:[#allocation9 + $0xb8] sm:$0xff] }
 0x23b   :  { %3378 = vmatpush.bf16.msrb.mxu2 %v5151_v9  ;;  %v2844_v9 = vpop.f32.mrf.mxu0  ;;  %v2860_v35 = vpop.f32.mrf.mxu1 }
 0x23c   :  { %v2845_v28 = vadd.f32 %v2844_v9, %v2456_v4  ;;  %v5890_v9 = vld [vmem:[#allocation9 + $0x90] sm:$0xff] }
 0x23d   :  { %3391 = vmatpush.bf16.msrb.mxu3 %v5295_v16  ;;  %v5886_v16 = vld [vmem:[#allocation9 + $0x70] sm:$0xff] }
 0x23e   :  { %3365 = vmatpush.bf16.msrb.mxu1 %v5259_v43  ;;  %v2859_v11 = vadd.f32 %v2858_v18, %v2845_v28  ;;  %v5892_v43 = vld [vmem:[#allocation9 + $0xa0] sm:$0xff] }
 0x23f   :  { %3379 = vmatpush.bf16.msrb.mxu2 %v5135_v29 }
 0x241   :  { %3392 = vmatpush.bf16.msrb.mxu3 %v5279_v36  ;;  %v5883_v36 = vld [vmem:[#allocation9 + $0x58] sm:$0xff] }
 0x242   :  { %3366 = vmatpush.bf16.msrb.mxu1 %v5243_v26  ;;  %v5888_v26 = vld [vmem:[#allocation9 + $0x80] sm:$0xff] }
 0x243   :  { %3380 = vmatpush.bf16.msrb.mxu2 %v5119_v8  ;;  %v2846_v7 = vpop.f32.mrf.mxu0 }
 0x244   :  { %v2847_v56 = vadd.f32 %v2846_v7, %v2456_v4 }
 0x245   :  { %3393 = vmatpush.bf16.msrb.mxu3 %v5263_v47  ;;  %v5891_v47 = vld [vmem:[#allocation9 + $0x98] sm:$0xff] }
 0x246   :  { %3367 = vmatpush.bf16.msrb.mxu1 %v5227_v2  ;;  %v2861_v12 = vadd.f32 %v2860_v35, %v2847_v56 }
 0x247   :  { %3381 = vmatpush.bf16.msrb.mxu2 %v5103_v24  ;;  %v5879_v24 = vld [vmem:[#allocation9 + $0x38] sm:$0xff] }
 0x249   :  { %3394 = vmatpush.bf16.msrb.mxu3 %v5247_v23  ;;  %v127_v23 = vld [vmem:[#allocation10 + $0x3] ss:$8 sm:$0xf] }
 0x24d   :  { %3395 = vmatpush.bf16.msrb.mxu3 %v5231_v6 }
 0x253   :  { %v6291_v39 = vpop.f32.mrf.mxu2 }
 0x254   :  { %v2817_v25 = vadd.f32 %v6291_v39, %v2803_v45  ;;  %v5901_v45 = vld [vmem:[#allocation9 + $0xe8] sm:$0xff] }
 0x25b   :  { %v2818_v34 = vpop.f32.mrf.mxu2 }
 0x25c   :  { %v2819_v19 = vadd.f32 %v2818_v34, %v2805_v53  ;;  %v5874_v34 = vld [vmem:[#allocation9 + $0x10] sm:$0xff]  ;;  %v5889_v53 = vld [vmem:[#allocation9 + $0x88] sm:$0xff] }
 0x263   :  { %v2872_v33 = vpop.f32.mrf.mxu2 }
 0x264   :  { %v2873_v14 = vadd.f32 %v2872_v33, %v2859_v11  ;;  %v2963_v33 = vperm.slane %v127_v23, 1 }
 0x26b   :  { %v2874_v10 = vpop.f32.mrf.mxu2 }
 0x26c   :  { %v2875_v15 = vadd.f32 %v2874_v10, %v2861_v12 }
 0x293   :  { %v2830_v22 = vpop.f32.mrf.mxu3 }
 0x294   :  { %v2831_v50 = vadd.f32 %v2830_v22, %v2817_v25  ;;  %v5894_v22 = vld [vmem:[#allocation9 + $0xb0] sm:$0xff] }
 0x295   :  { %v5898_v25 = vld [vmem:[#allocation9 + $0xd0] sm:$0xff] }
 0x296   :  { %v2891_v5 = vmax.f32 %v2831_v50, 0.0  ;;  %v5897_v50 = vld [vmem:[#allocation9 + $0xc8] sm:$0xff] }
 0x29b   :  { %v2832_v29 = vpop.f32.mrf.mxu3 }
 0x29c   :  { %v2833_v13 = vadd.f32 %v2832_v29, %v2819_v19  ;;  %v2962_v29 = vperm.slane %v127_v23, 0 }
 0x29e   :  { %v2893_v39 = vmax.f32 %v2833_v13, 0.0  ;;  %v5896_v13 = vld [vmem:[#allocation9 + $0xc0] sm:$0xff] }
 0x2a0   :  { %v2895_v27 = vpack.c.bf16 %v2893_v39, %v2891_v5 }
 0x2a2   :  { %3298 = vmatmul.bf16.vlgmr.msra.gmra.mxu0 %v2895_v27  ;;  %3326 = vmatmul.bf16.vlgmr.msra.gmra.mxu2 %v2895_v27 }
 0x2a3   :  { %v2886_v8 = vpop.f32.mrf.mxu3  ;;  %3670 = vmatpush.bf16.msra.mxu0 %v5879_v24  ;;  %3698 = vmatpush.bf16.msra.mxu2 %v5895_v30  ;;  %v2965_v24 = vperm.slane %v127_v23, 3 }
 0x2a4   :  { %v2887_v58 = vadd.f32 %v2886_v8, %v2873_v14 }
 0x2a6   :  { %v2892_v17 = vmax.f32 %v2887_v58, 0.0 }
 0x2a7   :  { %3671 = vmatpush.bf16.msra.mxu0 %v5878_v46  ;;  %3699 = vmatpush.bf16.msra.mxu2 %v5894_v22 }
 0x2ab   :  { %v2888_v38 = vpop.f32.mrf.mxu3  ;;  %3672 = vmatpush.bf16.msra.mxu0 %v5877_v62  ;;  %3700 = vmatpush.bf16.msra.mxu2 %v5893_v32 }
 0x2ac   :  { %v2889_v55 = vadd.f32 %v2888_v38, %v2875_v15  ;;  %v2964_v15 = vperm.slane %v127_v23, 2 }
 0x2ae   :  { %v2894_v20 = vmax.f32 %v2889_v55, 0.0 }
 0x2af   :  { %3673 = vmatpush.bf16.msra.mxu0 %v5876_v54  ;;  %3701 = vmatpush.bf16.msra.mxu2 %v5892_v43 }
 0x2b0   :  { %v2896_v21 = vpack.c.bf16 %v2894_v20, %v2892_v17 }
 0x2b2   :  { %3312 = vmatmul.bf16.vlgmr.msra.gmra.mxu1 %v2896_v21  ;;  %3340 = vmatmul.bf16.vlgmr.msra.gmra.mxu3 %v2896_v21 }
 0x2b3   :  { %3354 = vmatmul.bf16.vlgmr.msrb.gmra.mxu0 %v2895_v27  ;;  %3382 = vmatmul.bf16.vlgmr.msrb.gmra.mxu2 %v2895_v27 }
 0x2b4   :  { %3684 = vmatpush.bf16.msra.mxu1 %v5887_v63  ;;  %3674 = vmatpush.bf16.msra.mxu0 %v5875_v52 }
 0x2b5   :  { %3712 = vmatpush.bf16.msra.mxu3 %v5903_v37  ;;  %3702 = vmatpush.bf16.msra.mxu2 %v5891_v47 }
 0x2b8   :  { %3685 = vmatpush.bf16.msra.mxu1 %v5886_v16  ;;  %3675 = vmatpush.bf16.msra.mxu0 %v5874_v34 }
 0x2b9   :  { %3713 = vmatpush.bf16.msra.mxu3 %v5902_v57  ;;  %3703 = vmatpush.bf16.msra.mxu2 %v5890_v9 }
 0x2bc   :  { %3686 = vmatpush.bf16.msra.mxu1 %v5885_v3  ;;  %3676 = vmatpush.bf16.msra.mxu0 %v5873_v40 }
 0x2bd   :  { %3714 = vmatpush.bf16.msra.mxu3 %v5901_v45  ;;  %3704 = vmatpush.bf16.msra.mxu2 %v5889_v53 }
 0x2c0   :  { %3687 = vmatpush.bf16.msra.mxu1 %v5884_v31  ;;  %3677 = vmatpush.bf16.msra.mxu0 %v5872_v42  ;;  %v128_v42 = vld [vmem:[#allocation10 + $0x4] ss:$0 sm:$0xff] }
 0x2c1   :  { %3715 = vmatpush.bf16.msra.mxu3 %v5900_v49  ;;  %3705 = vmatpush.bf16.msra.mxu2 %v5888_v26 }
 0x2c2   :  { %3368 = vmatmul.bf16.vlgmr.msrb.gmra.mxu1 %v2896_v21  ;;  %3396 = vmatmul.bf16.vlgmr.msrb.gmra.mxu3 %v2896_v21 }
 0x2c4   :  { %3688 = vmatpush.bf16.msra.mxu1 %v5883_v36 }
 0x2c5   :  { %3716 = vmatpush.bf16.msra.mxu3 %v5899_v61 }
 0x2c8   :  { %3689 = vmatpush.bf16.msra.mxu1 %v5882_v41 }
 0x2c9   :  { %3717 = vmatpush.bf16.msra.mxu3 %v5898_v25 }
 0x2cc   :  { %3690 = vmatpush.bf16.msra.mxu1 %v5881_v44 }
 0x2cd   :  { %3718 = vmatpush.bf16.msra.mxu3 %v5897_v50 }
 0x2d0   :  { %3691 = vmatpush.bf16.msra.mxu1 %v5880_v48 }
 0x2d1   :  { %3719 = vmatpush.bf16.msra.mxu3 %v5896_v13 }
 0x31f   :  { %v3299_v51 = vpop.f32.mrf.mxu0 }
 0x320   :  { %v3300_v0 = vadd.f32 %v3299_v51, %v2962_v29 }
 0x325   :  { %v3327_v19 = vpop.f32.mrf.mxu2 }
 0x326   :  { %v3328_v27 = vadd.f32 %v3327_v19, %v2963_v33 }
 0x327   :  { %v3301_v59 = vpop.f32.mrf.mxu0 }
 0x328   :  { %v3302_v2 = vadd.f32 %v3301_v59, %v2962_v29 }
 0x32d   :  { %v3329_v1 = vpop.f32.mrf.mxu2 }
 0x32e   :  { %v3330_v8 = vadd.f32 %v3329_v1, %v2963_v33 }
 0x32f   :  { %v3313_v60 = vpop.f32.mrf.mxu1 }
 0x330   :  { %v3314_v4 = vadd.f32 %v3313_v60, %v3300_v0  ;;  %v3355_v6 = vpop.f32.mrf.mxu0 }
 0x331   :  { %v3356_v20 = vadd.f32 %v3355_v6, %v2964_v15 }
 0x332   :  { %v3402_v7 = vmax.f32 %v3314_v4, 0.0 }
 0x335   :  { %v3341_v18 = vpop.f32.mrf.mxu3 }
 0x336   :  { %v3342_v56 = vadd.f32 %v3341_v18, %v3328_v27  ;;  %v3383_v12 = vpop.f32.mrf.mxu2 }
 0x337   :  { %v3315_v5 = vpop.f32.mrf.mxu1  ;;  %v3384_v3 = vadd.f32 %v3383_v12, %v2965_v24 }
 0x338   :  { %v3316_v39 = vadd.f32 %v3315_v5, %v3302_v2  ;;  %v3403_v58 = vmax.f32 %v3342_v56, 0.0  ;;  %v3357_v17 = vpop.f32.mrf.mxu0 }
 0x339   :  { %v3358_v46 = vadd.f32 %v3357_v17, %v2964_v15 }
 0x33a   :  { %v3406_v28 = vmax.f32 %v3316_v39, 0.0 }
 0x33c   :  { %v3410_v11 = vpack.c.bf16 %v3406_v28, %v3402_v7 }
 0x33d   :  { %v3343_v35 = vpop.f32.mrf.mxu3 }
 0x33e   :  { %v3344_v10 = vadd.f32 %v3343_v35, %v3330_v8  ;;  %3678 = vmatmul.bf16.vlgmr.msra.gmra.mxu0 %v3410_v11  ;;  %v3385_v54 = vpop.f32.mrf.mxu2 }
 0x33f   :  { %v3369_v14 = vpop.f32.mrf.mxu1  ;;  %v3386_v31 = vadd.f32 %v3385_v54, %v2965_v24 }
 0x340   :  { %v3407_v38 = vmax.f32 %v3344_v10, 0.0  ;;  %v3370_v63 = vadd.f32 %v3369_v14, %v3356_v20 }
 0x342   :  { %v3411_v55 = vpack.c.bf16 %v3407_v38, %v3403_v58  ;;  %v3404_v52 = vmax.f32 %v3370_v63, 0.0 }
 0x344   :  { %3692 = vmatmul.bf16.vlgmr.msra.gmra.mxu1 %v3411_v55 }
 0x345   :  { %v3397_v21 = vpop.f32.mrf.mxu3 }
 0x346   :  { %v3398_v34 = vadd.f32 %v3397_v21, %v3384_v3 }
 0x347   :  { %v3371_v62 = vpop.f32.mrf.mxu1 }
 0x348   :  { %v3372_v16 = vadd.f32 %v3371_v62, %v3358_v46  ;;  %v3405_v40 = vmax.f32 %v3398_v34, 0.0 }
 0x34a   :  { %v3408_v30 = vmax.f32 %v3372_v16, 0.0 }
 0x34c   :  { %v3412_v22 = vpack.c.bf16 %v3408_v30, %v3404_v52 }
 0x34d   :  { %v3399_v36 = vpop.f32.mrf.mxu3 }
 0x34e   :  { %v3400_v37 = vadd.f32 %v3399_v36, %v3386_v31  ;;  %3706 = vmatmul.bf16.vlgmr.msra.gmra.mxu2 %v3412_v22 }
 0x350   :  { %v3409_v32 = vmax.f32 %v3400_v37, 0.0 }
 0x352   :  { %v3413_v41 = vpack.c.bf16 %v3409_v32, %v3405_v40 }
 0x354   :  { %3720 = vmatmul.bf16.vlgmr.msra.gmra.mxu3 %v3413_v41 }
 0x3bb   :  { %v3679_v57 = vpop.f32.mrf.mxu0 }
 0x3bc   :  { %v3680_v45 = vadd.f32 %v3679_v57, %v128_v42 }
 0x3c1   :  { %v3693_v43 = vpop.f32.mrf.mxu1 }
 0x3c2   :  { %v3694_v47 = vadd.f32 %v3693_v43, %v3680_v45 }
 0x3c3   :  { %v3681_v49 = vpop.f32.mrf.mxu0 }
 0x3c4   :  { %v3682_v53 = vadd.f32 %v3681_v49, %v128_v42 }
 0x3c9   :  { %v3695_v51 = vpop.f32.mrf.mxu1 }
 0x3ca   :  { %v3696_v26 = vadd.f32 %v3695_v51, %v3682_v53 }
 0x3d1   :  { %v3707_v44 = vpop.f32.mrf.mxu2 }
 0x3d2   :  { %v3708_v48 = vadd.f32 %v3707_v44, %v3694_v47 }
 0x3d7   :  { %v3721_v9 = vpop.f32.mrf.mxu3 }
 0x3d8   :  { %v3722_v61 = vadd.f32 %v3721_v9, %v3708_v48 }
 0x3d9   :  { %v3709_v25 = vpop.f32.mrf.mxu2 }
 0x3da   :  { %3726 = vst [vmem:[%s6312_s7] sm:$0xff] %v3722_v61  ;;  %v3710_v19 = vadd.f32 %v3709_v25, %v3696_v26 }
 0x3df   :  { %v3723_v50 = vpop.f32.mrf.mxu3 }
 0x3e0   :  { %v3724_v23 = vadd.f32 %v3723_v50, %v3710_v19 }
 0x3e2   :  { %3727 = vst [vmem:[%s6312_s7 + $0x8] sm:$0xff] %v3724_v23 }
 0x3e3   :  { %3732 = vsyncpa [#allocation3], 1 }
 0x3e4   :  { %3733 = vsyncpa [#allocation5], 1 }
 0x3e5   :  { %3734 = vsyncpa [#allocation8], 1 }
 0x3e6   :  { %3735 = vsyncpa [#allocation11], 1 }

// kernel: actor_critic_forward.1
= control target key start
LH: loop header
LB: loop body
LE: loop exit
PB: predicated region body
PF: predicated region fallthrough
CT: control target
= control target key end

     0   :  { %12 = vsyncpa [#allocation3], 0  ;;  %s6305_s0 = inlined_call_operand.vmem [shape: f32[16,32], index: 0, kind: input, shape index: {}]   ;;  %s6306_s1 = inlined_call_operand.hbm [shape: bf16[32,1024], index: 1, kind: input, shape index: {}]   ;;  %s6307_s2 = inlined_call_operand.hbm [shape: bf16[1024,512], index: 2, kind: input, shape index: {}]   ;;  %s6308_s3 = inlined_call_operand.hbm [shape: bf16[512,256], index: 3, kind: input, shape index: {}]   ;;  %s6309_s4 = inlined_call_operand.hbm [shape: bf16[256,512], index: 4, kind: input, shape index: {}]   ;;  %s6310_s5 = inlined_call_operand.hbm [shape: bf16[512,128], index: 5, kind: input, shape index: {}]   ;;  %s6311_s6 = inlined_call_operand.hbm [shape: f32[8,1024], index: 6, kind: input, shape index: {}]   ;;  %s6312_s7 = inlined_call_operand.vmem [shape: f32[16,128], index: 7, kind: output, shape index: {}]  }
   0x1   :  { %13 = vsyncpa [#allocation5], 0 }
   0x2   :  { %14 = vsyncpa [#allocation8], 0  ;;  %s35_s26 = sshll.u32 %s6307_s2, 4  ;;  %s36_s26 = int_to_ptr.hbm [resolvable:$true] %s35_s26 }
   0x3   :  { %15 = vsyncpa [#allocation11], 0  ;;  %s6070_s27 = smov [#allocation4]   ;;  %s61_s8 = sshll.u32 %s6309_s4, 4  ;;  %s62_s8 = int_to_ptr.hbm [resolvable:$true] %s61_s8 }
   0x4   :  { %s37_s28 = sshll.u32 %s6070_s27, 4  ;;  %s6071_s9 = smov 256   ;;  %s38_s28 = int_to_ptr.vmem [resolvable:$true] %s37_s28 }
   0x5   :  { %s6072_s10 = smov 16   ;;  %s6073_s11 = smov [#allocation7]  }
   0x6   :  { %43 = dma.hbm_to_vmem [thread:$0]  %s36_s26, 32768, %s38_s28, [#allocation5], %s6071_s9, %s6071_s9, %s6072_s10  }
   0x7   :  { %s63_s12 = sshll.u32 %s6073_s11, 4  ;;  %s22_s15 = sshll.u32 %s6306_s1, 4  ;;  %s64_s12 = int_to_ptr.vmem [resolvable:$true] %s63_s12  ;;  %s23_s15 = int_to_ptr.hbm [resolvable:$true] %s22_s15 }
   0x8   :  { %69 = dma.hbm_to_vmem [thread:$0]  %s62_s8, 8192, %s64_s12, [#allocation8], %s6071_s9, %s6071_s9, %s6072_s10  }
   0x9   :  { %s6074_s2 = smov [#allocation2]   ;;  %s48_s4 = sshll.u32 %s6308_s3, 4  ;;  %s49_s4 = int_to_ptr.hbm [resolvable:$true] %s48_s4 }
   0xa   :  { %s24_s16 = sshll.u32 %s6074_s2, 4  ;;  %s6075_s19 = smov 512   ;;  %s25_s16 = int_to_ptr.vmem [resolvable:$true] %s24_s16 }
   0xb   :  { %s6076_s20 = smov 32   ;;  %s6077_s21 = smov [#allocation6]  }
   0xc   :  { %30 = dma.hbm_to_vmem [thread:$0]  %s23_s15, 2048, %s25_s16, [#allocation3], %s6075_s19, %s6075_s19, %s6076_s20  }
   0xd   :  { %s50_s22 = sshll.u32 %s6077_s21, 4  ;;  %s6078_s23 = smov 128   ;;  %s51_s22 = int_to_ptr.vmem [resolvable:$true] %s50_s22 }
   0xe   :  { %s6079_s24 = smov 8   ;;  %s74_s26 = sshll.u32 %s6310_s5, 4  ;;  %s75_s26 = int_to_ptr.hbm [resolvable:$true] %s74_s26 }
   0xf   :  { %56 = dma.hbm_to_vmem [thread:$0]  %s49_s4, 8192, %s51_s22, [#allocation5], %s6078_s23, %s6078_s23, %s6079_s24  }
  0x10   :  { %s6080_s27 = smov [#allocation9]   ;;  %s88_s30 = sshll.u32 %s6311_s6, 4  ;;  %s89_s30 = int_to_ptr.hbm [resolvable:$true] %s88_s30 }
  0x11   :  { %s76_s28 = sshll.u32 %s6080_s27, 4  ;;  %s6081_s8 = smov 64   ;;  %s77_s28 = int_to_ptr.vmem [resolvable:$true] %s76_s28 }
  0x12   :  { %s6082_s9 = smov 4   ;;  %s6083_s10 = smov [#allocation10]  }
  0x13   :  { %82 = dma.hbm_to_vmem [thread:$0]  %s75_s26, 4096, %s77_s28, [#allocation8], %s6081_s8, %s6081_s8, %s6082_s9  }
  0x14   :  { %s90_s11 = sshll.u32 %s6083_s10, 4  ;;  %s91_s11 = int_to_ptr.vmem [resolvable:$true] %s90_s11 }
  0x15   :  { %93 = dma.hbm_to_vmem [thread:$0]  %s89_s30, 1024, %s91_s11, [#allocation11]  }
  0x16   :  { %6062 = dma.done.wait [#allocation3], 2048  }
  0x17   :  { %6063 = vsyncadd [#allocation3], 4294965248 }
  0x18   :  { %6064 = dma.done.wait [#allocation5], 40960  }
  0x19   :  { %6065 = vsyncadd [#allocation5], 4294926336 }
  0x1a   :  { %6066 = dma.done.wait [#allocation8], 12288  }
  0x1b   :  { %6067 = vsyncadd [#allocation8], 4294955008 }
  0x1c   :  { %6068 = dma.done.wait [#allocation11], 1024  }
  0x1d   :  { %6069 = vsyncadd [#allocation11], 4294966272  ;;  %v3770_v0 = vld [vmem:[#allocation2 + $0x40] sm:$0xf]  ;;  %v5480_v2 = vld [vmem:[#allocation2 + $0x44] sm:$0xf] }
  0x1e   :  { %v5484_v1 = vld [vmem:[#allocation2 + $0x5c] sm:$0xf0]  ;;  %v3772_v4 = vld [vmem:[#allocation2 + $0x60] sm:$0xf0]  ;;  %v3778_v5 = vld [vmem:[#allocation2 + $0x48] sm:$0xf] }
  0x1f   :  { %v3771_v3 = vor.u32 %v5484_v1, %v3770_v0  ;;  %v5485_v6 = vld [vmem:[#allocation2 + $0x64] sm:$0xf0]  ;;  %v3775_v7 = vor.u32 %v5480_v2, %v3772_v4  ;;  %v5481_v9 = vld [vmem:[#allocation2 + $0x4c] sm:$0xf]  ;;  %v3738_v11 = vld [vmem:[#allocation2] sm:$0xf] }
  0x20   :  { %v3779_v8 = vor.u32 %v5485_v6, %v3778_v5  ;;  %v3780_v10 = vld [vmem:[#allocation2 + $0x68] sm:$0xf0]  ;;  %v5476_v13 = vld [vmem:[#allocation2 + $0x1c] sm:$0xf0]  ;;  %v5472_v14 = vld [vmem:[#allocation2 + $0x4] sm:$0xf] }
  0x21   :  { %255 = vmatpush.bf16.msra.mxu0 %v3771_v3  ;;  %v3783_v12 = vor.u32 %v5481_v9, %v3780_v10  ;;  %v3740_v15 = vld [vmem:[#allocation2 + $0x20] sm:$0xf0]  ;;  %269 = vmatpush.bf16.msra.mxu1 %v3775_v7  ;;  %v3739_v16 = vor.u32 %v5476_v13, %v3738_v11  ;;  %v3746_v18 = vld [vmem:[#allocation2 + $0x8] sm:$0xf]  ;;  %v5473_v20 = vld [vmem:[#allocation2 + $0xc] sm:$0xf] }
  0x22   :  { %283 = vmatpush.bf16.msra.mxu2 %v3779_v8  ;;  %v3743_v17 = vor.u32 %v5472_v14, %v3740_v15  ;;  %v5477_v19 = vld [vmem:[#allocation2 + $0x24] sm:$0xf0]  ;;  %v3748_v22 = vld [vmem:[#allocation2 + $0x28] sm:$0xf0]  ;;  %v129_v23 = vld [vmem:[%s6305_s0] sm:$0xff]  ;;  %vm245_vm0 = vcmask 261120  }
  0x23   :  { %297 = vmatpush.bf16.msra.mxu3 %v3783_v12  ;;  %v3747_v21 = vor.u32 %v5477_v19, %v3746_v18  ;;  %v130_v24 = vld [vmem:[%s6305_s0 + $0x8] sm:$0xff]  ;;  %v3751_v25 = vor.u32 %v5473_v20, %v3748_v22  ;;  %v3786_v27 = vld [vmem:[#allocation2 + $0x50] sm:$0xf]  ;;  %v5482_v29 = vld [vmem:[#allocation2 + $0x54] sm:$0xf] }
  0x24   :  { %v6148_v26 = vpack.c.bf16 %v130_v24, %v129_v23  ;;  %v5486_v28 = vld [vmem:[#allocation2 + $0x6c] sm:$0xf0]  ;;  %v3788_v31 = vld [vmem:[#allocation2 + $0x70] sm:$0xf0]  ;;  %v3794_v32 = vld [vmem:[#allocation2 + $0x58] sm:$0xf] }
  0x25   :  { %256 = vmatpush.bf16.msra.mxu0 %v3739_v16  ;;  %v3787_v30 = vor.u32 %v5486_v28, %v3786_v27  ;;  %v5487_v33 = vld [vmem:[#allocation2 + $0x74] sm:$0xf0]  ;;  %270 = vmatpush.bf16.msra.mxu1 %v3743_v17  ;;  %v3791_v34 = vor.u32 %v5482_v29, %v3788_v31  ;;  %v5483_v36 = vld [vmem:[#allocation2 + $0x5c] sm:$0xf]  ;;  %v3754_v38 = vld [vmem:[#allocation2 + $0x10] sm:$0xf] }
  0x26   :  { %284 = vmatpush.bf16.msra.mxu2 %v3747_v21  ;;  %v3795_v35 = vor.u32 %v5487_v33, %v3794_v32  ;;  %v3796_v37 = vld [vmem:[#allocation2 + $0x78] sm:$0xf0]  ;;  %v5478_v40 = vld [vmem:[#allocation2 + $0x2c] sm:$0xf0]  ;;  %v5474_v41 = vld [vmem:[#allocation2 + $0x14] sm:$0xf] }
  0x27   :  { %298 = vmatpush.bf16.msra.mxu3 %v3751_v25  ;;  %v3799_v39 = vor.u32 %v5483_v36, %v3796_v37  ;;  %v3756_v42 = vld [vmem:[#allocation2 + $0x30] sm:$0xf0]  ;;  %v3755_v43 = vor.u32 %v5478_v40, %v3754_v38  ;;  %v3762_v45 = vld [vmem:[#allocation2 + $0x18] sm:$0xf]  ;;  %v5475_v47 = vld [vmem:[#allocation2 + $0x1c] sm:$0xf] }
  0x28   :  { %3800 = vmatmul.msk.bf16.vlgmr.msra.gmra.mxu0 %vm245_vm0, %v6148_v26  ;;  %v3759_v44 = vor.u32 %v5474_v41, %v3756_v42  ;;  %v5479_v46 = vld [vmem:[#allocation2 + $0x34] sm:$0xf0]  ;;  %3801 = vmatmul.msk.bf16.vlgmr.msra.gmra.mxu1 %vm245_vm0, %v6148_v26  ;;  %v3764_v48 = vld [vmem:[#allocation2 + $0x38] sm:$0xf0]  ;;  %v3922_v49 = vld [vmem:[#allocation4 + $0xe0] sm:$0xf] }
  0x29   :  { %311 = vmatpush.bf16.msrb.mxu0 %v3787_v30  ;;  %325 = vmatpush.bf16.msrb.mxu1 %v3791_v34  ;;  %v5518_v50 = vld [vmem:[#allocation4 + $0xec] sm:$0xf0]  ;;  %v3763_v51 = vor.u32 %v5479_v46, %v3762_v45  ;;  %v4050_v53 = vld [vmem:[#allocation4 + $0x1e0] sm:$0xf]  ;;  %v3767_v56 = vor.u32 %v5475_v47, %v3764_v48 }
  0x2a   :  { %3802 = vmatmul.msk.bf16.vlgmr.msra.gmra.mxu2 %vm245_vm0, %v6148_v26  ;;  %3803 = vmatmul.msk.bf16.vlgmr.msra.gmra.mxu3 %vm245_vm0, %v6148_v26  ;;  %v3923_v52 = vor.u32 %v5518_v50, %v3922_v49  ;;  %v5550_v54 = vld [vmem:[#allocation4 + $0x1ec] sm:$0xf0]  ;;  %v3906_v55 = vld [vmem:[#allocation4 + $0xc0] sm:$0xf] }
  0x2b   :  { %339 = vmatpush.bf16.msrb.mxu2 %v3795_v35  ;;  %353 = vmatpush.bf16.msrb.mxu3 %v3799_v39  ;;  %v4051_v57 = vor.u32 %v5550_v54, %v4050_v53  ;;  %v5514_v58 = vld [vmem:[#allocation4 + $0xcc] sm:$0xf0]  ;;  %v4034_v59 = vld [vmem:[#allocation4 + $0x1c0] sm:$0xf] }
  0x2c   :  { %v5546_v60 = vld [vmem:[#allocation4 + $0x1cc] sm:$0xf0]  ;;  %v3907_v61 = vor.u32 %v5514_v58, %v3906_v55  ;;  %v4178_v62 = vld [vmem:[#allocation4 + $0x2e0] sm:$0xf] }
  0x2d   :  { %312 = vmatpush.bf16.msrb.mxu0 %v3755_v43  ;;  %326 = vmatpush.bf16.msrb.mxu1 %v3759_v44  ;;  %v5582_v63 = vld [vmem:[#allocation4 + $0x2ec] sm:$0xf0]  ;;  %v4306_v0 = vld [vmem:[#allocation4 + $0x3e0] sm:$0xf]  ;;  %v4035_v1 = vor.u32 %v5546_v60, %v4034_v59 }
  0x2e   :  { %v4179_v2 = vor.u32 %v5582_v63, %v4178_v62  ;;  %v5614_v3 = vld [vmem:[#allocation4 + $0x3ec] sm:$0xf0]  ;;  %v3890_v4 = vld [vmem:[#allocation4 + $0xa0] sm:$0xf] }
  0x2f   :  { %v5510_v5 = vld [vmem:[#allocation4 + $0xac] sm:$0xf0]  ;;  %340 = vmatpush.bf16.msrb.mxu2 %v3763_v51  ;;  %v4307_v6 = vor.u32 %v5614_v3, %v4306_v0  ;;  %v4018_v7 = vld [vmem:[#allocation4 + $0x1a0] sm:$0xf]  ;;  %354 = vmatpush.bf16.msrb.mxu3 %v3767_v56 }
  0x30   :  { %v5542_v8 = vld [vmem:[#allocation4 + $0x1ac] sm:$0xf0]  ;;  %v4162_v9 = vld [vmem:[#allocation4 + $0x2c0] sm:$0xf]  ;;  %v3891_v13 = vor.u32 %v5510_v5, %v3890_v4 }
  0x31   :  { %1930 = vmatpush.bf16.msra.mxu0 %v3923_v52  ;;  %1944 = vmatpush.bf16.msra.mxu1 %v4051_v57  ;;  %v5578_v10 = vld [vmem:[#allocation4 + $0x2cc] sm:$0xf0]  ;;  %v4290_v11 = vld [vmem:[#allocation4 + $0x3c0] sm:$0xf]  ;;  %v4019_v16 = vor.u32 %v5542_v8, %v4018_v7 }
  0x32   :  { %v5610_v12 = vld [vmem:[#allocation4 + $0x3cc] sm:$0xf0]  ;;  %v4163_v14 = vor.u32 %v5578_v10, %v4162_v9  ;;  %v4146_v17 = vld [vmem:[#allocation4 + $0x2a0] sm:$0xf] }
  0x33   :  { %1958 = vmatpush.bf16.msra.mxu2 %v4179_v2  ;;  %1972 = vmatpush.bf16.msra.mxu3 %v4307_v6  ;;  %v4291_v15 = vor.u32 %v5610_v12, %v4290_v11  ;;  %v5574_v18 = vld [vmem:[#allocation4 + $0x2ac] sm:$0xf0]  ;;  %v4274_v19 = vld [vmem:[#allocation4 + $0x3a0] sm:$0xf] }
  0x34   :  { %v5606_v20 = vld [vmem:[#allocation4 + $0x3ac] sm:$0xf0]  ;;  %v3874_v21 = vld [vmem:[#allocation4 + $0x80] sm:$0xf]  ;;  %v4147_v24 = vor.u32 %v5574_v18, %v4146_v17 }
  0x35   :  { %1931 = vmatpush.bf16.msra.mxu0 %v3907_v61  ;;  %1945 = vmatpush.bf16.msra.mxu1 %v4035_v1  ;;  %v5506_v22 = vld [vmem:[#allocation4 + $0x8c] sm:$0xf0]  ;;  %v4002_v23 = vld [vmem:[#allocation4 + $0x180] sm:$0xf]  ;;  %v4275_v27 = vor.u32 %v5606_v20, %v4274_v19 }
  0x36   :  { %v5538_v25 = vld [vmem:[#allocation4 + $0x18c] sm:$0xf0]  ;;  %v4130_v28 = vld [vmem:[#allocation4 + $0x280] sm:$0xf]  ;;  %v3875_v32 = vor.u32 %v5506_v22, %v3874_v21 }
  0x37   :  { %1959 = vmatpush.bf16.msra.mxu2 %v4163_v14  ;;  %1973 = vmatpush.bf16.msra.mxu3 %v4291_v15  ;;  %v5570_v29 = vld [vmem:[#allocation4 + $0x28c] sm:$0xf0]  ;;  %v4258_v30 = vld [vmem:[#allocation4 + $0x380] sm:$0xf]  ;;  %v4003_v33 = vor.u32 %v5538_v25, %v4002_v23 }
  0x38   :  { %v5602_v31 = vld [vmem:[#allocation4 + $0x38c] sm:$0xf0]  ;;  %v3858_v34 = vld [vmem:[#allocation4 + $0x60] sm:$0xf]  ;;  %v4131_v37 = vor.u32 %v5570_v29, %v4130_v28  ;;  %3804 = vmatmul.msk.bf16.vlgmr.msrb.gmra.mxu0 %vm245_vm0, %v6148_v26  ;;  %3805 = vmatmul.msk.bf16.vlgmr.msrb.gmra.mxu1 %vm245_vm0, %v6148_v26 }
  0x39   :  { %1932 = vmatpush.bf16.msra.mxu0 %v3891_v13  ;;  %1946 = vmatpush.bf16.msra.mxu1 %v4019_v16  ;;  %v5502_v35 = vld [vmem:[#allocation4 + $0x6c] sm:$0xf0]  ;;  %v3986_v36 = vld [vmem:[#allocation4 + $0x160] sm:$0xf]  ;;  %v4259_v39 = vor.u32 %v5602_v31, %v4258_v30 }
  0x3a   :  { %v5534_v38 = vld [vmem:[#allocation4 + $0x16c] sm:$0xf0]  ;;  %v4114_v40 = vld [vmem:[#allocation4 + $0x260] sm:$0xf]  ;;  %3806 = vmatmul.msk.bf16.vlgmr.msrb.gmra.mxu2 %vm245_vm0, %v6148_v26  ;;  %3807 = vmatmul.msk.bf16.vlgmr.msrb.gmra.mxu3 %vm245_vm0, %v6148_v26  ;;  %v3859_v44 = vor.u32 %v5502_v35, %v3858_v34 }
  0x3b   :  { %1960 = vmatpush.bf16.msra.mxu2 %v4147_v24  ;;  %1974 = vmatpush.bf16.msra.mxu3 %v4275_v27  ;;  %v5566_v41 = vld [vmem:[#allocation4 + $0x26c] sm:$0xf0]  ;;  %v4242_v42 = vld [vmem:[#allocation4 + $0x360] sm:$0xf]  ;;  %v3987_v45 = vor.u32 %v5534_v38, %v3986_v36 }
  0x3c   :  { %v5598_v43 = vld [vmem:[#allocation4 + $0x36c] sm:$0xf0]  ;;  %v3842_v46 = vld [vmem:[#allocation4 + $0x40] sm:$0xf]  ;;  %v4115_v49 = vor.u32 %v5566_v41, %v4114_v40 }
  0x3d   :  { %1933 = vmatpush.bf16.msra.mxu0 %v3875_v32  ;;  %1947 = vmatpush.bf16.msra.mxu1 %v4003_v33  ;;  %v5498_v47 = vld [vmem:[#allocation4 + $0x4c] sm:$0xf0]  ;;  %v3970_v48 = vld [vmem:[#allocation4 + $0x140] sm:$0xf]  ;;  %v4243_v51 = vor.u32 %v5598_v43, %v4242_v42 }
  0x3e   :  { %v5530_v50 = vld [vmem:[#allocation4 + $0x14c] sm:$0xf0]  ;;  %v4098_v52 = vld [vmem:[#allocation4 + $0x240] sm:$0xf]  ;;  %v3843_v56 = vor.u32 %v5498_v47, %v3842_v46 }
  0x3f   :  { %1961 = vmatpush.bf16.msra.mxu2 %v4131_v37  ;;  %1975 = vmatpush.bf16.msra.mxu3 %v4259_v39  ;;  %v5562_v53 = vld [vmem:[#allocation4 + $0x24c] sm:$0xf0]  ;;  %v4226_v54 = vld [vmem:[#allocation4 + $0x340] sm:$0xf]  ;;  %v3971_v26 = vor.u32 %v5530_v50, %v3970_v48 }
  0x40   :  { %v5594_v55 = vld [vmem:[#allocation4 + $0x34c] sm:$0xf0]  ;;  %v3826_v57 = vld [vmem:[#allocation4 + $0x20] sm:$0xf]  ;;  %v4099_v60 = vor.u32 %v5562_v53, %v4098_v52 }
  0x41   :  { %1934 = vmatpush.bf16.msra.mxu0 %v3859_v44  ;;  %1948 = vmatpush.bf16.msra.mxu1 %v3987_v45  ;;  %v5494_v58 = vld [vmem:[#allocation4 + $0x2c] sm:$0xf0]  ;;  %v3954_v59 = vld [vmem:[#allocation4 + $0x120] sm:$0xf]  ;;  %v4227_v62 = vor.u32 %v5594_v55, %v4226_v54 }
  0x42   :  { %v5526_v61 = vld [vmem:[#allocation4 + $0x12c] sm:$0xf0]  ;;  %v4082_v63 = vld [vmem:[#allocation4 + $0x220] sm:$0xf]  ;;  %v3827_v3 = vor.u32 %v5494_v58, %v3826_v57 }
  0x43   :  { %1962 = vmatpush.bf16.msra.mxu2 %v4115_v49  ;;  %1976 = vmatpush.bf16.msra.mxu3 %v4243_v51  ;;  %v5558_v0 = vld [vmem:[#allocation4 + $0x22c] sm:$0xf0]  ;;  %v4210_v1 = vld [vmem:[#allocation4 + $0x320] sm:$0xf]  ;;  %v3955_v6 = vor.u32 %v5526_v61, %v3954_v59 }
  0x44   :  { %v5590_v2 = vld [vmem:[#allocation4 + $0x32c] sm:$0xf0]  ;;  %v3810_v4 = vld [vmem:[#allocation4] sm:$0xf]  ;;  %v4083_v10 = vor.u32 %v5558_v0, %v4082_v63 }
  0x45   :  { %1935 = vmatpush.bf16.msra.mxu0 %v3843_v56  ;;  %v5490_v5 = vld [vmem:[#allocation4 + $0xc] sm:$0xf0]  ;;  %1949 = vmatpush.bf16.msra.mxu1 %v3971_v26  ;;  %v3938_v7 = vld [vmem:[#allocation4 + $0x100] sm:$0xf]  ;;  %v4211_v14 = vor.u32 %v5590_v2, %v4210_v1 }
  0x46   :  { %v5522_v8 = vld [vmem:[#allocation4 + $0x10c] sm:$0xf0]  ;;  %v4434_v9 = vld [vmem:[#allocation4 + $0x4e0] sm:$0xf]  ;;  %v3811_v18 = vor.u32 %v5490_v5, %v3810_v4 }
  0x47   :  { %1963 = vmatpush.bf16.msra.mxu2 %v4099_v60  ;;  %1977 = vmatpush.bf16.msra.mxu3 %v4227_v62  ;;  %v5646_v11 = vld [vmem:[#allocation4 + $0x4ec] sm:$0xf0]  ;;  %v4562_v12 = vld [vmem:[#allocation4 + $0x5e0] sm:$0xf]  ;;  %v3939_v22 = vor.u32 %v5522_v8, %v3938_v7 }
  0x48   :  { %v5678_v13 = vld [vmem:[#allocation4 + $0x5ec] sm:$0xf0]  ;;  %v4066_v15 = vld [vmem:[#allocation4 + $0x200] sm:$0xf]  ;;  %v4435_v23 = vor.u32 %v5646_v11, %v4434_v9 }
  0x49   :  { %v5554_v16 = vld [vmem:[#allocation4 + $0x20c] sm:$0xf0]  ;;  %v4194_v17 = vld [vmem:[#allocation4 + $0x300] sm:$0xf]  ;;  %1936 = vmatpush.bf16.msra.mxu0 %v3827_v3  ;;  %1950 = vmatpush.bf16.msra.mxu1 %v3955_v6  ;;  %v4563_v27 = vor.u32 %v5678_v13, %v4562_v12 }
  0x4a   :  { %v5586_v19 = vld [vmem:[#allocation4 + $0x30c] sm:$0xf0]  ;;  %v4690_v20 = vld [vmem:[#allocation4 + $0x6e0] sm:$0xf]  ;;  %v4067_v30 = vor.u32 %v5554_v16, %v4066_v15 }
  0x4b   :  { %v5710_v21 = vld [vmem:[#allocation4 + $0x6ec] sm:$0xf0]  ;;  %1964 = vmatpush.bf16.msra.mxu2 %v4083_v10  ;;  %v4818_v24 = vld [vmem:[#allocation4 + $0x7e0] sm:$0xf]  ;;  %1978 = vmatpush.bf16.msra.mxu3 %v4211_v14  ;;  %v4195_v33 = vor.u32 %v5586_v19, %v4194_v17 }
  0x4c   :  { %v5742_v25 = vld [vmem:[#allocation4 + $0x7ec] sm:$0xf0]  ;;  %v4418_v28 = vld [vmem:[#allocation4 + $0x4c0] sm:$0xf]  ;;  %v4691_v34 = vor.u32 %v5710_v21, %v4690_v20 }
  0x4d   :  { %v5642_v29 = vld [vmem:[#allocation4 + $0x4cc] sm:$0xf0]  ;;  %v4546_v31 = vld [vmem:[#allocation4 + $0x5c0] sm:$0xf]  ;;  %1937 = vmatpush.bf16.msra.mxu0 %v3811_v18  ;;  %v4819_v35 = vor.u32 %v5742_v25, %v4818_v24  ;;  %1951 = vmatpush.bf16.msra.mxu1 %v3939_v22 }
  0x4e   :  { %v5674_v32 = vld [vmem:[#allocation4 + $0x5cc] sm:$0xf0]  ;;  %v4674_v36 = vld [vmem:[#allocation4 + $0x6c0] sm:$0xf]  ;;  %v4419_v38 = vor.u32 %v5642_v29, %v4418_v28 }
  0x4f   :  { %v5706_v37 = vld [vmem:[#allocation4 + $0x6cc] sm:$0xf0]  ;;  %v4802_v39 = vld [vmem:[#allocation4 + $0x7c0] sm:$0xf]  ;;  %v4547_v41 = vor.u32 %v5674_v32, %v4546_v31  ;;  %1965 = vmatpush.bf16.msra.mxu2 %v4067_v30  ;;  %1979 = vmatpush.bf16.msra.mxu3 %v4195_v33 }
  0x50   :  { %v5738_v40 = vld [vmem:[#allocation4 + $0x7cc] sm:$0xf0]  ;;  %v4402_v42 = vld [vmem:[#allocation4 + $0x4a0] sm:$0xf]  ;;  %v4675_v46 = vor.u32 %v5706_v37, %v4674_v36 }
  0x51   :  { %1986 = vmatpush.bf16.msrb.mxu0 %v4435_v23  ;;  %2000 = vmatpush.bf16.msrb.mxu1 %v4563_v27  ;;  %v5638_v43 = vld [vmem:[#allocation4 + $0x4ac] sm:$0xf0]  ;;  %v4530_v44 = vld [vmem:[#allocation4 + $0x5a0] sm:$0xf]  ;;  %v4803_v47 = vor.u32 %v5738_v40, %v4802_v39 }
  0x52   :  { %v5670_v45 = vld [vmem:[#allocation4 + $0x5ac] sm:$0xf0]  ;;  %v4403_v48 = vor.u32 %v5638_v43, %v4402_v42  ;;  %v4386_v50 = vld [vmem:[#allocation4 + $0x480] sm:$0xf] }
  0x53   :  { %2014 = vmatpush.bf16.msrb.mxu2 %v4691_v34  ;;  %2028 = vmatpush.bf16.msrb.mxu3 %v4819_v35  ;;  %v4531_v49 = vor.u32 %v5670_v45, %v4530_v44  ;;  %v5634_v51 = vld [vmem:[#allocation4 + $0x48c] sm:$0xf0]  ;;  %v4514_v52 = vld [vmem:[#allocation4 + $0x580] sm:$0xf] }
  0x54   :  { %v5666_v53 = vld [vmem:[#allocation4 + $0x58c] sm:$0xf0]  ;;  %v4387_v54 = vor.u32 %v5634_v51, %v4386_v50  ;;  %v4658_v56 = vld [vmem:[#allocation4 + $0x6a0] sm:$0xf] }
  0x55   :  { %1987 = vmatpush.bf16.msrb.mxu0 %v4419_v38  ;;  %2001 = vmatpush.bf16.msrb.mxu1 %v4547_v41  ;;  %v4515_v55 = vor.u32 %v5666_v53, %v4514_v52  ;;  %v5702_v26 = vld [vmem:[#allocation4 + $0x6ac] sm:$0xf0]  ;;  %v4786_v57 = vld [vmem:[#allocation4 + $0x7a0] sm:$0xf] }
  0x56   :  { %v4659_v58 = vor.u32 %v5702_v26, %v4658_v56  ;;  %v5734_v59 = vld [vmem:[#allocation4 + $0x7ac] sm:$0xf0]  ;;  %v4370_v61 = vld [vmem:[#allocation4 + $0x460] sm:$0xf] }
  0x57   :  { %2015 = vmatpush.bf16.msrb.mxu2 %v4675_v46  ;;  %2029 = vmatpush.bf16.msrb.mxu3 %v4803_v47  ;;  %v4787_v60 = vor.u32 %v5734_v59, %v4786_v57  ;;  %v5630_v62 = vld [vmem:[#allocation4 + $0x46c] sm:$0xf0]  ;;  %v4498_v63 = vld [vmem:[#allocation4 + $0x560] sm:$0xf] }
  0x58   :  { %v4371_v0 = vor.u32 %v5630_v62, %v4370_v61  ;;  %v5662_v1 = vld [vmem:[#allocation4 + $0x56c] sm:$0xf0]  ;;  %v4642_v3 = vld [vmem:[#allocation4 + $0x680] sm:$0xf] }
  0x59   :  { %1988 = vmatpush.bf16.msrb.mxu0 %v4403_v48  ;;  %2002 = vmatpush.bf16.msrb.mxu1 %v4531_v49  ;;  %v4499_v2 = vor.u32 %v5662_v1, %v4498_v63  ;;  %v5698_v4 = vld [vmem:[#allocation4 + $0x68c] sm:$0xf0]  ;;  %v4770_v6 = vld [vmem:[#allocation4 + $0x780] sm:$0xf] }
  0x5a   :  { %v4643_v5 = vor.u32 %v5698_v4, %v4642_v3  ;;  %v5730_v7 = vld [vmem:[#allocation4 + $0x78c] sm:$0xf0]  ;;  %v4354_v9 = vld [vmem:[#allocation4 + $0x440] sm:$0xf]  ;;  %v3924_v3 = vld [vmem:[#allocation4 + $0xf0] sm:$0xf0] }
  0x5b   :  { %2016 = vmatpush.bf16.msrb.mxu2 %v4659_v58  ;;  %2030 = vmatpush.bf16.msrb.mxu3 %v4787_v60  ;;  %v4771_v8 = vor.u32 %v5730_v7, %v4770_v6  ;;  %v5626_v10 = vld [vmem:[#allocation4 + $0x44c] sm:$0xf0]  ;;  %v4482_v11 = vld [vmem:[#allocation4 + $0x540] sm:$0xf]  ;;  %v5548_v7 = vld [vmem:[#allocation4 + $0x1e4] sm:$0xf] }
  0x5c   :  { %v4355_v12 = vor.u32 %v5626_v10, %v4354_v9  ;;  %v5658_v13 = vld [vmem:[#allocation4 + $0x54c] sm:$0xf0]  ;;  %v4626_v15 = vld [vmem:[#allocation4 + $0x660] sm:$0xf] }
  0x5d   :  { %1989 = vmatpush.bf16.msrb.mxu0 %v4387_v54  ;;  %2003 = vmatpush.bf16.msrb.mxu1 %v4515_v55  ;;  %v4483_v14 = vor.u32 %v5658_v13, %v4482_v11  ;;  %v5694_v16 = vld [vmem:[#allocation4 + $0x66c] sm:$0xf0]  ;;  %v4754_v17 = vld [vmem:[#allocation4 + $0x760] sm:$0xf] }
  0x5e   :  { %v4627_v18 = vor.u32 %v5694_v16, %v4626_v15  ;;  %v5726_v19 = vld [vmem:[#allocation4 + $0x76c] sm:$0xf0]  ;;  %v4338_v21 = vld [vmem:[#allocation4 + $0x420] sm:$0xf]  ;;  %v5512_v15 = vld [vmem:[#allocation4 + $0xc4] sm:$0xf] }
  0x5f   :  { %2017 = vmatpush.bf16.msrb.mxu2 %v4643_v5  ;;  %2031 = vmatpush.bf16.msrb.mxu3 %v4771_v8  ;;  %v4755_v20 = vor.u32 %v5726_v19, %v4754_v17  ;;  %v5622_v22 = vld [vmem:[#allocation4 + $0x42c] sm:$0xf0]  ;;  %v4466_v24 = vld [vmem:[#allocation4 + $0x520] sm:$0xf]  ;;  %v4052_v8 = vld [vmem:[#allocation4 + $0x1f0] sm:$0xf0] }
  0x60   :  { %v4339_v23 = vor.u32 %v5622_v22, %v4338_v21  ;;  %v5654_v25 = vld [vmem:[#allocation4 + $0x52c] sm:$0xf0]  ;;  %v4610_v28 = vld [vmem:[#allocation4 + $0x640] sm:$0xf]  ;;  %v3908_v16 = vld [vmem:[#allocation4 + $0xd0] sm:$0xf0] }
  0x61   :  { %1990 = vmatpush.bf16.msrb.mxu0 %v4371_v0  ;;  %2004 = vmatpush.bf16.msrb.mxu1 %v4499_v2  ;;  %v4467_v27 = vor.u32 %v5654_v25, %v4466_v24  ;;  %v5690_v29 = vld [vmem:[#allocation4 + $0x64c] sm:$0xf0]  ;;  %v4738_v30 = vld [vmem:[#allocation4 + $0x740] sm:$0xf]  ;;  %v5516_v2 = vld [vmem:[#allocation4 + $0xe4] sm:$0xf] }
  0x62   :  { %v4611_v31 = vor.u32 %v5690_v29, %v4610_v28  ;;  %v5722_v32 = vld [vmem:[#allocation4 + $0x74c] sm:$0xf0]  ;;  %v4322_v34 = vld [vmem:[#allocation4 + $0x400] sm:$0xf]  ;;  %v5544_v19 = vld [vmem:[#allocation4 + $0x1c4] sm:$0xf] }
  0x63   :  { %2018 = vmatpush.bf16.msrb.mxu2 %v4627_v18  ;;  %2032 = vmatpush.bf16.msrb.mxu3 %v4755_v20  ;;  %v4739_v33 = vor.u32 %v5722_v32, %v4738_v30  ;;  %v5618_v35 = vld [vmem:[#allocation4 + $0x40c] sm:$0xf0]  ;;  %v4450_v36 = vld [vmem:[#allocation4 + $0x500] sm:$0xf]  ;;  %v4036_v20 = vld [vmem:[#allocation4 + $0x1d0] sm:$0xf0]  ;;  %v3911_v30 = vor.u32 %v5512_v15, %v3908_v16 }
  0x64   :  { %v4323_v37 = vor.u32 %v5618_v35, %v4322_v34  ;;  %v5650_v38 = vld [vmem:[#allocation4 + $0x50c] sm:$0xf0]  ;;  %v4594_v40 = vld [vmem:[#allocation4 + $0x620] sm:$0xf]  ;;  %v5612_v32 = vld [vmem:[#allocation4 + $0x3e4] sm:$0xf]  ;;  %v4039_v35 = vor.u32 %v5544_v19, %v4036_v20 }
  0x65   :  { %1991 = vmatpush.bf16.msrb.mxu0 %v4355_v12  ;;  %2005 = vmatpush.bf16.msrb.mxu1 %v4483_v14  ;;  %v4451_v39 = vor.u32 %v5650_v38, %v4450_v36  ;;  %v5686_v41 = vld [vmem:[#allocation4 + $0x62c] sm:$0xf0]  ;;  %v4722_v42 = vld [vmem:[#allocation4 + $0x720] sm:$0xf]  ;;  %v3927_v12 = vor.u32 %v5516_v2, %v3924_v3  ;;  %v4055_v14 = vor.u32 %v5548_v7, %v4052_v8  ;;  %v4308_v36 = vld [vmem:[#allocation4 + $0x3f0] sm:$0xf0] }
  0x66   :  { %v5718_v43 = vld [vmem:[#allocation4 + $0x72c] sm:$0xf0]  ;;  %v4595_v44 = vor.u32 %v5686_v41, %v4594_v40  ;;  %v4578_v46 = vld [vmem:[#allocation4 + $0x600] sm:$0xf]  ;;  %v3892_v38 = vld [vmem:[#allocation4 + $0xb0] sm:$0xf0] }
  0x67   :  { %2019 = vmatpush.bf16.msrb.mxu2 %v4611_v31  ;;  %2033 = vmatpush.bf16.msrb.mxu3 %v4739_v33  ;;  %v4723_v45 = vor.u32 %v5718_v43, %v4722_v42  ;;  %v5682_v47 = vld [vmem:[#allocation4 + $0x60c] sm:$0xf0]  ;;  %v4706_v49 = vld [vmem:[#allocation4 + $0x700] sm:$0xf]  ;;  %v4180_v31 = vld [vmem:[#allocation4 + $0x2f0] sm:$0xf0] }
  0x68   :  { %v4579_v48 = vor.u32 %v5682_v47, %v4578_v46  ;;  %v5714_v50 = vld [vmem:[#allocation4 + $0x70c] sm:$0xf0]  ;;  %v5540_v41 = vld [vmem:[#allocation4 + $0x1a4] sm:$0xf]  ;;  %v4020_v42 = vld [vmem:[#allocation4 + $0x1b0] sm:$0xf0]  ;;  %v4311_v47 = vor.u32 %v5612_v32, %v4308_v36 }
  0x69   :  { %1992 = vmatpush.bf16.msrb.mxu0 %v4339_v23  ;;  %2006 = vmatpush.bf16.msrb.mxu1 %v4467_v27  ;;  %v4707_v51 = vor.u32 %v5714_v50, %v4706_v49  ;;  %v119_v52 = vld [vmem:[#allocation10] ss:$8 sm:$0xf]  ;;  %v5580_v23 = vld [vmem:[#allocation4 + $0x2e4] sm:$0xf] }
  0x6a   :  { %v120_v53 = vld [vmem:[#allocation10] ss:$8 sm:$0xf0]  ;;  %v5576_v49 = vld [vmem:[#allocation4 + $0x2c4] sm:$0xf] }
  0x6b   :  { %2020 = vmatpush.bf16.msrb.mxu2 %v4595_v44  ;;  %2034 = vmatpush.bf16.msrb.mxu3 %v4723_v45  ;;  %v6166_v54 = vor.u32 %v120_v53, %v119_v52  ;;  %v4183_v45 = vor.u32 %v5580_v23, %v4180_v31  ;;  %v4164_v50 = vld [vmem:[#allocation4 + $0x2d0] sm:$0xf0]  ;;  %v5532_v19 = vld [vmem:[#allocation4 + $0x164] sm:$0xf] }
  0x6c   :  { %v4276_v7 = vld [vmem:[#allocation4 + $0x3b0] sm:$0xf0] }
  0x6d   :  { %1993 = vmatpush.bf16.msrb.mxu0 %v4323_v37  ;;  %2007 = vmatpush.bf16.msrb.mxu1 %v4451_v39  ;;  %v149_v56 = vperm.slane %v6166_v54, 0  ;;  %v150_v57 = vperm.slane %v6166_v54, 1  ;;  %v151_v5 = vperm.slane %v6166_v54, 2  ;;  %v152_v9 = vperm.slane %v6166_v54, 3  ;;  %v5508_v37 = vld [vmem:[#allocation4 + $0xa4] sm:$0xf] }
  0x6e   :  { %v153_v27 = vperm.slane %v6166_v54, 4  ;;  %v154_v29 = vperm.slane %v6166_v54, 5  ;;  %v3860_v15 = vld [vmem:[#allocation4 + $0x70] sm:$0xf0] }
  0x6f   :  { %2021 = vmatpush.bf16.msrb.mxu2 %v4579_v48  ;;  %2035 = vmatpush.bf16.msrb.mxu3 %v4707_v51  ;;  %v3895_v48 = vor.u32 %v5508_v37, %v3892_v38  ;;  %v5608_v51 = vld [vmem:[#allocation4 + $0x3c4] sm:$0xf]  ;;  %v3988_v20 = vld [vmem:[#allocation4 + $0x170] sm:$0xf0] }
  0x70   :  { %v3991_v32 = vor.u32 %v5532_v19, %v3988_v20  ;;  %v3844_v36 = vld [vmem:[#allocation4 + $0x50] sm:$0xf0]  ;;  %v5528_v37 = vld [vmem:[#allocation4 + $0x144] sm:$0xf] }
  0x71   :  { %v3972_v38 = vld [vmem:[#allocation4 + $0x150] sm:$0xf0]  ;;  %v5556_v19 = vld [vmem:[#allocation4 + $0x224] sm:$0xf] }
  0x72   :  { %v4084_v20 = vld [vmem:[#allocation4 + $0x230] sm:$0xf0] }
  0xa5   :  { %v258_v55 = vpop.f32.mrf.mxu0  ;;  %v272_v26 = vpop.f32.mrf.mxu1 }
  0xa6   :  { %v259_v58 = vadd.f32 %v258_v55, %v149_v56  ;;  %v273_v59 = vadd.f32 %v272_v26, %v150_v57  ;;  %v4023_v55 = vor.u32 %v5540_v41, %v4020_v42  ;;  %v5504_v26 = vld [vmem:[#allocation4 + $0x84] sm:$0xf]  ;;  %v4116_v42 = vld [vmem:[#allocation4 + $0x270] sm:$0xf0] }
  0xa7   :  { %v5564_v41 = vld [vmem:[#allocation4 + $0x264] sm:$0xf] }
  0xa8   :  { %v361_v63 = vmax.f32 %v259_v58, 0.0  ;;  %v362_v4 = vmax.f32 %v273_v59, 0.0  ;;  %v5536_v59 = vld [vmem:[#allocation4 + $0x184] sm:$0xf] }
  0xad   :  { %v286_v60 = vpop.f32.mrf.mxu2  ;;  %v300_v61 = vpop.f32.mrf.mxu3 }
  0xae   :  { %v260_v62 = vpop.f32.mrf.mxu0  ;;  %v274_v1 = vpop.f32.mrf.mxu1  ;;  %v287_v17 = vadd.f32 %v286_v60, %v151_v5  ;;  %v301_v21 = vadd.f32 %v300_v61, %v152_v9  ;;  %v4004_v60 = vld [vmem:[#allocation4 + $0x190] sm:$0xf0]  ;;  %v155_v61 = vperm.slane %v6166_v54, 6 }
  0xaf   :  { %v261_v0 = vadd.f32 %v260_v62, %v149_v56  ;;  %v275_v6 = vadd.f32 %v274_v1, %v150_v57  ;;  %v4292_v56 = vld [vmem:[#allocation4 + $0x3d0] sm:$0xf0] }
  0xb0   :  { %v363_v39 = vmax.f32 %v287_v17, 0.0  ;;  %v364_v43 = vmax.f32 %v301_v21, 0.0  ;;  %v3876_v57 = vld [vmem:[#allocation4 + $0x90] sm:$0xf0]  ;;  %v4295_v3 = vor.u32 %v5608_v51, %v4292_v56  ;;  %v5492_v56 = vld [vmem:[#allocation4 + $0x24] sm:$0xf] }
  0xb1   :  { %v369_v10 = vmax.f32 %v261_v0, 0.0  ;;  %v370_v11 = vmax.f32 %v275_v6, 0.0  ;;  %v5572_v0 = vld [vmem:[#allocation4 + $0x2a4] sm:$0xf] }
  0xb2   :  { %v5604_v6 = vld [vmem:[#allocation4 + $0x3a4] sm:$0xf] }
  0xb3   :  { %v6172_v13 = vpack.c.bf16 %v369_v10, %v361_v63  ;;  %v6174_v18 = vpack.c.bf16 %v370_v11, %v362_v4  ;;  %v4167_v63 = vor.u32 %v5576_v49, %v4164_v50  ;;  %v3879_v4 = vor.u32 %v5504_v26, %v3876_v57  ;;  %v4244_v49 = vld [vmem:[#allocation4 + $0x370] sm:$0xf0] }
  0xb4   :  { %v3828_v26 = vld [vmem:[#allocation4 + $0x30] sm:$0xf0] }
  0xb5   :  { %v288_v22 = vpop.f32.mrf.mxu2  ;;  %1938 = vmatmul.bf16.vlgmr.msra.gmra.mxu0 %v6172_v13  ;;  %v302_v25 = vpop.f32.mrf.mxu3  ;;  %1952 = vmatmul.bf16.vlgmr.msra.gmra.mxu1 %v6174_v18 }
  0xb6   :  { %v289_v24 = vadd.f32 %v288_v22, %v151_v5  ;;  %2042 = vmatpush.bf16.msra.mxu0 %v3927_v12  ;;  %v314_v28 = vpop.f32.mrf.mxu0  ;;  %v303_v33 = vadd.f32 %v302_v25, %v152_v9  ;;  %2056 = vmatpush.bf16.msra.mxu1 %v4055_v14  ;;  %v328_v34 = vpop.f32.mrf.mxu1  ;;  %v4148_v5 = vld [vmem:[#allocation4 + $0x2b0] sm:$0xf0]  ;;  %v156_v9 = vperm.slane %v6166_v54, 7  ;;  %v4007_v12 = vor.u32 %v5536_v59, %v4004_v60  ;;  %v5500_v14 = vld [vmem:[#allocation4 + $0x64] sm:$0xf] }
  0xb7   :  { %v315_v53 = vadd.f32 %v314_v28, %v153_v27  ;;  %v329_v58 = vadd.f32 %v328_v34, %v154_v29  ;;  %v4151_v22 = vor.u32 %v5572_v0, %v4148_v5  ;;  %v4279_v25 = vor.u32 %v5604_v6, %v4276_v7  ;;  %v5568_v28 = vld [vmem:[#allocation4 + $0x284] sm:$0xf]  ;;  %v4132_v54 = vld [vmem:[#allocation4 + $0x290] sm:$0xf0] }
  0xb8   :  { %v371_v40 = vmax.f32 %v289_v24, 0.0  ;;  %v372_v44 = vmax.f32 %v303_v33, 0.0  ;;  %v3863_v31 = vor.u32 %v5500_v14, %v3860_v15  ;;  %v5600_v33 = vld [vmem:[#allocation4 + $0x384] sm:$0xf]  ;;  %v3956_v59 = vld [vmem:[#allocation4 + $0x130] sm:$0xf0] }
  0xb9   :  { %v365_v8 = vmax.f32 %v315_v53, 0.0  ;;  %v366_v16 = vmax.f32 %v329_v58, 0.0  ;;  %v5496_v34 = vld [vmem:[#allocation4 + $0x44] sm:$0xf]  ;;  %v4228_v6 = vld [vmem:[#allocation4 + $0x350] sm:$0xf0] }
  0xba   :  { %v6180_v46 = vpack.c.bf16 %v371_v40, %v363_v39  ;;  %2043 = vmatpush.bf16.msra.mxu0 %v3911_v30  ;;  %v6182_v52 = vpack.c.bf16 %v372_v44, %v364_v43  ;;  %2057 = vmatpush.bf16.msra.mxu1 %v4039_v35  ;;  %v4135_v40 = vor.u32 %v5568_v28, %v4132_v54  ;;  %v5524_v58 = vld [vmem:[#allocation4 + $0x124] sm:$0xf]  ;;  %v4436_v14 = vld [vmem:[#allocation4 + $0x4f0] sm:$0xf0] }
  0xbb   :  { %v3847_v53 = vor.u32 %v5496_v34, %v3844_v36  ;;  %v5560_v0 = vld [vmem:[#allocation4 + $0x244] sm:$0xf]  ;;  %v3959_v5 = vor.u32 %v5524_v58, %v3956_v59  ;;  %v4068_v36 = vld [vmem:[#allocation4 + $0x210] sm:$0xf0] }
  0xbc   :  { %1966 = vmatmul.bf16.vlgmr.msra.gmra.mxu2 %v6180_v46  ;;  %1980 = vmatmul.bf16.vlgmr.msra.gmra.mxu3 %v6182_v52  ;;  %v5488_v7 = vld [vmem:[#allocation4 + $0x4] sm:$0xf] }
  0xbd   :  { %2070 = vmatpush.bf16.msra.mxu2 %v4183_v45  ;;  %v342_v62 = vpop.f32.mrf.mxu2  ;;  %2084 = vmatpush.bf16.msra.mxu3 %v4311_v47  ;;  %v356_v1 = vpop.f32.mrf.mxu3  ;;  %v5676_v15 = vld [vmem:[#allocation4 + $0x5e4] sm:$0xf] }
  0xbe   :  { %2044 = vmatpush.bf16.msra.mxu0 %v3895_v48  ;;  %v316_v2 = vpop.f32.mrf.mxu0  ;;  %2058 = vmatpush.bf16.msra.mxu1 %v4023_v55  ;;  %v330_v11 = vpop.f32.mrf.mxu1  ;;  %v343_v23 = vadd.f32 %v342_v62, %v155_v61  ;;  %v357_v30 = vadd.f32 %v356_v1, %v156_v9  ;;  %v5596_v48 = vld [vmem:[#allocation4 + $0x364] sm:$0xf]  ;;  %v3975_v55 = vor.u32 %v5528_v37, %v3972_v38  ;;  %v4100_v1 = vld [vmem:[#allocation4 + $0x250] sm:$0xf0] }
  0xbf   :  { %v317_v10 = vadd.f32 %v316_v2, %v153_v27  ;;  %v331_v17 = vadd.f32 %v330_v11, %v154_v29  ;;  %v4260_v29 = vld [vmem:[#allocation4 + $0x390] sm:$0xf0]  ;;  %v5592_v2 = vld [vmem:[#allocation4 + $0x344] sm:$0xf] }
  0xc0   :  { %v367_v43 = vmax.f32 %v343_v23, 0.0  ;;  %v4263_v47 = vor.u32 %v5600_v33, %v4260_v29  ;;  %v368_v50 = vmax.f32 %v357_v30, 0.0  ;;  %v5644_v11 = vld [vmem:[#allocation4 + $0x4e4] sm:$0xf]  ;;  %v4087_v30 = vor.u32 %v5556_v19, %v4084_v20  ;;  %v4548_v33 = vld [vmem:[#allocation4 + $0x5d0] sm:$0xf0] }
  0xc1   :  { %v373_v21 = vmax.f32 %v317_v10, 0.0  ;;  %2071 = vmatpush.bf16.msra.mxu2 %v4167_v63  ;;  %v374_v24 = vmax.f32 %v331_v17, 0.0  ;;  %2085 = vmatpush.bf16.msra.mxu3 %v4295_v3  ;;  %v4247_v63 = vor.u32 %v5596_v48, %v4244_v49  ;;  %v3940_v10 = vld [vmem:[#allocation4 + $0x110] sm:$0xf0]  ;;  %v4231_v17 = vor.u32 %v5592_v2, %v4228_v6  ;;  %v5588_v23 = vld [vmem:[#allocation4 + $0x324] sm:$0xf] }
  0xc2   :  { %2045 = vmatpush.bf16.msra.mxu0 %v3879_v4  ;;  %2059 = vmatpush.bf16.msra.mxu1 %v4007_v12  ;;  %v3831_v4 = vor.u32 %v5492_v56, %v3828_v26  ;;  %v4103_v12 = vor.u32 %v5560_v0, %v4100_v1  ;;  %v5640_v54 = vld [vmem:[#allocation4 + $0x4c4] sm:$0xf]  ;;  %v4196_v38 = vld [vmem:[#allocation4 + $0x310] sm:$0xf0] }
  0xc3   :  { %v6188_v27 = vpack.c.bf16 %v373_v21, %v365_v8  ;;  %v6190_v35 = vpack.c.bf16 %v374_v24, %v366_v16  ;;  %v3812_v8 = vld [vmem:[#allocation4 + $0x10] sm:$0xf0]  ;;  %v5552_v34 = vld [vmem:[#allocation4 + $0x204] sm:$0xf] }
  0xc4   :  { %v4564_v16 = vld [vmem:[#allocation4 + $0x5f0] sm:$0xf0]  ;;  %v3815_v21 = vor.u32 %v5488_v7, %v3812_v8  ;;  %v5584_v37 = vld [vmem:[#allocation4 + $0x304] sm:$0xf] }
  0xc5   :  { %2072 = vmatpush.bf16.msra.mxu2 %v4151_v22  ;;  %v344_v39 = vpop.f32.mrf.mxu2  ;;  %1994 = vmatmul.bf16.vlgmr.msrb.gmra.mxu0 %v6188_v27  ;;  %v358_v45 = vpop.f32.mrf.mxu3  ;;  %v4212_v24 = vld [vmem:[#allocation4 + $0x330] sm:$0xf0]  ;;  %v4567_v28 = vor.u32 %v5676_v15, %v4564_v16  ;;  %v5668_v49 = vld [vmem:[#allocation4 + $0x5a4] sm:$0xf] }
  0xc6   :  { %2086 = vmatpush.bf16.msra.mxu3 %v4279_v25  ;;  %v345_v44 = vadd.f32 %v344_v39, %v155_v61  ;;  %2008 = vmatmul.bf16.vlgmr.msrb.gmra.mxu1 %v6190_v35  ;;  %v359_v51 = vadd.f32 %v358_v45, %v156_v9  ;;  %v4119_v61 = vor.u32 %v5564_v41, %v4116_v42  ;;  %v5520_v9 = vld [vmem:[#allocation4 + $0x104] sm:$0xf]  ;;  %v4404_v48 = vld [vmem:[#allocation4 + $0x4b0] sm:$0xf0] }
  0xc7   :  { %2046 = vmatpush.bf16.msra.mxu0 %v3863_v31  ;;  %2060 = vmatpush.bf16.msra.mxu1 %v3991_v32  ;;  %v3943_v22 = vor.u32 %v5520_v9, %v3940_v10  ;;  %v4439_v25 = vor.u32 %v5644_v11, %v4436_v14  ;;  %v4420_v31 = vld [vmem:[#allocation4 + $0x4d0] sm:$0xf0]  ;;  %v5672_v32 = vld [vmem:[#allocation4 + $0x5c4] sm:$0xf]  ;;  %v4215_v29 = vor.u32 %v5588_v23, %v4212_v24 }
  0xc8   :  { %v375_v57 = vmax.f32 %v345_v44, 0.0  ;;  %v376_v60 = vmax.f32 %v359_v51, 0.0  ;;  %v5708_v39 = vld [vmem:[#allocation4 + $0x6e4] sm:$0xf]  ;;  %v4423_v41 = vor.u32 %v5640_v54, %v4420_v31  ;;  %v4551_v42 = vor.u32 %v5672_v32, %v4548_v33  ;;  %v4820_v44 = vld [vmem:[#allocation4 + $0x7f0] sm:$0xf0] }
  0xc9   :  { %2073 = vmatpush.bf16.msra.mxu2 %v4135_v40  ;;  %v4692_v40 = vld [vmem:[#allocation4 + $0x6f0] sm:$0xf0]  ;;  %v5636_v45 = vld [vmem:[#allocation4 + $0x4a4] sm:$0xf]  ;;  %v4199_v51 = vor.u32 %v5584_v37, %v4196_v38 }
  0xca   :  { %v6194_v62 = vpack.c.bf16 %v375_v57, %v367_v43  ;;  %2087 = vmatpush.bf16.msra.mxu3 %v4263_v47  ;;  %v6196_v3 = vpack.c.bf16 %v376_v60, %v368_v50  ;;  %v5740_v43 = vld [vmem:[#allocation4 + $0x7e4] sm:$0xf]  ;;  %v4071_v47 = vor.u32 %v5552_v34, %v4068_v36  ;;  %v4532_v50 = vld [vmem:[#allocation4 + $0x5b0] sm:$0xf0]  ;;  %v4407_v57 = vor.u32 %v5636_v45, %v4404_v48 }
  0xcb   :  { %2047 = vmatpush.bf16.msra.mxu0 %v3847_v53  ;;  %2061 = vmatpush.bf16.msra.mxu1 %v3975_v55  ;;  %v4695_v53 = vor.u32 %v5708_v39, %v4692_v40  ;;  %v4823_v55 = vor.u32 %v5740_v43, %v4820_v44  ;;  %v5704_v56 = vld [vmem:[#allocation4 + $0x6c4] sm:$0xf]  ;;  %v4676_v26 = vld [vmem:[#allocation4 + $0x6d0] sm:$0xf0]  ;;  %v4535_v58 = vor.u32 %v5668_v49, %v4532_v50 }
  0xcc   :  { %2022 = vmatmul.bf16.vlgmr.msrb.gmra.mxu2 %v6194_v62  ;;  %2036 = vmatmul.bf16.vlgmr.msrb.gmra.mxu3 %v6196_v3  ;;  %v5736_v59 = vld [vmem:[#allocation4 + $0x7c4] sm:$0xf]  ;;  %v4804_v60 = vld [vmem:[#allocation4 + $0x7d0] sm:$0xf0]  ;;  %v4679_v2 = vor.u32 %v5704_v56, %v4676_v26 }
  0xcd   :  { %2074 = vmatpush.bf16.msra.mxu2 %v4119_v61  ;;  %v5632_v61 = vld [vmem:[#allocation4 + $0x484] sm:$0xf]  ;;  %v4516_v1 = vld [vmem:[#allocation4 + $0x590] sm:$0xf0] }
  0xce   :  { %2088 = vmatpush.bf16.msra.mxu3 %v4247_v63  ;;  %v4388_v63 = vld [vmem:[#allocation4 + $0x490] sm:$0xf0]  ;;  %v5664_v0 = vld [vmem:[#allocation4 + $0x584] sm:$0xf] }
  0xcf   :  { %2048 = vmatpush.bf16.msra.mxu0 %v3831_v4  ;;  %2062 = vmatpush.bf16.msra.mxu1 %v3959_v5  ;;  %v4807_v4 = vor.u32 %v5736_v59, %v4804_v60  ;;  %v5700_v5 = vld [vmem:[#allocation4 + $0x6a4] sm:$0xf]  ;;  %v4660_v6 = vld [vmem:[#allocation4 + $0x6b0] sm:$0xf0]  ;;  %v4391_v7 = vor.u32 %v5632_v61, %v4388_v63  ;;  %v4519_v8 = vor.u32 %v5664_v0, %v4516_v1  ;;  %v5519_v59 = vld [vmem:[#allocation4 + $0xf4] sm:$0xf0] }
  0xd0   :  { %v5732_v9 = vld [vmem:[#allocation4 + $0x7a4] sm:$0xf]  ;;  %v4788_v10 = vld [vmem:[#allocation4 + $0x7b0] sm:$0xf0]  ;;  %v4663_v16 = vor.u32 %v5700_v5, %v4660_v6  ;;  %v4058_v60 = vld [vmem:[#allocation4 + $0x1e8] sm:$0xf] }
  0xd1   :  { %2075 = vmatpush.bf16.msra.mxu2 %v4103_v12  ;;  %v5628_v11 = vld [vmem:[#allocation4 + $0x464] sm:$0xf]  ;;  %v4372_v12 = vld [vmem:[#allocation4 + $0x470] sm:$0xf0]  ;;  %v5551_v61 = vld [vmem:[#allocation4 + $0x1f4] sm:$0xf0] }
  0xd2   :  { %2089 = vmatpush.bf16.msra.mxu3 %v4231_v17  ;;  %v5660_v14 = vld [vmem:[#allocation4 + $0x564] sm:$0xf]  ;;  %v4500_v15 = vld [vmem:[#allocation4 + $0x570] sm:$0xf0]  ;;  %v4791_v17 = vor.u32 %v5732_v9, %v4788_v10  ;;  %v3914_v9 = vld [vmem:[#allocation4 + $0xc8] sm:$0xf] }
  0xd3   :  { %2049 = vmatpush.bf16.msra.mxu0 %v3815_v21  ;;  %2063 = vmatpush.bf16.msra.mxu1 %v3943_v22  ;;  %v5696_v19 = vld [vmem:[#allocation4 + $0x684] sm:$0xf]  ;;  %v4644_v20 = vld [vmem:[#allocation4 + $0x690] sm:$0xf0]  ;;  %v4375_v21 = vor.u32 %v5628_v11, %v4372_v12  ;;  %v4503_v22 = vor.u32 %v5660_v14, %v4500_v15  ;;  %v5515_v11 = vld [vmem:[#allocation4 + $0xd4] sm:$0xf0] }
  0xd4   :  { %v5728_v23 = vld [vmem:[#allocation4 + $0x784] sm:$0xf]  ;;  %v4772_v24 = vld [vmem:[#allocation4 + $0x790] sm:$0xf0]  ;;  %v4647_v31 = vor.u32 %v5696_v19, %v4644_v20  ;;  %v4042_v12 = vld [vmem:[#allocation4 + $0x1c8] sm:$0xf] }
  0xd5   :  { %2076 = vmatpush.bf16.msra.mxu2 %v4087_v30  ;;  %v5656_v54 = vld [vmem:[#allocation4 + $0x544] sm:$0xf]  ;;  %v4484_v30 = vld [vmem:[#allocation4 + $0x550] sm:$0xf0]  ;;  %v4775_v32 = vor.u32 %v5728_v23, %v4772_v24  ;;  %v5547_v14 = vld [vmem:[#allocation4 + $0x1d4] sm:$0xf0]  ;;  %v3915_v23 = vor.u32 %v5515_v11, %v3914_v9 }
  0xd6   :  { %2090 = vmatpush.bf16.msra.mxu3 %v4215_v29  ;;  %2050 = vmatmul.bf16.vlgmr.msra.gmra.mxu0 %v6172_v13  ;;  %v5692_v33 = vld [vmem:[#allocation4 + $0x664] sm:$0xf]  ;;  %v4628_v29 = vld [vmem:[#allocation4 + $0x670] sm:$0xf0]  ;;  %v4487_v36 = vor.u32 %v5656_v54, %v4484_v30  ;;  %v4043_v24 = vor.u32 %v5547_v14, %v4042_v12  ;;  %v3898_v30 = vld [vmem:[#allocation4 + $0xa8] sm:$0xf] }
  0xd7   :  { %2098 = vmatpush.bf16.msrb.mxu0 %v4439_v25  ;;  %2112 = vmatpush.bf16.msrb.mxu1 %v4567_v28  ;;  %v5624_v25 = vld [vmem:[#allocation4 + $0x444] sm:$0xf]  ;;  %v4356_v28 = vld [vmem:[#allocation4 + $0x450] sm:$0xf0]  ;;  %v4631_v43 = vor.u32 %v5692_v33, %v4628_v29  ;;  %v4026_v29 = vld [vmem:[#allocation4 + $0x1a8] sm:$0xf] }
  0xd8   :  { %2064 = vmatmul.bf16.vlgmr.msra.gmra.mxu1 %v6174_v18  ;;  %v4359_v34 = vor.u32 %v5624_v25, %v4356_v28  ;;  %v5724_v37 = vld [vmem:[#allocation4 + $0x764] sm:$0xf]  ;;  %v4756_v38 = vld [vmem:[#allocation4 + $0x770] sm:$0xf0]  ;;  %v4314_v25 = vld [vmem:[#allocation4 + $0x3e8] sm:$0xf] }
  0xd9   :  { %2077 = vmatpush.bf16.msra.mxu2 %v4071_v47  ;;  %v5620_v39 = vld [vmem:[#allocation4 + $0x424] sm:$0xf]  ;;  %v4340_v40 = vld [vmem:[#allocation4 + $0x430] sm:$0xf0]  ;;  %v4759_v44 = vor.u32 %v5724_v37, %v4756_v38  ;;  %v5615_v28 = vld [vmem:[#allocation4 + $0x3f4] sm:$0xf0] }
  0xda   :  { %2091 = vmatpush.bf16.msra.mxu3 %v4199_v51  ;;  %v5688_v45 = vld [vmem:[#allocation4 + $0x644] sm:$0xf]  ;;  %v4612_v47 = vld [vmem:[#allocation4 + $0x650] sm:$0xf0]  ;;  %v4343_v49 = vor.u32 %v5620_v39, %v4340_v40  ;;  %v4170_v37 = vld [vmem:[#allocation4 + $0x2c8] sm:$0xf] }
  0xdb   :  { %2099 = vmatpush.bf16.msrb.mxu0 %v4423_v41  ;;  %2113 = vmatpush.bf16.msrb.mxu1 %v4551_v42  ;;  %v5652_v41 = vld [vmem:[#allocation4 + $0x524] sm:$0xf]  ;;  %v4468_v42 = vld [vmem:[#allocation4 + $0x530] sm:$0xf0]  ;;  %v5579_v38 = vld [vmem:[#allocation4 + $0x2d4] sm:$0xf0] }
  0xdc   :  { %2078 = vmatmul.bf16.vlgmr.msra.gmra.mxu2 %v6180_v46  ;;  %v5720_v48 = vld [vmem:[#allocation4 + $0x744] sm:$0xf]  ;;  %v4471_v50 = vor.u32 %v5652_v41, %v4468_v42  ;;  %v4740_v51 = vld [vmem:[#allocation4 + $0x750] sm:$0xf0]  ;;  %v4298_v40 = vld [vmem:[#allocation4 + $0x3c8] sm:$0xf] }
  0xdd   :  { %2126 = vmatpush.bf16.msrb.mxu2 %v4695_v53  ;;  %2092 = vmatmul.bf16.vlgmr.msra.gmra.mxu3 %v6182_v52  ;;  %v5616_v53 = vld [vmem:[#allocation4 + $0x404] sm:$0xf]  ;;  %v4452_v26 = vld [vmem:[#allocation4 + $0x510] sm:$0xf0]  ;;  %v4743_v63 = vor.u32 %v5720_v48, %v4740_v51  ;;  %v5611_v41 = vld [vmem:[#allocation4 + $0x3d4] sm:$0xf0] }
  0xde   :  { %2140 = vmatpush.bf16.msrb.mxu3 %v4823_v55  ;;  %v4324_v55 = vld [vmem:[#allocation4 + $0x410] sm:$0xf0]  ;;  %v5648_v56 = vld [vmem:[#allocation4 + $0x504] sm:$0xf]  ;;  %v5539_v48 = vld [vmem:[#allocation4 + $0x194] sm:$0xf0] }
  0xdf   :  { %2100 = vmatpush.bf16.msrb.mxu0 %v4407_v57  ;;  %2114 = vmatpush.bf16.msrb.mxu1 %v4535_v58  ;;  %v3930_v57 = vld [vmem:[#allocation4 + $0xe8] sm:$0xf]  ;;  %v4615_v58 = vor.u32 %v5688_v45, %v4612_v47  ;;  %v5684_v0 = vld [vmem:[#allocation4 + $0x624] sm:$0xf]  ;;  %v4596_v1 = vld [vmem:[#allocation4 + $0x630] sm:$0xf0]  ;;  %v4171_v45 = vor.u32 %v5579_v38, %v4170_v37 }
  0xe0   :  { %v5716_v5 = vld [vmem:[#allocation4 + $0x724] sm:$0xf]  ;;  %v4724_v6 = vld [vmem:[#allocation4 + $0x730] sm:$0xf0]  ;;  %v4599_v10 = vor.u32 %v5684_v0, %v4596_v1  ;;  %v4010_v47 = vld [vmem:[#allocation4 + $0x188] sm:$0xf] }
  0xe1   :  { %2127 = vmatpush.bf16.msrb.mxu2 %v4679_v2  ;;  %v4327_v2 = vor.u32 %v5616_v53, %v4324_v55  ;;  %v4727_v15 = vor.u32 %v5716_v5, %v4724_v6  ;;  %v5712_v19 = vld [vmem:[#allocation4 + $0x704] sm:$0xf]  ;;  %v4708_v20 = vld [vmem:[#allocation4 + $0x710] sm:$0xf0]  ;;  %v5575_v51 = vld [vmem:[#allocation4 + $0x2b4] sm:$0xf0] }
  0xe2   :  { %2141 = vmatpush.bf16.msrb.mxu3 %v4807_v4  ;;  %v4455_v4 = vor.u32 %v5648_v56, %v4452_v26  ;;  %v4282_v55 = vld [vmem:[#allocation4 + $0x3a8] sm:$0xf]  ;;  %v5607_v56 = vld [vmem:[#allocation4 + $0x3b4] sm:$0xf0]  ;;  %v4011_v26 = vor.u32 %v5539_v48, %v4010_v47 }
  0xe3   :  { %2101 = vmatpush.bf16.msrb.mxu0 %v4391_v7  ;;  %2115 = vmatpush.bf16.msrb.mxu1 %v4519_v8  ;;  %v3931_v7 = vor.u32 %v5519_v59, %v3930_v57  ;;  %v4059_v8 = vor.u32 %v5551_v61, %v4058_v60  ;;  %v3866_v57 = vld [vmem:[#allocation4 + $0x68] sm:$0xf]  ;;  %v5535_v61 = vld [vmem:[#allocation4 + $0x174] sm:$0xf0] }
  0xe4   :  { %v3994_v60 = vld [vmem:[#allocation4 + $0x168] sm:$0xf]  ;;  %v5571_v1 = vld [vmem:[#allocation4 + $0x294] sm:$0xf0] }
  0xe5   :  { %2128 = vmatpush.bf16.msrb.mxu2 %v4663_v16  ;;  %v5680_v16 = vld [vmem:[#allocation4 + $0x604] sm:$0xf]  ;;  %v4138_v0 = vld [vmem:[#allocation4 + $0x288] sm:$0xf]  ;;  %v5603_v5 = vld [vmem:[#allocation4 + $0x394] sm:$0xf0]  ;;  %v3995_v6 = vor.u32 %v5535_v61, %v3994_v60 }
  0xe6   :  { %2142 = vmatpush.bf16.msrb.mxu3 %v4791_v17  ;;  %v4580_v17 = vld [vmem:[#allocation4 + $0x610] sm:$0xf0]  ;;  %v4139_v9 = vor.u32 %v5571_v1, %v4138_v0  ;;  %v5531_v11 = vld [vmem:[#allocation4 + $0x154] sm:$0xf0]  ;;  %v4122_v14 = vld [vmem:[#allocation4 + $0x268] sm:$0xf] }
  0xe7   :  { %2102 = vmatpush.bf16.msrb.mxu0 %v4375_v21  ;;  %2116 = vmatpush.bf16.msrb.mxu1 %v4503_v22  ;;  %v4186_v21 = vld [vmem:[#allocation4 + $0x2e8] sm:$0xf]  ;;  %v5583_v22 = vld [vmem:[#allocation4 + $0x2f4] sm:$0xf0]  ;;  %v4583_v54 = vor.u32 %v5680_v16, %v4580_v17 }
  0xe8   :  { %v4187_v33 = vor.u32 %v5583_v22, %v4186_v21  ;;  %v4250_v17 = vld [vmem:[#allocation4 + $0x368] sm:$0xf]  ;;  %v5495_v22 = vld [vmem:[#allocation4 + $0x34] sm:$0xf0] }
  0xe9   :  { %2129 = vmatpush.bf16.msrb.mxu2 %v4647_v31  ;;  %v5511_v31 = vld [vmem:[#allocation4 + $0xb4] sm:$0xf0]  ;;  %v3834_v21 = vld [vmem:[#allocation4 + $0x28] sm:$0xf] }
  0xea   :  { %2143 = vmatpush.bf16.msrb.mxu3 %v4775_v32  ;;  %v4711_v32 = vor.u32 %v5712_v19, %v4708_v20  ;;  %v3899_v39 = vor.u32 %v5511_v31, %v3898_v30  ;;  %v5599_v19 = vld [vmem:[#allocation4 + $0x374] sm:$0xf0]  ;;  %v3835_v31 = vor.u32 %v5495_v22, %v3834_v21  ;;  %v3946_v37 = vld [vmem:[#allocation4 + $0x108] sm:$0xf] }
  0xeb   :  { %2103 = vmatpush.bf16.msrb.mxu0 %v4359_v34  ;;  %2117 = vmatpush.bf16.msrb.mxu1 %v4487_v36  ;;  %v5543_v34 = vld [vmem:[#allocation4 + $0x1b4] sm:$0xf0]  ;;  %v4315_v36 = vor.u32 %v5615_v28, %v4314_v25  ;;  %v4251_v28 = vor.u32 %v5599_v19, %v4250_v17  ;;  %v4074_v61 = vld [vmem:[#allocation4 + $0x208] sm:$0xf] }
  0xec   :  { %v4027_v42 = vor.u32 %v5543_v34, %v4026_v29  ;;  %v5527_v25 = vld [vmem:[#allocation4 + $0x134] sm:$0xf0]  ;;  %v3818_v29 = vld [vmem:[#allocation4 + $0x8] sm:$0xf] }
  0xed   :  { %2130 = vmatpush.bf16.msrb.mxu2 %v4631_v43  ;;  %v3882_v43 = vld [vmem:[#allocation4 + $0x88] sm:$0xf]  ;;  %v5563_v30 = vld [vmem:[#allocation4 + $0x254] sm:$0xf0] }
  0xee   :  { %2144 = vmatpush.bf16.msrb.mxu3 %v4759_v44  ;;  %v5507_v44 = vld [vmem:[#allocation4 + $0x94] sm:$0xf0]  ;;  %v4202_v0 = vld [vmem:[#allocation4 + $0x308] sm:$0xf] }
  0xef   :  { %2104 = vmatpush.bf16.msrb.mxu0 %v4343_v49  ;;  %2118 = vmatpush.bf16.msrb.mxu1 %v4471_v50  ;;  %v4299_v49 = vor.u32 %v5611_v41, %v4298_v40  ;;  %v4154_v50 = vld [vmem:[#allocation4 + $0x2a8] sm:$0xf]  ;;  %v3883_v53 = vor.u32 %v5507_v44, %v3882_v43  ;;  %v5523_v38 = vld [vmem:[#allocation4 + $0x114] sm:$0xf0] }
  0xf0   :  { %v4155_v59 = vor.u32 %v5575_v51, %v4154_v50  ;;  %v4442_v40 = vld [vmem:[#allocation4 + $0x4e8] sm:$0xf]  ;;  %v5647_v41 = vld [vmem:[#allocation4 + $0x4f4] sm:$0xf0]  ;;  %v3947_v51 = vor.u32 %v5523_v38, %v3946_v37 }
  0xf1   :  { %2131 = vmatpush.bf16.msrb.mxu2 %v4615_v58  ;;  %v5503_v58 = vld [vmem:[#allocation4 + $0x74] sm:$0xf0]  ;;  %v4682_v19 = vld [vmem:[#allocation4 + $0x6c8] sm:$0xf] }
  0xf2   :  { %2145 = vmatpush.bf16.msrb.mxu3 %v4743_v63  ;;  %v4283_v63 = vor.u32 %v5607_v56, %v4282_v55  ;;  %v5679_v44 = vld [vmem:[#allocation4 + $0x5f4] sm:$0xf0]  ;;  %v4426_v55 = vld [vmem:[#allocation4 + $0x4c8] sm:$0xf] }
  0xf3   :  { %2105 = vmatpush.bf16.msrb.mxu0 %v4327_v2  ;;  %2119 = vmatpush.bf16.msrb.mxu1 %v4455_v4  ;;  %v3867_v2 = vor.u32 %v5503_v58, %v3866_v57  ;;  %v4266_v4 = vld [vmem:[#allocation4 + $0x388] sm:$0xf]  ;;  %v5559_v47 = vld [vmem:[#allocation4 + $0x234] sm:$0xf0] }
  0xf4   :  { %v4267_v12 = vor.u32 %v5603_v5, %v4266_v4  ;;  %v5591_v50 = vld [vmem:[#allocation4 + $0x334] sm:$0xf0]  ;;  %v4554_v58 = vld [vmem:[#allocation4 + $0x5c8] sm:$0xf] }
  0xf5   :  { %2132 = vmatpush.bf16.msrb.mxu2 %v4599_v10  ;;  %v3978_v10 = vld [vmem:[#allocation4 + $0x148] sm:$0xf]  ;;  %v5643_v57 = vld [vmem:[#allocation4 + $0x4d4] sm:$0xf0] }
  0xf6   :  { %2146 = vmatpush.bf16.msrb.mxu3 %v4727_v15  ;;  %2106 = vmatmul.bf16.vlgmr.msrb.gmra.mxu0 %v6188_v27  ;;  %v5567_v15 = vld [vmem:[#allocation4 + $0x274] sm:$0xf0]  ;;  %v3979_v20 = vor.u32 %v5531_v11, %v3978_v10  ;;  %v4427_v5 = vor.u32 %v5643_v57, %v4426_v55  ;;  %v4410_v10 = vld [vmem:[#allocation4 + $0x4a8] sm:$0xf] }
  0xf7   :  { %2154 = vmatpush.bf16.msra.mxu0 %v3931_v7  ;;  %2168 = vmatpush.bf16.msra.mxu1 %v4059_v8  ;;  %v3850_v7 = vld [vmem:[#allocation4 + $0x48] sm:$0xf]  ;;  %v5499_v8 = vld [vmem:[#allocation4 + $0x54] sm:$0xf0] }
  0xf8   :  { %2120 = vmatmul.bf16.vlgmr.msrb.gmra.mxu1 %v6190_v35  ;;  %v3851_v16 = vor.u32 %v5499_v8, %v3850_v7  ;;  %v5587_v1 = vld [vmem:[#allocation4 + $0x314] sm:$0xf0]  ;;  %v4810_v22 = vld [vmem:[#allocation4 + $0x7c8] sm:$0xf] }
  0xf9   :  { %2133 = vmatpush.bf16.msrb.mxu2 %v4583_v54  ;;  %v4106_v54 = vld [vmem:[#allocation4 + $0x248] sm:$0xf]  ;;  %v5711_v4 = vld [vmem:[#allocation4 + $0x6f4] sm:$0xf0] }
  0xfa   :  { %2147 = vmatpush.bf16.msrb.mxu3 %v4711_v32  ;;  %v4234_v32 = vld [vmem:[#allocation4 + $0x348] sm:$0xf]  ;;  %v5743_v7 = vld [vmem:[#allocation4 + $0x7f4] sm:$0xf0] }
  0xfb   :  { %2155 = vmatpush.bf16.msra.mxu0 %v3915_v23  ;;  %2169 = vmatpush.bf16.msra.mxu1 %v4043_v24  ;;  %v4123_v23 = vor.u32 %v5567_v15, %v4122_v14  ;;  %v3962_v24 = vld [vmem:[#allocation4 + $0x128] sm:$0xf]  ;;  %v5639_v11 = vld [vmem:[#allocation4 + $0x4b4] sm:$0xf0] }
  0xfc   :  { %2134 = vmatmul.bf16.vlgmr.msrb.gmra.mxu2 %v6194_v62  ;;  %v3963_v34 = vor.u32 %v5527_v25, %v3962_v24  ;;  %v4538_v15 = vld [vmem:[#allocation4 + $0x5a8] sm:$0xf]  ;;  %v4411_v21 = vor.u32 %v5639_v11, %v4410_v10  ;;  %v5735_v37 = vld [vmem:[#allocation4 + $0x7b4] sm:$0xf0] }
  0xfd   :  { %2182 = vmatpush.bf16.msra.mxu2 %v4187_v33  ;;  %2148 = vmatmul.bf16.vlgmr.msrb.gmra.mxu3 %v6196_v3  ;;  %v5595_v33 = vld [vmem:[#allocation4 + $0x354] sm:$0xf0]  ;;  %v4394_v25 = vld [vmem:[#allocation4 + $0x488] sm:$0xf] }
  0xfe   :  { %2196 = vmatpush.bf16.msra.mxu3 %v4315_v36  ;;  %v5491_v36 = vld [vmem:[#allocation4 + $0x14] sm:$0xf0]  ;;  %v4235_v43 = vor.u32 %v5595_v33, %v4234_v32  ;;  %v4666_v33 = vld [vmem:[#allocation4 + $0x6a8] sm:$0xf] }
  0xff   :  { %2156 = vmatpush.bf16.msra.mxu0 %v3899_v39  ;;  %2170 = vmatpush.bf16.msra.mxu1 %v4027_v42  ;;  %v4107_v39 = vor.u32 %v5563_v30, %v4106_v54  ;;  %v4570_v42 = vld [vmem:[#allocation4 + $0x5e8] sm:$0xf]  ;;  %v3819_v48 = vor.u32 %v5491_v36, %v3818_v29  ;;  %v5703_v29 = vld [vmem:[#allocation4 + $0x6b4] sm:$0xf0] }
 0x100   :  { %v4571_v56 = vor.u32 %v5679_v44, %v4570_v42  ;;  %v4522_v30 = vld [vmem:[#allocation4 + $0x588] sm:$0xf]  ;;  %v5627_v55 = vld [vmem:[#allocation4 + $0x454] sm:$0xf0] }
 0x101   :  { %2183 = vmatpush.bf16.msra.mxu2 %v4171_v45  ;;  %v4090_v45 = vld [vmem:[#allocation4 + $0x228] sm:$0xf]  ;;  %v5659_v57 = vld [vmem:[#allocation4 + $0x554] sm:$0xf0] }
 0x102   :  { %2197 = vmatpush.bf16.msra.mxu3 %v4299_v49  ;;  %v4218_v49 = vld [vmem:[#allocation4 + $0x328] sm:$0xf]  ;;  %v5691_v10 = vld [vmem:[#allocation4 + $0x654] sm:$0xf0] }
 0x103   :  { %2157 = vmatpush.bf16.msra.mxu0 %v3883_v53  ;;  %2171 = vmatpush.bf16.msra.mxu1 %v4011_v26  ;;  %v4443_v53 = vor.u32 %v5647_v41, %v4442_v40  ;;  %v4091_v26 = vor.u32 %v5559_v47, %v4090_v45  ;;  %v4219_v60 = vor.u32 %v5591_v50, %v4218_v49  ;;  %v4794_v36 = vld [vmem:[#allocation4 + $0x7a8] sm:$0xf]  ;;  %v5631_v40 = vld [vmem:[#allocation4 + $0x474] sm:$0xf0] }
 0x104   :  { %v4667_v41 = vor.u32 %v5703_v29, %v4666_v33  ;;  %v4506_v42 = vld [vmem:[#allocation4 + $0x568] sm:$0xf]  ;;  %v4795_v44 = vor.u32 %v5735_v37, %v4794_v36  ;;  %v5699_v47 = vld [vmem:[#allocation4 + $0x694] sm:$0xf0]  ;;  %v5513_v36 = vld [vmem:[#allocation4 + $0xcc] sm:$0xf] }
 0x105   :  { %2184 = vmatpush.bf16.msra.mxu2 %v4155_v59  ;;  %v5675_v59 = vld [vmem:[#allocation4 + $0x5d4] sm:$0xf0]  ;;  %v4650_v45 = vld [vmem:[#allocation4 + $0x688] sm:$0xf] }
 0x106   :  { %2198 = vmatpush.bf16.msra.mxu3 %v4283_v63  ;;  %v5555_v63 = vld [vmem:[#allocation4 + $0x214] sm:$0xf0]  ;;  %v4555_v8 = vor.u32 %v5675_v59, %v4554_v58  ;;  %v4778_v49 = vld [vmem:[#allocation4 + $0x788] sm:$0xf] }
 0x107   :  { %2158 = vmatpush.bf16.msra.mxu0 %v3867_v2  ;;  %2172 = vmatpush.bf16.msra.mxu1 %v3995_v6  ;;  %v4698_v2 = vld [vmem:[#allocation4 + $0x6e8] sm:$0xf]  ;;  %v5731_v50 = vld [vmem:[#allocation4 + $0x794] sm:$0xf0] }
 0x108   :  { %v4826_v6 = vld [vmem:[#allocation4 + $0x7e8] sm:$0xf]  ;;  %v4699_v14 = vor.u32 %v5711_v4, %v4698_v2  ;;  %v4779_v58 = vor.u32 %v5731_v50, %v4778_v49  ;;  %v5623_v4 = vld [vmem:[#allocation4 + $0x434] sm:$0xf0]  ;;  %v4188_v49 = vld [vmem:[#allocation4 + $0x2f8] sm:$0xf0] }
 0x109   :  { %2185 = vmatpush.bf16.msra.mxu2 %v4139_v9  ;;  %v4075_v9 = vor.u32 %v5555_v63, %v4074_v61  ;;  %v4827_v17 = vor.u32 %v5743_v7, %v4826_v6  ;;  %v4634_v59 = vld [vmem:[#allocation4 + $0x668] sm:$0xf]  ;;  %v5655_v7 = vld [vmem:[#allocation4 + $0x534] sm:$0xf0] }
 0x10a   :  { %2199 = vmatpush.bf16.msra.mxu3 %v4267_v12  ;;  %v4203_v12 = vor.u32 %v5587_v1, %v4202_v0  ;;  %v4762_v63 = vld [vmem:[#allocation4 + $0x768] sm:$0xf]  ;;  %v5727_v0 = vld [vmem:[#allocation4 + $0x774] sm:$0xf0] }
 0x10b   :  { %2159 = vmatpush.bf16.msra.mxu0 %v3851_v16  ;;  %2173 = vmatpush.bf16.msra.mxu1 %v3979_v20  ;;  %v5671_v16 = vld [vmem:[#allocation4 + $0x5b4] sm:$0xf0]  ;;  %v4346_v2 = vld [vmem:[#allocation4 + $0x428] sm:$0xf] }
 0x10c   :  { %v5707_v20 = vld [vmem:[#allocation4 + $0x6d4] sm:$0xf0]  ;;  %v4539_v24 = vor.u32 %v5671_v16, %v4538_v15  ;;  %v4474_v6 = vld [vmem:[#allocation4 + $0x528] sm:$0xf]  ;;  %v4347_v11 = vor.u32 %v5623_v4, %v4346_v2  ;;  %v5609_v4 = vld [vmem:[#allocation4 + $0x3cc] sm:$0xf] }
 0x10d   :  { %2186 = vmatpush.bf16.msra.mxu2 %v4123_v23  ;;  %v5739_v23 = vld [vmem:[#allocation4 + $0x7d4] sm:$0xf0]  ;;  %v4683_v54 = vor.u32 %v5707_v20, %v4682_v19  ;;  %v4330_v15 = vld [vmem:[#allocation4 + $0x408] sm:$0xf]  ;;  %v4475_v16 = vor.u32 %v5655_v7, %v4474_v6  ;;  %v5505_v7 = vld [vmem:[#allocation4 + $0x8c] sm:$0xf] }
 0x10e   :  { %2200 = vmatpush.bf16.msra.mxu3 %v4251_v28  ;;  %v5635_v28 = vld [vmem:[#allocation4 + $0x494] sm:$0xf0]  ;;  %v4811_v32 = vor.u32 %v5739_v23, %v4810_v22  ;;  %v4458_v19 = vld [vmem:[#allocation4 + $0x508] sm:$0xf]  ;;  %v5517_v22 = vld [vmem:[#allocation4 + $0xec] sm:$0xf] }
 0x10f   :  { %2160 = vmatpush.bf16.msra.mxu0 %v3835_v31  ;;  %2174 = vmatpush.bf16.msra.mxu1 %v3963_v34  ;;  %v5667_v31 = vld [vmem:[#allocation4 + $0x594] sm:$0xf0]  ;;  %v4395_v34 = vor.u32 %v5635_v28, %v4394_v25  ;;  %v3932_v23 = vld [vmem:[#allocation4 + $0xf8] sm:$0xf0] }
 0x110   :  { %v4523_v38 = vor.u32 %v5667_v31, %v4522_v30  ;;  %v5651_v20 = vld [vmem:[#allocation4 + $0x514] sm:$0xf0]  ;;  %v4060_v28 = vld [vmem:[#allocation4 + $0x1f8] sm:$0xf0] }
 0x111   :  { %2187 = vmatpush.bf16.msra.mxu2 %v4107_v39  ;;  %v4378_v39 = vld [vmem:[#allocation4 + $0x468] sm:$0xf]  ;;  %v5687_v30 = vld [vmem:[#allocation4 + $0x634] sm:$0xf0]  ;;  %v4459_v29 = vor.u32 %v5651_v20, %v4458_v19  ;;  %v4284_v19 = vld [vmem:[#allocation4 + $0x3b8] sm:$0xf0] }
 0x112   :  { %2201 = vmatpush.bf16.msra.mxu3 %v4235_v43  ;;  %v5663_v43 = vld [vmem:[#allocation4 + $0x574] sm:$0xf0] }
 0x113   :  { %2161 = vmatpush.bf16.msra.mxu0 %v3819_v48  ;;  %2175 = vmatpush.bf16.msra.mxu1 %v3947_v51  ;;  %v4379_v48 = vor.u32 %v5631_v40, %v4378_v39  ;;  %v4507_v51 = vor.u32 %v5663_v43, %v4506_v42  ;;  %v5719_v33 = vld [vmem:[#allocation4 + $0x734] sm:$0xf0]  ;;  %v3916_v39 = vld [vmem:[#allocation4 + $0xd8] sm:$0xf0]  ;;  %v5545_v40 = vld [vmem:[#allocation4 + $0x1cc] sm:$0xf] }
 0x114   :  { %v4586_v43 = vld [vmem:[#allocation4 + $0x608] sm:$0xf]  ;;  %v3919_v50 = vor.u32 %v5513_v36, %v3916_v39  ;;  %v5497_v36 = vld [vmem:[#allocation4 + $0x4c] sm:$0xf] }
 0x115   :  { %2188 = vmatpush.bf16.msra.mxu2 %v4091_v26  ;;  %v4490_v26 = vld [vmem:[#allocation4 + $0x548] sm:$0xf]  ;;  %v5529_v39 = vld [vmem:[#allocation4 + $0x14c] sm:$0xf] }
 0x116   :  { %2202 = vmatpush.bf16.msra.mxu3 %v4219_v60  ;;  %2162 = vmatmul.bf16.vlgmr.msra.gmra.mxu0 %v6172_v13  ;;  %v5695_v60 = vld [vmem:[#allocation4 + $0x674] sm:$0xf0]  ;;  %v4491_v1 = vor.u32 %v5659_v57, %v4490_v26  ;;  %v5509_v26 = vld [vmem:[#allocation4 + $0xac] sm:$0xf]  ;;  %v3900_v57 = vld [vmem:[#allocation4 + $0xb8] sm:$0xf0] }
 0x117   :  { %2210 = vmatpush.bf16.msrb.mxu0 %v4443_v53  ;;  %2224 = vmatpush.bf16.msrb.mxu1 %v4571_v56  ;;  %v4362_v53 = vld [vmem:[#allocation4 + $0x448] sm:$0xf]  ;;  %v4651_v56 = vor.u32 %v5699_v47, %v4650_v45  ;;  %v5715_v47 = vld [vmem:[#allocation4 + $0x714] sm:$0xf0]  ;;  %v3903_v2 = vor.u32 %v5509_v26, %v3900_v57  ;;  %v5561_v57 = vld [vmem:[#allocation4 + $0x24c] sm:$0xf] }
 0x118   :  { %2176 = vmatmul.bf16.vlgmr.msra.gmra.mxu1 %v6174_v18  ;;  %v4363_v61 = vor.u32 %v5627_v55, %v4362_v53  ;;  %v4714_v45 = vld [vmem:[#allocation4 + $0x708] sm:$0xf]  ;;  %v4316_v53 = vld [vmem:[#allocation4 + $0x3f8] sm:$0xf0] }
 0x119   :  { %2189 = vmatpush.bf16.msra.mxu2 %v4075_v9  ;;  %v4618_v9 = vld [vmem:[#allocation4 + $0x648] sm:$0xf] }
 0x11a   :  { %2203 = vmatpush.bf16.msra.mxu3 %v4203_v12  ;;  %v4746_v12 = vld [vmem:[#allocation4 + $0x748] sm:$0xf] }
 0x11b   :  { %2211 = vmatpush.bf16.msrb.mxu0 %v4427_v5  ;;  %2225 = vmatpush.bf16.msrb.mxu1 %v4555_v8  ;;  %v4635_v5 = vor.u32 %v5695_v60, %v4634_v59  ;;  %v4763_v8 = vor.u32 %v5727_v0, %v4762_v63  ;;  %v5541_v60 = vld [vmem:[#allocation4 + $0x1ac] sm:$0xf] }
 0x11c   :  { %2190 = vmatmul.bf16.vlgmr.msra.gmra.mxu2 %v6180_v46  ;;  %v5577_v0 = vld [vmem:[#allocation4 + $0x2cc] sm:$0xf] }
 0x11d   :  { %2238 = vmatpush.bf16.msrb.mxu2 %v4699_v14  ;;  %2204 = vmatmul.bf16.vlgmr.msra.gmra.mxu3 %v6182_v52  ;;  %v5723_v14 = vld [vmem:[#allocation4 + $0x754] sm:$0xf0] }
 0x11e   :  { %2252 = vmatpush.bf16.msrb.mxu3 %v4827_v17  ;;  %v5619_v17 = vld [vmem:[#allocation4 + $0x414] sm:$0xf0]  ;;  %v4747_v25 = vor.u32 %v5723_v14, %v4746_v12  ;;  %v5573_v14 = vld [vmem:[#allocation4 + $0x2ac] sm:$0xf] }
 0x11f   :  { %2212 = vmatpush.bf16.msrb.mxu0 %v4411_v21  ;;  %2226 = vmatpush.bf16.msrb.mxu1 %v4539_v24  ;;  %v4619_v21 = vor.u32 %v5691_v10, %v4618_v9  ;;  %v5549_v24 = vld [vmem:[#allocation4 + $0x1ec] sm:$0xf]  ;;  %v4331_v31 = vor.u32 %v5619_v17, %v4330_v15  ;;  %v4156_v15 = vld [vmem:[#allocation4 + $0x2b8] sm:$0xf0] }
 0x120   :  { %v4063_v37 = vor.u32 %v5549_v24, %v4060_v28  ;;  %v5537_v10 = vld [vmem:[#allocation4 + $0x18c] sm:$0xf] }
 0x121   :  { %2239 = vmatpush.bf16.msrb.mxu2 %v4683_v54  ;;  %v4602_v54 = vld [vmem:[#allocation4 + $0x628] sm:$0xf]  ;;  %v5605_v17 = vld [vmem:[#allocation4 + $0x3ac] sm:$0xf] }
 0x122   :  { %2253 = vmatpush.bf16.msrb.mxu3 %v4811_v32  ;;  %v4730_v32 = vld [vmem:[#allocation4 + $0x728] sm:$0xf]  ;;  %v5533_v24 = vld [vmem:[#allocation4 + $0x16c] sm:$0xf]  ;;  %v4287_v28 = vor.u32 %v5605_v17, %v4284_v19 }
 0x123   :  { %2213 = vmatpush.bf16.msrb.mxu0 %v4395_v34  ;;  %2227 = vmatpush.bf16.msrb.mxu1 %v4523_v38  ;;  %v3935_v34 = vor.u32 %v5517_v22, %v3932_v23  ;;  %v4603_v38 = vor.u32 %v5687_v30, %v4602_v54  ;;  %v4731_v42 = vor.u32 %v5719_v33, %v4730_v32  ;;  %v3868_v22 = vld [vmem:[#allocation4 + $0x78] sm:$0xf0]  ;;  %v5569_v54 = vld [vmem:[#allocation4 + $0x28c] sm:$0xf] }
 0x124   :  { %v4159_v23 = vor.u32 %v5573_v14, %v4156_v15  ;;  %v4140_v30 = vld [vmem:[#allocation4 + $0x298] sm:$0xf0]  ;;  %v5601_v32 = vld [vmem:[#allocation4 + $0x38c] sm:$0xf] }
 0x125   :  { %2240 = vmatpush.bf16.msrb.mxu2 %v4667_v41  ;;  %v4044_v41 = vld [vmem:[#allocation4 + $0x1d8] sm:$0xf0]  ;;  %v5557_v14 = vld [vmem:[#allocation4 + $0x22c] sm:$0xf] }
 0x126   :  { %2254 = vmatpush.bf16.msrb.mxu3 %v4795_v44  ;;  %v5683_v44 = vld [vmem:[#allocation4 + $0x614] sm:$0xf0]  ;;  %v4047_v55 = vor.u32 %v5545_v40, %v4044_v41  ;;  %v4268_v33 = vld [vmem:[#allocation4 + $0x398] sm:$0xf0]  ;;  %v5589_v19 = vld [vmem:[#allocation4 + $0x32c] sm:$0xf] }
 0x127   :  { %2214 = vmatpush.bf16.msrb.mxu0 %v4379_v48  ;;  %2228 = vmatpush.bf16.msrb.mxu1 %v4507_v51  ;;  %v5581_v48 = vld [vmem:[#allocation4 + $0x2ec] sm:$0xf]  ;;  %v3980_v40 = vld [vmem:[#allocation4 + $0x158] sm:$0xf0]  ;;  %v4271_v41 = vor.u32 %v5601_v32, %v4268_v33 }
 0x128   :  { %v5613_v51 = vld [vmem:[#allocation4 + $0x3ec] sm:$0xf]  ;;  %v4191_v59 = vor.u32 %v5581_v48, %v4188_v49  ;;  %v3983_v48 = vor.u32 %v5529_v39, %v3980_v40  ;;  %v4092_v15 = vld [vmem:[#allocation4 + $0x238] sm:$0xf0] }
 0x129   :  { %2241 = vmatpush.bf16.msrb.mxu2 %v4651_v56  ;;  %v4587_v56 = vor.u32 %v5683_v44, %v4586_v43  ;;  %v4319_v63 = vor.u32 %v5613_v51, %v4316_v53  ;;  %v4124_v43 = vld [vmem:[#allocation4 + $0x278] sm:$0xf0]  ;;  %v5493_v49 = vld [vmem:[#allocation4 + $0x2c] sm:$0xf] }
 0x12a   :  { %2255 = vmatpush.bf16.msrb.mxu3 %v4779_v58  ;;  %v4715_v58 = vor.u32 %v5715_v47, %v4714_v45  ;;  %v5597_v45 = vld [vmem:[#allocation4 + $0x36c] sm:$0xf]  ;;  %v4252_v47 = vld [vmem:[#allocation4 + $0x378] sm:$0xf0] }
 0x12b   :  { %2215 = vmatpush.bf16.msrb.mxu0 %v4363_v61  ;;  %2229 = vmatpush.bf16.msrb.mxu1 %v4491_v1  ;;  %v4028_v61 = vld [vmem:[#allocation4 + $0x1b8] sm:$0xf0]  ;;  %v5525_v53 = vld [vmem:[#allocation4 + $0x12c] sm:$0xf]  ;;  %v4255_v26 = vor.u32 %v5597_v45, %v4252_v47 }
 0x12c   :  { %v4172_v1 = vld [vmem:[#allocation4 + $0x2d8] sm:$0xf0]  ;;  %v4031_v6 = vor.u32 %v5541_v60, %v4028_v61  ;;  %v5593_v60 = vld [vmem:[#allocation4 + $0x34c] sm:$0xf] }
 0x12d   :  { %2242 = vmatpush.bf16.msrb.mxu2 %v4635_v5  ;;  %v4300_v5 = vld [vmem:[#allocation4 + $0x3d8] sm:$0xf0]  ;;  %v4175_v9 = vor.u32 %v5577_v0, %v4172_v1  ;;  %v5553_v32 = vld [vmem:[#allocation4 + $0x20c] sm:$0xf] }
 0x12e   :  { %2256 = vmatpush.bf16.msrb.mxu3 %v4763_v8  ;;  %v3884_v8 = vld [vmem:[#allocation4 + $0x98] sm:$0xf0]  ;;  %v4303_v12 = vor.u32 %v5609_v4, %v4300_v5  ;;  %v5637_v45 = vld [vmem:[#allocation4 + $0x4ac] sm:$0xf] }
 0x12f   :  { %2216 = vmatpush.bf16.msrb.mxu0 %v4347_v11  ;;  %2230 = vmatpush.bf16.msrb.mxu1 %v4475_v16  ;;  %v4012_v11 = vld [vmem:[#allocation4 + $0x198] sm:$0xf0]  ;;  %v3887_v16 = vor.u32 %v5505_v7, %v3884_v8  ;;  %v5677_v8 = vld [vmem:[#allocation4 + $0x5ec] sm:$0xf] }
 0x130   :  { %v4015_v20 = vor.u32 %v5537_v10, %v4012_v11  ;;  %v4236_v61 = vld [vmem:[#allocation4 + $0x358] sm:$0xf0] }
 0x131   :  { %2243 = vmatpush.bf16.msrb.mxu2 %v4619_v21  ;;  %v5501_v21 = vld [vmem:[#allocation4 + $0x6c] sm:$0xf]  ;;  %v3820_v1 = vld [vmem:[#allocation4 + $0x18] sm:$0xf0]  ;;  %v4239_v11 = vor.u32 %v5593_v60, %v4236_v61 }
 0x132   :  { %2257 = vmatpush.bf16.msrb.mxu3 %v4747_v25  ;;  %v3996_v25 = vld [vmem:[#allocation4 + $0x178] sm:$0xf0]  ;;  %v5737_v60 = vld [vmem:[#allocation4 + $0x7cc] sm:$0xf] }
 0x133   :  { %2217 = vmatpush.bf16.msrb.mxu0 %v4331_v31  ;;  %2231 = vmatpush.bf16.msrb.mxu1 %v4459_v29  ;;  %v3871_v31 = vor.u32 %v5501_v21, %v3868_v22  ;;  %v6216_v29 = vpop.f32.mrf.mxu0  ;;  %v3948_v4 = vld [vmem:[#allocation4 + $0x118] sm:$0xf0] }
 0x134   :  { %v4444_v7 = vld [vmem:[#allocation4 + $0x4f8] sm:$0xf0] }
 0x135   :  { %2244 = vmatpush.bf16.msrb.mxu2 %v4603_v38  ;;  %v4143_v38 = vor.u32 %v5569_v54, %v4140_v30  ;;  %v5673_v54 = vld [vmem:[#allocation4 + $0x5cc] sm:$0xf]  ;;  %v4556_v30 = vld [vmem:[#allocation4 + $0x5d8] sm:$0xf0] }
 0x136   :  { %2258 = vmatpush.bf16.msrb.mxu3 %v4731_v42  ;;  %2218 = vmatmul.bf16.vlgmr.msrb.gmra.mxu0 %v6188_v27  ;;  %v5565_v42 = vld [vmem:[#allocation4 + $0x26c] sm:$0xf]  ;;  %v4076_v33 = vld [vmem:[#allocation4 + $0x218] sm:$0xf0] }
 0x137   :  { %2266 = vmatpush.bf16.msra.mxu0 %v3935_v34  ;;  %2280 = vmatpush.bf16.msra.mxu1 %v4063_v37  ;;  %v3999_v34 = vor.u32 %v5533_v24, %v3996_v25  ;;  %v3852_v37 = vld [vmem:[#allocation4 + $0x58] sm:$0xf0]  ;;  %v4127_v51 = vor.u32 %v5565_v42, %v4124_v43  ;;  %v4095_v25 = vor.u32 %v5557_v14, %v4092_v15  ;;  %v5629_v15 = vld [vmem:[#allocation4 + $0x46c] sm:$0xf] }
 0x138   :  { %2232 = vmatmul.bf16.vlgmr.msrb.gmra.mxu1 %v6190_v35  ;;  %v3855_v44 = vor.u32 %v5497_v36, %v3852_v37  ;;  %v4204_v36 = vld [vmem:[#allocation4 + $0x318] sm:$0xf0]  ;;  %v5709_v37 = vld [vmem:[#allocation4 + $0x6ec] sm:$0xf]  ;;  %v4559_v43 = vor.u32 %v5673_v54, %v4556_v30 }
 0x139   :  { %2245 = vmatpush.bf16.msrb.mxu2 %v4587_v56  ;;  %v6218_v56 = vpop.f32.mrf.mxu1  ;;  %v4828_v42 = vld [vmem:[#allocation4 + $0x7f8] sm:$0xf0]  ;;  %v5625_v30 = vld [vmem:[#allocation4 + $0x44c] sm:$0xf] }
 0x13a   :  { %2259 = vmatpush.bf16.msrb.mxu3 %v4715_v58  ;;  %v4108_v58 = vld [vmem:[#allocation4 + $0x258] sm:$0xf0] }
 0x13b   :  { %2267 = vmatpush.bf16.msra.mxu0 %v3919_v50  ;;  %2281 = vmatpush.bf16.msra.mxu1 %v4047_v55  ;;  %v3836_v50 = vld [vmem:[#allocation4 + $0x38] sm:$0xf0]  ;;  %v4111_v5 = vor.u32 %v5561_v57, %v4108_v58 }
 0x13c   :  { %2246 = vmatmul.bf16.vlgmr.msrb.gmra.mxu2 %v6194_v62  ;;  %v3964_v55 = vld [vmem:[#allocation4 + $0x138] sm:$0xf0] }
 0x13d   :  { %2294 = vmatpush.bf16.msra.mxu2 %v4191_v59  ;;  %2260 = vmatmul.bf16.vlgmr.msrb.gmra.mxu3 %v6196_v3  ;;  %v3839_v59 = vor.u32 %v5493_v49, %v3836_v50  ;;  %v3967_v0 = vor.u32 %v5525_v53, %v3964_v55  ;;  %v4412_v47 = vld [vmem:[#allocation4 + $0x4b8] sm:$0xf0]  ;;  %v5669_v50 = vld [vmem:[#allocation4 + $0x5ac] sm:$0xf] }
 0x13e   :  { %2308 = vmatpush.bf16.msra.mxu3 %v4319_v63  ;;  %v5489_v63 = vld [vmem:[#allocation4 + $0xc] sm:$0xf]  ;;  %v4812_v61 = vld [vmem:[#allocation4 + $0x7d8] sm:$0xf0] }
 0x13f   :  { %2268 = vmatpush.bf16.msra.mxu0 %v3903_v2  ;;  %2282 = vmatpush.bf16.msra.mxu1 %v4031_v6  ;;  %v5521_v2 = vld [vmem:[#allocation4 + $0x10c] sm:$0xf]  ;;  %v6222_v10 = vpop.f32.mrf.mxu2  ;;  %v3823_v17 = vor.u32 %v5489_v63, %v3820_v1  ;;  %v4396_v1 = vld [vmem:[#allocation4 + $0x498] sm:$0xf0] }
 0x140   :  { %v5645_v6 = vld [vmem:[#allocation4 + $0x4ec] sm:$0xf]  ;;  %v3951_v21 = vor.u32 %v5521_v2, %v3948_v4  ;;  %v4524_v4 = vld [vmem:[#allocation4 + $0x598] sm:$0xf0] }
 0x141   :  { %2295 = vmatpush.bf16.msra.mxu2 %v4175_v9  ;;  %v6220_v9 = vpop.f32.mrf.mxu0  ;;  %v4447_v22 = vor.u32 %v5645_v6, %v4444_v7  ;;  %v6226_v39 = vpop.f32.mrf.mxu1  ;;  %v5705_v55 = vld [vmem:[#allocation4 + $0x6cc] sm:$0xf]  ;;  %v4668_v7 = vld [vmem:[#allocation4 + $0x6b8] sm:$0xf0] }
 0x142   :  { %2309 = vmatpush.bf16.msra.mxu3 %v4303_v12  ;;  %v4572_v12 = vld [vmem:[#allocation4 + $0x5f8] sm:$0xf0]  ;;  %v5665_v2 = vld [vmem:[#allocation4 + $0x58c] sm:$0xf] }
 0x143   :  { %2269 = vmatpush.bf16.msra.mxu0 %v3887_v16  ;;  %2283 = vmatpush.bf16.msra.mxu1 %v4015_v20  ;;  %v6224_v16 = vpop.f32.mrf.mxu3  ;;  %v4220_v20 = vld [vmem:[#allocation4 + $0x338] sm:$0xf0]  ;;  %v4575_v24 = vor.u32 %v5677_v8, %v4572_v12  ;;  %v5701_v6 = vld [vmem:[#allocation4 + $0x6ac] sm:$0xf]  ;;  %v4527_v14 = vor.u32 %v5665_v2, %v4524_v4 }
 0x144   :  { %v4796_v12 = vld [vmem:[#allocation4 + $0x7b8] sm:$0xf0] }
 0x145   :  { %2296 = vmatpush.bf16.msra.mxu2 %v4159_v23  ;;  %v5641_v23 = vld [vmem:[#allocation4 + $0x4cc] sm:$0xf]  ;;  %v4780_v54 = vld [vmem:[#allocation4 + $0x798] sm:$0xf0] }
 0x146   :  { %2310 = vmatpush.bf16.msra.mxu3 %v4287_v28  ;;  %v4428_v28 = vld [vmem:[#allocation4 + $0x4d8] sm:$0xf0] }
 0x147   :  { %2270 = vmatpush.bf16.msra.mxu0 %v3871_v31  ;;  %2284 = vmatpush.bf16.msra.mxu1 %v3999_v34  ;;  %v4223_v31 = vor.u32 %v5589_v19, %v4220_v20  ;;  %v5585_v34 = vld [vmem:[#allocation4 + $0x30c] sm:$0xf]  ;;  %v4431_v40 = vor.u32 %v5641_v23, %v4428_v28  ;;  %v6232_v58 = vpop.f32.mrf.mxu2  ;;  %v4671_v20 = vor.u32 %v5701_v6, %v4668_v7  ;;  %v4332_v4 = vld [vmem:[#allocation4 + $0x418] sm:$0xf0] }
 0x148   :  { %v5729_v28 = vld [vmem:[#allocation4 + $0x78c] sm:$0xf]  ;;  %v4460_v6 = vld [vmem:[#allocation4 + $0x518] sm:$0xf0] }
 0x149   :  { %2297 = vmatpush.bf16.msra.mxu2 %v4143_v38  ;;  %v4700_v38 = vld [vmem:[#allocation4 + $0x6f8] sm:$0xf0]  ;;  %v6230_v57 = vpop.f32.mrf.mxu0  ;;  %v6238_v19 = vpop.f32.mrf.mxu1 }
 0x14a   :  { %2311 = vmatpush.bf16.msra.mxu3 %v4271_v41  ;;  %v5741_v41 = vld [vmem:[#allocation4 + $0x7ec] sm:$0xf]  ;;  %v4703_v49 = vor.u32 %v5709_v37, %v4700_v38  ;;  %v4492_v37 = vld [vmem:[#allocation4 + $0x558] sm:$0xf0] }
 0x14b   :  { %2271 = vmatpush.bf16.msra.mxu0 %v3855_v44  ;;  %2285 = vmatpush.bf16.msra.mxu1 %v3983_v48  ;;  %v4079_v44 = vor.u32 %v5553_v32, %v4076_v33  ;;  %v4207_v48 = vor.u32 %v5585_v34, %v4204_v36  ;;  %v4831_v53 = vor.u32 %v5741_v41, %v4828_v42  ;;  %v6234_v63 = vpop.f32.mrf.mxu3  ;;  %v5657_v36 = vld [vmem:[#allocation4 + $0x54c] sm:$0xf]  ;;  %v4636_v42 = vld [vmem:[#allocation4 + $0x678] sm:$0xf0] }
 0x14c   :  { %v5693_v41 = vld [vmem:[#allocation4 + $0x66c] sm:$0xf] }
 0x14d   :  { %2298 = vmatpush.bf16.msra.mxu2 %v4127_v51  ;;  %v4540_v51 = vld [vmem:[#allocation4 + $0x5b8] sm:$0xf0] }
 0x14e   :  { %2312 = vmatpush.bf16.msra.mxu3 %v4255_v26  ;;  %v4684_v26 = vld [vmem:[#allocation4 + $0x6d8] sm:$0xf0] }
 0x14f   :  { %2272 = vmatpush.bf16.msra.mxu0 %v3839_v59  ;;  %2286 = vmatpush.bf16.msra.mxu1 %v3967_v0  ;;  %v4415_v59 = vor.u32 %v5637_v45, %v4412_v47  ;;  %v5633_v0 = vld [vmem:[#allocation4 + $0x48c] sm:$0xf]  ;;  %v6242_v33 = vpop.f32.mrf.mxu2  ;;  %v4764_v45 = vld [vmem:[#allocation4 + $0x778] sm:$0xf0]  ;;  %v4495_v47 = vor.u32 %v5657_v36, %v4492_v37  ;;  %v4882_v36 = vld [vmem:[#allocation6 + $0x60] sm:$0xf] }
 0x150   :  { %v4399_v8 = vor.u32 %v5633_v0, %v4396_v1  ;;  %v5721_v0 = vld [vmem:[#allocation4 + $0x74c] sm:$0xf]  ;;  %v4748_v1 = vld [vmem:[#allocation4 + $0x758] sm:$0xf0]  ;;  %v5757_v37 = vld [vmem:[#allocation6 + $0x64] sm:$0xf0] }
 0x151   :  { %2299 = vmatpush.bf16.msra.mxu2 %v4111_v5  ;;  %v4815_v5 = vor.u32 %v5737_v60, %v4812_v61  ;;  %v6240_v32 = vpop.f32.mrf.mxu0  ;;  %v4620_v60 = vld [vmem:[#allocation4 + $0x658] sm:$0xf0]  ;;  %v6248_v61 = vpop.f32.mrf.mxu1 }
 0x152   :  { %2313 = vmatpush.bf16.msra.mxu3 %v4239_v11  ;;  %v5733_v11 = vld [vmem:[#allocation4 + $0x7ac] sm:$0xf] }
 0x153   :  { %2273 = vmatpush.bf16.msra.mxu0 %v3823_v17  ;;  %2287 = vmatpush.bf16.msra.mxu1 %v3951_v21  ;;  %v4380_v17 = vld [vmem:[#allocation4 + $0x478] sm:$0xf0]  ;;  %v5661_v21 = vld [vmem:[#allocation4 + $0x56c] sm:$0xf]  ;;  %v4799_v23 = vor.u32 %v5733_v11, %v4796_v12  ;;  %v6244_v38 = vpop.f32.mrf.mxu3  ;;  %v5759_v11 = vld [vmem:[#allocation6 + $0x74] sm:$0xf0] }
 0x154   :  { %v4954_v12 = vld [vmem:[#allocation6 + $0xf0] sm:$0xf] }
 0x155   :  { %2300 = vmatpush.bf16.msra.mxu2 %v4095_v25  ;;  %v4383_v25 = vor.u32 %v5629_v15, %v4380_v17  ;;  %v5775_v15 = vld [vmem:[#allocation6 + $0xf4] sm:$0xf0]  ;;  %v5685_v17 = vld [vmem:[#allocation4 + $0x62c] sm:$0xf] }
 0x156   :  { %2314 = vmatpush.bf16.msra.mxu3 %v4223_v31  ;;  %2274 = vmatmul.bf16.vlgmr.msra.gmra.mxu0 %v6172_v13  ;;  %v4543_v13 = vor.u32 %v5669_v50, %v4540_v51  ;;  %v4364_v31 = vld [vmem:[#allocation4 + $0x458] sm:$0xf0]  ;;  %v4639_v50 = vor.u32 %v5693_v41, %v4636_v42  ;;  %v5653_v51 = vld [vmem:[#allocation4 + $0x52c] sm:$0xf]  ;;  %v5773_v42 = vld [vmem:[#allocation6 + $0xe4] sm:$0xf0] }
 0x157   :  { %2322 = vmatpush.bf16.msrb.mxu0 %v4447_v22  ;;  %2336 = vmatpush.bf16.msrb.mxu1 %v4575_v24  ;;  %v4508_v22 = vld [vmem:[#allocation4 + $0x578] sm:$0xf0]  ;;  %v5697_v24 = vld [vmem:[#allocation4 + $0x68c] sm:$0xf] }
 0x158   :  { %2288 = vmatmul.bf16.vlgmr.msra.gmra.mxu1 %v6174_v18  ;;  %v4687_v18 = vor.u32 %v5705_v55, %v4684_v26  ;;  %v6246_v55 = vld [vmem:[#allocation10 + $0x1] ss:$8 sm:$0xf] }
 0x159   :  { %2301 = vmatpush.bf16.msra.mxu2 %v4079_v44  ;;  %v5725_v44 = vld [vmem:[#allocation4 + $0x76c] sm:$0xf] }
 0x15a   :  { %2315 = vmatpush.bf16.msra.mxu3 %v4207_v48  ;;  %v5621_v48 = vld [vmem:[#allocation4 + $0x42c] sm:$0xf]  ;;  %v4767_v26 = vor.u32 %v5725_v44, %v4764_v45  ;;  %v4588_v44 = vld [vmem:[#allocation4 + $0x618] sm:$0xf0] }
 0x15b   :  { %2323 = vmatpush.bf16.msrb.mxu0 %v4431_v40  ;;  %2337 = vmatpush.bf16.msrb.mxu1 %v4559_v43  ;;  %v4783_v40 = vor.u32 %v5729_v28, %v4780_v54  ;;  %v4367_v43 = vor.u32 %v5625_v30, %v4364_v31  ;;  %v6255_v28 = vpop.f32.mrf.mxu3  ;;  %v4955_v31 = vor.u32 %v5775_v15, %v4954_v12  ;;  %v5751_v15 = vld [vmem:[#allocation6 + $0x34] sm:$0xf0] }
 0x15c   :  { %2302 = vmatmul.bf16.vlgmr.msra.gmra.mxu2 %v6180_v46  ;;  %v4652_v46 = vld [vmem:[#allocation4 + $0x698] sm:$0xf0] }
 0x15d   :  { %2350 = vmatpush.bf16.msrb.mxu2 %v4703_v49  ;;  %2316 = vmatmul.bf16.vlgmr.msra.gmra.mxu3 %v6182_v52  ;;  %v4511_v52 = vor.u32 %v5661_v21, %v4508_v22  ;;  %v4655_v34 = vor.u32 %v5697_v24, %v4652_v46  ;;  %v4348_v49 = vld [vmem:[#allocation4 + $0x438] sm:$0xf0]  ;;  %v642_v21 = vperm.slane %v6246_v55, 0  ;;  %v6251_v22 = vpop.f32.mrf.mxu0  ;;  %v5717_v46 = vld [vmem:[#allocation4 + $0x72c] sm:$0xf] }
 0x15e   :  { %2364 = vmatpush.bf16.msrb.mxu3 %v4831_v53  ;;  %v4476_v53 = vld [vmem:[#allocation4 + $0x538] sm:$0xf0] }
 0x15f   :  { %2324 = vmatpush.bf16.msrb.mxu0 %v4415_v59  ;;  %2338 = vmatpush.bf16.msrb.mxu1 %v4543_v13  ;;  %v5689_v59 = vld [vmem:[#allocation4 + $0x64c] sm:$0xf]  ;;  %v4351_v13 = vor.u32 %v5621_v48, %v4348_v49  ;;  %v4479_v2 = vor.u32 %v5653_v51, %v4476_v53  ;;  %v1942_v30 = vadd.f32 %v6220_v9, %v642_v21  ;;  %v4716_v48 = vld [vmem:[#allocation4 + $0x718] sm:$0xf0] }
 0x160   :  { %v4623_v7 = vor.u32 %v5689_v59, %v4620_v60  ;;  %v1940_v45 = vadd.f32 %v6216_v29, %v642_v21  ;;  %v4883_v49 = vor.u32 %v5757_v37, %v4882_v36  ;;  %v5755_v59 = vld [vmem:[#allocation6 + $0x54] sm:$0xf0]  ;;  %v4938_v29 = vld [vmem:[#allocation6 + $0xd0] sm:$0xf] }
 0x161   :  { %2351 = vmatpush.bf16.msrb.mxu2 %v4687_v18  ;;  %v5617_v18 = vld [vmem:[#allocation4 + $0x40c] sm:$0xf]  ;;  %v1956_v9 = vadd.f32 %v6226_v39, %v1942_v30  ;;  %v5767_v21 = vld [vmem:[#allocation6 + $0xb4] sm:$0xf0] }
 0x162   :  { %2365 = vmatpush.bf16.msrb.mxu3 %v4815_v5  ;;  %v5649_v5 = vld [vmem:[#allocation4 + $0x50c] sm:$0xf]  ;;  %v4335_v24 = vor.u32 %v5617_v18, %v4332_v4 }
 0x163   :  { %2325 = vmatpush.bf16.msrb.mxu0 %v4399_v8  ;;  %2339 = vmatpush.bf16.msrb.mxu1 %v4527_v14  ;;  %v4890_v8 = vld [vmem:[#allocation6 + $0x70] sm:$0xf]  ;;  %v4751_v14 = vor.u32 %v5721_v0, %v4748_v1  ;;  %v4463_v54 = vor.u32 %v5649_v5, %v4460_v6  ;;  %v1954_v0 = vadd.f32 %v6218_v56, %v1940_v45  ;;  %v4866_v6 = vld [vmem:[#allocation6 + $0x40] sm:$0xf] }
 0x164   :  { %v1970_v1 = vadd.f32 %v6232_v58, %v1956_v9  ;;  %v4930_v56 = vld [vmem:[#allocation6 + $0xc0] sm:$0xf] }
 0x165   :  { %2352 = vmatpush.bf16.msrb.mxu2 %v4671_v20  ;;  %v4604_v20 = vld [vmem:[#allocation4 + $0x638] sm:$0xf0]  ;;  %v1968_v18 = vadd.f32 %v6222_v10, %v1954_v0 }
 0x166   :  { %2366 = vmatpush.bf16.msrb.mxu3 %v4799_v23  ;;  %v6253_v23 = vpop.f32.mrf.mxu2  ;;  %v1984_v58 = vadd.f32 %v6234_v63, %v1970_v1  ;;  %v5761_v1 = vld [vmem:[#allocation6 + $0x84] sm:$0xf0] }
 0x167   :  { %2326 = vmatpush.bf16.msrb.mxu0 %v4383_v25  ;;  %2340 = vmatpush.bf16.msrb.mxu1 %v4511_v52  ;;  %v4732_v25 = vld [vmem:[#allocation4 + $0x738] sm:$0xf0]  ;;  %v4891_v52 = vor.u32 %v5759_v11, %v4890_v8  ;;  %v2093_v8 = vpop.f32.mrf.mxu3  ;;  %v5769_v11 = vld [vmem:[#allocation6 + $0xc4] sm:$0xf0]  ;;  %v1982_v10 = vadd.f32 %v6224_v16, %v1968_v18 }
 0x168   :  { %v4735_v41 = vor.u32 %v5717_v46, %v4732_v25  ;;  %v4931_v12 = vor.u32 %v5769_v11, %v4930_v56  ;;  %v4892_v18 = vld [vmem:[#allocation6 + $0x78] sm:$0xf0]  ;;  %v5789_v56 = vld [vmem:[#allocation6 + $0x164] sm:$0xf0] }
 0x169   :  { %2353 = vmatpush.bf16.msrb.mxu2 %v4655_v34  ;;  %v4607_v34 = vor.u32 %v5685_v17, %v4604_v20  ;;  %v4922_v20 = vld [vmem:[#allocation6 + $0xb0] sm:$0xf] }
 0x16a   :  { %2367 = vmatpush.bf16.msrb.mxu3 %v4783_v40  ;;  %v4946_v40 = vld [vmem:[#allocation6 + $0xe0] sm:$0xf]  ;;  %v4923_v16 = vor.u32 %v5767_v21, %v4922_v20  ;;  %v5772_v21 = vld [vmem:[#allocation6 + $0xe4] sm:$0xf] }
 0x16b   :  { %2327 = vmatpush.bf16.msrb.mxu0 %v4367_v43  ;;  %2341 = vmatpush.bf16.msrb.mxu1 %v4495_v47  ;;  %v5681_v43 = vld [vmem:[#allocation4 + $0x60c] sm:$0xf]  ;;  %v4947_v51 = vor.u32 %v5773_v42, %v4946_v40 }
 0x16c   :  { %v5713_v47 = vld [vmem:[#allocation4 + $0x70c] sm:$0xf]  ;;  %v4591_v53 = vor.u32 %v5681_v43, %v4588_v44  ;;  %v4842_v43 = vld [vmem:[#allocation6 + $0x10] sm:$0xf]  ;;  %v5747_v44 = vld [vmem:[#allocation6 + $0x14] sm:$0xf0] }
 0x16d   :  { %2354 = vmatpush.bf16.msrb.mxu2 %v4639_v50  ;;  %v2065_v50 = vpop.f32.mrf.mxu1  ;;  %v4719_v60 = vor.u32 %v5713_v47, %v4716_v48  ;;  %v4906_v47 = vld [vmem:[#allocation6 + $0x90] sm:$0xf]  ;;  %v5763_v48 = vld [vmem:[#allocation6 + $0x94] sm:$0xf0] }
 0x16e   :  { %2368 = vmatpush.bf16.msrb.mxu3 %v4767_v26  ;;  %v4874_v26 = vld [vmem:[#allocation6 + $0x50] sm:$0xf]  ;;  %v2079_v4 = vpop.f32.mrf.mxu2 }
 0x16f   :  { %2328 = vmatpush.bf16.msrb.mxu0 %v4351_v13  ;;  %2342 = vmatpush.bf16.msrb.mxu1 %v4479_v2  ;;  %v5771_v13 = vld [vmem:[#allocation6 + $0xd4] sm:$0xf0]  ;;  %v4875_v39 = vor.u32 %v5755_v59, %v4874_v26  ;;  %v2053_v2 = vpop.f32.mrf.mxu0  ;;  %v2095_v40 = vpop.f32.mrf.mxu3  ;;  %v4834_v59 = vld [vmem:[#allocation6] sm:$0xf] }
 0x170   :  { %v4939_v5 = vor.u32 %v5771_v13, %v4938_v29  ;;  %v5791_v26 = vld [vmem:[#allocation6 + $0x174] sm:$0xf0]  ;;  %v4898_v29 = vld [vmem:[#allocation6 + $0x80] sm:$0xf] }
 0x171   :  { %2355 = vmatpush.bf16.msrb.mxu2 %v4623_v7  ;;  %v643_v7 = vperm.slane %v6246_v55, 1 }
 0x172   :  { %2369 = vmatpush.bf16.msrb.mxu3 %v4751_v14  ;;  %v4858_v14 = vld [vmem:[#allocation6 + $0x30] sm:$0xf] }
 0x173   :  { %2329 = vmatpush.bf16.msrb.mxu0 %v4335_v24  ;;  %2343 = vmatpush.bf16.msrb.mxu1 %v4463_v54  ;;  %v2052_v17 = vadd.f32 %v6251_v22, %v643_v7  ;;  %v1998_v24 = vadd.f32 %v6240_v32, %v1984_v58  ;;  %v4859_v63 = vor.u32 %v5751_v15, %v4858_v14  ;;  %v4850_v54 = vld [vmem:[#allocation6 + $0x20] sm:$0xf] }
 0x174   :  { %v2054_v30 = vadd.f32 %v2053_v2, %v643_v7  ;;  %v4899_v58 = vor.u32 %v5761_v1, %v4898_v29  ;;  %v5750_v29 = vld [vmem:[#allocation6 + $0x34] sm:$0xf]  ;;  %v4924_v1 = vld [vmem:[#allocation6 + $0xb8] sm:$0xf0] }
 0x175   :  { %2356 = vmatpush.bf16.msrb.mxu2 %v4607_v34  ;;  %v2067_v46 = vpop.f32.mrf.mxu1  ;;  %v5765_v34 = vld [vmem:[#allocation6 + $0xa4] sm:$0xf0]  ;;  %v2012_v22 = vadd.f32 %v6248_v61, %v1998_v24  ;;  %v4948_v24 = vld [vmem:[#allocation6 + $0xe8] sm:$0xf0] }
 0x176   :  { %2370 = vmatpush.bf16.msrb.mxu3 %v4735_v41  ;;  %2330 = vmatmul.bf16.vlgmr.msrb.gmra.mxu0 %v6188_v27  ;;  %v5753_v27 = vld [vmem:[#allocation6 + $0x44] sm:$0xf0]  ;;  %v2081_v36 = vpop.f32.mrf.mxu2  ;;  %v2068_v45 = vadd.f32 %v2067_v46, %v2054_v30  ;;  %v4951_v30 = vor.u32 %v5772_v21, %v4948_v24  ;;  %v5790_v21 = vld [vmem:[#allocation6 + $0x174] sm:$0xf]  ;;  %v5020_v24 = vld [vmem:[#allocation6 + $0x178] sm:$0xf0] }
 0x177   :  { %2779 = vmatpush.bf16.msra.mxu0 %v4891_v52  ;;  %2793 = vmatpush.bf16.msra.mxu1 %v4955_v31  ;;  %v2107_v25 = vpop.f32.mrf.mxu0  ;;  %v2066_v52 = vadd.f32 %v2065_v50, %v2052_v17  ;;  %v4914_v31 = vld [vmem:[#allocation6 + $0xa0] sm:$0xf]  ;;  %v4884_v17 = vld [vmem:[#allocation6 + $0x68] sm:$0xf0] }
 0x178   :  { %2344 = vmatmul.bf16.vlgmr.msrb.gmra.mxu1 %v6190_v35  ;;  %v4867_v35 = vor.u32 %v5753_v27, %v4866_v6  ;;  %v4915_v42 = vor.u32 %v5765_v34, %v4914_v31  ;;  %v2082_v50 = vadd.f32 %v2081_v36, %v2068_v45  ;;  %v4956_v6 = vld [vmem:[#allocation6 + $0xf8] sm:$0xf0]  ;;  %v5754_v31 = vld [vmem:[#allocation6 + $0x54] sm:$0xf] }
 0x179   :  { %2357 = vmatpush.bf16.msrb.mxu2 %v4591_v53  ;;  %v2080_v37 = vadd.f32 %v2079_v4, %v2066_v52  ;;  %v5018_v53 = vld [vmem:[#allocation6 + $0x170] sm:$0xf]  ;;  %v4876_v34 = vld [vmem:[#allocation6 + $0x58] sm:$0xf0] }
 0x17a   :  { %2371 = vmatpush.bf16.msrb.mxu3 %v4719_v60  ;;  %v5745_v60 = vld [vmem:[#allocation6 + $0x4] sm:$0xf0]  ;;  %v5019_v13 = vor.u32 %v5791_v26, %v5018_v53  ;;  %v2096_v27 = vadd.f32 %v2095_v40, %v2082_v50  ;;  %v4994_v40 = vld [vmem:[#allocation6 + $0x140] sm:$0xf]  ;;  %v4986_v53 = vld [vmem:[#allocation6 + $0x130] sm:$0xf] }
 0x17b   :  { %2780 = vmatpush.bf16.msra.mxu0 %v4883_v49  ;;  %2794 = vmatpush.bf16.msra.mxu1 %v4947_v51  ;;  %v2094_v61 = vadd.f32 %v2093_v8, %v2080_v37  ;;  %v4843_v51 = vor.u32 %v5747_v44, %v4842_v43  ;;  %v5010_v8 = vld [vmem:[#allocation6 + $0x160] sm:$0xf]  ;;  %v4940_v37 = vld [vmem:[#allocation6 + $0xd8] sm:$0xf0]  ;;  %v4879_v44 = vor.u32 %v5754_v31, %v4876_v34  ;;  %v5783_v26 = vld [vmem:[#allocation6 + $0x134] sm:$0xf0] }
 0x17c   :  { %2358 = vmatmul.bf16.vlgmr.msrb.gmra.mxu2 %v6194_v62  ;;  %v1996_v62 = vadd.f32 %v6230_v57, %v1982_v10  ;;  %v2026_v57 = vadd.f32 %v6253_v23, %v2012_v22  ;;  %v4907_v23 = vor.u32 %v5763_v48, %v4906_v47  ;;  %v5011_v10 = vor.u32 %v5789_v56, %v5010_v8  ;;  %v5770_v22 = vld [vmem:[#allocation6 + $0xd4] sm:$0xf]  ;;  %v5752_v48 = vld [vmem:[#allocation6 + $0x44] sm:$0xf]  ;;  %v5779_v8 = vld [vmem:[#allocation6 + $0x114] sm:$0xf0] }
 0x17d   :  { %2372 = vmatmul.bf16.vlgmr.msrb.gmra.mxu3 %v6196_v3  ;;  %v5749_v3 = vld [vmem:[#allocation6 + $0x24] sm:$0xf0]  ;;  %v2121_v9 = vpop.f32.mrf.mxu1  ;;  %v2108_v0 = vadd.f32 %v2107_v25, %v2094_v61  ;;  %2807 = vmatpush.bf16.msra.mxu2 %v5019_v13  ;;  %v4943_v47 = vor.u32 %v5770_v22, %v4940_v37  ;;  %v4932_v61 = vld [vmem:[#allocation6 + $0xc8] sm:$0xf0]  ;;  %v4860_v13 = vld [vmem:[#allocation6 + $0x38] sm:$0xf0] }
 0x17e   :  { %v4851_v32 = vor.u32 %v5749_v3, %v4850_v54  ;;  %v2010_v41 = vadd.f32 %v6238_v19, %v1996_v62  ;;  %v2040_v19 = vadd.f32 %v6255_v28, %v2026_v57  ;;  %v4835_v28 = vor.u32 %v5745_v60, %v4834_v59  ;;  %v5787_v62 = vld [vmem:[#allocation6 + $0x154] sm:$0xf0]  ;;  %v5788_v31 = vld [vmem:[#allocation6 + $0x164] sm:$0xf]  ;;  %v5012_v34 = vld [vmem:[#allocation6 + $0x168] sm:$0xf0] }
 0x17f   :  { %2781 = vmatpush.bf16.msra.mxu0 %v4875_v39  ;;  %2795 = vmatpush.bf16.msra.mxu1 %v4939_v5  ;;  %v5758_v39 = vld [vmem:[#allocation6 + $0x74] sm:$0xf]  ;;  %v2109_v2 = vpop.f32.mrf.mxu0  ;;  %v2135_v4 = vpop.f32.mrf.mxu2 }
 0x180   :  { %v2024_v49 = vadd.f32 %v6242_v33, %v2010_v41  ;;  %v5774_v5 = vld [vmem:[#allocation6 + $0xf4] sm:$0xf]  ;;  %v2149_v7 = vpop.f32.mrf.mxu3  ;;  %v2382_v11 = vmax.f32 %v2040_v19, 0.0  ;;  %v2110_v14 = vadd.f32 %v2109_v2, %v2096_v27  ;;  %v5764_v27 = vld [vmem:[#allocation6 + $0xa4] sm:$0xf] }
 0x181   :  { %v4959_v15 = vor.u32 %v5774_v5, %v4956_v6  ;;  %2808 = vmatpush.bf16.msra.mxu2 %v5011_v10  ;;  %v5748_v5 = vld [vmem:[#allocation6 + $0x24] sm:$0xf]  ;;  %v4852_v6 = vld [vmem:[#allocation6 + $0x28] sm:$0xf0]  ;;  %v4844_v10 = vld [vmem:[#allocation6 + $0x18] sm:$0xf0] }
 0x182   :  { %v2038_v33 = vadd.f32 %v6244_v38, %v2024_v49  ;;  %v5756_v38 = vld [vmem:[#allocation6 + $0x64] sm:$0xf]  ;;  %v4868_v49 = vld [vmem:[#allocation6 + $0x48] sm:$0xf0]  ;;  %v4855_v56 = vor.u32 %v5748_v5, %v4852_v6  ;;  %v5786_v37 = vld [vmem:[#allocation6 + $0x154] sm:$0xf] }
 0x183   :  { %2782 = vmatpush.bf16.msra.mxu0 %v4867_v35  ;;  %2796 = vmatpush.bf16.msra.mxu1 %v4931_v12  ;;  %v4895_v35 = vor.u32 %v5758_v39, %v4892_v18  ;;  %v2122_v12 = vadd.f32 %v2121_v9, %v2108_v0  ;;  %v4887_v54 = vor.u32 %v5756_v38, %v4884_v17  ;;  %v5768_v9 = vld [vmem:[#allocation6 + $0xc4] sm:$0xf]  ;;  %v5766_v0 = vld [vmem:[#allocation6 + $0xb4] sm:$0xf]  ;;  %v4978_v39 = vld [vmem:[#allocation6 + $0x120] sm:$0xf] }
 0x184   :  { %v2378_v20 = vmax.f32 %v2038_v33, 0.0  ;;  %v4871_v19 = vor.u32 %v5752_v48, %v4868_v49  ;;  %v4935_v60 = vor.u32 %v5768_v9, %v4932_v61  ;;  %v5781_v18 = vld [vmem:[#allocation6 + $0x124] sm:$0xf0]  ;;  %v4863_v33 = vor.u32 %v5750_v29, %v4860_v13  ;;  %v5782_v49 = vld [vmem:[#allocation6 + $0x134] sm:$0xf] }
 0x185   :  { %v2136_v46 = vadd.f32 %v2135_v4, %v2122_v12  ;;  %v4979_v2 = vor.u32 %v5781_v18, %v4978_v39  ;;  %v4927_v4 = vor.u32 %v5766_v0, %v4924_v1  ;;  %v5762_v12 = vld [vmem:[#allocation6 + $0x94] sm:$0xf]  ;;  %v5777_v38 = vld [vmem:[#allocation6 + $0x104] sm:$0xf0]  ;;  %v4988_v9 = vld [vmem:[#allocation6 + $0x138] sm:$0xf0] }
 0x186   :  { %v6279_v25 = vpack.c.bf16 %v2382_v11, %v2378_v20  ;;  %v4991_v61 = vor.u32 %v5782_v49, %v4988_v9  ;;  %v5778_v29 = vld [vmem:[#allocation6 + $0x114] sm:$0xf]  ;;  %v4972_v13 = vld [vmem:[#allocation6 + $0x118] sm:$0xf0]  ;;  %v5026_v49 = vld [vmem:[#allocation6 + $0x180] sm:$0xf] }
 0x187   :  { %2783 = vmatpush.bf16.msra.mxu0 %v4859_v63  ;;  %2797 = vmatpush.bf16.msra.mxu1 %v4923_v16  ;;  %v5002_v63 = vld [vmem:[#allocation6 + $0x150] sm:$0xf]  ;;  %v2123_v16 = vpop.f32.mrf.mxu1  ;;  %v2137_v36 = vpop.f32.mrf.mxu2  ;;  %v2150_v41 = vadd.f32 %v2149_v7, %v2136_v46  ;;  %v4916_v7 = vld [vmem:[#allocation6 + $0xa8] sm:$0xf0]  ;;  %v4975_v39 = vor.u32 %v5778_v29, %v4972_v13  ;;  %v5793_v9 = vld [vmem:[#allocation6 + $0x184] sm:$0xf0] }
 0x188   :  { %v5003_v3 = vor.u32 %v5787_v62, %v5002_v63  ;;  %v2124_v52 = vadd.f32 %v2123_v16, %v2110_v14  ;;  %v2151_v43 = vpop.f32.mrf.mxu3  ;;  %v4908_v14 = vld [vmem:[#allocation6 + $0x98] sm:$0xf0]  ;;  %v5744_v63 = vld [vmem:[#allocation6 + $0x4] sm:$0xf]  ;;  %v4836_v62 = vld [vmem:[#allocation6 + $0x8] sm:$0xf0]  ;;  %v5023_v16 = vor.u32 %v5790_v21, %v5020_v24 }
 0x189   :  { %v2379_v50 = vmax.f32 %v2150_v41, 0.0  ;;  %v4911_v46 = vor.u32 %v5762_v12, %v4908_v14  ;;  %v5074_v12 = vld [vmem:[#allocation6 + $0x1e0] sm:$0xf]  ;;  %v5805_v14 = vld [vmem:[#allocation6 + $0x1e4] sm:$0xf0] }
 0x18a   :  { %2809 = vmatpush.bf16.msra.mxu2 %v5003_v3  ;;  %v2138_v57 = vadd.f32 %v2137_v36, %v2124_v52  ;;  %v4900_v3 = vld [vmem:[#allocation6 + $0x88] sm:$0xf0]  ;;  %v5015_v36 = vor.u32 %v5788_v31, %v5012_v34  ;;  %v5066_v21 = vld [vmem:[#allocation6 + $0x1d0] sm:$0xf]  ;;  %v5803_v24 = vld [vmem:[#allocation6 + $0x1d4] sm:$0xf0] }
 0x18b   :  { %2784 = vmatpush.bf16.msra.mxu0 %v4851_v32  ;;  %2798 = vmatpush.bf16.msra.mxu1 %v4915_v42  ;;  %v5785_v32 = vld [vmem:[#allocation6 + $0x144] sm:$0xf0] }
 0x18c   :  { %v4995_v42 = vor.u32 %v5785_v32, %v4994_v40  ;;  %v2152_v45 = vadd.f32 %v2151_v43, %v2138_v57  ;;  %v5004_v40 = vld [vmem:[#allocation6 + $0x158] sm:$0xf0]  ;;  %v5784_v57 = vld [vmem:[#allocation6 + $0x144] sm:$0xf] }
 0x18d   :  { %v5007_v32 = vor.u32 %v5786_v37, %v5004_v40  ;;  %v5050_v40 = vld [vmem:[#allocation6 + $0x1b0] sm:$0xf] }
 0x18e   :  { %2810 = vmatpush.bf16.msra.mxu2 %v4995_v42  ;;  %v4996_v42 = vld [vmem:[#allocation6 + $0x148] sm:$0xf0] }
 0x18f   :  { %2785 = vmatpush.bf16.msra.mxu0 %v4843_v51  ;;  %2799 = vmatpush.bf16.msra.mxu1 %v4907_v23  ;;  %v2383_v51 = vmax.f32 %v2152_v45, 0.0  ;;  %v4987_v23 = vor.u32 %v5783_v26, %v4986_v53  ;;  %v4999_v43 = vor.u32 %v5784_v57, %v4996_v42  ;;  %v5780_v53 = vld [vmem:[#allocation6 + $0x124] sm:$0xf]  ;;  %v5042_v42 = vld [vmem:[#allocation6 + $0x1a0] sm:$0xf] }
 0x191   :  { %v6282_v59 = vpack.c.bf16 %v2383_v51, %v2379_v50 }
 0x192   :  { %2811 = vmatpush.bf16.msra.mxu2 %v4987_v23 }
 0x193   :  { %2786 = vmatpush.bf16.msra.mxu0 %v4835_v28  ;;  %2800 = vmatpush.bf16.msra.mxu1 %v4899_v58  ;;  %v4970_v28 = vld [vmem:[#allocation6 + $0x110] sm:$0xf]  ;;  %v4919_v58 = vor.u32 %v5764_v27, %v4916_v7  ;;  %v2163_v52 = vpop.f32.mrf.mxu0 }
 0x194   :  { %v4971_v11 = vor.u32 %v5779_v8, %v4970_v28  ;;  %v5082_v7 = vld [vmem:[#allocation6 + $0x1f0] sm:$0xf]  ;;  %v5807_v28 = vld [vmem:[#allocation6 + $0x1f4] sm:$0xf0] }
 0x195   :  { %v2177_v41 = vpop.f32.mrf.mxu1  ;;  %v5083_v8 = vor.u32 %v5807_v28, %v5082_v7  ;;  %v5796_v7 = vld [vmem:[#allocation6 + $0x1a4] sm:$0xf]  ;;  %v5044_v28 = vld [vmem:[#allocation6 + $0x1a8] sm:$0xf0] }
 0x196   :  { %2787 = vmatmul.bf16.vlgmr.msra.gmra.mxu0 %v6279_v25  ;;  %2801 = vmatmul.bf16.vlgmr.msra.gmra.mxu1 %v6282_v59 }
 0x197   :  { %2835 = vmatpush.bf16.msrb.mxu0 %v4895_v35  ;;  %2849 = vmatpush.bf16.msrb.mxu1 %v4959_v15  ;;  %v5746_v35 = vld [vmem:[#allocation6 + $0x14] sm:$0xf]  ;;  %v4962_v15 = vld [vmem:[#allocation6 + $0x100] sm:$0xf] }
 0x198   :  { %2812 = vmatpush.bf16.msra.mxu2 %v4979_v2  ;;  %v4847_v17 = vor.u32 %v5746_v35, %v4844_v10  ;;  %v4963_v20 = vor.u32 %v5777_v38, %v4962_v15  ;;  %v5776_v2 = vld [vmem:[#allocation6 + $0x104] sm:$0xf]  ;;  %2821 = vmatpush.bf16.msra.mxu3 %v5083_v8  ;;  %v5075_v15 = vor.u32 %v5805_v14, %v5074_v12  ;;  %v5794_v14 = vld [vmem:[#allocation6 + $0x194] sm:$0xf] }
 0x19b   :  { %2836 = vmatpush.bf16.msrb.mxu0 %v4887_v54  ;;  %2850 = vmatpush.bf16.msrb.mxu1 %v4951_v30  ;;  %v5760_v54 = vld [vmem:[#allocation6 + $0x84] sm:$0xf]  ;;  %v4839_v30 = vor.u32 %v5744_v63, %v4836_v62  ;;  %v5067_v63 = vor.u32 %v5803_v24, %v5066_v21  ;;  %v5028_v24 = vld [vmem:[#allocation6 + $0x188] sm:$0xf0] }
 0x19c   :  { %2813 = vmatpush.bf16.msra.mxu2 %v4971_v11  ;;  %v4903_v22 = vor.u32 %v5760_v54, %v4900_v3  ;;  %2822 = vmatpush.bf16.msra.mxu3 %v5075_v15  ;;  %v5058_v54 = vld [vmem:[#allocation6 + $0x1c0] sm:$0xf]  ;;  %v5801_v3 = vld [vmem:[#allocation6 + $0x1c4] sm:$0xf0]  ;;  %v5036_v15 = vld [vmem:[#allocation6 + $0x198] sm:$0xf0] }
 0x19d   :  { %v2179_v51 = vpop.f32.mrf.mxu1  ;;  %v5059_v31 = vor.u32 %v5801_v3, %v5058_v54  ;;  %v5792_v21 = vld [vmem:[#allocation6 + $0x184] sm:$0xf] }
 0x19f   :  { %2837 = vmatpush.bf16.msrb.mxu0 %v4879_v44  ;;  %2851 = vmatpush.bf16.msrb.mxu1 %v4943_v47  ;;  %v2165_v44 = vpop.f32.mrf.mxu0  ;;  %v2191_v45 = vpop.f32.mrf.mxu2  ;;  %v644_v47 = vperm.slane %v6246_v55, 2 }
 0x1a0   :  { %2814 = vmatpush.bf16.msra.mxu2 %v4963_v20  ;;  %v2205_v48 = vpop.f32.mrf.mxu3  ;;  %2823 = vmatpush.bf16.msra.mxu3 %v5067_v63  ;;  %v5031_v63 = vor.u32 %v5792_v21, %v5028_v24  ;;  %v5860_v21 = vld [vmem:[#allocation7 + $0x1a4] sm:$0xf] }
 0x1a1   :  { %v2164_v50 = vadd.f32 %v2163_v52, %v644_v47  ;;  %v5820_v24 = vld [vmem:[#allocation7 + $0x64] sm:$0xf] }
 0x1a3   :  { %2838 = vmatpush.bf16.msrb.mxu0 %v4871_v19  ;;  %2852 = vmatpush.bf16.msrb.mxu1 %v4935_v60  ;;  %v2178_v23 = vadd.f32 %v2177_v41, %v2164_v50  ;;  %v5806_v50 = vld [vmem:[#allocation6 + $0x1f4] sm:$0xf] }
 0x1a4   :  { %2863 = vmatpush.bf16.msrb.mxu2 %v5023_v16  ;;  %2824 = vmatpush.bf16.msra.mxu3 %v5059_v31 }
 0x1a5   :  { %v2192_v0 = vadd.f32 %v2191_v45, %v2178_v23  ;;  %v5034_v45 = vld [vmem:[#allocation6 + $0x190] sm:$0xf] }
 0x1a7   :  { %2839 = vmatpush.bf16.msrb.mxu0 %v4863_v33  ;;  %2853 = vmatpush.bf16.msrb.mxu1 %v4927_v4  ;;  %v2193_v60 = vpop.f32.mrf.mxu2  ;;  %v4964_v4 = vld [vmem:[#allocation6 + $0x108] sm:$0xf0]  ;;  %v2206_v5 = vadd.f32 %v2205_v48, %v2192_v0  ;;  %v5800_v0 = vld [vmem:[#allocation6 + $0x1c4] sm:$0xf] }
 0x1a8   :  { %2864 = vmatpush.bf16.msrb.mxu2 %v5015_v36  ;;  %v2207_v1 = vpop.f32.mrf.mxu3  ;;  %v4967_v27 = vor.u32 %v5776_v2, %v4964_v4  ;;  %v645_v2 = vperm.slane %v6246_v55, 3 }
 0x1ab   :  { %2840 = vmatpush.bf16.msrb.mxu0 %v4855_v56  ;;  %2854 = vmatpush.bf16.msrb.mxu1 %v4919_v58 }
 0x1ac   :  { %2865 = vmatpush.bf16.msrb.mxu2 %v5007_v32  ;;  %v5799_v32 = vld [vmem:[#allocation6 + $0x1b4] sm:$0xf0] }
 0x1ad   :  { %v5051_v41 = vor.u32 %v5799_v32, %v5050_v40 }
 0x1af   :  { %2841 = vmatpush.bf16.msrb.mxu0 %v4847_v17  ;;  %2855 = vmatpush.bf16.msrb.mxu1 %v4911_v46 }
 0x1b0   :  { %2866 = vmatpush.bf16.msrb.mxu2 %v4999_v43  ;;  %2825 = vmatpush.bf16.msra.mxu3 %v5051_v41  ;;  %v5797_v43 = vld [vmem:[#allocation6 + $0x1a4] sm:$0xf0] }
 0x1b3   :  { %2842 = vmatpush.bf16.msrb.mxu0 %v4839_v30  ;;  %2856 = vmatpush.bf16.msrb.mxu1 %v4903_v22  ;;  %v2219_v19 = vpop.f32.mrf.mxu0 }
 0x1b4   :  { %2867 = vmatpush.bf16.msrb.mxu2 %v4991_v61  ;;  %v2220_v56 = vadd.f32 %v2219_v19, %v2206_v5  ;;  %v5027_v61 = vor.u32 %v5793_v9, %v5026_v49  ;;  %v5076_v19 = vld [vmem:[#allocation6 + $0x1e8] sm:$0xf0]  ;;  %v5798_v5 = vld [vmem:[#allocation6 + $0x1b4] sm:$0xf]  ;;  %v5838_v49 = vld [vmem:[#allocation7 + $0xec] sm:$0xf0] }
 0x1b5   :  { %v2233_v33 = vpop.f32.mrf.mxu1  ;;  %v5836_v9 = vld [vmem:[#allocation7 + $0xe4] sm:$0xf] }
 0x1b6   :  { %2843 = vmatmul.bf16.vlgmr.msrb.gmra.mxu0 %v6279_v25  ;;  %2857 = vmatmul.bf16.vlgmr.msrb.gmra.mxu1 %v6282_v59  ;;  %v4980_v25 = vld [vmem:[#allocation6 + $0x128] sm:$0xf0]  ;;  %v2166_v59 = vadd.f32 %v2165_v44, %v644_v47  ;;  %v2234_v38 = vadd.f32 %v2233_v33, %v2220_v56  ;;  %v5043_v44 = vor.u32 %v5797_v43, %v5042_v42  ;;  %v5795_v47 = vld [vmem:[#allocation6 + $0x194] sm:$0xf0] }
 0x1b7   :  { %v4983_v26 = vor.u32 %v5780_v53, %v4980_v25  ;;  %v5035_v48 = vor.u32 %v5795_v47, %v5034_v45  ;;  %v5047_v56 = vor.u32 %v5796_v7, %v5044_v28  ;;  %v5314_v28 = vld [vmem:[#allocation7 + $0x1c0] sm:$0xf] }
 0x1b8   :  { %v2180_v18 = vadd.f32 %v2179_v51, %v2166_v59  ;;  %2826 = vmatpush.bf16.msra.mxu3 %v5043_v44  ;;  %v5084_v51 = vld [vmem:[#allocation6 + $0x1f8] sm:$0xf0]  ;;  %v5802_v59 = vld [vmem:[#allocation6 + $0x1d4] sm:$0xf] }
 0x1b9   :  { %2868 = vmatpush.bf16.msrb.mxu2 %v4983_v26  ;;  %v5087_v53 = vor.u32 %v5806_v50, %v5084_v51  ;;  %v5804_v26 = vld [vmem:[#allocation6 + $0x1e4] sm:$0xf]  ;;  %v5204_v50 = vld [vmem:[#allocation7 + $0xf0] sm:$0xf0]  ;;  %v5186_v51 = vld [vmem:[#allocation7 + $0xc0] sm:$0xf] }
 0x1ba   :  { %v2194_v6 = vadd.f32 %v2193_v60, %v2180_v18  ;;  %v5079_v23 = vor.u32 %v5804_v26, %v5076_v19  ;;  %v5068_v60 = vld [vmem:[#allocation6 + $0x1d8] sm:$0xf0]  ;;  %v5832_v26 = vld [vmem:[#allocation7 + $0xc4] sm:$0xf]  ;;  %v5188_v19 = vld [vmem:[#allocation7 + $0xd0] sm:$0xf0] }
 0x1bb   :  { %v2221_v11 = vpop.f32.mrf.mxu0  ;;  %v5071_v29 = vor.u32 %v5802_v59, %v5068_v60  ;;  %v5191_v59 = vor.u32 %v5832_v26, %v5188_v19  ;;  %v5170_v60 = vld [vmem:[#allocation7 + $0xa0] sm:$0xf]  ;;  %v5210_v26 = vld [vmem:[#allocation7 + $0xe8] sm:$0xf]  ;;  %v5839_v19 = vld [vmem:[#allocation7 + $0xf4] sm:$0xf0] }
 0x1bc   :  { %v2208_v35 = vadd.f32 %v2207_v1, %v2194_v6  ;;  %2827 = vmatpush.bf16.msra.mxu3 %v5035_v48  ;;  %v5060_v1 = vld [vmem:[#allocation6 + $0x1c8] sm:$0xf0]  ;;  %v5052_v6 = vld [vmem:[#allocation6 + $0x1b8] sm:$0xf0]  ;;  %v5202_v48 = vld [vmem:[#allocation7 + $0xe0] sm:$0xf] }
 0x1bd   :  { %2869 = vmatpush.bf16.msrb.mxu2 %v4975_v39  ;;  %v2235_v46 = vpop.f32.mrf.mxu1  ;;  %v5063_v39 = vor.u32 %v5800_v0, %v5060_v1  ;;  %v5172_v0 = vld [vmem:[#allocation7 + $0xb0] sm:$0xf0]  ;;  %v5330_v1 = vld [vmem:[#allocation7 + $0x1e0] sm:$0xf] }
 0x1be   :  { %v2222_v17 = vadd.f32 %v2221_v11, %v2208_v35 }
 0x1bf   :  { %v2247_v58 = vpop.f32.mrf.mxu2 }
 0x1c0   :  { %v2261_v10 = vpop.f32.mrf.mxu3  ;;  %v2248_v20 = vadd.f32 %v2247_v58, %v2234_v38  ;;  %v2236_v62 = vadd.f32 %v2235_v46, %v2222_v17  ;;  %2828 = vmatpush.bf16.msra.mxu3 %v5027_v61  ;;  %v5039_v17 = vor.u32 %v5794_v14, %v5036_v15  ;;  %v5203_v61 = vor.u32 %v5838_v49, %v5202_v48  ;;  %v5298_v15 = vld [vmem:[#allocation7 + $0x1a0] sm:$0xf] }
 0x1c1   :  { %2870 = vmatpush.bf16.msrb.mxu2 %v4967_v27  ;;  %v5055_v27 = vor.u32 %v5798_v5, %v5052_v6  ;;  %v5154_v6 = vld [vmem:[#allocation7 + $0x80] sm:$0xf] }
 0x1c2   :  { %v2262_v52 = vadd.f32 %v2261_v10, %v2248_v20  ;;  %3290 = vmatpush.bf16.msra.mxu0 %v5203_v61  ;;  %v5810_v61 = vld [vmem:[#allocation7 + $0xc] sm:$0xf0] }
 0x1c4   :  { %v2380_v36 = vmax.f32 %v2262_v52, 0.0  ;;  %2877 = vmatpush.bf16.msrb.mxu3 %v5087_v53  ;;  %v5834_v53 = vld [vmem:[#allocation7 + $0xcc] sm:$0xf0] }
 0x1c7   :  { %v2249_v16 = vpop.f32.mrf.mxu2 }
 0x1c8   :  { %v2250_v30 = vadd.f32 %v2249_v16, %v2236_v62  ;;  %v2263_v34 = vpop.f32.mrf.mxu3  ;;  %2878 = vmatpush.bf16.msrb.mxu3 %v5079_v23  ;;  %v5187_v23 = vor.u32 %v5834_v53, %v5186_v51  ;;  %v5092_v51 = vld [vmem:[#allocation7 + $0x10] sm:$0xf0] }
 0x1ca   :  { %v2264_v22 = vadd.f32 %v2263_v34, %v2250_v30  ;;  %3291 = vmatpush.bf16.msra.mxu0 %v5187_v23  ;;  %v5837_v23 = vld [vmem:[#allocation7 + $0xec] sm:$0xf] }
 0x1cc   :  { %v2384_v37 = vmax.f32 %v2264_v22, 0.0  ;;  %2879 = vmatpush.bf16.msrb.mxu3 %v5071_v29  ;;  %v5830_v29 = vld [vmem:[#allocation7 + $0xac] sm:$0xf0] }
 0x1ce   :  { %v2388_v57 = vpack.c.bf16 %v2384_v37, %v2380_v36 }
 0x1d0   :  { %2815 = vmatmul.bf16.vlgmr.msra.gmra.mxu2 %v2388_v57  ;;  %2880 = vmatpush.bf16.msrb.mxu3 %v5063_v39  ;;  %v5870_v39 = vld [vmem:[#allocation7 + $0x1ec] sm:$0xf0] }
 0x1d3   :  { %v2275_v25 = vpop.f32.mrf.mxu0 }
 0x1d4   :  { %v2276_v8 = vadd.f32 %v2275_v25, %v645_v2  ;;  %2881 = vmatpush.bf16.msrb.mxu3 %v5055_v27  ;;  %v5207_v25 = vor.u32 %v5836_v9, %v5204_v50  ;;  %v5826_v27 = vld [vmem:[#allocation7 + $0x8c] sm:$0xf0]  ;;  %v5090_v9 = vld [vmem:[#allocation7] sm:$0xf]  ;;  %v5808_v50 = vld [vmem:[#allocation7 + $0x4] sm:$0xf] }
 0x1d5   :  { %v2289_v13 = vpop.f32.mrf.mxu1  ;;  %v5091_v53 = vor.u32 %v5810_v61, %v5090_v9 }
 0x1d6   :  { %v2290_v35 = vadd.f32 %v2289_v13, %v2276_v8  ;;  %3318 = vmatpush.bf16.msra.mxu2 %v5207_v25  ;;  %v5828_v13 = vld [vmem:[#allocation7 + $0xa4] sm:$0xf]  ;;  %v5095_v25 = vor.u32 %v5808_v50, %v5092_v51  ;;  %v5130_v51 = vld [vmem:[#allocation7 + $0x48] sm:$0xf] }
 0x1d7   :  { %v5175_v5 = vor.u32 %v5828_v13, %v5172_v0  ;;  %v5824_v8 = vld [vmem:[#allocation7 + $0x84] sm:$0xf]  ;;  %v5266_v13 = vld [vmem:[#allocation7 + $0x160] sm:$0xf]  ;;  %v5854_v0 = vld [vmem:[#allocation7 + $0x16c] sm:$0xf0] }
 0x1d8   :  { %2882 = vmatpush.bf16.msrb.mxu3 %v5047_v56  ;;  %v5156_v56 = vld [vmem:[#allocation7 + $0x90] sm:$0xf0] }
 0x1da   :  { %3319 = vmatpush.bf16.msra.mxu2 %v5191_v59  ;;  %v5211_v59 = vor.u32 %v5839_v19, %v5210_v26  ;;  %v5867_v19 = vld [vmem:[#allocation7 + $0x1d4] sm:$0xf0] }
 0x1db   :  { %v2277_v18 = vpop.f32.mrf.mxu0 }
 0x1dc   :  { %v2278_v10 = vadd.f32 %v2277_v18, %v645_v2  ;;  %2883 = vmatpush.bf16.msrb.mxu3 %v5039_v17  ;;  %v5171_v18 = vor.u32 %v5830_v29, %v5170_v60  ;;  %v5868_v2 = vld [vmem:[#allocation7 + $0x1e4] sm:$0xf]  ;;  %v5138_v17 = vld [vmem:[#allocation7 + $0x60] sm:$0xf]  ;;  %v5212_v60 = vld [vmem:[#allocation7 + $0xf8] sm:$0xf0] }
 0x1dd   :  { %v2291_v11 = vpop.f32.mrf.mxu1  ;;  %v5215_v29 = vor.u32 %v5837_v23, %v5212_v60  ;;  %v5817_v23 = vld [vmem:[#allocation7 + $0x4c] sm:$0xf] }
 0x1de   :  { %v2292_v20 = vadd.f32 %v2291_v11, %v2278_v10  ;;  %v5866_v11 = vld [vmem:[#allocation7 + $0x1cc] sm:$0xf0]  ;;  %v5316_v10 = vld [vmem:[#allocation7 + $0x1d0] sm:$0xf0]  ;;  %3292 = vmatpush.bf16.msra.mxu0 %v5171_v18  ;;  %3320 = vmatpush.bf16.msra.mxu2 %v5175_v5 }
 0x1df   :  { %v2303_v33 = vpop.f32.mrf.mxu2  ;;  %v5268_v18 = vld [vmem:[#allocation7 + $0x170] sm:$0xf0] }
 0x1e0   :  { %2871 = vmatmul.bf16.vlgmr.msrb.gmra.mxu2 %v2388_v57  ;;  %v2317_v4 = vpop.f32.mrf.mxu3  ;;  %v2304_v38 = vadd.f32 %v2303_v33, %v2290_v35  ;;  %2884 = vmatpush.bf16.msrb.mxu3 %v5031_v63  ;;  %v5331_v33 = vor.u32 %v5870_v39, %v5330_v1  ;;  %v5864_v35 = vld [vmem:[#allocation7 + $0x1c4] sm:$0xf]  ;;  %v5267_v39 = vor.u32 %v5854_v0, %v5266_v13  ;;  %v5865_v13 = vld [vmem:[#allocation7 + $0x1cc] sm:$0xf]  ;;  %v5324_v0 = vld [vmem:[#allocation7 + $0x1d8] sm:$0xf0] }
 0x1e1   :  { %v5319_v14 = vor.u32 %v5864_v35, %v5316_v10  ;;  %v5852_v1 = vld [vmem:[#allocation7 + $0x164] sm:$0xf]  ;;  %v5178_v10 = vld [vmem:[#allocation7 + $0xa8] sm:$0xf] }
 0x1e2   :  { %v2318_v62 = vadd.f32 %v2317_v4, %v2304_v38  ;;  %v5332_v4 = vld [vmem:[#allocation7 + $0x1f0] sm:$0xf0]  ;;  %3304 = vmatpush.bf16.msra.mxu1 %v5331_v33  ;;  %v5862_v38 = vld [vmem:[#allocation7 + $0x1ac] sm:$0xf0]  ;;  %v5194_v33 = vld [vmem:[#allocation7 + $0xc8] sm:$0xf] }
 0x1e3   :  { %v5335_v7 = vor.u32 %v5868_v2, %v5332_v4  ;;  %v5299_v63 = vor.u32 %v5862_v38, %v5298_v15  ;;  %v5835_v2 = vld [vmem:[#allocation7 + $0xd4] sm:$0xf0]  ;;  %v5271_v4 = vor.u32 %v5852_v1, %v5268_v18  ;;  %v5180_v38 = vld [vmem:[#allocation7 + $0xb8] sm:$0xf0]  ;;  %v5327_v1 = vor.u32 %v5865_v13, %v5324_v0  ;;  %v5114_v18 = vld [vmem:[#allocation7 + $0x28] sm:$0xf] }
 0x1e4   :  { %v5195_v5 = vor.u32 %v5835_v2, %v5194_v33  ;;  %v5815_v33 = vld [vmem:[#allocation7 + $0x34] sm:$0xf0]  ;;  %v5306_v2 = vld [vmem:[#allocation7 + $0x1a8] sm:$0xf]  ;;  %v5841_v0 = vld [vmem:[#allocation7 + $0x10c] sm:$0xf] }
 0x1e7   :  { %v2305_v12 = vpop.f32.mrf.mxu2 }
 0x1e8   :  { %v2319_v55 = vpop.f32.mrf.mxu3  ;;  %v2306_v16 = vadd.f32 %v2305_v12, %v2292_v20  ;;  %v5155_v12 = vor.u32 %v5826_v27, %v5154_v6  ;;  %v5822_v20 = vld [vmem:[#allocation7 + $0x6c] sm:$0xf0]  ;;  %v5833_v6 = vld [vmem:[#allocation7 + $0xcc] sm:$0xf]  ;;  %v5196_v27 = vld [vmem:[#allocation7 + $0xd8] sm:$0xf0] }
 0x1ea   :  { %v2320_v30 = vadd.f32 %v2319_v55, %v2306_v16  ;;  %v5159_v55 = vor.u32 %v5824_v8, %v5156_v56  ;;  %3293 = vmatpush.bf16.msra.mxu0 %v5155_v12  ;;  %v5850_v8 = vld [vmem:[#allocation7 + $0x14c] sm:$0xf0]  ;;  %v5848_v56 = vld [vmem:[#allocation7 + $0x144] sm:$0xf]  ;;  %v5831_v12 = vld [vmem:[#allocation7 + $0xb4] sm:$0xf0] }
 0x1eb   :  { %v5179_v15 = vor.u32 %v5831_v12, %v5178_v10  ;;  %v5098_v10 = vld [vmem:[#allocation7 + $0x8] sm:$0xf]  ;;  %v5811_v12 = vld [vmem:[#allocation7 + $0x14] sm:$0xf0] }
 0x1ec   :  { %3321 = vmatpush.bf16.msra.mxu2 %v5159_v55 }
 0x1f3   :  { %v2331_v58 = vpop.f32.mrf.mxu0 }
 0x1f4   :  { %v2332_v54 = vadd.f32 %v2331_v58, %v2318_v62  ;;  %v5315_v58 = vor.u32 %v5866_v11, %v5314_v28  ;;  %v5300_v62 = vld [vmem:[#allocation7 + $0x1b0] sm:$0xf0]  ;;  %v5199_v28 = vor.u32 %v5833_v6, %v5196_v27  ;;  %v5813_v6 = vld [vmem:[#allocation7 + $0x2c] sm:$0xf]  ;;  %v5116_v27 = vld [vmem:[#allocation7 + $0x38] sm:$0xf0] }
 0x1f5   :  { %v2345_v46 = vpop.f32.mrf.mxu1  ;;  %v5303_v16 = vor.u32 %v5860_v21, %v5300_v62  ;;  %v5252_v11 = vld [vmem:[#allocation7 + $0x150] sm:$0xf0]  ;;  %v5844_v21 = vld [vmem:[#allocation7 + $0x124] sm:$0xf]  ;;  %v5827_v62 = vld [vmem:[#allocation7 + $0x94] sm:$0xf0] }
 0x1f6   :  { %v2346_v34 = vadd.f32 %v2345_v46, %v2332_v54  ;;  %v5140_v46 = vld [vmem:[#allocation7 + $0x70] sm:$0xf0]  ;;  %3305 = vmatpush.bf16.msra.mxu1 %v5315_v58  ;;  %v5282_v54 = vld [vmem:[#allocation7 + $0x180] sm:$0xf]  ;;  %v5255_v35 = vor.u32 %v5848_v56, %v5252_v11  ;;  %v5861_v56 = vld [vmem:[#allocation7 + $0x1ac] sm:$0xf] }
 0x1f7   :  { %v5308_v11 = vld [vmem:[#allocation7 + $0x1b8] sm:$0xf0] }
 0x1fa   :  { %3306 = vmatpush.bf16.msra.mxu1 %v5299_v63  ;;  %v5162_v63 = vld [vmem:[#allocation7 + $0x88] sm:$0xf] }
 0x1fb   :  { %v2333_v3 = vpop.f32.mrf.mxu0 }
 0x1fc   :  { %v2334_v22 = vadd.f32 %v2333_v3, %v2320_v30  ;;  %v5858_v3 = vld [vmem:[#allocation7 + $0x18c] sm:$0xf0]  ;;  %v5856_v30 = vld [vmem:[#allocation7 + $0x184] sm:$0xf] }
 0x1fd   :  { %v2347_v37 = vpop.f32.mrf.mxu1 }
 0x1fe   :  { %v2348_v40 = vadd.f32 %v2347_v37, %v2334_v22  ;;  %v5122_v22 = vld [vmem:[#allocation7 + $0x40] sm:$0xf]  ;;  %v5816_v37 = vld [vmem:[#allocation7 + $0x44] sm:$0xf] }
 0x1ff   :  { %v2359_v52 = vpop.f32.mrf.mxu2 }
 0x200   :  { %v2373_v31 = vpop.f32.mrf.mxu3  ;;  %v2360_v36 = vadd.f32 %v2359_v52, %v2346_v34  ;;  %v5139_v52 = vor.u32 %v5822_v20, %v5138_v17  ;;  %v5143_v34 = vor.u32 %v5820_v24, %v5140_v46  ;;  %v5234_v17 = vld [vmem:[#allocation7 + $0x120] sm:$0xf]  ;;  %v5846_v20 = vld [vmem:[#allocation7 + $0x12c] sm:$0xf0]  ;;  %v5236_v46 = vld [vmem:[#allocation7 + $0x130] sm:$0xf0] }
 0x201   :  { %v5235_v24 = vor.u32 %v5846_v20, %v5234_v17  ;;  %v5100_v17 = vld [vmem:[#allocation7 + $0x18] sm:$0xf0] }
 0x202   :  { %v2374_v41 = vadd.f32 %v2373_v31, %v2360_v36  ;;  %v5284_v31 = vld [vmem:[#allocation7 + $0x190] sm:$0xf0]  ;;  %v5818_v36 = vld [vmem:[#allocation7 + $0x4c] sm:$0xf0]  ;;  %3294 = vmatpush.bf16.msra.mxu0 %v5139_v52  ;;  %3322 = vmatpush.bf16.msra.mxu2 %v5143_v34  ;;  %v5164_v52 = vld [vmem:[#allocation7 + $0x98] sm:$0xf0] }
 0x203   :  { %v5842_v34 = vld [vmem:[#allocation7 + $0x10c] sm:$0xf0] }
 0x204   :  { %v2381_v44 = vmax.f32 %v2374_v41, 0.0  ;;  %v5287_v41 = vor.u32 %v5856_v30, %v5284_v31  ;;  %v5218_v31 = vld [vmem:[#allocation7 + $0x100] sm:$0xf] }
 0x207   :  { %v2361_v32 = vpop.f32.mrf.mxu2 }
 0x208   :  { %v2362_v57 = vadd.f32 %v2361_v32, %v2348_v40  ;;  %v2375_v42 = vpop.f32.mrf.mxu3  ;;  %v5124_v40 = vld [vmem:[#allocation7 + $0x50] sm:$0xf0]  ;;  %v5283_v32 = vor.u32 %v5858_v3, %v5282_v54  ;;  %v5163_v54 = vor.u32 %v5827_v62, %v5162_v63  ;;  %v5825_v3 = vld [vmem:[#allocation7 + $0x8c] sm:$0xf]  ;;  %v5292_v63 = vld [vmem:[#allocation7 + $0x198] sm:$0xf0] }
 0x209   :  { %v5167_v30 = vor.u32 %v5825_v3, %v5164_v52  ;;  %v5855_v3 = vld [vmem:[#allocation7 + $0x174] sm:$0xf0]  ;;  %v5853_v52 = vld [vmem:[#allocation7 + $0x16c] sm:$0xf] }
 0x20a   :  { %v2376_v43 = vadd.f32 %v2375_v42, %v2362_v57  ;;  %v5123_v57 = vor.u32 %v5818_v36, %v5122_v22  ;;  %v5127_v42 = vor.u32 %v5816_v37, %v5124_v40  ;;  %3307 = vmatpush.bf16.msra.mxu1 %v5283_v32  ;;  %v5840_v22 = vld [vmem:[#allocation7 + $0x104] sm:$0xf]  ;;  %v5219_v36 = vor.u32 %v5842_v34, %v5218_v31  ;;  %v5220_v37 = vld [vmem:[#allocation7 + $0x110] sm:$0xf0]  ;;  %v5146_v40 = vld [vmem:[#allocation7 + $0x68] sm:$0xf] }
 0x20b   :  { %v5823_v32 = vld [vmem:[#allocation7 + $0x74] sm:$0xf0]  ;;  %v5276_v31 = vld [vmem:[#allocation7 + $0x178] sm:$0xf0] }
 0x20c   :  { %v2385_v45 = vmax.f32 %v2376_v43, 0.0  ;;  %v5106_v43 = vld [vmem:[#allocation7 + $0x20] sm:$0xf]  ;;  %3295 = vmatpush.bf16.msra.mxu0 %v5123_v57  ;;  %3323 = vmatpush.bf16.msra.mxu2 %v5127_v42  ;;  %v5147_v57 = vor.u32 %v5823_v32, %v5146_v40  ;;  %v5338_v42 = vld [vmem:[#allocation7 + $0x1e8] sm:$0xf] }
 0x20d   :  { %v5851_v40 = vld [vmem:[#allocation7 + $0x154] sm:$0xf0]  ;;  %v5849_v32 = vld [vmem:[#allocation7 + $0x14c] sm:$0xf] }
 0x20e   :  { %v2389_v47 = vpack.c.bf16 %v2385_v45, %v2381_v44  ;;  %v5814_v44 = vld [vmem:[#allocation7 + $0x2c] sm:$0xf0]  ;;  %v5812_v45 = vld [vmem:[#allocation7 + $0x24] sm:$0xf]  ;;  %3308 = vmatpush.bf16.msra.mxu1 %v5267_v39 }
 0x20f   :  { %v5107_v48 = vor.u32 %v5814_v44, %v5106_v43  ;;  %v5871_v43 = vld [vmem:[#allocation7 + $0x1f4] sm:$0xf0]  ;;  %v5821_v44 = vld [vmem:[#allocation7 + $0x6c] sm:$0xf] }
 0x210   :  { %2829 = vmatmul.bf16.vlgmr.msra.gmra.mxu3 %v2389_v47 }
 0x211   :  { %3332 = vmatpush.bf16.msra.mxu3 %v5335_v7  ;;  %3296 = vmatpush.bf16.msra.mxu0 %v5107_v48  ;;  %v5250_v7 = vld [vmem:[#allocation7 + $0x140] sm:$0xf]  ;;  %v5869_v48 = vld [vmem:[#allocation7 + $0x1ec] sm:$0xf] }
 0x212   :  { %v5251_v58 = vor.u32 %v5850_v8, %v5250_v7  ;;  %v5119_v8 = vor.u32 %v5813_v6, %v5116_v27 }
 0x213   :  { %v6289_v50 = vpop.f32.mrf.mxu0  ;;  %v2802_v7 = vpop.f32.mrf.mxu1 }
 0x214   :  { %3309 = vmatpush.bf16.msra.mxu1 %v5251_v58  ;;  %v6293_v58 = vld [vmem:[#allocation10 + $0x2] ss:$8 sm:$0x3] }
 0x215   :  { %3333 = vmatpush.bf16.msra.mxu3 %v5319_v14  ;;  %3297 = vmatpush.bf16.msra.mxu0 %v5091_v53  ;;  %v5829_v14 = vld [vmem:[#allocation7 + $0xac] sm:$0xf]  ;;  %v5819_v53 = vld [vmem:[#allocation7 + $0x54] sm:$0xf0]  ;;  %v2455_v62 = vperm.slane %v6293_v58, 0 }
 0x216   :  { %v5183_v55 = vor.u32 %v5829_v14, %v5180_v38  ;;  %v5131_v26 = vor.u32 %v5819_v53, %v5130_v51  ;;  %v5290_v14 = vld [vmem:[#allocation7 + $0x188] sm:$0xf]  ;;  %v5859_v38 = vld [vmem:[#allocation7 + $0x194] sm:$0xf0]  ;;  %v5244_v51 = vld [vmem:[#allocation7 + $0x138] sm:$0xf0] }
 0x218   :  { %3310 = vmatpush.bf16.msra.mxu1 %v5235_v24 }
 0x219   :  { %3334 = vmatpush.bf16.msra.mxu3 %v5303_v16  ;;  %3346 = vmatpush.bf16.msrb.mxu0 %v5211_v59  ;;  %v5239_v16 = vor.u32 %v5844_v21, %v5236_v46  ;;  %v5132_v59 = vld [vmem:[#allocation7 + $0x58] sm:$0xf0]  ;;  %v5291_v21 = vor.u32 %v5859_v38, %v5290_v14  ;;  %v5857_v46 = vld [vmem:[#allocation7 + $0x18c] sm:$0xf] }
 0x21b   :  { %v2790_v20 = vpop.f32.mrf.mxu0 }
 0x21c   :  { %3311 = vmatpush.bf16.msra.mxu1 %v5219_v36  ;;  %v5279_v36 = vor.u32 %v5853_v52, %v5276_v31  ;;  %v5875_v52 = vld [vmem:[#allocation9 + $0x18] sm:$0xff]  ;;  %v5884_v31 = vld [vmem:[#allocation9 + $0x60] sm:$0xff] }
 0x21d   :  { %3335 = vmatpush.bf16.msra.mxu3 %v5287_v41  ;;  %3347 = vmatpush.bf16.msrb.mxu0 %v5195_v5  ;;  %v5223_v41 = vor.u32 %v5840_v22, %v5220_v37  ;;  %v5863_v5 = vld [vmem:[#allocation7 + $0x1b4] sm:$0xf0]  ;;  %v5258_v37 = vld [vmem:[#allocation7 + $0x148] sm:$0xf] }
 0x220   :  { %2885 = vmatmul.bf16.vlgmr.msrb.gmra.mxu3 %v2389_v47  ;;  %v5108_v47 = vld [vmem:[#allocation7 + $0x30] sm:$0xf0] }
 0x221   :  { %v5111_v49 = vor.u32 %v5812_v45, %v5108_v47  ;;  %3336 = vmatpush.bf16.msra.mxu3 %v5271_v4  ;;  %3348 = vmatpush.bf16.msrb.mxu0 %v5179_v15  ;;  %v5339_v45 = vor.u32 %v5871_v43, %v5338_v42  ;;  %v5148_v47 = vld [vmem:[#allocation7 + $0x78] sm:$0xf0]  ;;  %v5115_v4 = vor.u32 %v5815_v33, %v5114_v18  ;;  %v2804_v42 = vpop.f32.mrf.mxu1 }
 0x222   :  { %v5151_v9 = vor.u32 %v5821_v44, %v5148_v47  ;;  %v5099_v15 = vor.u32 %v5811_v12, %v5098_v10  ;;  %v5259_v43 = vor.u32 %v5851_v40, %v5258_v37  ;;  %v2791_v44 = vadd.f32 %v2790_v20, %v2455_v62  ;;  %v5903_v37 = vld [vmem:[#allocation9 + $0xf8] sm:$0xff]  ;;  %v5873_v40 = vld [vmem:[#allocation9 + $0x8] sm:$0xff] }
 0x223   :  { %3324 = vmatpush.bf16.msra.mxu2 %v5111_v49  ;;  %v5340_v49 = vld [vmem:[#allocation7 + $0x1f8] sm:$0xf0]  ;;  %3360 = vmatpush.bf16.msrb.mxu1 %v5339_v45 }
 0x224   :  { %v5343_v61 = vor.u32 %v5869_v48, %v5340_v49  ;;  %v5242_v48 = vld [vmem:[#allocation7 + $0x128] sm:$0xf]  ;;  %v5847_v49 = vld [vmem:[#allocation7 + $0x134] sm:$0xf0]  ;;  %v2805_v53 = vadd.f32 %v2804_v42, %v2791_v44  ;;  %v5872_v42 = vld [vmem:[#allocation9] sm:$0xff] }
 0x225   :  { %3337 = vmatpush.bf16.msra.mxu3 %v5255_v35  ;;  %3349 = vmatpush.bf16.msrb.mxu0 %v5163_v54  ;;  %v5311_v35 = vor.u32 %v5861_v56, %v5308_v11  ;;  %v5274_v54 = vld [vmem:[#allocation7 + $0x168] sm:$0xf] }
 0x226   :  { %v5881_v44 = vld [vmem:[#allocation9 + $0x48] sm:$0xff] }
 0x227   :  { %3325 = vmatpush.bf16.msra.mxu2 %v5095_v25  ;;  %v5322_v25 = vld [vmem:[#allocation7 + $0x1c8] sm:$0xf] }
 0x228   :  { %v5323_v60 = vor.u32 %v5867_v19, %v5322_v25 }
 0x229   :  { %3338 = vmatpush.bf16.msra.mxu3 %v5239_v16  ;;  %3350 = vmatpush.bf16.msrb.mxu0 %v5147_v57  ;;  %v5295_v16 = vor.u32 %v5857_v46, %v5292_v63  ;;  %v5260_v57 = vld [vmem:[#allocation7 + $0x158] sm:$0xf0]  ;;  %v5878_v46 = vld [vmem:[#allocation9 + $0x30] sm:$0xff] }
 0x22a   :  { %3361 = vmatpush.bf16.msrb.mxu1 %v5323_v60  ;;  %v5263_v47 = vor.u32 %v5849_v32, %v5260_v57  ;;  %v5843_v60 = vld [vmem:[#allocation7 + $0x114] sm:$0xf0]  ;;  %v5893_v32 = vld [vmem:[#allocation9 + $0xa8] sm:$0xff]  ;;  %v5902_v57 = vld [vmem:[#allocation9 + $0xf0] sm:$0xff] }
 0x22b   :  { %3374 = vmatpush.bf16.msrb.mxu2 %v5215_v29  ;;  %v5135_v29 = vor.u32 %v5817_v23, %v5132_v59  ;;  %v5226_v59 = vld [vmem:[#allocation7 + $0x108] sm:$0xf]  ;;  %v5887_v63 = vld [vmem:[#allocation9 + $0x78] sm:$0xff] }
 0x22d   :  { %3339 = vmatpush.bf16.msra.mxu3 %v5223_v41  ;;  %3351 = vmatpush.bf16.msrb.mxu0 %v5131_v26  ;;  %v2789_v41 = vadd.f32 %v6289_v50, %v2455_v62  ;;  %v5243_v26 = vor.u32 %v5847_v49, %v5242_v48  ;;  %v5877_v62 = vld [vmem:[#allocation9 + $0x28] sm:$0xff]  ;;  %v5880_v48 = vld [vmem:[#allocation9 + $0x40] sm:$0xff] }
 0x22e   :  { %v5900_v49 = vld [vmem:[#allocation9 + $0xe0] sm:$0xff] }
 0x22f   :  { %3375 = vmatpush.bf16.msrb.mxu2 %v5199_v28  ;;  %v5307_v28 = vor.u32 %v5863_v5, %v5306_v2  ;;  %v2803_v45 = vadd.f32 %v2802_v7, %v2789_v41  ;;  %v5227_v2 = vor.u32 %v5843_v60, %v5226_v59  ;;  %v5882_v41 = vld [vmem:[#allocation9 + $0x50] sm:$0xff] }
 0x231   :  { %3388 = vmatpush.bf16.msrb.mxu3 %v5343_v61  ;;  %3352 = vmatpush.bf16.msrb.mxu0 %v5115_v4  ;;  %v5845_v61 = vld [vmem:[#allocation7 + $0x12c] sm:$0xf]  ;;  %v2456_v4 = vperm.slane %v6293_v58, 1 }
 0x232   :  { %3362 = vmatpush.bf16.msrb.mxu1 %v5307_v28  ;;  %v5247_v23 = vor.u32 %v5845_v61, %v5244_v51  ;;  %v5899_v61 = vld [vmem:[#allocation9 + $0xd8] sm:$0xff] }
 0x233   :  { %3376 = vmatpush.bf16.msrb.mxu2 %v5183_v55  ;;  %v5809_v55 = vld [vmem:[#allocation7 + $0xc] sm:$0xf]  ;;  %v2858_v18 = vpop.f32.mrf.mxu1 }
 0x234   :  { %v5103_v24 = vor.u32 %v5809_v55, %v5100_v17 }
 0x235   :  { %3389 = vmatpush.bf16.msrb.mxu3 %v5327_v1  ;;  %3353 = vmatpush.bf16.msrb.mxu0 %v5099_v15  ;;  %v5228_v1 = vld [vmem:[#allocation7 + $0x118] sm:$0xf0] }
 0x236   :  { %3363 = vmatpush.bf16.msrb.mxu1 %v5291_v21  ;;  %v5231_v6 = vor.u32 %v5841_v0, %v5228_v1 }
 0x237   :  { %3377 = vmatpush.bf16.msrb.mxu2 %v5167_v30  ;;  %v5275_v30 = vor.u32 %v5855_v3, %v5274_v54  ;;  %v5876_v54 = vld [vmem:[#allocation9 + $0x20] sm:$0xff]  ;;  %v5885_v3 = vld [vmem:[#allocation9 + $0x68] sm:$0xff] }
 0x239   :  { %3390 = vmatpush.bf16.msrb.mxu3 %v5311_v35 }
 0x23a   :  { %3364 = vmatpush.bf16.msrb.mxu1 %v5275_v30  ;;  %v5895_v30 = vld [vmem:[#allocation9 + $0xb8] sm:$0xff] }
 0x23b   :  { %3378 = vmatpush.bf16.msrb.mxu2 %v5151_v9  ;;  %v2844_v9 = vpop.f32.mrf.mxu0  ;;  %v2860_v35 = vpop.f32.mrf.mxu1 }
 0x23c   :  { %v2845_v28 = vadd.f32 %v2844_v9, %v2456_v4  ;;  %v5890_v9 = vld [vmem:[#allocation9 + $0x90] sm:$0xff] }
 0x23d   :  { %3391 = vmatpush.bf16.msrb.mxu3 %v5295_v16  ;;  %v5886_v16 = vld [vmem:[#allocation9 + $0x70] sm:$0xff] }
 0x23e   :  { %3365 = vmatpush.bf16.msrb.mxu1 %v5259_v43  ;;  %v2859_v11 = vadd.f32 %v2858_v18, %v2845_v28  ;;  %v5892_v43 = vld [vmem:[#allocation9 + $0xa0] sm:$0xff] }
 0x23f   :  { %3379 = vmatpush.bf16.msrb.mxu2 %v5135_v29 }
 0x241   :  { %3392 = vmatpush.bf16.msrb.mxu3 %v5279_v36  ;;  %v5883_v36 = vld [vmem:[#allocation9 + $0x58] sm:$0xff] }
 0x242   :  { %3366 = vmatpush.bf16.msrb.mxu1 %v5243_v26  ;;  %v5888_v26 = vld [vmem:[#allocation9 + $0x80] sm:$0xff] }
 0x243   :  { %3380 = vmatpush.bf16.msrb.mxu2 %v5119_v8  ;;  %v2846_v7 = vpop.f32.mrf.mxu0 }
 0x244   :  { %v2847_v56 = vadd.f32 %v2846_v7, %v2456_v4 }
 0x245   :  { %3393 = vmatpush.bf16.msrb.mxu3 %v5263_v47  ;;  %v5891_v47 = vld [vmem:[#allocation9 + $0x98] sm:$0xff] }
 0x246   :  { %3367 = vmatpush.bf16.msrb.mxu1 %v5227_v2  ;;  %v2861_v12 = vadd.f32 %v2860_v35, %v2847_v56 }
 0x247   :  { %3381 = vmatpush.bf16.msrb.mxu2 %v5103_v24  ;;  %v5879_v24 = vld [vmem:[#allocation9 + $0x38] sm:$0xff] }
 0x249   :  { %3394 = vmatpush.bf16.msrb.mxu3 %v5247_v23  ;;  %v127_v23 = vld [vmem:[#allocation10 + $0x3] ss:$8 sm:$0xf] }
 0x24d   :  { %3395 = vmatpush.bf16.msrb.mxu3 %v5231_v6 }
 0x253   :  { %v6291_v39 = vpop.f32.mrf.mxu2 }
 0x254   :  { %v2817_v25 = vadd.f32 %v6291_v39, %v2803_v45  ;;  %v5901_v45 = vld [vmem:[#allocation9 + $0xe8] sm:$0xff] }
 0x25b   :  { %v2818_v34 = vpop.f32.mrf.mxu2 }
 0x25c   :  { %v2819_v19 = vadd.f32 %v2818_v34, %v2805_v53  ;;  %v5874_v34 = vld [vmem:[#allocation9 + $0x10] sm:$0xff]  ;;  %v5889_v53 = vld [vmem:[#allocation9 + $0x88] sm:$0xff] }
 0x263   :  { %v2872_v33 = vpop.f32.mrf.mxu2 }
 0x264   :  { %v2873_v14 = vadd.f32 %v2872_v33, %v2859_v11  ;;  %v2963_v33 = vperm.slane %v127_v23, 1 }
 0x26b   :  { %v2874_v10 = vpop.f32.mrf.mxu2 }
 0x26c   :  { %v2875_v15 = vadd.f32 %v2874_v10, %v2861_v12 }
 0x293   :  { %v2830_v22 = vpop.f32.mrf.mxu3 }
 0x294   :  { %v2831_v50 = vadd.f32 %v2830_v22, %v2817_v25  ;;  %v5894_v22 = vld [vmem:[#allocation9 + $0xb0] sm:$0xff] }
 0x295   :  { %v5898_v25 = vld [vmem:[#allocation9 + $0xd0] sm:$0xff] }
 0x296   :  { %v2891_v5 = vmax.f32 %v2831_v50, 0.0  ;;  %v5897_v50 = vld [vmem:[#allocation9 + $0xc8] sm:$0xff] }
 0x29b   :  { %v2832_v29 = vpop.f32.mrf.mxu3 }
 0x29c   :  { %v2833_v13 = vadd.f32 %v2832_v29, %v2819_v19  ;;  %v2962_v29 = vperm.slane %v127_v23, 0 }
 0x29e   :  { %v2893_v39 = vmax.f32 %v2833_v13, 0.0  ;;  %v5896_v13 = vld [vmem:[#allocation9 + $0xc0] sm:$0xff] }
 0x2a0   :  { %v2895_v27 = vpack.c.bf16 %v2893_v39, %v2891_v5 }
 0x2a2   :  { %3298 = vmatmul.bf16.vlgmr.msra.gmra.mxu0 %v2895_v27  ;;  %3326 = vmatmul.bf16.vlgmr.msra.gmra.mxu2 %v2895_v27 }
 0x2a3   :  { %v2886_v8 = vpop.f32.mrf.mxu3  ;;  %3670 = vmatpush.bf16.msra.mxu0 %v5879_v24  ;;  %3698 = vmatpush.bf16.msra.mxu2 %v5895_v30  ;;  %v2965_v24 = vperm.slane %v127_v23, 3 }
 0x2a4   :  { %v2887_v58 = vadd.f32 %v2886_v8, %v2873_v14 }
 0x2a6   :  { %v2892_v17 = vmax.f32 %v2887_v58, 0.0 }
 0x2a7   :  { %3671 = vmatpush.bf16.msra.mxu0 %v5878_v46  ;;  %3699 = vmatpush.bf16.msra.mxu2 %v5894_v22 }
 0x2ab   :  { %v2888_v38 = vpop.f32.mrf.mxu3  ;;  %3672 = vmatpush.bf16.msra.mxu0 %v5877_v62  ;;  %3700 = vmatpush.bf16.msra.mxu2 %v5893_v32 }
 0x2ac   :  { %v2889_v55 = vadd.f32 %v2888_v38, %v2875_v15  ;;  %v2964_v15 = vperm.slane %v127_v23, 2 }
 0x2ae   :  { %v2894_v20 = vmax.f32 %v2889_v55, 0.0 }
 0x2af   :  { %3673 = vmatpush.bf16.msra.mxu0 %v5876_v54  ;;  %3701 = vmatpush.bf16.msra.mxu2 %v5892_v43 }
 0x2b0   :  { %v2896_v21 = vpack.c.bf16 %v2894_v20, %v2892_v17 }
 0x2b2   :  { %3312 = vmatmul.bf16.vlgmr.msra.gmra.mxu1 %v2896_v21  ;;  %3340 = vmatmul.bf16.vlgmr.msra.gmra.mxu3 %v2896_v21 }
 0x2b3   :  { %3354 = vmatmul.bf16.vlgmr.msrb.gmra.mxu0 %v2895_v27  ;;  %3382 = vmatmul.bf16.vlgmr.msrb.gmra.mxu2 %v2895_v27 }
 0x2b4   :  { %3684 = vmatpush.bf16.msra.mxu1 %v5887_v63  ;;  %3674 = vmatpush.bf16.msra.mxu0 %v5875_v52 }
 0x2b5   :  { %3712 = vmatpush.bf16.msra.mxu3 %v5903_v37  ;;  %3702 = vmatpush.bf16.msra.mxu2 %v5891_v47 }
 0x2b8   :  { %3685 = vmatpush.bf16.msra.mxu1 %v5886_v16  ;;  %3675 = vmatpush.bf16.msra.mxu0 %v5874_v34 }
 0x2b9   :  { %3713 = vmatpush.bf16.msra.mxu3 %v5902_v57  ;;  %3703 = vmatpush.bf16.msra.mxu2 %v5890_v9 }
 0x2bc   :  { %3686 = vmatpush.bf16.msra.mxu1 %v5885_v3  ;;  %3676 = vmatpush.bf16.msra.mxu0 %v5873_v40 }
 0x2bd   :  { %3714 = vmatpush.bf16.msra.mxu3 %v5901_v45  ;;  %3704 = vmatpush.bf16.msra.mxu2 %v5889_v53 }
 0x2c0   :  { %3687 = vmatpush.bf16.msra.mxu1 %v5884_v31  ;;  %3677 = vmatpush.bf16.msra.mxu0 %v5872_v42  ;;  %v128_v42 = vld [vmem:[#allocation10 + $0x4] ss:$0 sm:$0xff] }
 0x2c1   :  { %3715 = vmatpush.bf16.msra.mxu3 %v5900_v49  ;;  %3705 = vmatpush.bf16.msra.mxu2 %v5888_v26 }
 0x2c2   :  { %3368 = vmatmul.bf16.vlgmr.msrb.gmra.mxu1 %v2896_v21  ;;  %3396 = vmatmul.bf16.vlgmr.msrb.gmra.mxu3 %v2896_v21 }
 0x2c4   :  { %3688 = vmatpush.bf16.msra.mxu1 %v5883_v36 }
 0x2c5   :  { %3716 = vmatpush.bf16.msra.mxu3 %v5899_v61 }
 0x2c8   :  { %3689 = vmatpush.bf16.msra.mxu1 %v5882_v41 }
 0x2c9   :  { %3717 = vmatpush.bf16.msra.mxu3 %v5898_v25 }
 0x2cc   :  { %3690 = vmatpush.bf16.msra.mxu1 %v5881_v44 }
 0x2cd   :  { %3718 = vmatpush.bf16.msra.mxu3 %v5897_v50 }
 0x2d0   :  { %3691 = vmatpush.bf16.msra.mxu1 %v5880_v48 }
 0x2d1   :  { %3719 = vmatpush.bf16.msra.mxu3 %v5896_v13 }
 0x31f   :  { %v3299_v51 = vpop.f32.mrf.mxu0 }
 0x320   :  { %v3300_v0 = vadd.f32 %v3299_v51, %v2962_v29 }
 0x325   :  { %v3327_v19 = vpop.f32.mrf.mxu2 }
 0x326   :  { %v3328_v27 = vadd.f32 %v3327_v19, %v2963_v33 }
 0x327   :  { %v3301_v59 = vpop.f32.mrf.mxu0 }
 0x328   :  { %v3302_v2 = vadd.f32 %v3301_v59, %v2962_v29 }
 0x32d   :  { %v3329_v1 = vpop.f32.mrf.mxu2 }
 0x32e   :  { %v3330_v8 = vadd.f32 %v3329_v1, %v2963_v33 }
 0x32f   :  { %v3313_v60 = vpop.f32.mrf.mxu1 }
 0x330   :  { %v3314_v4 = vadd.f32 %v3313_v60, %v3300_v0  ;;  %v3355_v6 = vpop.f32.mrf.mxu0 }
 0x331   :  { %v3356_v20 = vadd.f32 %v3355_v6, %v2964_v15 }
 0x332   :  { %v3402_v7 = vmax.f32 %v3314_v4, 0.0 }
 0x335   :  { %v3341_v18 = vpop.f32.mrf.mxu3 }
 0x336   :  { %v3342_v56 = vadd.f32 %v3341_v18, %v3328_v27  ;;  %v3383_v12 = vpop.f32.mrf.mxu2 }
 0x337   :  { %v3315_v5 = vpop.f32.mrf.mxu1  ;;  %v3384_v3 = vadd.f32 %v3383_v12, %v2965_v24 }
 0x338   :  { %v3316_v39 = vadd.f32 %v3315_v5, %v3302_v2  ;;  %v3403_v58 = vmax.f32 %v3342_v56, 0.0  ;;  %v3357_v17 = vpop.f32.mrf.mxu0 }
 0x339   :  { %v3358_v46 = vadd.f32 %v3357_v17, %v2964_v15 }
 0x33a   :  { %v3406_v28 = vmax.f32 %v3316_v39, 0.0 }
 0x33c   :  { %v3410_v11 = vpack.c.bf16 %v3406_v28, %v3402_v7 }
 0x33d   :  { %v3343_v35 = vpop.f32.mrf.mxu3 }
 0x33e   :  { %v3344_v10 = vadd.f32 %v3343_v35, %v3330_v8  ;;  %3678 = vmatmul.bf16.vlgmr.msra.gmra.mxu0 %v3410_v11  ;;  %v3385_v54 = vpop.f32.mrf.mxu2 }
 0x33f   :  { %v3369_v14 = vpop.f32.mrf.mxu1  ;;  %v3386_v31 = vadd.f32 %v3385_v54, %v2965_v24 }
 0x340   :  { %v3407_v38 = vmax.f32 %v3344_v10, 0.0  ;;  %v3370_v63 = vadd.f32 %v3369_v14, %v3356_v20 }
 0x342   :  { %v3411_v55 = vpack.c.bf16 %v3407_v38, %v3403_v58  ;;  %v3404_v52 = vmax.f32 %v3370_v63, 0.0 }
 0x344   :  { %3692 = vmatmul.bf16.vlgmr.msra.gmra.mxu1 %v3411_v55 }
 0x345   :  { %v3397_v21 = vpop.f32.mrf.mxu3 }
 0x346   :  { %v3398_v34 = vadd.f32 %v3397_v21, %v3384_v3 }
 0x347   :  { %v3371_v62 = vpop.f32.mrf.mxu1 }
 0x348   :  { %v3372_v16 = vadd.f32 %v3371_v62, %v3358_v46  ;;  %v3405_v40 = vmax.f32 %v3398_v34, 0.0 }
 0x34a   :  { %v3408_v30 = vmax.f32 %v3372_v16, 0.0 }
 0x34c   :  { %v3412_v22 = vpack.c.bf16 %v3408_v30, %v3404_v52 }
 0x34d   :  { %v3399_v36 = vpop.f32.mrf.mxu3 }
 0x34e   :  { %v3400_v37 = vadd.f32 %v3399_v36, %v3386_v31  ;;  %3706 = vmatmul.bf16.vlgmr.msra.gmra.mxu2 %v3412_v22 }
 0x350   :  { %v3409_v32 = vmax.f32 %v3400_v37, 0.0 }
 0x352   :  { %v3413_v41 = vpack.c.bf16 %v3409_v32, %v3405_v40 }
 0x354   :  { %3720 = vmatmul.bf16.vlgmr.msra.gmra.mxu3 %v3413_v41 }
 0x3bb   :  { %v3679_v57 = vpop.f32.mrf.mxu0 }
 0x3bc   :  { %v3680_v45 = vadd.f32 %v3679_v57, %v128_v42 }
 0x3c1   :  { %v3693_v43 = vpop.f32.mrf.mxu1 }
 0x3c2   :  { %v3694_v47 = vadd.f32 %v3693_v43, %v3680_v45 }
 0x3c3   :  { %v3681_v49 = vpop.f32.mrf.mxu0 }
 0x3c4   :  { %v3682_v53 = vadd.f32 %v3681_v49, %v128_v42 }
 0x3c9   :  { %v3695_v51 = vpop.f32.mrf.mxu1 }
 0x3ca   :  { %v3696_v26 = vadd.f32 %v3695_v51, %v3682_v53 }
 0x3d1   :  { %v3707_v44 = vpop.f32.mrf.mxu2 }
 0x3d2   :  { %v3708_v48 = vadd.f32 %v3707_v44, %v3694_v47 }
 0x3d7   :  { %v3721_v9 = vpop.f32.mrf.mxu3 }
 0x3d8   :  { %v3722_v61 = vadd.f32 %v3721_v9, %v3708_v48 }
 0x3d9   :  { %v3709_v25 = vpop.f32.mrf.mxu2 }
 0x3da   :  { %3726 = vst [vmem:[%s6312_s7] sm:$0xff] %v3722_v61  ;;  %v3710_v19 = vadd.f32 %v3709_v25, %v3696_v26 }
 0x3df   :  { %v3723_v50 = vpop.f32.mrf.mxu3 }
 0x3e0   :  { %v3724_v23 = vadd.f32 %v3723_v50, %v3710_v19 }
 0x3e2   :  { %3727 = vst [vmem:[%s6312_s7 + $0x8] sm:$0xff] %v3724_v23 }
 0x3e3   :  { %3732 = vsyncpa [#allocation3], 1 }
 0x3e4   :  { %3733 = vsyncpa [#allocation5], 1 }
 0x3e5   :  { %3734 = vsyncpa [#allocation8], 1 }
 0x3e6   :  { %3735 = vsyncpa [#allocation11], 1 }

</bundles_post_ra>
